<compile_context>
chip_gen: v6e
topology: v6e:2x2x1
jax: 0.10.0
libtpu: 0.0.40
codegen_flags: <defaults>
</compile_context>

<pallas_src>
import functools

import jax
import jax.numpy as jnp
from jax.experimental import pallas as pl
from jax.experimental.pallas import tpu as pltpu


# --------------------- in-kernel 3x3 convs (flattened spatial on lanes) --------------------- #

def _conv3x3_s1(x, w_ref, Wo, P, mleft, mright, mm_dtype):
    """3x3, stride 1, zero pad 1.  x: (C, P=Ho*Wo) f32 value.  Returns (Cout, P) f32 (no bias).

    Row (vertical) out-of-range taps are zeroed by padding the flattened row axis with
    Wo+1 zeros on each side; column wrap of the +/-1 horizontal taps is zeroed by
    mleft / mright (f32 {0,1}, shape (1, P))."""
    C = x.shape[0]
    Cout = w_ref.shape[1]
    zpad = jnp.zeros((C, Wo + 1), jnp.float32)
    xz = jnp.concatenate([zpad, x, zpad], axis=1)            # (C, P + 2*Wo + 2)
    acc = jnp.zeros((Cout, P), jnp.float32)
    for kh in range(3):
        for kw in range(3):
            t = kh * 3 + kw
            off = (Wo + 1) + (kh - 1) * Wo + (kw - 1)        # flat shift of this tap
            tap = xz[:, off:off + P]
            if kw == 0:
                tap = tap * mleft
            elif kw == 2:
                tap = tap * mright
            acc = acc + jnp.dot(w_ref[t].astype(mm_dtype), tap.astype(mm_dtype),
                                preferred_element_type=jnp.float32)
    return acc


def _conv3x3_s2(x4, w_ref, cin, Wo, P, mleft, mm_dtype):
    """3x3, stride 2, zero pad 1, consuming space-to-depth polyphase planes.

    x4: (4*cin, P=Ho*Wo) f32; plane (pr, pc) = x[:, pr::2, pc::2] sits at rows
    [(2*pr+pc)*cin : (2*pr+pc+1)*cin].  Each tap reads exactly one plane with a
    shift in {-(Wo+1), -Wo, -1, 0}; only the dc=-1 taps need a column mask."""
    Cout = w_ref.shape[1]
    acc = jnp.zeros((Cout, P), jnp.float32)
    for kh in range(3):
        pr, dr = (1, -1) if kh == 0 else ((0, 0) if kh == 1 else (1, 0))
        for kw in range(3):
            pc, dc = (1, -1) if kw == 0 else ((0, 0) if kw == 1 else (1, 0))
            t = kh * 3 + kw
            q = 2 * pr + pc
            plane = x4[q * cin:(q + 1) * cin, :]
            s = dr * Wo + dc
            if s != 0:
                tap = jnp.concatenate(
                    [jnp.zeros((cin, -s), jnp.float32), plane[:, :P + s]], axis=1)
            else:
                tap = plane
            if dc == -1:
                tap = tap * mleft
            acc = acc + jnp.dot(w_ref[t].astype(mm_dtype), tap.astype(mm_dtype),
                                preferred_element_type=jnp.float32)
    return acc


# ----------------------------------- fused stage kernel ------------------------------------- #

def _stage_kernel(x_ref, w0_ref, b0_ref, w1_ref, b1_ref, w2_ref, b2_ref, m_ref, o_ref,
                  *, stride, cin, Wo, P, mm_dtype):
    """Fused conv_resblock_one (head conv + residual block) for one batch element.

    x_ref : (1, Cin, P) for stride 1, (1, 4*Cin, Ho*Wo) (space-to-depth) for stride 2
    w*    : (9, Cout, Cin/Cout) per-tap transposed weights, mm_dtype
    b*    : (Cout, 1) f32
    m_ref : (2, P) f32 column-validity masks [left, right]
    o_ref : (1, Cout, P) f32
    All intermediates stay in VMEM/vregs; one pallas_call per stage."""
    masks = m_ref[...]
    mleft = masks[0:1, :]
    mright = masks[1:2, :]
    x = x_ref[0]

    # head conv + ReLU
    if stride == 2:
        z0 = _conv3x3_s2(x, w0_ref, cin, Wo, P, mleft, mm_dtype)
    else:
        z0 = _conv3x3_s1(x, w0_ref, Wo, P, mleft, mright, mm_dtype)
    y0 = jnp.maximum(z0 + b0_ref[...], 0.0)

    # residual block: conv1 + ReLU, conv2 + skip + ReLU (skip is a free VMEM/vreg read)
    y1 = jnp.maximum(
        _conv3x3_s1(y0, w1_ref, Wo, P, mleft, mright, mm_dtype) + b1_ref[...], 0.0)
    y2 = jnp.maximum(
        _conv3x3_s1(y1, w2_ref, Wo, P, mleft, mright, mm_dtype) + b2_ref[...] + y0, 0.0)

    o_ref[0] = y2


# ------------------------------------- stage wrapper ---------------------------------------- #

def conv_resblock_stage(x_nchw, p, stride, mm_dtype):
    """conv_resblock_one(Cin, Cout, stride) as ONE pallas_call.  NCHW in, NCHW out."""
    N, Cin, H, W = x_nchw.shape
    Cout = p["w0"].shape[-1]
    assert stride in (1, 2)
    if stride == 2:
        assert H % 2 == 0 and W % 2 == 0, "stride-2 stage assumes even H, W"
        # TODO(synk): support odd H/W (PyTorch Conv2d(stride=2, pad=1) keeps the extra row/col).
    Ho, Wo = H // stride, W // stride
    P = Ho * Wo

    if stride == 2:
        # Space-to-depth in XLA (O(C*H*W) HBM traffic) replaces the old (Ho*Wo, H*W)
        # selection matmul: nothing is computed and thrown away, nothing big sits in VMEM.
        xk = jnp.transpose(x_nchw.reshape(N, Cin, Ho, 2, Wo, 2),
                           (0, 3, 5, 1, 2, 4)).reshape(N, 4 * Cin, P)
        c_lead = 4 * Cin
    else:
        xk = x_nchw.reshape(N, Cin, P)       # free reshape, NCHW is already channel-major
        c_lead = Cin

    def _prep_w(w, ci, co):
        # HWIO (3,3,ci,co) -> (9, co, ci): per-tap LHS for (co,ci)@(ci,P) MXU dots.
        return jnp.transpose(w, (0, 1, 3, 2)).reshape(9, co, ci).astype(mm_dtype)

    w0 = _prep_w(p["w0"], Cin, Cout)
    w1 = _prep_w(p["w1"], Cout, Cout)
    w2 = _prep_w(p["w2"], Cout, Cout)
    b0 = p["b0"].reshape(Cout, 1).astype(jnp.float32)
    b1 = p["b1"].reshape(Cout, 1).astype(jnp.float32)
    b2 = p["b2"].reshape(Cout, 1).astype(jnp.float32)

    # Column-validity masks for the +/-1 horizontal taps (row validity is handled by the
    # zero padding of the flattened row axis inside the kernel).
    col = jnp.arange(P, dtype=jnp.int32) % Wo
    masks = jnp.stack([(col >= 1).astype(jnp.float32),
                       (col <= Wo - 2).astype(jnp.float32)], axis=0)      # (2, P)

    y = pl.pallas_call(
        functools.partial(_stage_kernel, stride=stride, cin=Cin, Wo=Wo, P=P,
                          mm_dtype=mm_dtype),
        out_shape=jax.ShapeDtypeStruct((N, Cout, P), jnp.float32),
        grid=(N,),
        in_specs=[
            pl.BlockSpec((1, c_lead, P), lambda n: (n, 0, 0)),
            pl.BlockSpec((9, Cout, Cin), lambda n: (0, 0, 0)),
            pl.BlockSpec((Cout, 1), lambda n: (0, 0)),
            pl.BlockSpec((9, Cout, Cout), lambda n: (0, 0, 0)),
            pl.BlockSpec((Cout, 1), lambda n: (0, 0)),
            pl.BlockSpec((9, Cout, Cout), lambda n: (0, 0, 0)),
            pl.BlockSpec((Cout, 1), lambda n: (0, 0)),
            pl.BlockSpec((2, P), lambda n: (0, 0)),
        ],
        out_specs=pl.BlockSpec((1, Cout, P), lambda n: (n, 0, 0)),
        compiler_params=pltpu.CompilerParams(dimension_semantics=("parallel",)),
        # TODO(synk): at production resolutions add an output-row-tiled grid axis with a
        # 1-row halo and set vmem_limit_bytes so the per-step working set fits v7x's
        # 64 MiB VMEM and both TensorCores stay busy even when N == 1.
    )(xk.astype(jnp.float32), w0, b0, w1, b2 * 0 + b1, w2, b2, masks) if False else \
        pl.pallas_call(
        functools.partial(_stage_kernel, stride=stride, cin=Cin, Wo=Wo, P=P,
                          mm_dtype=mm_dtype),
        out_shape=jax.ShapeDtypeStruct((N, Cout, P), jnp.float32),
        grid=(N,),
        in_specs=[
            pl.BlockSpec((1, c_lead, P), lambda n: (n, 0, 0)),
            pl.BlockSpec((9, Cout, Cin), lambda n: (0, 0, 0)),
            pl.BlockSpec((Cout, 1), lambda n: (0, 0)),
            pl.BlockSpec((9, Cout, Cout), lambda n: (0, 0, 0)),
            pl.BlockSpec((Cout, 1), lambda n: (0, 0)),
            pl.BlockSpec((9, Cout, Cout), lambda n: (0, 0, 0)),
            pl.BlockSpec((Cout, 1), lambda n: (0, 0)),
            pl.BlockSpec((2, P), lambda n: (0, 0)),
        ],
        out_specs=pl.BlockSpec((1, Cout, P), lambda n: (n, 0, 0)),
        compiler_params=pltpu.CompilerParams(dimension_semantics=("parallel",)),
    )(xk.astype(jnp.float32), w0, b0, w1, b1, w2, b2, masks)
    return y.reshape(N, Cout, Ho, Wo)       # free row-major split back to NCHW


# -------------------------------------- EncoderEvent ---------------------------------------- #

@functools.partial(jax.jit, static_argnames=("mm_dtype",))
def encoder_event_forward(image_nchw, params, mm_dtype=jnp.bfloat16):
    """Forward of EncoderEvent.  NCHW in, NCHW outs (f1, f2, f3); no layout transposes."""
    x = image_nchw.astype(jnp.float32)
    feats = []
    for p, s in zip(params, (1, 2, 2, 2)):
        x = conv_resblock_stage(x, p, s, mm_dtype)
        feats.append(x)
    return feats[1], feats[2], feats[3]


def init_params(key, num_chs):
    """Deterministic synthetic parameters; HWIO weight layout, one bias per conv."""
    params = []
    for i in range(4):
        cin, cout = num_chs[i], num_chs[i + 1]
        key, *ks = jax.random.split(key, 7)

        def wz(k, ci, co):
            return jax.random.normal(k, (3, 3, ci, co), jnp.float32) / jnp.sqrt(9.0 * ci)

        params.append(dict(
            w0=wz(ks[0], cin, cout), b0=0.01 * jax.random.normal(ks[1], (cout,), jnp.float32),
            w1=wz(ks[2], cout, cout), b1=0.01 * jax.random.normal(ks[3], (cout,), jnp.float32),
            w2=wz(ks[4], cout, cout), b2=0.01 * jax.random.normal(ks[5], (cout,), jnp.float32),
        ))
    return params


# ------------------------------------ pure-JAX reference ------------------------------------ #

def _conv_ref(x, w, b, stride):
    y = jax.lax.conv_general_dilated(
        x, w, window_strides=(stride, stride), padding=((1, 1), (1, 1)),
        dimension_numbers=("NCHW", "HWIO", "NCHW"))
    return y + b[None, :, None, None]


def encoder_event_reference(image_nchw, params):
    x = image_nchw.astype(jnp.float32)
    feats = []
    for p, s in zip(params, (1, 2, 2, 2)):
        y0 = jax.nn.relu(_conv_ref(x, p["w0"], p["b0"], s))
        y1 = jax.nn.relu(_conv_ref(y0, p["w1"], p["b1"], 1))
        x = jax.nn.relu(_conv_ref(y1, p["w2"], p["b2"], 1) + y0)
        feats.append(x)
    return tuple(feats[1:])


# -------------------------------------------- main ------------------------------------------- #

if __name__ == "__main__":
    num_chs = (4, 8, 16, 32, 32)
    key = jax.random.PRNGKey(0)
    k_img, k_par = jax.random.split(key)

    image = jax.random.normal(k_img, (2, num_chs[0], 16, 16), jnp.float32)   # NCHW
    params = init_params(k_par, num_chs)

    refs = encoder_event_reference(image, params)

    # Exact-math path: verifies the shifted-tap conv algorithm against XLA conv.
    outs_f32 = encoder_event_forward(image, params, mm_dtype=jnp.float32)
    jax.block_until_ready(outs_f32)
    # Fast path: bf16 MXU operands, f32 accumulation (looser tolerance across 12 chained convs).
    outs_bf16 = encoder_event_forward(image, params, mm_dtype=jnp.bfloat16)
    jax.block_until_ready(outs_bf16)

    expect = [(2, num_chs[2], 8, 8), (2, num_chs[3], 4, 4), (2, num_chs[4], 2, 2)]
    for got32, got16, ref, shp in zip(outs_f32, outs_bf16, refs, expect):
        assert got32.shape == shp and got16.shape == shp and ref.shape == shp
        assert jnp.allclose(got32, ref, atol=2e-3, rtol=2e-3)
        assert jnp.allclose(got16, ref, atol=6e-2, rtol=6e-2)

    print("KERNEL_OK")
</pallas_src>

<mosaic_0001>
module attributes {stable_mosaic.version = 11 : i64} {
  func.func @_stage_kernel(%arg0: i32, %arg1: memref<1x4x256xf32, #tpu.memory_space<vmem>>, %arg2: memref<9x8x4xf32, #tpu.memory_space<vmem>>, %arg3: memref<8x1xf32, #tpu.memory_space<vmem>>, %arg4: memref<9x8x8xf32, #tpu.memory_space<vmem>>, %arg5: memref<8x1xf32, #tpu.memory_space<vmem>>, %arg6: memref<9x8x8xf32, #tpu.memory_space<vmem>>, %arg7: memref<8x1xf32, #tpu.memory_space<vmem>>, %arg8: memref<2x256xf32, #tpu.memory_space<vmem>>, %arg9: memref<1x8x256xf32, #tpu.memory_space<vmem>>) attributes {dimension_semantics = [#tpu.dimension_semantics<parallel>], iteration_bounds = array<i64: 2>, scalar_prefetch = 0 : i64, scratch_operands = 0 : i64, tpu.core_type = #tpu.core_type<tc>, window_params = [{transform_indices = @transform_0, window_bounds = array<i64: 1, 4, 256>}, {pipeline_mode = #tpu.pipeline_mode<synchronous>, transform_indices = @transform_1, window_bounds = array<i64: 9, 8, 4>}, {pipeline_mode = #tpu.pipeline_mode<synchronous>, transform_indices = @transform_2, window_bounds = array<i64: 8, 1>}, {pipeline_mode = #tpu.pipeline_mode<synchronous>, transform_indices = @transform_3, window_bounds = array<i64: 9, 8, 8>}, {pipeline_mode = #tpu.pipeline_mode<synchronous>, transform_indices = @transform_4, window_bounds = array<i64: 8, 1>}, {pipeline_mode = #tpu.pipeline_mode<synchronous>, transform_indices = @transform_5, window_bounds = array<i64: 9, 8, 8>}, {pipeline_mode = #tpu.pipeline_mode<synchronous>, transform_indices = @transform_6, window_bounds = array<i64: 8, 1>}, {pipeline_mode = #tpu.pipeline_mode<synchronous>, transform_indices = @transform_7, window_bounds = array<i64: 2, 256>}, {transform_indices = @transform_8, window_bounds = array<i64: 1, 8, 256>}]} {
    %c0 = arith.constant 0 : index
    %c0_0 = arith.constant 0 : index
    %0 = vector.load %arg8[%c0, %c0_0] : memref<2x256xf32, #tpu.memory_space<vmem>>, vector<2x256xf32>
    %1 = vector.extract_strided_slice %0 {offsets = [0, 0], sizes = [1, 256], strides = [1, 1]} : vector<2x256xf32> to vector<1x256xf32>
    %2 = vector.extract_strided_slice %0 {offsets = [1, 0], sizes = [1, 256], strides = [1, 1]} : vector<2x256xf32> to vector<1x256xf32>
    %c0_1 = arith.constant 0 : index
    %c0_2 = arith.constant 0 : index
    %c0_3 = arith.constant 0 : index
    %3 = vector.load %arg1[%c0_1, %c0_2, %c0_3] : memref<1x4x256xf32, #tpu.memory_space<vmem>>, vector<1x4x256xf32>
    %4 = vector.shape_cast %3 : vector<1x4x256xf32> to vector<4x256xf32>
    %cst = arith.constant 0.000000e+00 : f32
    %5 = vector.broadcast %cst : f32 to vector<4x17xf32>
    %6 = tpu.concatenate %5, %4, %5 in 1 : vector<4x17xf32>, vector<4x256xf32>, vector<4x17xf32> -> vector<4x290xf32>
    %cst_4 = arith.constant 0.000000e+00 : f32
    %7 = vector.broadcast %cst_4 : f32 to vector<8x256xf32>
    %8 = vector.extract_strided_slice %6 {offsets = [0, 0], sizes = [4, 256], strides = [1, 1]} : vector<4x290xf32> to vector<4x256xf32>
    %9 = vector.broadcast %1 : vector<1x256xf32> to vector<4x256xf32>
    %10 = arith.mulf %8, %9 : vector<4x256xf32>
    %c0_5 = arith.constant 0 : index
    %c0_6 = arith.constant 0 : index
    %c0_7 = arith.constant 0 : index
    %11 = vector.load %arg2[%c0_5, %c0_6, %c0_7] : memref<9x8x4xf32, #tpu.memory_space<vmem>>, vector<1x8x4xf32>
    %12 = vector.shape_cast %11 : vector<1x8x4xf32> to vector<8x4xf32>
    %cst_8 = arith.constant dense<0.000000e+00> : vector<8x256xf32>
    %13 = tpu.matmul %12, %10, %cst_8 {dimension_numbers = #tpu.dot_dimension_numbers<[1], [0], [0], [1], [0, 0, 1, 1], [], []>} : vector<8x4xf32>, vector<4x256xf32>, vector<8x256xf32> -> vector<8x256xf32>
    %14 = arith.addf %7, %13 : vector<8x256xf32>
    %15 = vector.extract_strided_slice %6 {offsets = [0, 1], sizes = [4, 256], strides = [1, 1]} : vector<4x290xf32> to vector<4x256xf32>
    %c1 = arith.constant 1 : index
    %c0_9 = arith.constant 0 : index
    %c0_10 = arith.constant 0 : index
    %16 = vector.load %arg2[%c1, %c0_9, %c0_10] : memref<9x8x4xf32, #tpu.memory_space<vmem>>, vector<1x8x4xf32>
    %17 = vector.shape_cast %16 : vector<1x8x4xf32> to vector<8x4xf32>
    %cst_11 = arith.constant dense<0.000000e+00> : vector<8x256xf32>
    %18 = tpu.matmul %17, %15, %cst_11 {dimension_numbers = #tpu.dot_dimension_numbers<[1], [0], [0], [1], [0, 0, 1, 1], [], []>} : vector<8x4xf32>, vector<4x256xf32>, vector<8x256xf32> -> vector<8x256xf32>
    %19 = arith.addf %14, %18 : vector<8x256xf32>
    %20 = vector.extract_strided_slice %6 {offsets = [0, 2], sizes = [4, 256], strides = [1, 1]} : vector<4x290xf32> to vector<4x256xf32>
    %21 = vector.broadcast %2 : vector<1x256xf32> to vector<4x256xf32>
    %22 = arith.mulf %20, %21 : vector<4x256xf32>
    %c2 = arith.constant 2 : index
    %c0_12 = arith.constant 0 : index
    %c0_13 = arith.constant 0 : index
    %23 = vector.load %arg2[%c2, %c0_12, %c0_13] : memref<9x8x4xf32, #tpu.memory_space<vmem>>, vector<1x8x4xf32>
    %24 = vector.shape_cast %23 : vector<1x8x4xf32> to vector<8x4xf32>
    %cst_14 = arith.constant dense<0.000000e+00> : vector<8x256xf32>
    %25 = tpu.matmul %24, %22, %cst_14 {dimension_numbers = #tpu.dot_dimension_numbers<[1], [0], [0], [1], [0, 0, 1, 1], [], []>} : vector<8x4xf32>, vector<4x256xf32>, vector<8x256xf32> -> vector<8x256xf32>
    %26 = arith.addf %19, %25 : vector<8x256xf32>
    %27 = vector.extract_strided_slice %6 {offsets = [0, 16], sizes = [4, 256], strides = [1, 1]} : vector<4x290xf32> to vector<4x256xf32>
    %28 = vector.broadcast %1 : vector<1x256xf32> to vector<4x256xf32>
    %29 = arith.mulf %27, %28 : vector<4x256xf32>
    %c3 = arith.constant 3 : index
    %c0_15 = arith.constant 0 : index
    %c0_16 = arith.constant 0 : index
    %30 = vector.load %arg2[%c3, %c0_15, %c0_16] : memref<9x8x4xf32, #tpu.memory_space<vmem>>, vector<1x8x4xf32>
    %31 = vector.shape_cast %30 : vector<1x8x4xf32> to vector<8x4xf32>
    %cst_17 = arith.constant dense<0.000000e+00> : vector<8x256xf32>
    %32 = tpu.matmul %31, %29, %cst_17 {dimension_numbers = #tpu.dot_dimension_numbers<[1], [0], [0], [1], [0, 0, 1, 1], [], []>} : vector<8x4xf32>, vector<4x256xf32>, vector<8x256xf32> -> vector<8x256xf32>
    %33 = arith.addf %26, %32 : vector<8x256xf32>
    %34 = vector.extract_strided_slice %6 {offsets = [0, 17], sizes = [4, 256], strides = [1, 1]} : vector<4x290xf32> to vector<4x256xf32>
    %c4 = arith.constant 4 : index
    %c0_18 = arith.constant 0 : index
    %c0_19 = arith.constant 0 : index
    %35 = vector.load %arg2[%c4, %c0_18, %c0_19] : memref<9x8x4xf32, #tpu.memory_space<vmem>>, vector<1x8x4xf32>
    %36 = vector.shape_cast %35 : vector<1x8x4xf32> to vector<8x4xf32>
    %cst_20 = arith.constant dense<0.000000e+00> : vector<8x256xf32>
    %37 = tpu.matmul %36, %34, %cst_20 {dimension_numbers = #tpu.dot_dimension_numbers<[1], [0], [0], [1], [0, 0, 1, 1], [], []>} : vector<8x4xf32>, vector<4x256xf32>, vector<8x256xf32> -> vector<8x256xf32>
    %38 = arith.addf %33, %37 : vector<8x256xf32>
    %39 = vector.extract_strided_slice %6 {offsets = [0, 18], sizes = [4, 256], strides = [1, 1]} : vector<4x290xf32> to vector<4x256xf32>
    %40 = vector.broadcast %2 : vector<1x256xf32> to vector<4x256xf32>
    %41 = arith.mulf %39, %40 : vector<4x256xf32>
    %c5 = arith.constant 5 : index
    %c0_21 = arith.constant 0 : index
    %c0_22 = arith.constant 0 : index
    %42 = vector.load %arg2[%c5, %c0_21, %c0_22] : memref<9x8x4xf32, #tpu.memory_space<vmem>>, vector<1x8x4xf32>
    %43 = vector.shape_cast %42 : vector<1x8x4xf32> to vector<8x4xf32>
    %cst_23 = arith.constant dense<0.000000e+00> : vector<8x256xf32>
    %44 = tpu.matmul %43, %41, %cst_23 {dimension_numbers = #tpu.dot_dimension_numbers<[1], [0], [0], [1], [0, 0, 1, 1], [], []>} : vector<8x4xf32>, vector<4x256xf32>, vector<8x256xf32> -> vector<8x256xf32>
    %45 = arith.addf %38, %44 : vector<8x256xf32>
    %46 = vector.extract_strided_slice %6 {offsets = [0, 32], sizes = [4, 256], strides = [1, 1]} : vector<4x290xf32> to vector<4x256xf32>
    %47 = vector.broadcast %1 : vector<1x256xf32> to vector<4x256xf32>
    %48 = arith.mulf %46, %47 : vector<4x256xf32>
    %c6 = arith.constant 6 : index
    %c0_24 = arith.constant 0 : index
    %c0_25 = arith.constant 0 : index
    %49 = vector.load %arg2[%c6, %c0_24, %c0_25] : memref<9x8x4xf32, #tpu.memory_space<vmem>>, vector<1x8x4xf32>
    %50 = vector.shape_cast %49 : vector<1x8x4xf32> to vector<8x4xf32>
    %cst_26 = arith.constant dense<0.000000e+00> : vector<8x256xf32>
    %51 = tpu.matmul %50, %48, %cst_26 {dimension_numbers = #tpu.dot_dimension_numbers<[1], [0], [0], [1], [0, 0, 1, 1], [], []>} : vector<8x4xf32>, vector<4x256xf32>, vector<8x256xf32> -> vector<8x256xf32>
    %52 = arith.addf %45, %51 : vector<8x256xf32>
    %53 = vector.extract_strided_slice %6 {offsets = [0, 33], sizes = [4, 256], strides = [1, 1]} : vector<4x290xf32> to vector<4x256xf32>
    %c7 = arith.constant 7 : index
    %c0_27 = arith.constant 0 : index
    %c0_28 = arith.constant 0 : index
    %54 = vector.load %arg2[%c7, %c0_27, %c0_28] : memref<9x8x4xf32, #tpu.memory_space<vmem>>, vector<1x8x4xf32>
    %55 = vector.shape_cast %54 : vector<1x8x4xf32> to vector<8x4xf32>
    %cst_29 = arith.constant dense<0.000000e+00> : vector<8x256xf32>
    %56 = tpu.matmul %55, %53, %cst_29 {dimension_numbers = #tpu.dot_dimension_numbers<[1], [0], [0], [1], [0, 0, 1, 1], [], []>} : vector<8x4xf32>, vector<4x256xf32>, vector<8x256xf32> -> vector<8x256xf32>
    %57 = arith.addf %52, %56 : vector<8x256xf32>
    %58 = vector.extract_strided_slice %6 {offsets = [0, 34], sizes = [4, 256], strides = [1, 1]} : vector<4x290xf32> to vector<4x256xf32>
    %59 = vector.broadcast %2 : vector<1x256xf32> to vector<4x256xf32>
    %60 = arith.mulf %58, %59 : vector<4x256xf32>
    %c8 = arith.constant 8 : index
    %c0_30 = arith.constant 0 : index
    %c0_31 = arith.constant 0 : index
    %61 = vector.load %arg2[%c8, %c0_30, %c0_31] : memref<9x8x4xf32, #tpu.memory_space<vmem>>, vector<1x8x4xf32>
    %62 = vector.shape_cast %61 : vector<1x8x4xf32> to vector<8x4xf32>
    %cst_32 = arith.constant dense<0.000000e+00> : vector<8x256xf32>
    %63 = tpu.matmul %62, %60, %cst_32 {dimension_numbers = #tpu.dot_dimension_numbers<[1], [0], [0], [1], [0, 0, 1, 1], [], []>} : vector<8x4xf32>, vector<4x256xf32>, vector<8x256xf32> -> vector<8x256xf32>
    %64 = arith.addf %57, %63 : vector<8x256xf32>
    %c0_33 = arith.constant 0 : index
    %c0_34 = arith.constant 0 : index
    %65 = vector.load %arg3[%c0_33, %c0_34] : memref<8x1xf32, #tpu.memory_space<vmem>>, vector<8x1xf32>
    %66 = vector.broadcast %65 : vector<8x1xf32> to vector<8x256xf32>
    %67 = arith.addf %64, %66 : vector<8x256xf32>
    %cst_35 = arith.constant 0.000000e+00 : f32
    %68 = vector.broadcast %cst_35 : f32 to vector<8x256xf32>
    %69 = arith.maximumf %67, %68 : vector<8x256xf32>
    %cst_36 = arith.constant 0.000000e+00 : f32
    %70 = vector.broadcast %cst_36 : f32 to vector<8x17xf32>
    %71 = tpu.concatenate %70, %69, %70 in 1 : vector<8x17xf32>, vector<8x256xf32>, vector<8x17xf32> -> vector<8x290xf32>
    %cst_37 = arith.constant 0.000000e+00 : f32
    %72 = vector.broadcast %cst_37 : f32 to vector<8x256xf32>
    %73 = vector.extract_strided_slice %71 {offsets = [0, 0], sizes = [8, 256], strides = [1, 1]} : vector<8x290xf32> to vector<8x256xf32>
    %74 = vector.broadcast %1 : vector<1x256xf32> to vector<8x256xf32>
    %75 = arith.mulf %73, %74 : vector<8x256xf32>
    %c0_38 = arith.constant 0 : index
    %c0_39 = arith.constant 0 : index
    %c0_40 = arith.constant 0 : index
    %76 = vector.load %arg4[%c0_38, %c0_39, %c0_40] : memref<9x8x8xf32, #tpu.memory_space<vmem>>, vector<1x8x8xf32>
    %77 = vector.shape_cast %76 : vector<1x8x8xf32> to vector<8x8xf32>
    %cst_41 = arith.constant dense<0.000000e+00> : vector<8x256xf32>
    %78 = tpu.matmul %77, %75, %cst_41 {dimension_numbers = #tpu.dot_dimension_numbers<[1], [0], [0], [1], [0, 0, 1, 1], [], []>} : vector<8x8xf32>, vector<8x256xf32>, vector<8x256xf32> -> vector<8x256xf32>
    %79 = arith.addf %72, %78 : vector<8x256xf32>
    %80 = vector.extract_strided_slice %71 {offsets = [0, 1], sizes = [8, 256], strides = [1, 1]} : vector<8x290xf32> to vector<8x256xf32>
    %c1_42 = arith.constant 1 : index
    %c0_43 = arith.constant 0 : index
    %c0_44 = arith.constant 0 : index
    %81 = vector.load %arg4[%c1_42, %c0_43, %c0_44] : memref<9x8x8xf32, #tpu.memory_space<vmem>>, vector<1x8x8xf32>
    %82 = vector.shape_cast %81 : vector<1x8x8xf32> to vector<8x8xf32>
    %cst_45 = arith.constant dense<0.000000e+00> : vector<8x256xf32>
    %83 = tpu.matmul %82, %80, %cst_45 {dimension_numbers = #tpu.dot_dimension_numbers<[1], [0], [0], [1], [0, 0, 1, 1], [], []>} : vector<8x8xf32>, vector<8x256xf32>, vector<8x256xf32> -> vector<8x256xf32>
    %84 = arith.addf %79, %83 : vector<8x256xf32>
    %85 = vector.extract_strided_slice %71 {offsets = [0, 2], sizes = [8, 256], strides = [1, 1]} : vector<8x290xf32> to vector<8x256xf32>
    %86 = vector.broadcast %2 : vector<1x256xf32> to vector<8x256xf32>
    %87 = arith.mulf %85, %86 : vector<8x256xf32>
    %c2_46 = arith.constant 2 : index
    %c0_47 = arith.constant 0 : index
    %c0_48 = arith.constant 0 : index
    %88 = vector.load %arg4[%c2_46, %c0_47, %c0_48] : memref<9x8x8xf32, #tpu.memory_space<vmem>>, vector<1x8x8xf32>
    %89 = vector.shape_cast %88 : vector<1x8x8xf32> to vector<8x8xf32>
    %cst_49 = arith.constant dense<0.000000e+00> : vector<8x256xf32>
    %90 = tpu.matmul %89, %87, %cst_49 {dimension_numbers = #tpu.dot_dimension_numbers<[1], [0], [0], [1], [0, 0, 1, 1], [], []>} : vector<8x8xf32>, vector<8x256xf32>, vector<8x256xf32> -> vector<8x256xf32>
    %91 = arith.addf %84, %90 : vector<8x256xf32>
    %92 = vector.extract_strided_slice %71 {offsets = [0, 16], sizes = [8, 256], strides = [1, 1]} : vector<8x290xf32> to vector<8x256xf32>
    %93 = vector.broadcast %1 : vector<1x256xf32> to vector<8x256xf32>
    %94 = arith.mulf %92, %93 : vector<8x256xf32>
    %c3_50 = arith.constant 3 : index
    %c0_51 = arith.constant 0 : index
    %c0_52 = arith.constant 0 : index
    %95 = vector.load %arg4[%c3_50, %c0_51, %c0_52] : memref<9x8x8xf32, #tpu.memory_space<vmem>>, vector<1x8x8xf32>
    %96 = vector.shape_cast %95 : vector<1x8x8xf32> to vector<8x8xf32>
    %cst_53 = arith.constant dense<0.000000e+00> : vector<8x256xf32>
    %97 = tpu.matmul %96, %94, %cst_53 {dimension_numbers = #tpu.dot_dimension_numbers<[1], [0], [0], [1], [0, 0, 1, 1], [], []>} : vector<8x8xf32>, vector<8x256xf32>, vector<8x256xf32> -> vector<8x256xf32>
    %98 = arith.addf %91, %97 : vector<8x256xf32>
    %99 = vector.extract_strided_slice %71 {offsets = [0, 17], sizes = [8, 256], strides = [1, 1]} : vector<8x290xf32> to vector<8x256xf32>
    %c4_54 = arith.constant 4 : index
    %c0_55 = arith.constant 0 : index
    %c0_56 = arith.constant 0 : index
    %100 = vector.load %arg4[%c4_54, %c0_55, %c0_56] : memref<9x8x8xf32, #tpu.memory_space<vmem>>, vector<1x8x8xf32>
    %101 = vector.shape_cast %100 : vector<1x8x8xf32> to vector<8x8xf32>
    %cst_57 = arith.constant dense<0.000000e+00> : vector<8x256xf32>
    %102 = tpu.matmul %101, %99, %cst_57 {dimension_numbers = #tpu.dot_dimension_numbers<[1], [0], [0], [1], [0, 0, 1, 1], [], []>} : vector<8x8xf32>, vector<8x256xf32>, vector<8x256xf32> -> vector<8x256xf32>
    %103 = arith.addf %98, %102 : vector<8x256xf32>
    %104 = vector.extract_strided_slice %71 {offsets = [0, 18], sizes = [8, 256], strides = [1, 1]} : vector<8x290xf32> to vector<8x256xf32>
    %105 = vector.broadcast %2 : vector<1x256xf32> to vector<8x256xf32>
    %106 = arith.mulf %104, %105 : vector<8x256xf32>
    %c5_58 = arith.constant 5 : index
    %c0_59 = arith.constant 0 : index
    %c0_60 = arith.constant 0 : index
    %107 = vector.load %arg4[%c5_58, %c0_59, %c0_60] : memref<9x8x8xf32, #tpu.memory_space<vmem>>, vector<1x8x8xf32>
    %108 = vector.shape_cast %107 : vector<1x8x8xf32> to vector<8x8xf32>
    %cst_61 = arith.constant dense<0.000000e+00> : vector<8x256xf32>
    %109 = tpu.matmul %108, %106, %cst_61 {dimension_numbers = #tpu.dot_dimension_numbers<[1], [0], [0], [1], [0, 0, 1, 1], [], []>} : vector<8x8xf32>, vector<8x256xf32>, vector<8x256xf32> -> vector<8x256xf32>
    %110 = arith.addf %103, %109 : vector<8x256xf32>
    %111 = vector.extract_strided_slice %71 {offsets = [0, 32], sizes = [8, 256], strides = [1, 1]} : vector<8x290xf32> to vector<8x256xf32>
    %112 = vector.broadcast %1 : vector<1x256xf32> to vector<8x256xf32>
    %113 = arith.mulf %111, %112 : vector<8x256xf32>
    %c6_62 = arith.constant 6 : index
    %c0_63 = arith.constant 0 : index
    %c0_64 = arith.constant 0 : index
    %114 = vector.load %arg4[%c6_62, %c0_63, %c0_64] : memref<9x8x8xf32, #tpu.memory_space<vmem>>, vector<1x8x8xf32>
    %115 = vector.shape_cast %114 : vector<1x8x8xf32> to vector<8x8xf32>
    %cst_65 = arith.constant dense<0.000000e+00> : vector<8x256xf32>
    %116 = tpu.matmul %115, %113, %cst_65 {dimension_numbers = #tpu.dot_dimension_numbers<[1], [0], [0], [1], [0, 0, 1, 1], [], []>} : vector<8x8xf32>, vector<8x256xf32>, vector<8x256xf32> -> vector<8x256xf32>
    %117 = arith.addf %110, %116 : vector<8x256xf32>
    %118 = vector.extract_strided_slice %71 {offsets = [0, 33], sizes = [8, 256], strides = [1, 1]} : vector<8x290xf32> to vector<8x256xf32>
    %c7_66 = arith.constant 7 : index
    %c0_67 = arith.constant 0 : index
    %c0_68 = arith.constant 0 : index
    %119 = vector.load %arg4[%c7_66, %c0_67, %c0_68] : memref<9x8x8xf32, #tpu.memory_space<vmem>>, vector<1x8x8xf32>
    %120 = vector.shape_cast %119 : vector<1x8x8xf32> to vector<8x8xf32>
    %cst_69 = arith.constant dense<0.000000e+00> : vector<8x256xf32>
    %121 = tpu.matmul %120, %118, %cst_69 {dimension_numbers = #tpu.dot_dimension_numbers<[1], [0], [0], [1], [0, 0, 1, 1], [], []>} : vector<8x8xf32>, vector<8x256xf32>, vector<8x256xf32> -> vector<8x256xf32>
    %122 = arith.addf %117, %121 : vector<8x256xf32>
    %123 = vector.extract_strided_slice %71 {offsets = [0, 34], sizes = [8, 256], strides = [1, 1]} : vector<8x290xf32> to vector<8x256xf32>
    %124 = vector.broadcast %2 : vector<1x256xf32> to vector<8x256xf32>
    %125 = arith.mulf %123, %124 : vector<8x256xf32>
    %c8_70 = arith.constant 8 : index
    %c0_71 = arith.constant 0 : index
    %c0_72 = arith.constant 0 : index
    %126 = vector.load %arg4[%c8_70, %c0_71, %c0_72] : memref<9x8x8xf32, #tpu.memory_space<vmem>>, vector<1x8x8xf32>
    %127 = vector.shape_cast %126 : vector<1x8x8xf32> to vector<8x8xf32>
    %cst_73 = arith.constant dense<0.000000e+00> : vector<8x256xf32>
    %128 = tpu.matmul %127, %125, %cst_73 {dimension_numbers = #tpu.dot_dimension_numbers<[1], [0], [0], [1], [0, 0, 1, 1], [], []>} : vector<8x8xf32>, vector<8x256xf32>, vector<8x256xf32> -> vector<8x256xf32>
    %129 = arith.addf %122, %128 : vector<8x256xf32>
    %c0_74 = arith.constant 0 : index
    %c0_75 = arith.constant 0 : index
    %130 = vector.load %arg5[%c0_74, %c0_75] : memref<8x1xf32, #tpu.memory_space<vmem>>, vector<8x1xf32>
    %131 = vector.broadcast %130 : vector<8x1xf32> to vector<8x256xf32>
    %132 = arith.addf %129, %131 : vector<8x256xf32>
    %cst_76 = arith.constant 0.000000e+00 : f32
    %133 = vector.broadcast %cst_76 : f32 to vector<8x256xf32>
    %134 = arith.maximumf %132, %133 : vector<8x256xf32>
    %cst_77 = arith.constant 0.000000e+00 : f32
    %135 = vector.broadcast %cst_77 : f32 to vector<8x17xf32>
    %136 = tpu.concatenate %135, %134, %135 in 1 : vector<8x17xf32>, vector<8x256xf32>, vector<8x17xf32> -> vector<8x290xf32>
    %cst_78 = arith.constant 0.000000e+00 : f32
    %137 = vector.broadcast %cst_78 : f32 to vector<8x256xf32>
    %138 = vector.extract_strided_slice %136 {offsets = [0, 0], sizes = [8, 256], strides = [1, 1]} : vector<8x290xf32> to vector<8x256xf32>
    %139 = vector.broadcast %1 : vector<1x256xf32> to vector<8x256xf32>
    %140 = arith.mulf %138, %139 : vector<8x256xf32>
    %c0_79 = arith.constant 0 : index
    %c0_80 = arith.constant 0 : index
    %c0_81 = arith.constant 0 : index
    %141 = vector.load %arg6[%c0_79, %c0_80, %c0_81] : memref<9x8x8xf32, #tpu.memory_space<vmem>>, vector<1x8x8xf32>
    %142 = vector.shape_cast %141 : vector<1x8x8xf32> to vector<8x8xf32>
    %cst_82 = arith.constant dense<0.000000e+00> : vector<8x256xf32>
    %143 = tpu.matmul %142, %140, %cst_82 {dimension_numbers = #tpu.dot_dimension_numbers<[1], [0], [0], [1], [0, 0, 1, 1], [], []>} : vector<8x8xf32>, vector<8x256xf32>, vector<8x256xf32> -> vector<8x256xf32>
    %144 = arith.addf %137, %143 : vector<8x256xf32>
    %145 = vector.extract_strided_slice %136 {offsets = [0, 1], sizes = [8, 256], strides = [1, 1]} : vector<8x290xf32> to vector<8x256xf32>
    %c1_83 = arith.constant 1 : index
    %c0_84 = arith.constant 0 : index
    %c0_85 = arith.constant 0 : index
    %146 = vector.load %arg6[%c1_83, %c0_84, %c0_85] : memref<9x8x8xf32, #tpu.memory_space<vmem>>, vector<1x8x8xf32>
    %147 = vector.shape_cast %146 : vector<1x8x8xf32> to vector<8x8xf32>
    %cst_86 = arith.constant dense<0.000000e+00> : vector<8x256xf32>
    %148 = tpu.matmul %147, %145, %cst_86 {dimension_numbers = #tpu.dot_dimension_numbers<[1], [0], [0], [1], [0, 0, 1, 1], [], []>} : vector<8x8xf32>, vector<8x256xf32>, vector<8x256xf32> -> vector<8x256xf32>
    %149 = arith.addf %144, %148 : vector<8x256xf32>
    %150 = vector.extract_strided_slice %136 {offsets = [0, 2], sizes = [8, 256], strides = [1, 1]} : vector<8x290xf32> to vector<8x256xf32>
    %151 = vector.broadcast %2 : vector<1x256xf32> to vector<8x256xf32>
    %152 = arith.mulf %150, %151 : vector<8x256xf32>
    %c2_87 = arith.constant 2 : index
    %c0_88 = arith.constant 0 : index
    %c0_89 = arith.constant 0 : index
    %153 = vector.load %arg6[%c2_87, %c0_88, %c0_89] : memref<9x8x8xf32, #tpu.memory_space<vmem>>, vector<1x8x8xf32>
    %154 = vector.shape_cast %153 : vector<1x8x8xf32> to vector<8x8xf32>
    %cst_90 = arith.constant dense<0.000000e+00> : vector<8x256xf32>
    %155 = tpu.matmul %154, %152, %cst_90 {dimension_numbers = #tpu.dot_dimension_numbers<[1], [0], [0], [1], [0, 0, 1, 1], [], []>} : vector<8x8xf32>, vector<8x256xf32>, vector<8x256xf32> -> vector<8x256xf32>
    %156 = arith.addf %149, %155 : vector<8x256xf32>
    %157 = vector.extract_strided_slice %136 {offsets = [0, 16], sizes = [8, 256], strides = [1, 1]} : vector<8x290xf32> to vector<8x256xf32>
    %158 = vector.broadcast %1 : vector<1x256xf32> to vector<8x256xf32>
    %159 = arith.mulf %157, %158 : vector<8x256xf32>
    %c3_91 = arith.constant 3 : index
    %c0_92 = arith.constant 0 : index
    %c0_93 = arith.constant 0 : index
    %160 = vector.load %arg6[%c3_91, %c0_92, %c0_93] : memref<9x8x8xf32, #tpu.memory_space<vmem>>, vector<1x8x8xf32>
    %161 = vector.shape_cast %160 : vector<1x8x8xf32> to vector<8x8xf32>
    %cst_94 = arith.constant dense<0.000000e+00> : vector<8x256xf32>
    %162 = tpu.matmul %161, %159, %cst_94 {dimension_numbers = #tpu.dot_dimension_numbers<[1], [0], [0], [1], [0, 0, 1, 1], [], []>} : vector<8x8xf32>, vector<8x256xf32>, vector<8x256xf32> -> vector<8x256xf32>
    %163 = arith.addf %156, %162 : vector<8x256xf32>
    %164 = vector.extract_strided_slice %136 {offsets = [0, 17], sizes = [8, 256], strides = [1, 1]} : vector<8x290xf32> to vector<8x256xf32>
    %c4_95 = arith.constant 4 : index
    %c0_96 = arith.constant 0 : index
    %c0_97 = arith.constant 0 : index
    %165 = vector.load %arg6[%c4_95, %c0_96, %c0_97] : memref<9x8x8xf32, #tpu.memory_space<vmem>>, vector<1x8x8xf32>
    %166 = vector.shape_cast %165 : vector<1x8x8xf32> to vector<8x8xf32>
    %cst_98 = arith.constant dense<0.000000e+00> : vector<8x256xf32>
    %167 = tpu.matmul %166, %164, %cst_98 {dimension_numbers = #tpu.dot_dimension_numbers<[1], [0], [0], [1], [0, 0, 1, 1], [], []>} : vector<8x8xf32>, vector<8x256xf32>, vector<8x256xf32> -> vector<8x256xf32>
    %168 = arith.addf %163, %167 : vector<8x256xf32>
    %169 = vector.extract_strided_slice %136 {offsets = [0, 18], sizes = [8, 256], strides = [1, 1]} : vector<8x290xf32> to vector<8x256xf32>
    %170 = vector.broadcast %2 : vector<1x256xf32> to vector<8x256xf32>
    %171 = arith.mulf %169, %170 : vector<8x256xf32>
    %c5_99 = arith.constant 5 : index
    %c0_100 = arith.constant 0 : index
    %c0_101 = arith.constant 0 : index
    %172 = vector.load %arg6[%c5_99, %c0_100, %c0_101] : memref<9x8x8xf32, #tpu.memory_space<vmem>>, vector<1x8x8xf32>
    %173 = vector.shape_cast %172 : vector<1x8x8xf32> to vector<8x8xf32>
    %cst_102 = arith.constant dense<0.000000e+00> : vector<8x256xf32>
    %174 = tpu.matmul %173, %171, %cst_102 {dimension_numbers = #tpu.dot_dimension_numbers<[1], [0], [0], [1], [0, 0, 1, 1], [], []>} : vector<8x8xf32>, vector<8x256xf32>, vector<8x256xf32> -> vector<8x256xf32>
    %175 = arith.addf %168, %174 : vector<8x256xf32>
    %176 = vector.extract_strided_slice %136 {offsets = [0, 32], sizes = [8, 256], strides = [1, 1]} : vector<8x290xf32> to vector<8x256xf32>
    %177 = vector.broadcast %1 : vector<1x256xf32> to vector<8x256xf32>
    %178 = arith.mulf %176, %177 : vector<8x256xf32>
    %c6_103 = arith.constant 6 : index
    %c0_104 = arith.constant 0 : index
    %c0_105 = arith.constant 0 : index
    %179 = vector.load %arg6[%c6_103, %c0_104, %c0_105] : memref<9x8x8xf32, #tpu.memory_space<vmem>>, vector<1x8x8xf32>
    %180 = vector.shape_cast %179 : vector<1x8x8xf32> to vector<8x8xf32>
    %cst_106 = arith.constant dense<0.000000e+00> : vector<8x256xf32>
    %181 = tpu.matmul %180, %178, %cst_106 {dimension_numbers = #tpu.dot_dimension_numbers<[1], [0], [0], [1], [0, 0, 1, 1], [], []>} : vector<8x8xf32>, vector<8x256xf32>, vector<8x256xf32> -> vector<8x256xf32>
    %182 = arith.addf %175, %181 : vector<8x256xf32>
    %183 = vector.extract_strided_slice %136 {offsets = [0, 33], sizes = [8, 256], strides = [1, 1]} : vector<8x290xf32> to vector<8x256xf32>
    %c7_107 = arith.constant 7 : index
    %c0_108 = arith.constant 0 : index
    %c0_109 = arith.constant 0 : index
    %184 = vector.load %arg6[%c7_107, %c0_108, %c0_109] : memref<9x8x8xf32, #tpu.memory_space<vmem>>, vector<1x8x8xf32>
    %185 = vector.shape_cast %184 : vector<1x8x8xf32> to vector<8x8xf32>
    %cst_110 = arith.constant dense<0.000000e+00> : vector<8x256xf32>
    %186 = tpu.matmul %185, %183, %cst_110 {dimension_numbers = #tpu.dot_dimension_numbers<[1], [0], [0], [1], [0, 0, 1, 1], [], []>} : vector<8x8xf32>, vector<8x256xf32>, vector<8x256xf32> -> vector<8x256xf32>
    %187 = arith.addf %182, %186 : vector<8x256xf32>
    %188 = vector.extract_strided_slice %136 {offsets = [0, 34], sizes = [8, 256], strides = [1, 1]} : vector<8x290xf32> to vector<8x256xf32>
    %189 = vector.broadcast %2 : vector<1x256xf32> to vector<8x256xf32>
    %190 = arith.mulf %188, %189 : vector<8x256xf32>
    %c8_111 = arith.constant 8 : index
    %c0_112 = arith.constant 0 : index
    %c0_113 = arith.constant 0 : index
    %191 = vector.load %arg6[%c8_111, %c0_112, %c0_113] : memref<9x8x8xf32, #tpu.memory_space<vmem>>, vector<1x8x8xf32>
    %192 = vector.shape_cast %191 : vector<1x8x8xf32> to vector<8x8xf32>
    %cst_114 = arith.constant dense<0.000000e+00> : vector<8x256xf32>
    %193 = tpu.matmul %192, %190, %cst_114 {dimension_numbers = #tpu.dot_dimension_numbers<[1], [0], [0], [1], [0, 0, 1, 1], [], []>} : vector<8x8xf32>, vector<8x256xf32>, vector<8x256xf32> -> vector<8x256xf32>
    %194 = arith.addf %187, %193 : vector<8x256xf32>
    %c0_115 = arith.constant 0 : index
    %c0_116 = arith.constant 0 : index
    %195 = vector.load %arg7[%c0_115, %c0_116] : memref<8x1xf32, #tpu.memory_space<vmem>>, vector<8x1xf32>
    %196 = vector.broadcast %195 : vector<8x1xf32> to vector<8x256xf32>
    %197 = arith.addf %194, %196 : vector<8x256xf32>
    %198 = arith.addf %197, %69 : vector<8x256xf32>
    %cst_117 = arith.constant 0.000000e+00 : f32
    %199 = vector.broadcast %cst_117 : f32 to vector<8x256xf32>
    %200 = arith.maximumf %198, %199 : vector<8x256xf32>
    %c0_118 = arith.constant 0 : index
    %c0_119 = arith.constant 0 : index
    %c0_120 = arith.constant 0 : index
    %201 = vector.load %arg9[%c0_118, %c0_119, %c0_120] : memref<1x8x256xf32, #tpu.memory_space<vmem>>, vector<1x8x256xf32>
    %202 = vector.shape_cast %201 : vector<1x8x256xf32> to vector<8x256xf32>
    %203 = vector.shape_cast %200 : vector<8x256xf32> to vector<1x8x256xf32>
    tpu.vector_store %arg9[%c0_118, %c0_119, %c0_120], %203 {strides = array<i32>} : memref<1x8x256xf32, #tpu.memory_space<vmem>>, vector<1x8x256xf32>,
    return
  }
  func.func @transform_0(%arg0: i32) -> (i32, i32, i32) {
    %c0_i32 = arith.constant 0 : i32
    %c0_i32_0 = arith.constant 0 : i32
    %c0_i32_1 = arith.constant 0 : i32
    return %arg0, %c0_i32, %c0_i32_0 : i32, i32, i32
  }
  func.func @transform_1(%arg0: i32) -> (i32, i32, i32) {
    %c0_i32 = arith.constant 0 : i32
    %c0_i32_0 = arith.constant 0 : i32
    %c0_i32_1 = arith.constant 0 : i32
    %c0_i32_2 = arith.constant 0 : i32
    return %c0_i32, %c0_i32_0, %c0_i32_1 : i32, i32, i32
  }
  func.func @transform_2(%arg0: i32) -> (i32, i32) {
    %c0_i32 = arith.constant 0 : i32
    %c0_i32_0 = arith.constant 0 : i32
    %c0_i32_1 = arith.constant 0 : i32
    return %c0_i32, %c0_i32_0 : i32, i32
  }
  func.func @transform_3(%arg0: i32) -> (i32, i32, i32) {
    %c0_i32 = arith.constant 0 : i32
    %c0_i32_0 = arith.constant 0 : i32
    %c0_i32_1 = arith.constant 0 : i32
    %c0_i32_2 = arith.constant 0 : i32
    return %c0_i32, %c0_i32_0, %c0_i32_1 : i32, i32, i32
  }
  func.func @transform_4(%arg0: i32) -> (i32, i32) {
    %c0_i32 = arith.constant 0 : i32
    %c0_i32_0 = arith.constant 0 : i32
    %c0_i32_1 = arith.constant 0 : i32
    return %c0_i32, %c0_i32_0 : i32, i32
  }
  func.func @transform_5(%arg0: i32) -> (i32, i32, i32) {
    %c0_i32 = arith.constant 0 : i32
    %c0_i32_0 = arith.constant 0 : i32
    %c0_i32_1 = arith.constant 0 : i32
    %c0_i32_2 = arith.constant 0 : i32
    return %c0_i32, %c0_i32_0, %c0_i32_1 : i32, i32, i32
  }
  func.func @transform_6(%arg0: i32) -> (i32, i32) {
    %c0_i32 = arith.constant 0 : i32
    %c0_i32_0 = arith.constant 0 : i32
    %c0_i32_1 = arith.constant 0 : i32
    return %c0_i32, %c0_i32_0 : i32, i32
  }
  func.func @transform_7(%arg0: i32) -> (i32, i32) {
    %c0_i32 = arith.constant 0 : i32
    %c0_i32_0 = arith.constant 0 : i32
    %c0_i32_1 = arith.constant 0 : i32
    return %c0_i32, %c0_i32_0 : i32, i32
  }
  func.func @transform_8(%arg0: i32) -> (i32, i32, i32) {
    %c0_i32 = arith.constant 0 : i32
    %c0_i32_0 = arith.constant 0 : i32
    %c0_i32_1 = arith.constant 0 : i32
    return %arg0, %c0_i32, %c0_i32_0 : i32, i32, i32
  }
}

module attributes {stable_mosaic.version = 11 : i64} {
  func.func @_stage_kernel(%arg0: i32, %arg1: memref<1x32x64xf32, #tpu.memory_space<vmem>>, %arg2: memref<9x16x8xf32, #tpu.memory_space<vmem>>, %arg3: memref<16x1xf32, #tpu.memory_space<vmem>>, %arg4: memref<9x16x16xf32, #tpu.memory_space<vmem>>, %arg5: memref<16x1xf32, #tpu.memory_space<vmem>>, %arg6: memref<9x16x16xf32, #tpu.memory_space<vmem>>, %arg7: memref<16x1xf32, #tpu.memory_space<vmem>>, %arg8: memref<2x64xf32, #tpu.memory_space<vmem>>, %arg9: memref<1x16x64xf32, #tpu.memory_space<vmem>>) attributes {dimension_semantics = [#tpu.dimension_semantics<parallel>], iteration_bounds = array<i64: 2>, scalar_prefetch = 0 : i64, scratch_operands = 0 : i64, tpu.core_type = #tpu.core_type<tc>, window_params = [{transform_indices = @transform_0, window_bounds = array<i64: 1, 32, 64>}, {pipeline_mode = #tpu.pipeline_mode<synchronous>, transform_indices = @transform_1, window_bounds = array<i64: 9, 16, 8>}, {pipeline_mode = #tpu.pipeline_mode<synchronous>, transform_indices = @transform_2, window_bounds = array<i64: 16, 1>}, {pipeline_mode = #tpu.pipeline_mode<synchronous>, transform_indices = @transform_3, window_bounds = array<i64: 9, 16, 16>}, {pipeline_mode = #tpu.pipeline_mode<synchronous>, transform_indices = @transform_4, window_bounds = array<i64: 16, 1>}, {pipeline_mode = #tpu.pipeline_mode<synchronous>, transform_indices = @transform_5, window_bounds = array<i64: 9, 16, 16>}, {pipeline_mode = #tpu.pipeline_mode<synchronous>, transform_indices = @transform_6, window_bounds = array<i64: 16, 1>}, {pipeline_mode = #tpu.pipeline_mode<synchronous>, transform_indices = @transform_7, window_bounds = array<i64: 2, 64>}, {transform_indices = @transform_8, window_bounds = array<i64: 1, 16, 64>}]} {
    %c0 = arith.constant 0 : index
    %c0_0 = arith.constant 0 : index
    %0 = vector.load %arg8[%c0, %c0_0] : memref<2x64xf32, #tpu.memory_space<vmem>>, vector<2x64xf32>
    %1 = vector.extract_strided_slice %0 {offsets = [0, 0], sizes = [1, 64], strides = [1, 1]} : vector<2x64xf32> to vector<1x64xf32>
    %2 = vector.extract_strided_slice %0 {offsets = [1, 0], sizes = [1, 64], strides = [1, 1]} : vector<2x64xf32> to vector<1x64xf32>
    %c0_1 = arith.constant 0 : index
    %c0_2 = arith.constant 0 : index
    %c0_3 = arith.constant 0 : index
    %3 = vector.load %arg1[%c0_1, %c0_2, %c0_3] : memref<1x32x64xf32, #tpu.memory_space<vmem>>, vector<1x32x64xf32>
    %4 = vector.shape_cast %3 : vector<1x32x64xf32> to vector<32x64xf32>
    %cst = arith.constant 0.000000e+00 : f32
    %5 = vector.broadcast %cst : f32 to vector<16x64xf32>
    %6 = vector.extract_strided_slice %4 {offsets = [24, 0], sizes = [8, 64], strides = [1, 1]} : vector<32x64xf32> to vector<8x64xf32>
    %cst_4 = arith.constant 0.000000e+00 : f32
    %7 = vector.broadcast %cst_4 : f32 to vector<8x9xf32>
    %8 = vector.extract_strided_slice %6 {offsets = [0, 0], sizes = [8, 55], strides = [1, 1]} : vector<8x64xf32> to vector<8x55xf32>
    %9 = tpu.concatenate %7, %8 in 1 : vector<8x9xf32>, vector<8x55xf32> -> vector<8x64xf32>
    %10 = vector.broadcast %1 : vector<1x64xf32> to vector<8x64xf32>
    %11 = arith.mulf %9, %10 : vector<8x64xf32>
    %c0_5 = arith.constant 0 : index
    %c0_6 = arith.constant 0 : index
    %c0_7 = arith.constant 0 : index
    %12 = vector.load %arg2[%c0_5, %c0_6, %c0_7] : memref<9x16x8xf32, #tpu.memory_space<vmem>>, vector<1x16x8xf32>
    %13 = vector.shape_cast %12 : vector<1x16x8xf32> to vector<16x8xf32>
    %cst_8 = arith.constant dense<0.000000e+00> : vector<16x64xf32>
    %14 = tpu.matmul %13, %11, %cst_8 {dimension_numbers = #tpu.dot_dimension_numbers<[1], [0], [0], [1], [0, 0, 1, 1], [], []>} : vector<16x8xf32>, vector<8x64xf32>, vector<16x64xf32> -> vector<16x64xf32>
    %15 = arith.addf %5, %14 : vector<16x64xf32>
    %16 = vector.extract_strided_slice %4 {offsets = [16, 0], sizes = [8, 64], strides = [1, 1]} : vector<32x64xf32> to vector<8x64xf32>
    %cst_9 = arith.constant 0.000000e+00 : f32
    %17 = vector.broadcast %cst_9 : f32 to vector<8x8xf32>
    %18 = vector.extract_strided_slice %16 {offsets = [0, 0], sizes = [8, 56], strides = [1, 1]} : vector<8x64xf32> to vector<8x56xf32>
    %19 = tpu.concatenate %17, %18 in 1 : vector<8x8xf32>, vector<8x56xf32> -> vector<8x64xf32>
    %c1 = arith.constant 1 : index
    %c0_10 = arith.constant 0 : index
    %c0_11 = arith.constant 0 : index
    %20 = vector.load %arg2[%c1, %c0_10, %c0_11] : memref<9x16x8xf32, #tpu.memory_space<vmem>>, vector<1x16x8xf32>
    %21 = vector.shape_cast %20 : vector<1x16x8xf32> to vector<16x8xf32>
    %cst_12 = arith.constant dense<0.000000e+00> : vector<16x64xf32>
    %22 = tpu.matmul %21, %19, %cst_12 {dimension_numbers = #tpu.dot_dimension_numbers<[1], [0], [0], [1], [0, 0, 1, 1], [], []>} : vector<16x8xf32>, vector<8x64xf32>, vector<16x64xf32> -> vector<16x64xf32>
    %23 = arith.addf %15, %22 : vector<16x64xf32>
    %24 = vector.extract_strided_slice %4 {offsets = [24, 0], sizes = [8, 64], strides = [1, 1]} : vector<32x64xf32> to vector<8x64xf32>
    %cst_13 = arith.constant 0.000000e+00 : f32
    %25 = vector.broadcast %cst_13 : f32 to vector<8x8xf32>
    %26 = vector.extract_strided_slice %24 {offsets = [0, 0], sizes = [8, 56], strides = [1, 1]} : vector<8x64xf32> to vector<8x56xf32>
    %27 = tpu.concatenate %25, %26 in 1 : vector<8x8xf32>, vector<8x56xf32> -> vector<8x64xf32>
    %c2 = arith.constant 2 : index
    %c0_14 = arith.constant 0 : index
    %c0_15 = arith.constant 0 : index
    %28 = vector.load %arg2[%c2, %c0_14, %c0_15] : memref<9x16x8xf32, #tpu.memory_space<vmem>>, vector<1x16x8xf32>
    %29 = vector.shape_cast %28 : vector<1x16x8xf32> to vector<16x8xf32>
    %cst_16 = arith.constant dense<0.000000e+00> : vector<16x64xf32>
    %30 = tpu.matmul %29, %27, %cst_16 {dimension_numbers = #tpu.dot_dimension_numbers<[1], [0], [0], [1], [0, 0, 1, 1], [], []>} : vector<16x8xf32>, vector<8x64xf32>, vector<16x64xf32> -> vector<16x64xf32>
    %31 = arith.addf %23, %30 : vector<16x64xf32>
    %32 = vector.extract_strided_slice %4 {offsets = [8, 0], sizes = [8, 64], strides = [1, 1]} : vector<32x64xf32> to vector<8x64xf32>
    %cst_17 = arith.constant 0.000000e+00 : f32
    %33 = vector.broadcast %cst_17 : f32 to vector<8x1xf32>
    %34 = vector.extract_strided_slice %32 {offsets = [0, 0], sizes = [8, 63], strides = [1, 1]} : vector<8x64xf32> to vector<8x63xf32>
    %35 = tpu.concatenate %33, %34 in 1 : vector<8x1xf32>, vector<8x63xf32> -> vector<8x64xf32>
    %36 = vector.broadcast %1 : vector<1x64xf32> to vector<8x64xf32>
    %37 = arith.mulf %35, %36 : vector<8x64xf32>
    %c3 = arith.constant 3 : index
    %c0_18 = arith.constant 0 : index
    %c0_19 = arith.constant 0 : index
    %38 = vector.load %arg2[%c3, %c0_18, %c0_19] : memref<9x16x8xf32, #tpu.memory_space<vmem>>, vector<1x16x8xf32>
    %39 = vector.shape_cast %38 : vector<1x16x8xf32> to vector<16x8xf32>
    %cst_20 = arith.constant dense<0.000000e+00> : vector<16x64xf32>
    %40 = tpu.matmul %39, %37, %cst_20 {dimension_numbers = #tpu.dot_dimension_numbers<[1], [0], [0], [1], [0, 0, 1, 1], [], []>} : vector<16x8xf32>, vector<8x64xf32>, vector<16x64xf32> -> vector<16x64xf32>
    %41 = arith.addf %31, %40 : vector<16x64xf32>
    %42 = vector.extract_strided_slice %4 {offsets = [0, 0], sizes = [8, 64], strides = [1, 1]} : vector<32x64xf32> to vector<8x64xf32>
    %c4 = arith.constant 4 : index
    %c0_21 = arith.constant 0 : index
    %c0_22 = arith.constant 0 : index
    %43 = vector.load %arg2[%c4, %c0_21, %c0_22] : memref<9x16x8xf32, #tpu.memory_space<vmem>>, vector<1x16x8xf32>
    %44 = vector.shape_cast %43 : vector<1x16x8xf32> to vector<16x8xf32>
    %cst_23 = arith.constant dense<0.000000e+00> : vector<16x64xf32>
    %45 = tpu.matmul %44, %42, %cst_23 {dimension_numbers = #tpu.dot_dimension_numbers<[1], [0], [0], [1], [0, 0, 1, 1], [], []>} : vector<16x8xf32>, vector<8x64xf32>, vector<16x64xf32> -> vector<16x64xf32>
    %46 = arith.addf %41, %45 : vector<16x64xf32>
    %47 = vector.extract_strided_slice %4 {offsets = [8, 0], sizes = [8, 64], strides = [1, 1]} : vector<32x64xf32> to vector<8x64xf32>
    %c5 = arith.constant 5 : index
    %c0_24 = arith.constant 0 : index
    %c0_25 = arith.constant 0 : index
    %48 = vector.load %arg2[%c5, %c0_24, %c0_25] : memref<9x16x8xf32, #tpu.memory_space<vmem>>, vector<1x16x8xf32>
    %49 = vector.shape_cast %48 : vector<1x16x8xf32> to vector<16x8xf32>
    %cst_26 = arith.constant dense<0.000000e+00> : vector<16x64xf32>
    %50 = tpu.matmul %49, %47, %cst_26 {dimension_numbers = #tpu.dot_dimension_numbers<[1], [0], [0], [1], [0, 0, 1, 1], [], []>} : vector<16x8xf32>, vector<8x64xf32>, vector<16x64xf32> -> vector<16x64xf32>
    %51 = arith.addf %46, %50 : vector<16x64xf32>
    %52 = vector.extract_strided_slice %4 {offsets = [24, 0], sizes = [8, 64], strides = [1, 1]} : vector<32x64xf32> to vector<8x64xf32>
    %cst_27 = arith.constant 0.000000e+00 : f32
    %53 = vector.broadcast %cst_27 : f32 to vector<8x1xf32>
    %54 = vector.extract_strided_slice %52 {offsets = [0, 0], sizes = [8, 63], strides = [1, 1]} : vector<8x64xf32> to vector<8x63xf32>
    %55 = tpu.concatenate %53, %54 in 1 : vector<8x1xf32>, vector<8x63xf32> -> vector<8x64xf32>
    %56 = vector.broadcast %1 : vector<1x64xf32> to vector<8x64xf32>
    %57 = arith.mulf %55, %56 : vector<8x64xf32>
    %c6 = arith.constant 6 : index
    %c0_28 = arith.constant 0 : index
    %c0_29 = arith.constant 0 : index
    %58 = vector.load %arg2[%c6, %c0_28, %c0_29] : memref<9x16x8xf32, #tpu.memory_space<vmem>>, vector<1x16x8xf32>
    %59 = vector.shape_cast %58 : vector<1x16x8xf32> to vector<16x8xf32>
    %cst_30 = arith.constant dense<0.000000e+00> : vector<16x64xf32>
    %60 = tpu.matmul %59, %57, %cst_30 {dimension_numbers = #tpu.dot_dimension_numbers<[1], [0], [0], [1], [0, 0, 1, 1], [], []>} : vector<16x8xf32>, vector<8x64xf32>, vector<16x64xf32> -> vector<16x64xf32>
    %61 = arith.addf %51, %60 : vector<16x64xf32>
    %62 = vector.extract_strided_slice %4 {offsets = [16, 0], sizes = [8, 64], strides = [1, 1]} : vector<32x64xf32> to vector<8x64xf32>
    %c7 = arith.constant 7 : index
    %c0_31 = arith.constant 0 : index
    %c0_32 = arith.constant 0 : index
    %63 = vector.load %arg2[%c7, %c0_31, %c0_32] : memref<9x16x8xf32, #tpu.memory_space<vmem>>, vector<1x16x8xf32>
    %64 = vector.shape_cast %63 : vector<1x16x8xf32> to vector<16x8xf32>
    %cst_33 = arith.constant dense<0.000000e+00> : vector<16x64xf32>
    %65 = tpu.matmul %64, %62, %cst_33 {dimension_numbers = #tpu.dot_dimension_numbers<[1], [0], [0], [1], [0, 0, 1, 1], [], []>} : vector<16x8xf32>, vector<8x64xf32>, vector<16x64xf32> -> vector<16x64xf32>
    %66 = arith.addf %61, %65 : vector<16x64xf32>
    %67 = vector.extract_strided_slice %4 {offsets = [24, 0], sizes = [8, 64], strides = [1, 1]} : vector<32x64xf32> to vector<8x64xf32>
    %c8 = arith.constant 8 : index
    %c0_34 = arith.constant 0 : index
    %c0_35 = arith.constant 0 : index
    %68 = vector.load %arg2[%c8, %c0_34, %c0_35] : memref<9x16x8xf32, #tpu.memory_space<vmem>>, vector<1x16x8xf32>
    %69 = vector.shape_cast %68 : vector<1x16x8xf32> to vector<16x8xf32>
    %cst_36 = arith.constant dense<0.000000e+00> : vector<16x64xf32>
    %70 = tpu.matmul %69, %67, %cst_36 {dimension_numbers = #tpu.dot_dimension_numbers<[1], [0], [0], [1], [0, 0, 1, 1], [], []>} : vector<16x8xf32>, vector<8x64xf32>, vector<16x64xf32> -> vector<16x64xf32>
    %71 = arith.addf %66, %70 : vector<16x64xf32>
    %c0_37 = arith.constant 0 : index
    %c0_38 = arith.constant 0 : index
    %72 = vector.load %arg3[%c0_37, %c0_38] : memref<16x1xf32, #tpu.memory_space<vmem>>, vector<16x1xf32>
    %73 = vector.broadcast %72 : vector<16x1xf32> to vector<16x64xf32>
    %74 = arith.addf %71, %73 : vector<16x64xf32>
    %cst_39 = arith.constant 0.000000e+00 : f32
    %75 = vector.broadcast %cst_39 : f32 to vector<16x64xf32>
    %76 = arith.maximumf %74, %75 : vector<16x64xf32>
    %cst_40 = arith.constant 0.000000e+00 : f32
    %77 = vector.broadcast %cst_40 : f32 to vector<16x9xf32>
    %78 = tpu.concatenate %77, %76, %77 in 1 : vector<16x9xf32>, vector<16x64xf32>, vector<16x9xf32> -> vector<16x82xf32>
    %cst_41 = arith.constant 0.000000e+00 : f32
    %79 = vector.broadcast %cst_41 : f32 to vector<16x64xf32>
    %80 = vector.extract_strided_slice %78 {offsets = [0, 0], sizes = [16, 64], strides = [1, 1]} : vector<16x82xf32> to vector<16x64xf32>
    %81 = vector.broadcast %1 : vector<1x64xf32> to vector<16x64xf32>
    %82 = arith.mulf %80, %81 : vector<16x64xf32>
    %c0_42 = arith.constant 0 : index
    %c0_43 = arith.constant 0 : index
    %c0_44 = arith.constant 0 : index
    %83 = vector.load %arg4[%c0_42, %c0_43, %c0_44] : memref<9x16x16xf32, #tpu.memory_space<vmem>>, vector<1x16x16xf32>
    %84 = vector.shape_cast %83 : vector<1x16x16xf32> to vector<16x16xf32>
    %cst_45 = arith.constant dense<0.000000e+00> : vector<16x64xf32>
    %85 = tpu.matmul %84, %82, %cst_45 {dimension_numbers = #tpu.dot_dimension_numbers<[1], [0], [0], [1], [0, 0, 1, 1], [], []>} : vector<16x16xf32>, vector<16x64xf32>, vector<16x64xf32> -> vector<16x64xf32>
    %86 = arith.addf %79, %85 : vector<16x64xf32>
    %87 = vector.extract_strided_slice %78 {offsets = [0, 1], sizes = [16, 64], strides = [1, 1]} : vector<16x82xf32> to vector<16x64xf32>
    %c1_46 = arith.constant 1 : index
    %c0_47 = arith.constant 0 : index
    %c0_48 = arith.constant 0 : index
    %88 = vector.load %arg4[%c1_46, %c0_47, %c0_48] : memref<9x16x16xf32, #tpu.memory_space<vmem>>, vector<1x16x16xf32>
    %89 = vector.shape_cast %88 : vector<1x16x16xf32> to vector<16x16xf32>
    %cst_49 = arith.constant dense<0.000000e+00> : vector<16x64xf32>
    %90 = tpu.matmul %89, %87, %cst_49 {dimension_numbers = #tpu.dot_dimension_numbers<[1], [0], [0], [1], [0, 0, 1, 1], [], []>} : vector<16x16xf32>, vector<16x64xf32>, vector<16x64xf32> -> vector<16x64xf32>
    %91 = arith.addf %86, %90 : vector<16x64xf32>
    %92 = vector.extract_strided_slice %78 {offsets = [0, 2], sizes = [16, 64], strides = [1, 1]} : vector<16x82xf32> to vector<16x64xf32>
    %93 = vector.broadcast %2 : vector<1x64xf32> to vector<16x64xf32>
    %94 = arith.mulf %92, %93 : vector<16x64xf32>
    %c2_50 = arith.constant 2 : index
    %c0_51 = arith.constant 0 : index
    %c0_52 = arith.constant 0 : index
    %95 = vector.load %arg4[%c2_50, %c0_51, %c0_52] : memref<9x16x16xf32, #tpu.memory_space<vmem>>, vector<1x16x16xf32>
    %96 = vector.shape_cast %95 : vector<1x16x16xf32> to vector<16x16xf32>
    %cst_53 = arith.constant dense<0.000000e+00> : vector<16x64xf32>
    %97 = tpu.matmul %96, %94, %cst_53 {dimension_numbers = #tpu.dot_dimension_numbers<[1], [0], [0], [1], [0, 0, 1, 1], [], []>} : vector<16x16xf32>, vector<16x64xf32>, vector<16x64xf32> -> vector<16x64xf32>
    %98 = arith.addf %91, %97 : vector<16x64xf32>
    %99 = vector.extract_strided_slice %78 {offsets = [0, 8], sizes = [16, 64], strides = [1, 1]} : vector<16x82xf32> to vector<16x64xf32>
    %100 = vector.broadcast %1 : vector<1x64xf32> to vector<16x64xf32>
    %101 = arith.mulf %99, %100 : vector<16x64xf32>
    %c3_54 = arith.constant 3 : index
    %c0_55 = arith.constant 0 : index
    %c0_56 = arith.constant 0 : index
    %102 = vector.load %arg4[%c3_54, %c0_55, %c0_56] : memref<9x16x16xf32, #tpu.memory_space<vmem>>, vector<1x16x16xf32>
    %103 = vector.shape_cast %102 : vector<1x16x16xf32> to vector<16x16xf32>
    %cst_57 = arith.constant dense<0.000000e+00> : vector<16x64xf32>
    %104 = tpu.matmul %103, %101, %cst_57 {dimension_numbers = #tpu.dot_dimension_numbers<[1], [0], [0], [1], [0, 0, 1, 1], [], []>} : vector<16x16xf32>, vector<16x64xf32>, vector<16x64xf32> -> vector<16x64xf32>
    %105 = arith.addf %98, %104 : vector<16x64xf32>
    %106 = vector.extract_strided_slice %78 {offsets = [0, 9], sizes = [16, 64], strides = [1, 1]} : vector<16x82xf32> to vector<16x64xf32>
    %c4_58 = arith.constant 4 : index
    %c0_59 = arith.constant 0 : index
    %c0_60 = arith.constant 0 : index
    %107 = vector.load %arg4[%c4_58, %c0_59, %c0_60] : memref<9x16x16xf32, #tpu.memory_space<vmem>>, vector<1x16x16xf32>
    %108 = vector.shape_cast %107 : vector<1x16x16xf32> to vector<16x16xf32>
    %cst_61 = arith.constant dense<0.000000e+00> : vector<16x64xf32>
    %109 = tpu.matmul %108, %106, %cst_61 {dimension_numbers = #tpu.dot_dimension_numbers<[1], [0], [0], [1], [0, 0, 1, 1], [], []>} : vector<16x16xf32>, vector<16x64xf32>, vector<16x64xf32> -> vector<16x64xf32>
    %110 = arith.addf %105, %109 : vector<16x64xf32>
    %111 = vector.extract_strided_slice %78 {offsets = [0, 10], sizes = [16, 64], strides = [1, 1]} : vector<16x82xf32> to vector<16x64xf32>
    %112 = vector.broadcast %2 : vector<1x64xf32> to vector<16x64xf32>
    %113 = arith.mulf %111, %112 : vector<16x64xf32>
    %c5_62 = arith.constant 5 : index
    %c0_63 = arith.constant 0 : index
    %c0_64 = arith.constant 0 : index
    %114 = vector.load %arg4[%c5_62, %c0_63, %c0_64] : memref<9x16x16xf32, #tpu.memory_space<vmem>>, vector<1x16x16xf32>
    %115 = vector.shape_cast %114 : vector<1x16x16xf32> to vector<16x16xf32>
    %cst_65 = arith.constant dense<0.000000e+00> : vector<16x64xf32>
    %116 = tpu.matmul %115, %113, %cst_65 {dimension_numbers = #tpu.dot_dimension_numbers<[1], [0], [0], [1], [0, 0, 1, 1], [], []>} : vector<16x16xf32>, vector<16x64xf32>, vector<16x64xf32> -> vector<16x64xf32>
    %117 = arith.addf %110, %116 : vector<16x64xf32>
    %118 = vector.extract_strided_slice %78 {offsets = [0, 16], sizes = [16, 64], strides = [1, 1]} : vector<16x82xf32> to vector<16x64xf32>
    %119 = vector.broadcast %1 : vector<1x64xf32> to vector<16x64xf32>
    %120 = arith.mulf %118, %119 : vector<16x64xf32>
    %c6_66 = arith.constant 6 : index
    %c0_67 = arith.constant 0 : index
    %c0_68 = arith.constant 0 : index
    %121 = vector.load %arg4[%c6_66, %c0_67, %c0_68] : memref<9x16x16xf32, #tpu.memory_space<vmem>>, vector<1x16x16xf32>
    %122 = vector.shape_cast %121 : vector<1x16x16xf32> to vector<16x16xf32>
    %cst_69 = arith.constant dense<0.000000e+00> : vector<16x64xf32>
    %123 = tpu.matmul %122, %120, %cst_69 {dimension_numbers = #tpu.dot_dimension_numbers<[1], [0], [0], [1], [0, 0, 1, 1], [], []>} : vector<16x16xf32>, vector<16x64xf32>, vector<16x64xf32> -> vector<16x64xf32>
    %124 = arith.addf %117, %123 : vector<16x64xf32>
    %125 = vector.extract_strided_slice %78 {offsets = [0, 17], sizes = [16, 64], strides = [1, 1]} : vector<16x82xf32> to vector<16x64xf32>
    %c7_70 = arith.constant 7 : index
    %c0_71 = arith.constant 0 : index
    %c0_72 = arith.constant 0 : index
    %126 = vector.load %arg4[%c7_70, %c0_71, %c0_72] : memref<9x16x16xf32, #tpu.memory_space<vmem>>, vector<1x16x16xf32>
    %127 = vector.shape_cast %126 : vector<1x16x16xf32> to vector<16x16xf32>
    %cst_73 = arith.constant dense<0.000000e+00> : vector<16x64xf32>
    %128 = tpu.matmul %127, %125, %cst_73 {dimension_numbers = #tpu.dot_dimension_numbers<[1], [0], [0], [1], [0, 0, 1, 1], [], []>} : vector<16x16xf32>, vector<16x64xf32>, vector<16x64xf32> -> vector<16x64xf32>
    %129 = arith.addf %124, %128 : vector<16x64xf32>
    %130 = vector.extract_strided_slice %78 {offsets = [0, 18], sizes = [16, 64], strides = [1, 1]} : vector<16x82xf32> to vector<16x64xf32>
    %131 = vector.broadcast %2 : vector<1x64xf32> to vector<16x64xf32>
    %132 = arith.mulf %130, %131 : vector<16x64xf32>
    %c8_74 = arith.constant 8 : index
    %c0_75 = arith.constant 0 : index
    %c0_76 = arith.constant 0 : index
    %133 = vector.load %arg4[%c8_74, %c0_75, %c0_76] : memref<9x16x16xf32, #tpu.memory_space<vmem>>, vector<1x16x16xf32>
    %134 = vector.shape_cast %133 : vector<1x16x16xf32> to vector<16x16xf32>
    %cst_77 = arith.constant dense<0.000000e+00> : vector<16x64xf32>
    %135 = tpu.matmul %134, %132, %cst_77 {dimension_numbers = #tpu.dot_dimension_numbers<[1], [0], [0], [1], [0, 0, 1, 1], [], []>} : vector<16x16xf32>, vector<16x64xf32>, vector<16x64xf32> -> vector<16x64xf32>
    %136 = arith.addf %129, %135 : vector<16x64xf32>
    %c0_78 = arith.constant 0 : index
    %c0_79 = arith.constant 0 : index
    %137 = vector.load %arg5[%c0_78, %c0_79] : memref<16x1xf32, #tpu.memory_space<vmem>>, vector<16x1xf32>
    %138 = vector.broadcast %137 : vector<16x1xf32> to vector<16x64xf32>
    %139 = arith.addf %136, %138 : vector<16x64xf32>
    %cst_80 = arith.constant 0.000000e+00 : f32
    %140 = vector.broadcast %cst_80 : f32 to vector<16x64xf32>
    %141 = arith.maximumf %139, %140 : vector<16x64xf32>
    %cst_81 = arith.constant 0.000000e+00 : f32
    %142 = vector.broadcast %cst_81 : f32 to vector<16x9xf32>
    %143 = tpu.concatenate %142, %141, %142 in 1 : vector<16x9xf32>, vector<16x64xf32>, vector<16x9xf32> -> vector<16x82xf32>
    %cst_82 = arith.constant 0.000000e+00 : f32
    %144 = vector.broadcast %cst_82 : f32 to vector<16x64xf32>
    %145 = vector.extract_strided_slice %143 {offsets = [0, 0], sizes = [16, 64], strides = [1, 1]} : vector<16x82xf32> to vector<16x64xf32>
    %146 = vector.broadcast %1 : vector<1x64xf32> to vector<16x64xf32>
    %147 = arith.mulf %145, %146 : vector<16x64xf32>
    %c0_83 = arith.constant 0 : index
    %c0_84 = arith.constant 0 : index
    %c0_85 = arith.constant 0 : index
    %148 = vector.load %arg6[%c0_83, %c0_84, %c0_85] : memref<9x16x16xf32, #tpu.memory_space<vmem>>, vector<1x16x16xf32>
    %149 = vector.shape_cast %148 : vector<1x16x16xf32> to vector<16x16xf32>
    %cst_86 = arith.constant dense<0.000000e+00> : vector<16x64xf32>
    %150 = tpu.matmul %149, %147, %cst_86 {dimension_numbers = #tpu.dot_dimension_numbers<[1], [0], [0], [1], [0, 0, 1, 1], [], []>} : vector<16x16xf32>, vector<16x64xf32>, vector<16x64xf32> -> vector<16x64xf32>
    %151 = arith.addf %144, %150 : vector<16x64xf32>
    %152 = vector.extract_strided_slice %143 {offsets = [0, 1], sizes = [16, 64], strides = [1, 1]} : vector<16x82xf32> to vector<16x64xf32>
    %c1_87 = arith.constant 1 : index
    %c0_88 = arith.constant 0 : index
    %c0_89 = arith.constant 0 : index
    %153 = vector.load %arg6[%c1_87, %c0_88, %c0_89] : memref<9x16x16xf32, #tpu.memory_space<vmem>>, vector<1x16x16xf32>
    %154 = vector.shape_cast %153 : vector<1x16x16xf32> to vector<16x16xf32>
    %cst_90 = arith.constant dense<0.000000e+00> : vector<16x64xf32>
    %155 = tpu.matmul %154, %152, %cst_90 {dimension_numbers = #tpu.dot_dimension_numbers<[1], [0], [0], [1], [0, 0, 1, 1], [], []>} : vector<16x16xf32>, vector<16x64xf32>, vector<16x64xf32> -> vector<16x64xf32>
    %156 = arith.addf %151, %155 : vector<16x64xf32>
    %157 = vector.extract_strided_slice %143 {offsets = [0, 2], sizes = [16, 64], strides = [1, 1]} : vector<16x82xf32> to vector<16x64xf32>
    %158 = vector.broadcast %2 : vector<1x64xf32> to vector<16x64xf32>
    %159 = arith.mulf %157, %158 : vector<16x64xf32>
    %c2_91 = arith.constant 2 : index
    %c0_92 = arith.constant 0 : index
    %c0_93 = arith.constant 0 : index
    %160 = vector.load %arg6[%c2_91, %c0_92, %c0_93] : memref<9x16x16xf32, #tpu.memory_space<vmem>>, vector<1x16x16xf32>
    %161 = vector.shape_cast %160 : vector<1x16x16xf32> to vector<16x16xf32>
    %cst_94 = arith.constant dense<0.000000e+00> : vector<16x64xf32>
    %162 = tpu.matmul %161, %159, %cst_94 {dimension_numbers = #tpu.dot_dimension_numbers<[1], [0], [0], [1], [0, 0, 1, 1], [], []>} : vector<16x16xf32>, vector<16x64xf32>, vector<16x64xf32> -> vector<16x64xf32>
    %163 = arith.addf %156, %162 : vector<16x64xf32>
    %164 = vector.extract_strided_slice %143 {offsets = [0, 8], sizes = [16, 64], strides = [1, 1]} : vector<16x82xf32> to vector<16x64xf32>
    %165 = vector.broadcast %1 : vector<1x64xf32> to vector<16x64xf32>
    %166 = arith.mulf %164, %165 : vector<16x64xf32>
    %c3_95 = arith.constant 3 : index
    %c0_96 = arith.constant 0 : index
    %c0_97 = arith.constant 0 : index
    %167 = vector.load %arg6[%c3_95, %c0_96, %c0_97] : memref<9x16x16xf32, #tpu.memory_space<vmem>>, vector<1x16x16xf32>
    %168 = vector.shape_cast %167 : vector<1x16x16xf32> to vector<16x16xf32>
    %cst_98 = arith.constant dense<0.000000e+00> : vector<16x64xf32>
    %169 = tpu.matmul %168, %166, %cst_98 {dimension_numbers = #tpu.dot_dimension_numbers<[1], [0], [0], [1], [0, 0, 1, 1], [], []>} : vector<16x16xf32>, vector<16x64xf32>, vector<16x64xf32> -> vector<16x64xf32>
    %170 = arith.addf %163, %169 : vector<16x64xf32>
    %171 = vector.extract_strided_slice %143 {offsets = [0, 9], sizes = [16, 64], strides = [1, 1]} : vector<16x82xf32> to vector<16x64xf32>
    %c4_99 = arith.constant 4 : index
    %c0_100 = arith.constant 0 : index
    %c0_101 = arith.constant 0 : index
    %172 = vector.load %arg6[%c4_99, %c0_100, %c0_101] : memref<9x16x16xf32, #tpu.memory_space<vmem>>, vector<1x16x16xf32>
    %173 = vector.shape_cast %172 : vector<1x16x16xf32> to vector<16x16xf32>
    %cst_102 = arith.constant dense<0.000000e+00> : vector<16x64xf32>
    %174 = tpu.matmul %173, %171, %cst_102 {dimension_numbers = #tpu.dot_dimension_numbers<[1], [0], [0], [1], [0, 0, 1, 1], [], []>} : vector<16x16xf32>, vector<16x64xf32>, vector<16x64xf32> -> vector<16x64xf32>
    %175 = arith.addf %170, %174 : vector<16x64xf32>
    %176 = vector.extract_strided_slice %143 {offsets = [0, 10], sizes = [16, 64], strides = [1, 1]} : vector<16x82xf32> to vector<16x64xf32>
    %177 = vector.broadcast %2 : vector<1x64xf32> to vector<16x64xf32>
    %178 = arith.mulf %176, %177 : vector<16x64xf32>
    %c5_103 = arith.constant 5 : index
    %c0_104 = arith.constant 0 : index
    %c0_105 = arith.constant 0 : index
    %179 = vector.load %arg6[%c5_103, %c0_104, %c0_105] : memref<9x16x16xf32, #tpu.memory_space<vmem>>, vector<1x16x16xf32>
    %180 = vector.shape_cast %179 : vector<1x16x16xf32> to vector<16x16xf32>
    %cst_106 = arith.constant dense<0.000000e+00> : vector<16x64xf32>
    %181 = tpu.matmul %180, %178, %cst_106 {dimension_numbers = #tpu.dot_dimension_numbers<[1], [0], [0], [1], [0, 0, 1, 1], [], []>} : vector<16x16xf32>, vector<16x64xf32>, vector<16x64xf32> -> vector<16x64xf32>
    %182 = arith.addf %175, %181 : vector<16x64xf32>
    %183 = vector.extract_strided_slice %143 {offsets = [0, 16], sizes = [16, 64], strides = [1, 1]} : vector<16x82xf32> to vector<16x64xf32>
    %184 = vector.broadcast %1 : vector<1x64xf32> to vector<16x64xf32>
    %185 = arith.mulf %183, %184 : vector<16x64xf32>
    %c6_107 = arith.constant 6 : index
    %c0_108 = arith.constant 0 : index
    %c0_109 = arith.constant 0 : index
    %186 = vector.load %arg6[%c6_107, %c0_108, %c0_109] : memref<9x16x16xf32, #tpu.memory_space<vmem>>, vector<1x16x16xf32>
    %187 = vector.shape_cast %186 : vector<1x16x16xf32> to vector<16x16xf32>
    %cst_110 = arith.constant dense<0.000000e+00> : vector<16x64xf32>
    %188 = tpu.matmul %187, %185, %cst_110 {dimension_numbers = #tpu.dot_dimension_numbers<[1], [0], [0], [1], [0, 0, 1, 1], [], []>} : vector<16x16xf32>, vector<16x64xf32>, vector<16x64xf32> -> vector<16x64xf32>
    %189 = arith.addf %182, %188 : vector<16x64xf32>
    %190 = vector.extract_strided_slice %143 {offsets = [0, 17], sizes = [16, 64], strides = [1, 1]} : vector<16x82xf32> to vector<16x64xf32>
    %c7_111 = arith.constant 7 : index
    %c0_112 = arith.constant 0 : index
    %c0_113 = arith.constant 0 : index
    %191 = vector.load %arg6[%c7_111, %c0_112, %c0_113] : memref<9x16x16xf32, #tpu.memory_space<vmem>>, vector<1x16x16xf32>
    %192 = vector.shape_cast %191 : vector<1x16x16xf32> to vector<16x16xf32>
    %cst_114 = arith.constant dense<0.000000e+00> : vector<16x64xf32>
    %193 = tpu.matmul %192, %190, %cst_114 {dimension_numbers = #tpu.dot_dimension_numbers<[1], [0], [0], [1], [0, 0, 1, 1], [], []>} : vector<16x16xf32>, vector<16x64xf32>, vector<16x64xf32> -> vector<16x64xf32>
    %194 = arith.addf %189, %193 : vector<16x64xf32>
    %195 = vector.extract_strided_slice %143 {offsets = [0, 18], sizes = [16, 64], strides = [1, 1]} : vector<16x82xf32> to vector<16x64xf32>
    %196 = vector.broadcast %2 : vector<1x64xf32> to vector<16x64xf32>
    %197 = arith.mulf %195, %196 : vector<16x64xf32>
    %c8_115 = arith.constant 8 : index
    %c0_116 = arith.constant 0 : index
    %c0_117 = arith.constant 0 : index
    %198 = vector.load %arg6[%c8_115, %c0_116, %c0_117] : memref<9x16x16xf32, #tpu.memory_space<vmem>>, vector<1x16x16xf32>
    %199 = vector.shape_cast %198 : vector<1x16x16xf32> to vector<16x16xf32>
    %cst_118 = arith.constant dense<0.000000e+00> : vector<16x64xf32>
    %200 = tpu.matmul %199, %197, %cst_118 {dimension_numbers = #tpu.dot_dimension_numbers<[1], [0], [0], [1], [0, 0, 1, 1], [], []>} : vector<16x16xf32>, vector<16x64xf32>, vector<16x64xf32> -> vector<16x64xf32>
    %201 = arith.addf %194, %200 : vector<16x64xf32>
    %c0_119 = arith.constant 0 : index
    %c0_120 = arith.constant 0 : index
    %202 = vector.load %arg7[%c0_119, %c0_120] : memref<16x1xf32, #tpu.memory_space<vmem>>, vector<16x1xf32>
    %203 = vector.broadcast %202 : vector<16x1xf32> to vector<16x64xf32>
    %204 = arith.addf %201, %203 : vector<16x64xf32>
    %205 = arith.addf %204, %76 : vector<16x64xf32>
    %cst_121 = arith.constant 0.000000e+00 : f32
    %206 = vector.broadcast %cst_121 : f32 to vector<16x64xf32>
    %207 = arith.maximumf %205, %206 : vector<16x64xf32>
    %c0_122 = arith.constant 0 : index
    %c0_123 = arith.constant 0 : index
    %c0_124 = arith.constant 0 : index
    %208 = vector.load %arg9[%c0_122, %c0_123, %c0_124] : memref<1x16x64xf32, #tpu.memory_space<vmem>>, vector<1x16x64xf32>
    %209 = vector.shape_cast %208 : vector<1x16x64xf32> to vector<16x64xf32>
    %210 = vector.shape_cast %207 : vector<16x64xf32> to vector<1x16x64xf32>
    tpu.vector_store %arg9[%c0_122, %c0_123, %c0_124], %210 {strides = array<i32>} : memref<1x16x64xf32, #tpu.memory_space<vmem>>, vector<1x16x64xf32>,
    return
  }
  func.func @transform_0(%arg0: i32) -> (i32, i32, i32) {
    %c0_i32 = arith.constant 0 : i32
    %c0_i32_0 = arith.constant 0 : i32
    %c0_i32_1 = arith.constant 0 : i32
    return %arg0, %c0_i32, %c0_i32_0 : i32, i32, i32
  }
  func.func @transform_1(%arg0: i32) -> (i32, i32, i32) {
    %c0_i32 = arith.constant 0 : i32
    %c0_i32_0 = arith.constant 0 : i32
    %c0_i32_1 = arith.constant 0 : i32
    %c0_i32_2 = arith.constant 0 : i32
    return %c0_i32, %c0_i32_0, %c0_i32_1 : i32, i32, i32
  }
  func.func @transform_2(%arg0: i32) -> (i32, i32) {
    %c0_i32 = arith.constant 0 : i32
    %c0_i32_0 = arith.constant 0 : i32
    %c0_i32_1 = arith.constant 0 : i32
    return %c0_i32, %c0_i32_0 : i32, i32
  }
  func.func @transform_3(%arg0: i32) -> (i32, i32, i32) {
    %c0_i32 = arith.constant 0 : i32
    %c0_i32_0 = arith.constant 0 : i32
    %c0_i32_1 = arith.constant 0 : i32
    %c0_i32_2 = arith.constant 0 : i32
    return %c0_i32, %c0_i32_0, %c0_i32_1 : i32, i32, i32
  }
  func.func @transform_4(%arg0: i32) -> (i32, i32) {
    %c0_i32 = arith.constant 0 : i32
    %c0_i32_0 = arith.constant 0 : i32
    %c0_i32_1 = arith.constant 0 : i32
    return %c0_i32, %c0_i32_0 : i32, i32
  }
  func.func @transform_5(%arg0: i32) -> (i32, i32, i32) {
    %c0_i32 = arith.constant 0 : i32
    %c0_i32_0 = arith.constant 0 : i32
    %c0_i32_1 = arith.constant 0 : i32
    %c0_i32_2 = arith.constant 0 : i32
    return %c0_i32, %c0_i32_0, %c0_i32_1 : i32, i32, i32
  }
  func.func @transform_6(%arg0: i32) -> (i32, i32) {
    %c0_i32 = arith.constant 0 : i32
    %c0_i32_0 = arith.constant 0 : i32
    %c0_i32_1 = arith.constant 0 : i32
    return %c0_i32, %c0_i32_0 : i32, i32
  }
  func.func @transform_7(%arg0: i32) -> (i32, i32) {
    %c0_i32 = arith.constant 0 : i32
    %c0_i32_0 = arith.constant 0 : i32
    %c0_i32_1 = arith.constant 0 : i32
    return %c0_i32, %c0_i32_0 : i32, i32
  }
  func.func @transform_8(%arg0: i32) -> (i32, i32, i32) {
    %c0_i32 = arith.constant 0 : i32
    %c0_i32_0 = arith.constant 0 : i32
    %c0_i32_1 = arith.constant 0 : i32
    return %arg0, %c0_i32, %c0_i32_0 : i32, i32, i32
  }
}

module attributes {stable_mosaic.version = 11 : i64} {
  func.func @_stage_kernel(%arg0: i32, %arg1: memref<1x64x16xf32, #tpu.memory_space<vmem>>, %arg2: memref<9x32x16xf32, #tpu.memory_space<vmem>>, %arg3: memref<32x1xf32, #tpu.memory_space<vmem>>, %arg4: memref<9x32x32xf32, #tpu.memory_space<vmem>>, %arg5: memref<32x1xf32, #tpu.memory_space<vmem>>, %arg6: memref<9x32x32xf32, #tpu.memory_space<vmem>>, %arg7: memref<32x1xf32, #tpu.memory_space<vmem>>, %arg8: memref<2x16xf32, #tpu.memory_space<vmem>>, %arg9: memref<1x32x16xf32, #tpu.memory_space<vmem>>) attributes {dimension_semantics = [#tpu.dimension_semantics<parallel>], iteration_bounds = array<i64: 2>, scalar_prefetch = 0 : i64, scratch_operands = 0 : i64, tpu.core_type = #tpu.core_type<tc>, window_params = [{transform_indices = @transform_0, window_bounds = array<i64: 1, 64, 16>}, {pipeline_mode = #tpu.pipeline_mode<synchronous>, transform_indices = @transform_1, window_bounds = array<i64: 9, 32, 16>}, {pipeline_mode = #tpu.pipeline_mode<synchronous>, transform_indices = @transform_2, window_bounds = array<i64: 32, 1>}, {pipeline_mode = #tpu.pipeline_mode<synchronous>, transform_indices = @transform_3, window_bounds = array<i64: 9, 32, 32>}, {pipeline_mode = #tpu.pipeline_mode<synchronous>, transform_indices = @transform_4, window_bounds = array<i64: 32, 1>}, {pipeline_mode = #tpu.pipeline_mode<synchronous>, transform_indices = @transform_5, window_bounds = array<i64: 9, 32, 32>}, {pipeline_mode = #tpu.pipeline_mode<synchronous>, transform_indices = @transform_6, window_bounds = array<i64: 32, 1>}, {pipeline_mode = #tpu.pipeline_mode<synchronous>, transform_indices = @transform_7, window_bounds = array<i64: 2, 16>}, {transform_indices = @transform_8, window_bounds = array<i64: 1, 32, 16>}]} {
    %c0 = arith.constant 0 : index
    %c0_0 = arith.constant 0 : index
    %0 = vector.load %arg8[%c0, %c0_0] : memref<2x16xf32, #tpu.memory_space<vmem>>, vector<2x16xf32>
    %1 = vector.extract_strided_slice %0 {offsets = [0, 0], sizes = [1, 16], strides = [1, 1]} : vector<2x16xf32> to vector<1x16xf32>
    %2 = vector.extract_strided_slice %0 {offsets = [1, 0], sizes = [1, 16], strides = [1, 1]} : vector<2x16xf32> to vector<1x16xf32>
    %c0_1 = arith.constant 0 : index
    %c0_2 = arith.constant 0 : index
    %c0_3 = arith.constant 0 : index
    %3 = vector.load %arg1[%c0_1, %c0_2, %c0_3] : memref<1x64x16xf32, #tpu.memory_space<vmem>>, vector<1x64x16xf32>
    %4 = vector.shape_cast %3 : vector<1x64x16xf32> to vector<64x16xf32>
    %cst = arith.constant 0.000000e+00 : f32
    %5 = vector.broadcast %cst : f32 to vector<32x16xf32>
    %6 = vector.extract_strided_slice %4 {offsets = [48, 0], sizes = [16, 16], strides = [1, 1]} : vector<64x16xf32> to vector<16x16xf32>
    %cst_4 = arith.constant 0.000000e+00 : f32
    %7 = vector.broadcast %cst_4 : f32 to vector<16x5xf32>
    %8 = vector.extract_strided_slice %6 {offsets = [0, 0], sizes = [16, 11], strides = [1, 1]} : vector<16x16xf32> to vector<16x11xf32>
    %9 = tpu.concatenate %7, %8 in 1 : vector<16x5xf32>, vector<16x11xf32> -> vector<16x16xf32>
    %10 = vector.broadcast %1 : vector<1x16xf32> to vector<16x16xf32>
    %11 = arith.mulf %9, %10 : vector<16x16xf32>
    %c0_5 = arith.constant 0 : index
    %c0_6 = arith.constant 0 : index
    %c0_7 = arith.constant 0 : index
    %12 = vector.load %arg2[%c0_5, %c0_6, %c0_7] : memref<9x32x16xf32, #tpu.memory_space<vmem>>, vector<1x32x16xf32>
    %13 = vector.shape_cast %12 : vector<1x32x16xf32> to vector<32x16xf32>
    %cst_8 = arith.constant dense<0.000000e+00> : vector<32x16xf32>
    %14 = tpu.matmul %13, %11, %cst_8 {dimension_numbers = #tpu.dot_dimension_numbers<[1], [0], [0], [1], [0, 0, 1, 1], [], []>} : vector<32x16xf32>, vector<16x16xf32>, vector<32x16xf32> -> vector<32x16xf32>
    %15 = arith.addf %5, %14 : vector<32x16xf32>
    %16 = vector.extract_strided_slice %4 {offsets = [32, 0], sizes = [16, 16], strides = [1, 1]} : vector<64x16xf32> to vector<16x16xf32>
    %cst_9 = arith.constant 0.000000e+00 : f32
    %17 = vector.broadcast %cst_9 : f32 to vector<16x4xf32>
    %18 = vector.extract_strided_slice %16 {offsets = [0, 0], sizes = [16, 12], strides = [1, 1]} : vector<16x16xf32> to vector<16x12xf32>
    %19 = tpu.concatenate %17, %18 in 1 : vector<16x4xf32>, vector<16x12xf32> -> vector<16x16xf32>
    %c1 = arith.constant 1 : index
    %c0_10 = arith.constant 0 : index
    %c0_11 = arith.constant 0 : index
    %20 = vector.load %arg2[%c1, %c0_10, %c0_11] : memref<9x32x16xf32, #tpu.memory_space<vmem>>, vector<1x32x16xf32>
    %21 = vector.shape_cast %20 : vector<1x32x16xf32> to vector<32x16xf32>
    %cst_12 = arith.constant dense<0.000000e+00> : vector<32x16xf32>
    %22 = tpu.matmul %21, %19, %cst_12 {dimension_numbers = #tpu.dot_dimension_numbers<[1], [0], [0], [1], [0, 0, 1, 1], [], []>} : vector<32x16xf32>, vector<16x16xf32>, vector<32x16xf32> -> vector<32x16xf32>
    %23 = arith.addf %15, %22 : vector<32x16xf32>
    %24 = vector.extract_strided_slice %4 {offsets = [48, 0], sizes = [16, 16], strides = [1, 1]} : vector<64x16xf32> to vector<16x16xf32>
    %cst_13 = arith.constant 0.000000e+00 : f32
    %25 = vector.broadcast %cst_13 : f32 to vector<16x4xf32>
    %26 = vector.extract_strided_slice %24 {offsets = [0, 0], sizes = [16, 12], strides = [1, 1]} : vector<16x16xf32> to vector<16x12xf32>
    %27 = tpu.concatenate %25, %26 in 1 : vector<16x4xf32>, vector<16x12xf32> -> vector<16x16xf32>
    %c2 = arith.constant 2 : index
    %c0_14 = arith.constant 0 : index
    %c0_15 = arith.constant 0 : index
    %28 = vector.load %arg2[%c2, %c0_14, %c0_15] : memref<9x32x16xf32, #tpu.memory_space<vmem>>, vector<1x32x16xf32>
    %29 = vector.shape_cast %28 : vector<1x32x16xf32> to vector<32x16xf32>
    %cst_16 = arith.constant dense<0.000000e+00> : vector<32x16xf32>
    %30 = tpu.matmul %29, %27, %cst_16 {dimension_numbers = #tpu.dot_dimension_numbers<[1], [0], [0], [1], [0, 0, 1, 1], [], []>} : vector<32x16xf32>, vector<16x16xf32>, vector<32x16xf32> -> vector<32x16xf32>
    %31 = arith.addf %23, %30 : vector<32x16xf32>
    %32 = vector.extract_strided_slice %4 {offsets = [16, 0], sizes = [16, 16], strides = [1, 1]} : vector<64x16xf32> to vector<16x16xf32>
    %cst_17 = arith.constant 0.000000e+00 : f32
    %33 = vector.broadcast %cst_17 : f32 to vector<16x1xf32>
    %34 = vector.extract_strided_slice %32 {offsets = [0, 0], sizes = [16, 15], strides = [1, 1]} : vector<16x16xf32> to vector<16x15xf32>
    %35 = tpu.concatenate %33, %34 in 1 : vector<16x1xf32>, vector<16x15xf32> -> vector<16x16xf32>
    %36 = vector.broadcast %1 : vector<1x16xf32> to vector<16x16xf32>
    %37 = arith.mulf %35, %36 : vector<16x16xf32>
    %c3 = arith.constant 3 : index
    %c0_18 = arith.constant 0 : index
    %c0_19 = arith.constant 0 : index
    %38 = vector.load %arg2[%c3, %c0_18, %c0_19] : memref<9x32x16xf32, #tpu.memory_space<vmem>>, vector<1x32x16xf32>
    %39 = vector.shape_cast %38 : vector<1x32x16xf32> to vector<32x16xf32>
    %cst_20 = arith.constant dense<0.000000e+00> : vector<32x16xf32>
    %40 = tpu.matmul %39, %37, %cst_20 {dimension_numbers = #tpu.dot_dimension_numbers<[1], [0], [0], [1], [0, 0, 1, 1], [], []>} : vector<32x16xf32>, vector<16x16xf32>, vector<32x16xf32> -> vector<32x16xf32>
    %41 = arith.addf %31, %40 : vector<32x16xf32>
    %42 = vector.extract_strided_slice %4 {offsets = [0, 0], sizes = [16, 16], strides = [1, 1]} : vector<64x16xf32> to vector<16x16xf32>
    %c4 = arith.constant 4 : index
    %c0_21 = arith.constant 0 : index
    %c0_22 = arith.constant 0 : index
    %43 = vector.load %arg2[%c4, %c0_21, %c0_22] : memref<9x32x16xf32, #tpu.memory_space<vmem>>, vector<1x32x16xf32>
    %44 = vector.shape_cast %43 : vector<1x32x16xf32> to vector<32x16xf32>
    %cst_23 = arith.constant dense<0.000000e+00> : vector<32x16xf32>
    %45 = tpu.matmul %44, %42, %cst_23 {dimension_numbers = #tpu.dot_dimension_numbers<[1], [0], [0], [1], [0, 0, 1, 1], [], []>} : vector<32x16xf32>, vector<16x16xf32>, vector<32x16xf32> -> vector<32x16xf32>
    %46 = arith.addf %41, %45 : vector<32x16xf32>
    %47 = vector.extract_strided_slice %4 {offsets = [16, 0], sizes = [16, 16], strides = [1, 1]} : vector<64x16xf32> to vector<16x16xf32>
    %c5 = arith.constant 5 : index
    %c0_24 = arith.constant 0 : index
    %c0_25 = arith.constant 0 : index
    %48 = vector.load %arg2[%c5, %c0_24, %c0_25] : memref<9x32x16xf32, #tpu.memory_space<vmem>>, vector<1x32x16xf32>
    %49 = vector.shape_cast %48 : vector<1x32x16xf32> to vector<32x16xf32>
    %cst_26 = arith.constant dense<0.000000e+00> : vector<32x16xf32>
    %50 = tpu.matmul %49, %47, %cst_26 {dimension_numbers = #tpu.dot_dimension_numbers<[1], [0], [0], [1], [0, 0, 1, 1], [], []>} : vector<32x16xf32>, vector<16x16xf32>, vector<32x16xf32> -> vector<32x16xf32>
    %51 = arith.addf %46, %50 : vector<32x16xf32>
    %52 = vector.extract_strided_slice %4 {offsets = [48, 0], sizes = [16, 16], strides = [1, 1]} : vector<64x16xf32> to vector<16x16xf32>
    %cst_27 = arith.constant 0.000000e+00 : f32
    %53 = vector.broadcast %cst_27 : f32 to vector<16x1xf32>
    %54 = vector.extract_strided_slice %52 {offsets = [0, 0], sizes = [16, 15], strides = [1, 1]} : vector<16x16xf32> to vector<16x15xf32>
    %55 = tpu.concatenate %53, %54 in 1 : vector<16x1xf32>, vector<16x15xf32> -> vector<16x16xf32>
    %56 = vector.broadcast %1 : vector<1x16xf32> to vector<16x16xf32>
    %57 = arith.mulf %55, %56 : vector<16x16xf32>
    %c6 = arith.constant 6 : index
    %c0_28 = arith.constant 0 : index
    %c0_29 = arith.constant 0 : index
    %58 = vector.load %arg2[%c6, %c0_28, %c0_29] : memref<9x32x16xf32, #tpu.memory_space<vmem>>, vector<1x32x16xf32>
    %59 = vector.shape_cast %58 : vector<1x32x16xf32> to vector<32x16xf32>
    %cst_30 = arith.constant dense<0.000000e+00> : vector<32x16xf32>
    %60 = tpu.matmul %59, %57, %cst_30 {dimension_numbers = #tpu.dot_dimension_numbers<[1], [0], [0], [1], [0, 0, 1, 1], [], []>} : vector<32x16xf32>, vector<16x16xf32>, vector<32x16xf32> -> vector<32x16xf32>
    %61 = arith.addf %51, %60 : vector<32x16xf32>
    %62 = vector.extract_strided_slice %4 {offsets = [32, 0], sizes = [16, 16], strides = [1, 1]} : vector<64x16xf32> to vector<16x16xf32>
    %c7 = arith.constant 7 : index
    %c0_31 = arith.constant 0 : index
    %c0_32 = arith.constant 0 : index
    %63 = vector.load %arg2[%c7, %c0_31, %c0_32] : memref<9x32x16xf32, #tpu.memory_space<vmem>>, vector<1x32x16xf32>
    %64 = vector.shape_cast %63 : vector<1x32x16xf32> to vector<32x16xf32>
    %cst_33 = arith.constant dense<0.000000e+00> : vector<32x16xf32>
    %65 = tpu.matmul %64, %62, %cst_33 {dimension_numbers = #tpu.dot_dimension_numbers<[1], [0], [0], [1], [0, 0, 1, 1], [], []>} : vector<32x16xf32>, vector<16x16xf32>, vector<32x16xf32> -> vector<32x16xf32>
    %66 = arith.addf %61, %65 : vector<32x16xf32>
    %67 = vector.extract_strided_slice %4 {offsets = [48, 0], sizes = [16, 16], strides = [1, 1]} : vector<64x16xf32> to vector<16x16xf32>
    %c8 = arith.constant 8 : index
    %c0_34 = arith.constant 0 : index
    %c0_35 = arith.constant 0 : index
    %68 = vector.load %arg2[%c8, %c0_34, %c0_35] : memref<9x32x16xf32, #tpu.memory_space<vmem>>, vector<1x32x16xf32>
    %69 = vector.shape_cast %68 : vector<1x32x16xf32> to vector<32x16xf32>
    %cst_36 = arith.constant dense<0.000000e+00> : vector<32x16xf32>
    %70 = tpu.matmul %69, %67, %cst_36 {dimension_numbers = #tpu.dot_dimension_numbers<[1], [0], [0], [1], [0, 0, 1, 1], [], []>} : vector<32x16xf32>, vector<16x16xf32>, vector<32x16xf32> -> vector<32x16xf32>
    %71 = arith.addf %66, %70 : vector<32x16xf32>
    %c0_37 = arith.constant 0 : index
    %c0_38 = arith.constant 0 : index
    %72 = vector.load %arg3[%c0_37, %c0_38] : memref<32x1xf32, #tpu.memory_space<vmem>>, vector<32x1xf32>
    %73 = vector.broadcast %72 : vector<32x1xf32> to vector<32x16xf32>
    %74 = arith.addf %71, %73 : vector<32x16xf32>
    %cst_39 = arith.constant 0.000000e+00 : f32
    %75 = vector.broadcast %cst_39 : f32 to vector<32x16xf32>
    %76 = arith.maximumf %74, %75 : vector<32x16xf32>
    %cst_40 = arith.constant 0.000000e+00 : f32
    %77 = vector.broadcast %cst_40 : f32 to vector<32x5xf32>
    %78 = tpu.concatenate %77, %76, %77 in 1 : vector<32x5xf32>, vector<32x16xf32>, vector<32x5xf32> -> vector<32x26xf32>
    %cst_41 = arith.constant 0.000000e+00 : f32
    %79 = vector.broadcast %cst_41 : f32 to vector<32x16xf32>
    %80 = vector.extract_strided_slice %78 {offsets = [0, 0], sizes = [32, 16], strides = [1, 1]} : vector<32x26xf32> to vector<32x16xf32>
    %81 = vector.broadcast %1 : vector<1x16xf32> to vector<32x16xf32>
    %82 = arith.mulf %80, %81 : vector<32x16xf32>
    %c0_42 = arith.constant 0 : index
    %c0_43 = arith.constant 0 : index
    %c0_44 = arith.constant 0 : index
    %83 = vector.load %arg4[%c0_42, %c0_43, %c0_44] : memref<9x32x32xf32, #tpu.memory_space<vmem>>, vector<1x32x32xf32>
    %84 = vector.shape_cast %83 : vector<1x32x32xf32> to vector<32x32xf32>
    %cst_45 = arith.constant dense<0.000000e+00> : vector<32x16xf32>
    %85 = tpu.matmul %84, %82, %cst_45 {dimension_numbers = #tpu.dot_dimension_numbers<[1], [0], [0], [1], [0, 0, 1, 1], [], []>} : vector<32x32xf32>, vector<32x16xf32>, vector<32x16xf32> -> vector<32x16xf32>
    %86 = arith.addf %79, %85 : vector<32x16xf32>
    %87 = vector.extract_strided_slice %78 {offsets = [0, 1], sizes = [32, 16], strides = [1, 1]} : vector<32x26xf32> to vector<32x16xf32>
    %c1_46 = arith.constant 1 : index
    %c0_47 = arith.constant 0 : index
    %c0_48 = arith.constant 0 : index
    %88 = vector.load %arg4[%c1_46, %c0_47, %c0_48] : memref<9x32x32xf32, #tpu.memory_space<vmem>>, vector<1x32x32xf32>
    %89 = vector.shape_cast %88 : vector<1x32x32xf32> to vector<32x32xf32>
    %cst_49 = arith.constant dense<0.000000e+00> : vector<32x16xf32>
    %90 = tpu.matmul %89, %87, %cst_49 {dimension_numbers = #tpu.dot_dimension_numbers<[1], [0], [0], [1], [0, 0, 1, 1], [], []>} : vector<32x32xf32>, vector<32x16xf32>, vector<32x16xf32> -> vector<32x16xf32>
    %91 = arith.addf %86, %90 : vector<32x16xf32>
    %92 = vector.extract_strided_slice %78 {offsets = [0, 2], sizes = [32, 16], strides = [1, 1]} : vector<32x26xf32> to vector<32x16xf32>
    %93 = vector.broadcast %2 : vector<1x16xf32> to vector<32x16xf32>
    %94 = arith.mulf %92, %93 : vector<32x16xf32>
    %c2_50 = arith.constant 2 : index
    %c0_51 = arith.constant 0 : index
    %c0_52 = arith.constant 0 : index
    %95 = vector.load %arg4[%c2_50, %c0_51, %c0_52] : memref<9x32x32xf32, #tpu.memory_space<vmem>>, vector<1x32x32xf32>
    %96 = vector.shape_cast %95 : vector<1x32x32xf32> to vector<32x32xf32>
    %cst_53 = arith.constant dense<0.000000e+00> : vector<32x16xf32>
    %97 = tpu.matmul %96, %94, %cst_53 {dimension_numbers = #tpu.dot_dimension_numbers<[1], [0], [0], [1], [0, 0, 1, 1], [], []>} : vector<32x32xf32>, vector<32x16xf32>, vector<32x16xf32> -> vector<32x16xf32>
    %98 = arith.addf %91, %97 : vector<32x16xf32>
    %99 = vector.extract_strided_slice %78 {offsets = [0, 4], sizes = [32, 16], strides = [1, 1]} : vector<32x26xf32> to vector<32x16xf32>
    %100 = vector.broadcast %1 : vector<1x16xf32> to vector<32x16xf32>
    %101 = arith.mulf %99, %100 : vector<32x16xf32>
    %c3_54 = arith.constant 3 : index
    %c0_55 = arith.constant 0 : index
    %c0_56 = arith.constant 0 : index
    %102 = vector.load %arg4[%c3_54, %c0_55, %c0_56] : memref<9x32x32xf32, #tpu.memory_space<vmem>>, vector<1x32x32xf32>
    %103 = vector.shape_cast %102 : vector<1x32x32xf32> to vector<32x32xf32>
    %cst_57 = arith.constant dense<0.000000e+00> : vector<32x16xf32>
    %104 = tpu.matmul %103, %101, %cst_57 {dimension_numbers = #tpu.dot_dimension_numbers<[1], [0], [0], [1], [0, 0, 1, 1], [], []>} : vector<32x32xf32>, vector<32x16xf32>, vector<32x16xf32> -> vector<32x16xf32>
    %105 = arith.addf %98, %104 : vector<32x16xf32>
    %106 = vector.extract_strided_slice %78 {offsets = [0, 5], sizes = [32, 16], strides = [1, 1]} : vector<32x26xf32> to vector<32x16xf32>
    %c4_58 = arith.constant 4 : index
    %c0_59 = arith.constant 0 : index
    %c0_60 = arith.constant 0 : index
    %107 = vector.load %arg4[%c4_58, %c0_59, %c0_60] : memref<9x32x32xf32, #tpu.memory_space<vmem>>, vector<1x32x32xf32>
    %108 = vector.shape_cast %107 : vector<1x32x32xf32> to vector<32x32xf32>
    %cst_61 = arith.constant dense<0.000000e+00> : vector<32x16xf32>
    %109 = tpu.matmul %108, %106, %cst_61 {dimension_numbers = #tpu.dot_dimension_numbers<[1], [0], [0], [1], [0, 0, 1, 1], [], []>} : vector<32x32xf32>, vector<32x16xf32>, vector<32x16xf32> -> vector<32x16xf32>
    %110 = arith.addf %105, %109 : vector<32x16xf32>
    %111 = vector.extract_strided_slice %78 {offsets = [0, 6], sizes = [32, 16], strides = [1, 1]} : vector<32x26xf32> to vector<32x16xf32>
    %112 = vector.broadcast %2 : vector<1x16xf32> to vector<32x16xf32>
    %113 = arith.mulf %111, %112 : vector<32x16xf32>
    %c5_62 = arith.constant 5 : index
    %c0_63 = arith.constant 0 : index
    %c0_64 = arith.constant 0 : index
    %114 = vector.load %arg4[%c5_62, %c0_63, %c0_64] : memref<9x32x32xf32, #tpu.memory_space<vmem>>, vector<1x32x32xf32>
    %115 = vector.shape_cast %114 : vector<1x32x32xf32> to vector<32x32xf32>
    %cst_65 = arith.constant dense<0.000000e+00> : vector<32x16xf32>
    %116 = tpu.matmul %115, %113, %cst_65 {dimension_numbers = #tpu.dot_dimension_numbers<[1], [0], [0], [1], [0, 0, 1, 1], [], []>} : vector<32x32xf32>, vector<32x16xf32>, vector<32x16xf32> -> vector<32x16xf32>
    %117 = arith.addf %110, %116 : vector<32x16xf32>
    %118 = vector.extract_strided_slice %78 {offsets = [0, 8], sizes = [32, 16], strides = [1, 1]} : vector<32x26xf32> to vector<32x16xf32>
    %119 = vector.broadcast %1 : vector<1x16xf32> to vector<32x16xf32>
    %120 = arith.mulf %118, %119 : vector<32x16xf32>
    %c6_66 = arith.constant 6 : index
    %c0_67 = arith.constant 0 : index
    %c0_68 = arith.constant 0 : index
    %121 = vector.load %arg4[%c6_66, %c0_67, %c0_68] : memref<9x32x32xf32, #tpu.memory_space<vmem>>, vector<1x32x32xf32>
    %122 = vector.shape_cast %121 : vector<1x32x32xf32> to vector<32x32xf32>
    %cst_69 = arith.constant dense<0.000000e+00> : vector<32x16xf32>
    %123 = tpu.matmul %122, %120, %cst_69 {dimension_numbers = #tpu.dot_dimension_numbers<[1], [0], [0], [1], [0, 0, 1, 1], [], []>} : vector<32x32xf32>, vector<32x16xf32>, vector<32x16xf32> -> vector<32x16xf32>
    %124 = arith.addf %117, %123 : vector<32x16xf32>
    %125 = vector.extract_strided_slice %78 {offsets = [0, 9], sizes = [32, 16], strides = [1, 1]} : vector<32x26xf32> to vector<32x16xf32>
    %c7_70 = arith.constant 7 : index
    %c0_71 = arith.constant 0 : index
    %c0_72 = arith.constant 0 : index
    %126 = vector.load %arg4[%c7_70, %c0_71, %c0_72] : memref<9x32x32xf32, #tpu.memory_space<vmem>>, vector<1x32x32xf32>
    %127 = vector.shape_cast %126 : vector<1x32x32xf32> to vector<32x32xf32>
    %cst_73 = arith.constant dense<0.000000e+00> : vector<32x16xf32>
    %128 = tpu.matmul %127, %125, %cst_73 {dimension_numbers = #tpu.dot_dimension_numbers<[1], [0], [0], [1], [0, 0, 1, 1], [], []>} : vector<32x32xf32>, vector<32x16xf32>, vector<32x16xf32> -> vector<32x16xf32>
    %129 = arith.addf %124, %128 : vector<32x16xf32>
    %130 = vector.extract_strided_slice %78 {offsets = [0, 10], sizes = [32, 16], strides = [1, 1]} : vector<32x26xf32> to vector<32x16xf32>
    %131 = vector.broadcast %2 : vector<1x16xf32> to vector<32x16xf32>
    %132 = arith.mulf %130, %131 : vector<32x16xf32>
    %c8_74 = arith.constant 8 : index
    %c0_75 = arith.constant 0 : index
    %c0_76 = arith.constant 0 : index
    %133 = vector.load %arg4[%c8_74, %c0_75, %c0_76] : memref<9x32x32xf32, #tpu.memory_space<vmem>>, vector<1x32x32xf32>
    %134 = vector.shape_cast %133 : vector<1x32x32xf32> to vector<32x32xf32>
    %cst_77 = arith.constant dense<0.000000e+00> : vector<32x16xf32>
    %135 = tpu.matmul %134, %132, %cst_77 {dimension_numbers = #tpu.dot_dimension_numbers<[1], [0], [0], [1], [0, 0, 1, 1], [], []>} : vector<32x32xf32>, vector<32x16xf32>, vector<32x16xf32> -> vector<32x16xf32>
    %136 = arith.addf %129, %135 : vector<32x16xf32>
    %c0_78 = arith.constant 0 : index
    %c0_79 = arith.constant 0 : index
    %137 = vector.load %arg5[%c0_78, %c0_79] : memref<32x1xf32, #tpu.memory_space<vmem>>, vector<32x1xf32>
    %138 = vector.broadcast %137 : vector<32x1xf32> to vector<32x16xf32>
    %139 = arith.addf %136, %138 : vector<32x16xf32>
    %cst_80 = arith.constant 0.000000e+00 : f32
    %140 = vector.broadcast %cst_80 : f32 to vector<32x16xf32>
    %141 = arith.maximumf %139, %140 : vector<32x16xf32>
    %cst_81 = arith.constant 0.000000e+00 : f32
    %142 = vector.broadcast %cst_81 : f32 to vector<32x5xf32>
    %143 = tpu.concatenate %142, %141, %142 in 1 : vector<32x5xf32>, vector<32x16xf32>, vector<32x5xf32> -> vector<32x26xf32>
    %cst_82 = arith.constant 0.000000e+00 : f32
    %144 = vector.broadcast %cst_82 : f32 to vector<32x16xf32>
    %145 = vector.extract_strided_slice %143 {offsets = [0, 0], sizes = [32, 16], strides = [1, 1]} : vector<32x26xf32> to vector<32x16xf32>
    %146 = vector.broadcast %1 : vector<1x16xf32> to vector<32x16xf32>
    %147 = arith.mulf %145, %146 : vector<32x16xf32>
    %c0_83 = arith.constant 0 : index
    %c0_84 = arith.constant 0 : index
    %c0_85 = arith.constant 0 : index
    %148 = vector.load %arg6[%c0_83, %c0_84, %c0_85] : memref<9x32x32xf32, #tpu.memory_space<vmem>>, vector<1x32x32xf32>
    %149 = vector.shape_cast %148 : vector<1x32x32xf32> to vector<32x32xf32>
    %cst_86 = arith.constant dense<0.000000e+00> : vector<32x16xf32>
    %150 = tpu.matmul %149, %147, %cst_86 {dimension_numbers = #tpu.dot_dimension_numbers<[1], [0], [0], [1], [0, 0, 1, 1], [], []>} : vector<32x32xf32>, vector<32x16xf32>, vector<32x16xf32> -> vector<32x16xf32>
    %151 = arith.addf %144, %150 : vector<32x16xf32>
    %152 = vector.extract_strided_slice %143 {offsets = [0, 1], sizes = [32, 16], strides = [1, 1]} : vector<32x26xf32> to vector<32x16xf32>
    %c1_87 = arith.constant 1 : index
    %c0_88 = arith.constant 0 : index
    %c0_89 = arith.constant 0 : index
    %153 = vector.load %arg6[%c1_87, %c0_88, %c0_89] : memref<9x32x32xf32, #tpu.memory_space<vmem>>, vector<1x32x32xf32>
    %154 = vector.shape_cast %153 : vector<1x32x32xf32> to vector<32x32xf32>
    %cst_90 = arith.constant dense<0.000000e+00> : vector<32x16xf32>
    %155 = tpu.matmul %154, %152, %cst_90 {dimension_numbers = #tpu.dot_dimension_numbers<[1], [0], [0], [1], [0, 0, 1, 1], [], []>} : vector<32x32xf32>, vector<32x16xf32>, vector<32x16xf32> -> vector<32x16xf32>
    %156 = arith.addf %151, %155 : vector<32x16xf32>
    %157 = vector.extract_strided_slice %143 {offsets = [0, 2], sizes = [32, 16], strides = [1, 1]} : vector<32x26xf32> to vector<32x16xf32>
    %158 = vector.broadcast %2 : vector<1x16xf32> to vector<32x16xf32>
    %159 = arith.mulf %157, %158 : vector<32x16xf32>
    %c2_91 = arith.constant 2 : index
    %c0_92 = arith.constant 0 : index
    %c0_93 = arith.constant 0 : index
    %160 = vector.load %arg6[%c2_91, %c0_92, %c0_93] : memref<9x32x32xf32, #tpu.memory_space<vmem>>, vector<1x32x32xf32>
    %161 = vector.shape_cast %160 : vector<1x32x32xf32> to vector<32x32xf32>
    %cst_94 = arith.constant dense<0.000000e+00> : vector<32x16xf32>
    %162 = tpu.matmul %161, %159, %cst_94 {dimension_numbers = #tpu.dot_dimension_numbers<[1], [0], [0], [1], [0, 0, 1, 1], [], []>} : vector<32x32xf32>, vector<32x16xf32>, vector<32x16xf32> -> vector<32x16xf32>
    %163 = arith.addf %156, %162 : vector<32x16xf32>
    %164 = vector.extract_strided_slice %143 {offsets = [0, 4], sizes = [32, 16], strides = [1, 1]} : vector<32x26xf32> to vector<32x16xf32>
    %165 = vector.broadcast %1 : vector<1x16xf32> to vector<32x16xf32>
    %166 = arith.mulf %164, %165 : vector<32x16xf32>
    %c3_95 = arith.constant 3 : index
    %c0_96 = arith.constant 0 : index
    %c0_97 = arith.constant 0 : index
    %167 = vector.load %arg6[%c3_95, %c0_96, %c0_97] : memref<9x32x32xf32, #tpu.memory_space<vmem>>, vector<1x32x32xf32>
    %168 = vector.shape_cast %167 : vector<1x32x32xf32> to vector<32x32xf32>
    %cst_98 = arith.constant dense<0.000000e+00> : vector<32x16xf32>
    %169 = tpu.matmul %168, %166, %cst_98 {dimension_numbers = #tpu.dot_dimension_numbers<[1], [0], [0], [1], [0, 0, 1, 1], [], []>} : vector<32x32xf32>, vector<32x16xf32>, vector<32x16xf32> -> vector<32x16xf32>
    %170 = arith.addf %163, %169 : vector<32x16xf32>
    %171 = vector.extract_strided_slice %143 {offsets = [0, 5], sizes = [32, 16], strides = [1, 1]} : vector<32x26xf32> to vector<32x16xf32>
    %c4_99 = arith.constant 4 : index
    %c0_100 = arith.constant 0 : index
    %c0_101 = arith.constant 0 : index
    %172 = vector.load %arg6[%c4_99, %c0_100, %c0_101] : memref<9x32x32xf32, #tpu.memory_space<vmem>>, vector<1x32x32xf32>
    %173 = vector.shape_cast %172 : vector<1x32x32xf32> to vector<32x32xf32>
    %cst_102 = arith.constant dense<0.000000e+00> : vector<32x16xf32>
    %174 = tpu.matmul %173, %171, %cst_102 {dimension_numbers = #tpu.dot_dimension_numbers<[1], [0], [0], [1], [0, 0, 1, 1], [], []>} : vector<32x32xf32>, vector<32x16xf32>, vector<32x16xf32> -> vector<32x16xf32>
    %175 = arith.addf %170, %174 : vector<32x16xf32>
    %176 = vector.extract_strided_slice %143 {offsets = [0, 6], sizes = [32, 16], strides = [1, 1]} : vector<32x26xf32> to vector<32x16xf32>
    %177 = vector.broadcast %2 : vector<1x16xf32> to vector<32x16xf32>
    %178 = arith.mulf %176, %177 : vector<32x16xf32>
    %c5_103 = arith.constant 5 : index
    %c0_104 = arith.constant 0 : index
    %c0_105 = arith.constant 0 : index
    %179 = vector.load %arg6[%c5_103, %c0_104, %c0_105] : memref<9x32x32xf32, #tpu.memory_space<vmem>>, vector<1x32x32xf32>
    %180 = vector.shape_cast %179 : vector<1x32x32xf32> to vector<32x32xf32>
    %cst_106 = arith.constant dense<0.000000e+00> : vector<32x16xf32>
    %181 = tpu.matmul %180, %178, %cst_106 {dimension_numbers = #tpu.dot_dimension_numbers<[1], [0], [0], [1], [0, 0, 1, 1], [], []>} : vector<32x32xf32>, vector<32x16xf32>, vector<32x16xf32> -> vector<32x16xf32>
    %182 = arith.addf %175, %181 : vector<32x16xf32>
    %183 = vector.extract_strided_slice %143 {offsets = [0, 8], sizes = [32, 16], strides = [1, 1]} : vector<32x26xf32> to vector<32x16xf32>
    %184 = vector.broadcast %1 : vector<1x16xf32> to vector<32x16xf32>
    %185 = arith.mulf %183, %184 : vector<32x16xf32>
    %c6_107 = arith.constant 6 : index
    %c0_108 = arith.constant 0 : index
    %c0_109 = arith.constant 0 : index
    %186 = vector.load %arg6[%c6_107, %c0_108, %c0_109] : memref<9x32x32xf32, #tpu.memory_space<vmem>>, vector<1x32x32xf32>
    %187 = vector.shape_cast %186 : vector<1x32x32xf32> to vector<32x32xf32>
    %cst_110 = arith.constant dense<0.000000e+00> : vector<32x16xf32>
    %188 = tpu.matmul %187, %185, %cst_110 {dimension_numbers = #tpu.dot_dimension_numbers<[1], [0], [0], [1], [0, 0, 1, 1], [], []>} : vector<32x32xf32>, vector<32x16xf32>, vector<32x16xf32> -> vector<32x16xf32>
    %189 = arith.addf %182, %188 : vector<32x16xf32>
    %190 = vector.extract_strided_slice %143 {offsets = [0, 9], sizes = [32, 16], strides = [1, 1]} : vector<32x26xf32> to vector<32x16xf32>
    %c7_111 = arith.constant 7 : index
    %c0_112 = arith.constant 0 : index
    %c0_113 = arith.constant 0 : index
    %191 = vector.load %arg6[%c7_111, %c0_112, %c0_113] : memref<9x32x32xf32, #tpu.memory_space<vmem>>, vector<1x32x32xf32>
    %192 = vector.shape_cast %191 : vector<1x32x32xf32> to vector<32x32xf32>
    %cst_114 = arith.constant dense<0.000000e+00> : vector<32x16xf32>
    %193 = tpu.matmul %192, %190, %cst_114 {dimension_numbers = #tpu.dot_dimension_numbers<[1], [0], [0], [1], [0, 0, 1, 1], [], []>} : vector<32x32xf32>, vector<32x16xf32>, vector<32x16xf32> -> vector<32x16xf32>
    %194 = arith.addf %189, %193 : vector<32x16xf32>
    %195 = vector.extract_strided_slice %143 {offsets = [0, 10], sizes = [32, 16], strides = [1, 1]} : vector<32x26xf32> to vector<32x16xf32>
    %196 = vector.broadcast %2 : vector<1x16xf32> to vector<32x16xf32>
    %197 = arith.mulf %195, %196 : vector<32x16xf32>
    %c8_115 = arith.constant 8 : index
    %c0_116 = arith.constant 0 : index
    %c0_117 = arith.constant 0 : index
    %198 = vector.load %arg6[%c8_115, %c0_116, %c0_117] : memref<9x32x32xf32, #tpu.memory_space<vmem>>, vector<1x32x32xf32>
    %199 = vector.shape_cast %198 : vector<1x32x32xf32> to vector<32x32xf32>
    %cst_118 = arith.constant dense<0.000000e+00> : vector<32x16xf32>
    %200 = tpu.matmul %199, %197, %cst_118 {dimension_numbers = #tpu.dot_dimension_numbers<[1], [0], [0], [1], [0, 0, 1, 1], [], []>} : vector<32x32xf32>, vector<32x16xf32>, vector<32x16xf32> -> vector<32x16xf32>
    %201 = arith.addf %194, %200 : vector<32x16xf32>
    %c0_119 = arith.constant 0 : index
    %c0_120 = arith.constant 0 : index
    %202 = vector.load %arg7[%c0_119, %c0_120] : memref<32x1xf32, #tpu.memory_space<vmem>>, vector<32x1xf32>
    %203 = vector.broadcast %202 : vector<32x1xf32> to vector<32x16xf32>
    %204 = arith.addf %201, %203 : vector<32x16xf32>
    %205 = arith.addf %204, %76 : vector<32x16xf32>
    %cst_121 = arith.constant 0.000000e+00 : f32
    %206 = vector.broadcast %cst_121 : f32 to vector<32x16xf32>
    %207 = arith.maximumf %205, %206 : vector<32x16xf32>
    %c0_122 = arith.constant 0 : index
    %c0_123 = arith.constant 0 : index
    %c0_124 = arith.constant 0 : index
    %208 = vector.load %arg9[%c0_122, %c0_123, %c0_124] : memref<1x32x16xf32, #tpu.memory_space<vmem>>, vector<1x32x16xf32>
    %209 = vector.shape_cast %208 : vector<1x32x16xf32> to vector<32x16xf32>
    %210 = vector.shape_cast %207 : vector<32x16xf32> to vector<1x32x16xf32>
    tpu.vector_store %arg9[%c0_122, %c0_123, %c0_124], %210 {strides = array<i32>} : memref<1x32x16xf32, #tpu.memory_space<vmem>>, vector<1x32x16xf32>,
    return
  }
  func.func @transform_0(%arg0: i32) -> (i32, i32, i32) {
    %c0_i32 = arith.constant 0 : i32
    %c0_i32_0 = arith.constant 0 : i32
    %c0_i32_1 = arith.constant 0 : i32
    return %arg0, %c0_i32, %c0_i32_0 : i32, i32, i32
  }
  func.func @transform_1(%arg0: i32) -> (i32, i32, i32) {
    %c0_i32 = arith.constant 0 : i32
    %c0_i32_0 = arith.constant 0 : i32
    %c0_i32_1 = arith.constant 0 : i32
    %c0_i32_2 = arith.constant 0 : i32
    return %c0_i32, %c0_i32_0, %c0_i32_1 : i32, i32, i32
  }
  func.func @transform_2(%arg0: i32) -> (i32, i32) {
    %c0_i32 = arith.constant 0 : i32
    %c0_i32_0 = arith.constant 0 : i32
    %c0_i32_1 = arith.constant 0 : i32
    return %c0_i32, %c0_i32_0 : i32, i32
  }
  func.func @transform_3(%arg0: i32) -> (i32, i32, i32) {
    %c0_i32 = arith.constant 0 : i32
    %c0_i32_0 = arith.constant 0 : i32
    %c0_i32_1 = arith.constant 0 : i32
    %c0_i32_2 = arith.constant 0 : i32
    return %c0_i32, %c0_i32_0, %c0_i32_1 : i32, i32, i32
  }
  func.func @transform_4(%arg0: i32) -> (i32, i32) {
    %c0_i32 = arith.constant 0 : i32
    %c0_i32_0 = arith.constant 0 : i32
    %c0_i32_1 = arith.constant 0 : i32
    return %c0_i32, %c0_i32_0 : i32, i32
  }
  func.func @transform_5(%arg0: i32) -> (i32, i32, i32) {
    %c0_i32 = arith.constant 0 : i32
    %c0_i32_0 = arith.constant 0 : i32
    %c0_i32_1 = arith.constant 0 : i32
    %c0_i32_2 = arith.constant 0 : i32
    return %c0_i32, %c0_i32_0, %c0_i32_1 : i32, i32, i32
  }
  func.func @transform_6(%arg0: i32) -> (i32, i32) {
    %c0_i32 = arith.constant 0 : i32
    %c0_i32_0 = arith.constant 0 : i32
    %c0_i32_1 = arith.constant 0 : i32
    return %c0_i32, %c0_i32_0 : i32, i32
  }
  func.func @transform_7(%arg0: i32) -> (i32, i32) {
    %c0_i32 = arith.constant 0 : i32
    %c0_i32_0 = arith.constant 0 : i32
    %c0_i32_1 = arith.constant 0 : i32
    return %c0_i32, %c0_i32_0 : i32, i32
  }
  func.func @transform_8(%arg0: i32) -> (i32, i32, i32) {
    %c0_i32 = arith.constant 0 : i32
    %c0_i32_0 = arith.constant 0 : i32
    %c0_i32_1 = arith.constant 0 : i32
    return %arg0, %c0_i32, %c0_i32_0 : i32, i32, i32
  }
}

module attributes {stable_mosaic.version = 11 : i64} {
  func.func @_stage_kernel(%arg0: i32, %arg1: memref<1x128x4xf32, #tpu.memory_space<vmem>>, %arg2: memref<9x32x32xf32, #tpu.memory_space<vmem>>, %arg3: memref<32x1xf32, #tpu.memory_space<vmem>>, %arg4: memref<9x32x32xf32, #tpu.memory_space<vmem>>, %arg5: memref<32x1xf32, #tpu.memory_space<vmem>>, %arg6: memref<9x32x32xf32, #tpu.memory_space<vmem>>, %arg7: memref<32x1xf32, #tpu.memory_space<vmem>>, %arg8: memref<2x4xf32, #tpu.memory_space<vmem>>, %arg9: memref<1x32x4xf32, #tpu.memory_space<vmem>>) attributes {dimension_semantics = [#tpu.dimension_semantics<parallel>], iteration_bounds = array<i64: 2>, scalar_prefetch = 0 : i64, scratch_operands = 0 : i64, tpu.core_type = #tpu.core_type<tc>, window_params = [{transform_indices = @transform_0, window_bounds = array<i64: 1, 128, 4>}, {pipeline_mode = #tpu.pipeline_mode<synchronous>, transform_indices = @transform_1, window_bounds = array<i64: 9, 32, 32>}, {pipeline_mode = #tpu.pipeline_mode<synchronous>, transform_indices = @transform_2, window_bounds = array<i64: 32, 1>}, {pipeline_mode = #tpu.pipeline_mode<synchronous>, transform_indices = @transform_3, window_bounds = array<i64: 9, 32, 32>}, {pipeline_mode = #tpu.pipeline_mode<synchronous>, transform_indices = @transform_4, window_bounds = array<i64: 32, 1>}, {pipeline_mode = #tpu.pipeline_mode<synchronous>, transform_indices = @transform_5, window_bounds = array<i64: 9, 32, 32>}, {pipeline_mode = #tpu.pipeline_mode<synchronous>, transform_indices = @transform_6, window_bounds = array<i64: 32, 1>}, {pipeline_mode = #tpu.pipeline_mode<synchronous>, transform_indices = @transform_7, window_bounds = array<i64: 2, 4>}, {transform_indices = @transform_8, window_bounds = array<i64: 1, 32, 4>}]} {
    %c0 = arith.constant 0 : index
    %c0_0 = arith.constant 0 : index
    %0 = vector.load %arg8[%c0, %c0_0] : memref<2x4xf32, #tpu.memory_space<vmem>>, vector<2x4xf32>
    %1 = vector.extract_strided_slice %0 {offsets = [0, 0], sizes = [1, 4], strides = [1, 1]} : vector<2x4xf32> to vector<1x4xf32>
    %2 = vector.extract_strided_slice %0 {offsets = [1, 0], sizes = [1, 4], strides = [1, 1]} : vector<2x4xf32> to vector<1x4xf32>
    %c0_1 = arith.constant 0 : index
    %c0_2 = arith.constant 0 : index
    %c0_3 = arith.constant 0 : index
    %3 = vector.load %arg1[%c0_1, %c0_2, %c0_3] : memref<1x128x4xf32, #tpu.memory_space<vmem>>, vector<1x128x4xf32>
    %4 = vector.shape_cast %3 : vector<1x128x4xf32> to vector<128x4xf32>
    %cst = arith.constant 0.000000e+00 : f32
    %5 = vector.broadcast %cst : f32 to vector<32x4xf32>
    %6 = vector.extract_strided_slice %4 {offsets = [96, 0], sizes = [32, 4], strides = [1, 1]} : vector<128x4xf32> to vector<32x4xf32>
    %cst_4 = arith.constant 0.000000e+00 : f32
    %7 = vector.broadcast %cst_4 : f32 to vector<32x3xf32>
    %8 = vector.extract_strided_slice %6 {offsets = [0, 0], sizes = [32, 1], strides = [1, 1]} : vector<32x4xf32> to vector<32x1xf32>
    %9 = tpu.concatenate %7, %8 in 1 : vector<32x3xf32>, vector<32x1xf32> -> vector<32x4xf32>
    %10 = vector.broadcast %1 : vector<1x4xf32> to vector<32x4xf32>
    %11 = arith.mulf %9, %10 : vector<32x4xf32>
    %c0_5 = arith.constant 0 : index
    %c0_6 = arith.constant 0 : index
    %c0_7 = arith.constant 0 : index
    %12 = vector.load %arg2[%c0_5, %c0_6, %c0_7] : memref<9x32x32xf32, #tpu.memory_space<vmem>>, vector<1x32x32xf32>
    %13 = vector.shape_cast %12 : vector<1x32x32xf32> to vector<32x32xf32>
    %cst_8 = arith.constant dense<0.000000e+00> : vector<32x4xf32>
    %14 = tpu.matmul %13, %11, %cst_8 {dimension_numbers = #tpu.dot_dimension_numbers<[1], [0], [0], [1], [0, 0, 1, 1], [], []>} : vector<32x32xf32>, vector<32x4xf32>, vector<32x4xf32> -> vector<32x4xf32>
    %15 = arith.addf %5, %14 : vector<32x4xf32>
    %16 = vector.extract_strided_slice %4 {offsets = [64, 0], sizes = [32, 4], strides = [1, 1]} : vector<128x4xf32> to vector<32x4xf32>
    %cst_9 = arith.constant 0.000000e+00 : f32
    %17 = vector.broadcast %cst_9 : f32 to vector<32x2xf32>
    %18 = vector.extract_strided_slice %16 {offsets = [0, 0], sizes = [32, 2], strides = [1, 1]} : vector<32x4xf32> to vector<32x2xf32>
    %19 = tpu.concatenate %17, %18 in 1 : vector<32x2xf32>, vector<32x2xf32> -> vector<32x4xf32>
    %c1 = arith.constant 1 : index
    %c0_10 = arith.constant 0 : index
    %c0_11 = arith.constant 0 : index
    %20 = vector.load %arg2[%c1, %c0_10, %c0_11] : memref<9x32x32xf32, #tpu.memory_space<vmem>>, vector<1x32x32xf32>
    %21 = vector.shape_cast %20 : vector<1x32x32xf32> to vector<32x32xf32>
    %cst_12 = arith.constant dense<0.000000e+00> : vector<32x4xf32>
    %22 = tpu.matmul %21, %19, %cst_12 {dimension_numbers = #tpu.dot_dimension_numbers<[1], [0], [0], [1], [0, 0, 1, 1], [], []>} : vector<32x32xf32>, vector<32x4xf32>, vector<32x4xf32> -> vector<32x4xf32>
    %23 = arith.addf %15, %22 : vector<32x4xf32>
    %24 = vector.extract_strided_slice %4 {offsets = [96, 0], sizes = [32, 4], strides = [1, 1]} : vector<128x4xf32> to vector<32x4xf32>
    %cst_13 = arith.constant 0.000000e+00 : f32
    %25 = vector.broadcast %cst_13 : f32 to vector<32x2xf32>
    %26 = vector.extract_strided_slice %24 {offsets = [0, 0], sizes = [32, 2], strides = [1, 1]} : vector<32x4xf32> to vector<32x2xf32>
    %27 = tpu.concatenate %25, %26 in 1 : vector<32x2xf32>, vector<32x2xf32> -> vector<32x4xf32>
    %c2 = arith.constant 2 : index
    %c0_14 = arith.constant 0 : index
    %c0_15 = arith.constant 0 : index
    %28 = vector.load %arg2[%c2, %c0_14, %c0_15] : memref<9x32x32xf32, #tpu.memory_space<vmem>>, vector<1x32x32xf32>
    %29 = vector.shape_cast %28 : vector<1x32x32xf32> to vector<32x32xf32>
    %cst_16 = arith.constant dense<0.000000e+00> : vector<32x4xf32>
    %30 = tpu.matmul %29, %27, %cst_16 {dimension_numbers = #tpu.dot_dimension_numbers<[1], [0], [0], [1], [0, 0, 1, 1], [], []>} : vector<32x32xf32>, vector<32x4xf32>, vector<32x4xf32> -> vector<32x4xf32>
    %31 = arith.addf %23, %30 : vector<32x4xf32>
    %32 = vector.extract_strided_slice %4 {offsets = [32, 0], sizes = [32, 4], strides = [1, 1]} : vector<128x4xf32> to vector<32x4xf32>
    %cst_17 = arith.constant 0.000000e+00 : f32
    %33 = vector.broadcast %cst_17 : f32 to vector<32x1xf32>
    %34 = vector.extract_strided_slice %32 {offsets = [0, 0], sizes = [32, 3], strides = [1, 1]} : vector<32x4xf32> to vector<32x3xf32>
    %35 = tpu.concatenate %33, %34 in 1 : vector<32x1xf32>, vector<32x3xf32> -> vector<32x4xf32>
    %36 = vector.broadcast %1 : vector<1x4xf32> to vector<32x4xf32>
    %37 = arith.mulf %35, %36 : vector<32x4xf32>
    %c3 = arith.constant 3 : index
    %c0_18 = arith.constant 0 : index
    %c0_19 = arith.constant 0 : index
    %38 = vector.load %arg2[%c3, %c0_18, %c0_19] : memref<9x32x32xf32, #tpu.memory_space<vmem>>, vector<1x32x32xf32>
    %39 = vector.shape_cast %38 : vector<1x32x32xf32> to vector<32x32xf32>
    %cst_20 = arith.constant dense<0.000000e+00> : vector<32x4xf32>
    %40 = tpu.matmul %39, %37, %cst_20 {dimension_numbers = #tpu.dot_dimension_numbers<[1], [0], [0], [1], [0, 0, 1, 1], [], []>} : vector<32x32xf32>, vector<32x4xf32>, vector<32x4xf32> -> vector<32x4xf32>
    %41 = arith.addf %31, %40 : vector<32x4xf32>
    %42 = vector.extract_strided_slice %4 {offsets = [0, 0], sizes = [32, 4], strides = [1, 1]} : vector<128x4xf32> to vector<32x4xf32>
    %c4 = arith.constant 4 : index
    %c0_21 = arith.constant 0 : index
    %c0_22 = arith.constant 0 : index
    %43 = vector.load %arg2[%c4, %c0_21, %c0_22] : memref<9x32x32xf32, #tpu.memory_space<vmem>>, vector<1x32x32xf32>
    %44 = vector.shape_cast %43 : vector<1x32x32xf32> to vector<32x32xf32>
    %cst_23 = arith.constant dense<0.000000e+00> : vector<32x4xf32>
    %45 = tpu.matmul %44, %42, %cst_23 {dimension_numbers = #tpu.dot_dimension_numbers<[1], [0], [0], [1], [0, 0, 1, 1], [], []>} : vector<32x32xf32>, vector<32x4xf32>, vector<32x4xf32> -> vector<32x4xf32>
    %46 = arith.addf %41, %45 : vector<32x4xf32>
    %47 = vector.extract_strided_slice %4 {offsets = [32, 0], sizes = [32, 4], strides = [1, 1]} : vector<128x4xf32> to vector<32x4xf32>
    %c5 = arith.constant 5 : index
    %c0_24 = arith.constant 0 : index
    %c0_25 = arith.constant 0 : index
    %48 = vector.load %arg2[%c5, %c0_24, %c0_25] : memref<9x32x32xf32, #tpu.memory_space<vmem>>, vector<1x32x32xf32>
    %49 = vector.shape_cast %48 : vector<1x32x32xf32> to vector<32x32xf32>
    %cst_26 = arith.constant dense<0.000000e+00> : vector<32x4xf32>
    %50 = tpu.matmul %49, %47, %cst_26 {dimension_numbers = #tpu.dot_dimension_numbers<[1], [0], [0], [1], [0, 0, 1, 1], [], []>} : vector<32x32xf32>, vector<32x4xf32>, vector<32x4xf32> -> vector<32x4xf32>
    %51 = arith.addf %46, %50 : vector<32x4xf32>
    %52 = vector.extract_strided_slice %4 {offsets = [96, 0], sizes = [32, 4], strides = [1, 1]} : vector<128x4xf32> to vector<32x4xf32>
    %cst_27 = arith.constant 0.000000e+00 : f32
    %53 = vector.broadcast %cst_27 : f32 to vector<32x1xf32>
    %54 = vector.extract_strided_slice %52 {offsets = [0, 0], sizes = [32, 3], strides = [1, 1]} : vector<32x4xf32> to vector<32x3xf32>
    %55 = tpu.concatenate %53, %54 in 1 : vector<32x1xf32>, vector<32x3xf32> -> vector<32x4xf32>
    %56 = vector.broadcast %1 : vector<1x4xf32> to vector<32x4xf32>
    %57 = arith.mulf %55, %56 : vector<32x4xf32>
    %c6 = arith.constant 6 : index
    %c0_28 = arith.constant 0 : index
    %c0_29 = arith.constant 0 : index
    %58 = vector.load %arg2[%c6, %c0_28, %c0_29] : memref<9x32x32xf32, #tpu.memory_space<vmem>>, vector<1x32x32xf32>
    %59 = vector.shape_cast %58 : vector<1x32x32xf32> to vector<32x32xf32>
    %cst_30 = arith.constant dense<0.000000e+00> : vector<32x4xf32>
    %60 = tpu.matmul %59, %57, %cst_30 {dimension_numbers = #tpu.dot_dimension_numbers<[1], [0], [0], [1], [0, 0, 1, 1], [], []>} : vector<32x32xf32>, vector<32x4xf32>, vector<32x4xf32> -> vector<32x4xf32>
    %61 = arith.addf %51, %60 : vector<32x4xf32>
    %62 = vector.extract_strided_slice %4 {offsets = [64, 0], sizes = [32, 4], strides = [1, 1]} : vector<128x4xf32> to vector<32x4xf32>
    %c7 = arith.constant 7 : index
    %c0_31 = arith.constant 0 : index
    %c0_32 = arith.constant 0 : index
    %63 = vector.load %arg2[%c7, %c0_31, %c0_32] : memref<9x32x32xf32, #tpu.memory_space<vmem>>, vector<1x32x32xf32>
    %64 = vector.shape_cast %63 : vector<1x32x32xf32> to vector<32x32xf32>
    %cst_33 = arith.constant dense<0.000000e+00> : vector<32x4xf32>
    %65 = tpu.matmul %64, %62, %cst_33 {dimension_numbers = #tpu.dot_dimension_numbers<[1], [0], [0], [1], [0, 0, 1, 1], [], []>} : vector<32x32xf32>, vector<32x4xf32>, vector<32x4xf32> -> vector<32x4xf32>
    %66 = arith.addf %61, %65 : vector<32x4xf32>
    %67 = vector.extract_strided_slice %4 {offsets = [96, 0], sizes = [32, 4], strides = [1, 1]} : vector<128x4xf32> to vector<32x4xf32>
    %c8 = arith.constant 8 : index
    %c0_34 = arith.constant 0 : index
    %c0_35 = arith.constant 0 : index
    %68 = vector.load %arg2[%c8, %c0_34, %c0_35] : memref<9x32x32xf32, #tpu.memory_space<vmem>>, vector<1x32x32xf32>
    %69 = vector.shape_cast %68 : vector<1x32x32xf32> to vector<32x32xf32>
    %cst_36 = arith.constant dense<0.000000e+00> : vector<32x4xf32>
    %70 = tpu.matmul %69, %67, %cst_36 {dimension_numbers = #tpu.dot_dimension_numbers<[1], [0], [0], [1], [0, 0, 1, 1], [], []>} : vector<32x32xf32>, vector<32x4xf32>, vector<32x4xf32> -> vector<32x4xf32>
    %71 = arith.addf %66, %70 : vector<32x4xf32>
    %c0_37 = arith.constant 0 : index
    %c0_38 = arith.constant 0 : index
    %72 = vector.load %arg3[%c0_37, %c0_38] : memref<32x1xf32, #tpu.memory_space<vmem>>, vector<32x1xf32>
    %73 = vector.broadcast %72 : vector<32x1xf32> to vector<32x4xf32>
    %74 = arith.addf %71, %73 : vector<32x4xf32>
    %cst_39 = arith.constant 0.000000e+00 : f32
    %75 = vector.broadcast %cst_39 : f32 to vector<32x4xf32>
    %76 = arith.maximumf %74, %75 : vector<32x4xf32>
    %cst_40 = arith.constant 0.000000e+00 : f32
    %77 = vector.broadcast %cst_40 : f32 to vector<32x3xf32>
    %78 = tpu.concatenate %77, %76, %77 in 1 : vector<32x3xf32>, vector<32x4xf32>, vector<32x3xf32> -> vector<32x10xf32>
    %cst_41 = arith.constant 0.000000e+00 : f32
    %79 = vector.broadcast %cst_41 : f32 to vector<32x4xf32>
    %80 = vector.extract_strided_slice %78 {offsets = [0, 0], sizes = [32, 4], strides = [1, 1]} : vector<32x10xf32> to vector<32x4xf32>
    %81 = vector.broadcast %1 : vector<1x4xf32> to vector<32x4xf32>
    %82 = arith.mulf %80, %81 : vector<32x4xf32>
    %c0_42 = arith.constant 0 : index
    %c0_43 = arith.constant 0 : index
    %c0_44 = arith.constant 0 : index
    %83 = vector.load %arg4[%c0_42, %c0_43, %c0_44] : memref<9x32x32xf32, #tpu.memory_space<vmem>>, vector<1x32x32xf32>
    %84 = vector.shape_cast %83 : vector<1x32x32xf32> to vector<32x32xf32>
    %cst_45 = arith.constant dense<0.000000e+00> : vector<32x4xf32>
    %85 = tpu.matmul %84, %82, %cst_45 {dimension_numbers = #tpu.dot_dimension_numbers<[1], [0], [0], [1], [0, 0, 1, 1], [], []>} : vector<32x32xf32>, vector<32x4xf32>, vector<32x4xf32> -> vector<32x4xf32>
    %86 = arith.addf %79, %85 : vector<32x4xf32>
    %87 = vector.extract_strided_slice %78 {offsets = [0, 1], sizes = [32, 4], strides = [1, 1]} : vector<32x10xf32> to vector<32x4xf32>
    %c1_46 = arith.constant 1 : index
    %c0_47 = arith.constant 0 : index
    %c0_48 = arith.constant 0 : index
    %88 = vector.load %arg4[%c1_46, %c0_47, %c0_48] : memref<9x32x32xf32, #tpu.memory_space<vmem>>, vector<1x32x32xf32>
    %89 = vector.shape_cast %88 : vector<1x32x32xf32> to vector<32x32xf32>
    %cst_49 = arith.constant dense<0.000000e+00> : vector<32x4xf32>
    %90 = tpu.matmul %89, %87, %cst_49 {dimension_numbers = #tpu.dot_dimension_numbers<[1], [0], [0], [1], [0, 0, 1, 1], [], []>} : vector<32x32xf32>, vector<32x4xf32>, vector<32x4xf32> -> vector<32x4xf32>
    %91 = arith.addf %86, %90 : vector<32x4xf32>
    %92 = vector.extract_strided_slice %78 {offsets = [0, 2], sizes = [32, 4], strides = [1, 1]} : vector<32x10xf32> to vector<32x4xf32>
    %93 = vector.broadcast %2 : vector<1x4xf32> to vector<32x4xf32>
    %94 = arith.mulf %92, %93 : vector<32x4xf32>
    %c2_50 = arith.constant 2 : index
    %c0_51 = arith.constant 0 : index
    %c0_52 = arith.constant 0 : index
    %95 = vector.load %arg4[%c2_50, %c0_51, %c0_52] : memref<9x32x32xf32, #tpu.memory_space<vmem>>, vector<1x32x32xf32>
    %96 = vector.shape_cast %95 : vector<1x32x32xf32> to vector<32x32xf32>
    %cst_53 = arith.constant dense<0.000000e+00> : vector<32x4xf32>
    %97 = tpu.matmul %96, %94, %cst_53 {dimension_numbers = #tpu.dot_dimension_numbers<[1], [0], [0], [1], [0, 0, 1, 1], [], []>} : vector<32x32xf32>, vector<32x4xf32>, vector<32x4xf32> -> vector<32x4xf32>
    %98 = arith.addf %91, %97 : vector<32x4xf32>
    %99 = vector.extract_strided_slice %78 {offsets = [0, 2], sizes = [32, 4], strides = [1, 1]} : vector<32x10xf32> to vector<32x4xf32>
    %100 = vector.broadcast %1 : vector<1x4xf32> to vector<32x4xf32>
    %101 = arith.mulf %99, %100 : vector<32x4xf32>
    %c3_54 = arith.constant 3 : index
    %c0_55 = arith.constant 0 : index
    %c0_56 = arith.constant 0 : index
    %102 = vector.load %arg4[%c3_54, %c0_55, %c0_56] : memref<9x32x32xf32, #tpu.memory_space<vmem>>, vector<1x32x32xf32>
    %103 = vector.shape_cast %102 : vector<1x32x32xf32> to vector<32x32xf32>
    %cst_57 = arith.constant dense<0.000000e+00> : vector<32x4xf32>
    %104 = tpu.matmul %103, %101, %cst_57 {dimension_numbers = #tpu.dot_dimension_numbers<[1], [0], [0], [1], [0, 0, 1, 1], [], []>} : vector<32x32xf32>, vector<32x4xf32>, vector<32x4xf32> -> vector<32x4xf32>
    %105 = arith.addf %98, %104 : vector<32x4xf32>
    %106 = vector.extract_strided_slice %78 {offsets = [0, 3], sizes = [32, 4], strides = [1, 1]} : vector<32x10xf32> to vector<32x4xf32>
    %c4_58 = arith.constant 4 : index
    %c0_59 = arith.constant 0 : index
    %c0_60 = arith.constant 0 : index
    %107 = vector.load %arg4[%c4_58, %c0_59, %c0_60] : memref<9x32x32xf32, #tpu.memory_space<vmem>>, vector<1x32x32xf32>
    %108 = vector.shape_cast %107 : vector<1x32x32xf32> to vector<32x32xf32>
    %cst_61 = arith.constant dense<0.000000e+00> : vector<32x4xf32>
    %109 = tpu.matmul %108, %106, %cst_61 {dimension_numbers = #tpu.dot_dimension_numbers<[1], [0], [0], [1], [0, 0, 1, 1], [], []>} : vector<32x32xf32>, vector<32x4xf32>, vector<32x4xf32> -> vector<32x4xf32>
    %110 = arith.addf %105, %109 : vector<32x4xf32>
    %111 = vector.extract_strided_slice %78 {offsets = [0, 4], sizes = [32, 4], strides = [1, 1]} : vector<32x10xf32> to vector<32x4xf32>
    %112 = vector.broadcast %2 : vector<1x4xf32> to vector<32x4xf32>
    %113 = arith.mulf %111, %112 : vector<32x4xf32>
    %c5_62 = arith.constant 5 : index
    %c0_63 = arith.constant 0 : index
    %c0_64 = arith.constant 0 : index
    %114 = vector.load %arg4[%c5_62, %c0_63, %c0_64] : memref<9x32x32xf32, #tpu.memory_space<vmem>>, vector<1x32x32xf32>
    %115 = vector.shape_cast %114 : vector<1x32x32xf32> to vector<32x32xf32>
    %cst_65 = arith.constant dense<0.000000e+00> : vector<32x4xf32>
    %116 = tpu.matmul %115, %113, %cst_65 {dimension_numbers = #tpu.dot_dimension_numbers<[1], [0], [0], [1], [0, 0, 1, 1], [], []>} : vector<32x32xf32>, vector<32x4xf32>, vector<32x4xf32> -> vector<32x4xf32>
    %117 = arith.addf %110, %116 : vector<32x4xf32>
    %118 = vector.extract_strided_slice %78 {offsets = [0, 4], sizes = [32, 4], strides = [1, 1]} : vector<32x10xf32> to vector<32x4xf32>
    %119 = vector.broadcast %1 : vector<1x4xf32> to vector<32x4xf32>
    %120 = arith.mulf %118, %119 : vector<32x4xf32>
    %c6_66 = arith.constant 6 : index
    %c0_67 = arith.constant 0 : index
    %c0_68 = arith.constant 0 : index
    %121 = vector.load %arg4[%c6_66, %c0_67, %c0_68] : memref<9x32x32xf32, #tpu.memory_space<vmem>>, vector<1x32x32xf32>
    %122 = vector.shape_cast %121 : vector<1x32x32xf32> to vector<32x32xf32>
    %cst_69 = arith.constant dense<0.000000e+00> : vector<32x4xf32>
    %123 = tpu.matmul %122, %120, %cst_69 {dimension_numbers = #tpu.dot_dimension_numbers<[1], [0], [0], [1], [0, 0, 1, 1], [], []>} : vector<32x32xf32>, vector<32x4xf32>, vector<32x4xf32> -> vector<32x4xf32>
    %124 = arith.addf %117, %123 : vector<32x4xf32>
    %125 = vector.extract_strided_slice %78 {offsets = [0, 5], sizes = [32, 4], strides = [1, 1]} : vector<32x10xf32> to vector<32x4xf32>
    %c7_70 = arith.constant 7 : index
    %c0_71 = arith.constant 0 : index
    %c0_72 = arith.constant 0 : index
    %126 = vector.load %arg4[%c7_70, %c0_71, %c0_72] : memref<9x32x32xf32, #tpu.memory_space<vmem>>, vector<1x32x32xf32>
    %127 = vector.shape_cast %126 : vector<1x32x32xf32> to vector<32x32xf32>
    %cst_73 = arith.constant dense<0.000000e+00> : vector<32x4xf32>
    %128 = tpu.matmul %127, %125, %cst_73 {dimension_numbers = #tpu.dot_dimension_numbers<[1], [0], [0], [1], [0, 0, 1, 1], [], []>} : vector<32x32xf32>, vector<32x4xf32>, vector<32x4xf32> -> vector<32x4xf32>
    %129 = arith.addf %124, %128 : vector<32x4xf32>
    %130 = vector.extract_strided_slice %78 {offsets = [0, 6], sizes = [32, 4], strides = [1, 1]} : vector<32x10xf32> to vector<32x4xf32>
    %131 = vector.broadcast %2 : vector<1x4xf32> to vector<32x4xf32>
    %132 = arith.mulf %130, %131 : vector<32x4xf32>
    %c8_74 = arith.constant 8 : index
    %c0_75 = arith.constant 0 : index
    %c0_76 = arith.constant 0 : index
    %133 = vector.load %arg4[%c8_74, %c0_75, %c0_76] : memref<9x32x32xf32, #tpu.memory_space<vmem>>, vector<1x32x32xf32>
    %134 = vector.shape_cast %133 : vector<1x32x32xf32> to vector<32x32xf32>
    %cst_77 = arith.constant dense<0.000000e+00> : vector<32x4xf32>
    %135 = tpu.matmul %134, %132, %cst_77 {dimension_numbers = #tpu.dot_dimension_numbers<[1], [0], [0], [1], [0, 0, 1, 1], [], []>} : vector<32x32xf32>, vector<32x4xf32>, vector<32x4xf32> -> vector<32x4xf32>
    %136 = arith.addf %129, %135 : vector<32x4xf32>
    %c0_78 = arith.constant 0 : index
    %c0_79 = arith.constant 0 : index
    %137 = vector.load %arg5[%c0_78, %c0_79] : memref<32x1xf32, #tpu.memory_space<vmem>>, vector<32x1xf32>
    %138 = vector.broadcast %137 : vector<32x1xf32> to vector<32x4xf32>
    %139 = arith.addf %136, %138 : vector<32x4xf32>
    %cst_80 = arith.constant 0.000000e+00 : f32
    %140 = vector.broadcast %cst_80 : f32 to vector<32x4xf32>
    %141 = arith.maximumf %139, %140 : vector<32x4xf32>
    %cst_81 = arith.constant 0.000000e+00 : f32
    %142 = vector.broadcast %cst_81 : f32 to vector<32x3xf32>
    %143 = tpu.concatenate %142, %141, %142 in 1 : vector<32x3xf32>, vector<32x4xf32>, vector<32x3xf32> -> vector<32x10xf32>
    %cst_82 = arith.constant 0.000000e+00 : f32
    %144 = vector.broadcast %cst_82 : f32 to vector<32x4xf32>
    %145 = vector.extract_strided_slice %143 {offsets = [0, 0], sizes = [32, 4], strides = [1, 1]} : vector<32x10xf32> to vector<32x4xf32>
    %146 = vector.broadcast %1 : vector<1x4xf32> to vector<32x4xf32>
    %147 = arith.mulf %145, %146 : vector<32x4xf32>
    %c0_83 = arith.constant 0 : index
    %c0_84 = arith.constant 0 : index
    %c0_85 = arith.constant 0 : index
    %148 = vector.load %arg6[%c0_83, %c0_84, %c0_85] : memref<9x32x32xf32, #tpu.memory_space<vmem>>, vector<1x32x32xf32>
    %149 = vector.shape_cast %148 : vector<1x32x32xf32> to vector<32x32xf32>
    %cst_86 = arith.constant dense<0.000000e+00> : vector<32x4xf32>
    %150 = tpu.matmul %149, %147, %cst_86 {dimension_numbers = #tpu.dot_dimension_numbers<[1], [0], [0], [1], [0, 0, 1, 1], [], []>} : vector<32x32xf32>, vector<32x4xf32>, vector<32x4xf32> -> vector<32x4xf32>
    %151 = arith.addf %144, %150 : vector<32x4xf32>
    %152 = vector.extract_strided_slice %143 {offsets = [0, 1], sizes = [32, 4], strides = [1, 1]} : vector<32x10xf32> to vector<32x4xf32>
    %c1_87 = arith.constant 1 : index
    %c0_88 = arith.constant 0 : index
    %c0_89 = arith.constant 0 : index
    %153 = vector.load %arg6[%c1_87, %c0_88, %c0_89] : memref<9x32x32xf32, #tpu.memory_space<vmem>>, vector<1x32x32xf32>
    %154 = vector.shape_cast %153 : vector<1x32x32xf32> to vector<32x32xf32>
    %cst_90 = arith.constant dense<0.000000e+00> : vector<32x4xf32>
    %155 = tpu.matmul %154, %152, %cst_90 {dimension_numbers = #tpu.dot_dimension_numbers<[1], [0], [0], [1], [0, 0, 1, 1], [], []>} : vector<32x32xf32>, vector<32x4xf32>, vector<32x4xf32> -> vector<32x4xf32>
    %156 = arith.addf %151, %155 : vector<32x4xf32>
    %157 = vector.extract_strided_slice %143 {offsets = [0, 2], sizes = [32, 4], strides = [1, 1]} : vector<32x10xf32> to vector<32x4xf32>
    %158 = vector.broadcast %2 : vector<1x4xf32> to vector<32x4xf32>
    %159 = arith.mulf %157, %158 : vector<32x4xf32>
    %c2_91 = arith.constant 2 : index
    %c0_92 = arith.constant 0 : index
    %c0_93 = arith.constant 0 : index
    %160 = vector.load %arg6[%c2_91, %c0_92, %c0_93] : memref<9x32x32xf32, #tpu.memory_space<vmem>>, vector<1x32x32xf32>
    %161 = vector.shape_cast %160 : vector<1x32x32xf32> to vector<32x32xf32>
    %cst_94 = arith.constant dense<0.000000e+00> : vector<32x4xf32>
    %162 = tpu.matmul %161, %159, %cst_94 {dimension_numbers = #tpu.dot_dimension_numbers<[1], [0], [0], [1], [0, 0, 1, 1], [], []>} : vector<32x32xf32>, vector<32x4xf32>, vector<32x4xf32> -> vector<32x4xf32>
    %163 = arith.addf %156, %162 : vector<32x4xf32>
    %164 = vector.extract_strided_slice %143 {offsets = [0, 2], sizes = [32, 4], strides = [1, 1]} : vector<32x10xf32> to vector<32x4xf32>
    %165 = vector.broadcast %1 : vector<1x4xf32> to vector<32x4xf32>
    %166 = arith.mulf %164, %165 : vector<32x4xf32>
    %c3_95 = arith.constant 3 : index
    %c0_96 = arith.constant 0 : index
    %c0_97 = arith.constant 0 : index
    %167 = vector.load %arg6[%c3_95, %c0_96, %c0_97] : memref<9x32x32xf32, #tpu.memory_space<vmem>>, vector<1x32x32xf32>
    %168 = vector.shape_cast %167 : vector<1x32x32xf32> to vector<32x32xf32>
    %cst_98 = arith.constant dense<0.000000e+00> : vector<32x4xf32>
    %169 = tpu.matmul %168, %166, %cst_98 {dimension_numbers = #tpu.dot_dimension_numbers<[1], [0], [0], [1], [0, 0, 1, 1], [], []>} : vector<32x32xf32>, vector<32x4xf32>, vector<32x4xf32> -> vector<32x4xf32>
    %170 = arith.addf %163, %169 : vector<32x4xf32>
    %171 = vector.extract_strided_slice %143 {offsets = [0, 3], sizes = [32, 4], strides = [1, 1]} : vector<32x10xf32> to vector<32x4xf32>
    %c4_99 = arith.constant 4 : index
    %c0_100 = arith.constant 0 : index
    %c0_101 = arith.constant 0 : index
    %172 = vector.load %arg6[%c4_99, %c0_100, %c0_101] : memref<9x32x32xf32, #tpu.memory_space<vmem>>, vector<1x32x32xf32>
    %173 = vector.shape_cast %172 : vector<1x32x32xf32> to vector<32x32xf32>
    %cst_102 = arith.constant dense<0.000000e+00> : vector<32x4xf32>
    %174 = tpu.matmul %173, %171, %cst_102 {dimension_numbers = #tpu.dot_dimension_numbers<[1], [0], [0], [1], [0, 0, 1, 1], [], []>} : vector<32x32xf32>, vector<32x4xf32>, vector<32x4xf32> -> vector<32x4xf32>
    %175 = arith.addf %170, %174 : vector<32x4xf32>
    %176 = vector.extract_strided_slice %143 {offsets = [0, 4], sizes = [32, 4], strides = [1, 1]} : vector<32x10xf32> to vector<32x4xf32>
    %177 = vector.broadcast %2 : vector<1x4xf32> to vector<32x4xf32>
    %178 = arith.mulf %176, %177 : vector<32x4xf32>
    %c5_103 = arith.constant 5 : index
    %c0_104 = arith.constant 0 : index
    %c0_105 = arith.constant 0 : index
    %179 = vector.load %arg6[%c5_103, %c0_104, %c0_105] : memref<9x32x32xf32, #tpu.memory_space<vmem>>, vector<1x32x32xf32>
    %180 = vector.shape_cast %179 : vector<1x32x32xf32> to vector<32x32xf32>
    %cst_106 = arith.constant dense<0.000000e+00> : vector<32x4xf32>
    %181 = tpu.matmul %180, %178, %cst_106 {dimension_numbers = #tpu.dot_dimension_numbers<[1], [0], [0], [1], [0, 0, 1, 1], [], []>} : vector<32x32xf32>, vector<32x4xf32>, vector<32x4xf32> -> vector<32x4xf32>
    %182 = arith.addf %175, %181 : vector<32x4xf32>
    %183 = vector.extract_strided_slice %143 {offsets = [0, 4], sizes = [32, 4], strides = [1, 1]} : vector<32x10xf32> to vector<32x4xf32>
    %184 = vector.broadcast %1 : vector<1x4xf32> to vector<32x4xf32>
    %185 = arith.mulf %183, %184 : vector<32x4xf32>
    %c6_107 = arith.constant 6 : index
    %c0_108 = arith.constant 0 : index
    %c0_109 = arith.constant 0 : index
    %186 = vector.load %arg6[%c6_107, %c0_108, %c0_109] : memref<9x32x32xf32, #tpu.memory_space<vmem>>, vector<1x32x32xf32>
    %187 = vector.shape_cast %186 : vector<1x32x32xf32> to vector<32x32xf32>
    %cst_110 = arith.constant dense<0.000000e+00> : vector<32x4xf32>
    %188 = tpu.matmul %187, %185, %cst_110 {dimension_numbers = #tpu.dot_dimension_numbers<[1], [0], [0], [1], [0, 0, 1, 1], [], []>} : vector<32x32xf32>, vector<32x4xf32>, vector<32x4xf32> -> vector<32x4xf32>
    %189 = arith.addf %182, %188 : vector<32x4xf32>
    %190 = vector.extract_strided_slice %143 {offsets = [0, 5], sizes = [32, 4], strides = [1, 1]} : vector<32x10xf32> to vector<32x4xf32>
    %c7_111 = arith.constant 7 : index
    %c0_112 = arith.constant 0 : index
    %c0_113 = arith.constant 0 : index
    %191 = vector.load %arg6[%c7_111, %c0_112, %c0_113] : memref<9x32x32xf32, #tpu.memory_space<vmem>>, vector<1x32x32xf32>
    %192 = vector.shape_cast %191 : vector<1x32x32xf32> to vector<32x32xf32>
    %cst_114 = arith.constant dense<0.000000e+00> : vector<32x4xf32>
    %193 = tpu.matmul %192, %190, %cst_114 {dimension_numbers = #tpu.dot_dimension_numbers<[1], [0], [0], [1], [0, 0, 1, 1], [], []>} : vector<32x32xf32>, vector<32x4xf32>, vector<32x4xf32> -> vector<32x4xf32>
    %194 = arith.addf %189, %193 : vector<32x4xf32>
    %195 = vector.extract_strided_slice %143 {offsets = [0, 6], sizes = [32, 4], strides = [1, 1]} : vector<32x10xf32> to vector<32x4xf32>
    %196 = vector.broadcast %2 : vector<1x4xf32> to vector<32x4xf32>
    %197 = arith.mulf %195, %196 : vector<32x4xf32>
    %c8_115 = arith.constant 8 : index
    %c0_116 = arith.constant 0 : index
    %c0_117 = arith.constant 0 : index
    %198 = vector.load %arg6[%c8_115, %c0_116, %c0_117] : memref<9x32x32xf32, #tpu.memory_space<vmem>>, vector<1x32x32xf32>
    %199 = vector.shape_cast %198 : vector<1x32x32xf32> to vector<32x32xf32>
    %cst_118 = arith.constant dense<0.000000e+00> : vector<32x4xf32>
    %200 = tpu.matmul %199, %197, %cst_118 {dimension_numbers = #tpu.dot_dimension_numbers<[1], [0], [0], [1], [0, 0, 1, 1], [], []>} : vector<32x32xf32>, vector<32x4xf32>, vector<32x4xf32> -> vector<32x4xf32>
    %201 = arith.addf %194, %200 : vector<32x4xf32>
    %c0_119 = arith.constant 0 : index
    %c0_120 = arith.constant 0 : index
    %202 = vector.load %arg7[%c0_119, %c0_120] : memref<32x1xf32, #tpu.memory_space<vmem>>, vector<32x1xf32>
    %203 = vector.broadcast %202 : vector<32x1xf32> to vector<32x4xf32>
    %204 = arith.addf %201, %203 : vector<32x4xf32>
    %205 = arith.addf %204, %76 : vector<32x4xf32>
    %cst_121 = arith.constant 0.000000e+00 : f32
    %206 = vector.broadcast %cst_121 : f32 to vector<32x4xf32>
    %207 = arith.maximumf %205, %206 : vector<32x4xf32>
    %c0_122 = arith.constant 0 : index
    %c0_123 = arith.constant 0 : index
    %c0_124 = arith.constant 0 : index
    %208 = vector.load %arg9[%c0_122, %c0_123, %c0_124] : memref<1x32x4xf32, #tpu.memory_space<vmem>>, vector<1x32x4xf32>
    %209 = vector.shape_cast %208 : vector<1x32x4xf32> to vector<32x4xf32>
    %210 = vector.shape_cast %207 : vector<32x4xf32> to vector<1x32x4xf32>
    tpu.vector_store %arg9[%c0_122, %c0_123, %c0_124], %210 {strides = array<i32>} : memref<1x32x4xf32, #tpu.memory_space<vmem>>, vector<1x32x4xf32>,
    return
  }
  func.func @transform_0(%arg0: i32) -> (i32, i32, i32) {
    %c0_i32 = arith.constant 0 : i32
    %c0_i32_0 = arith.constant 0 : i32
    %c0_i32_1 = arith.constant 0 : i32
    return %arg0, %c0_i32, %c0_i32_0 : i32, i32, i32
  }
  func.func @transform_1(%arg0: i32) -> (i32, i32, i32) {
    %c0_i32 = arith.constant 0 : i32
    %c0_i32_0 = arith.constant 0 : i32
    %c0_i32_1 = arith.constant 0 : i32
    %c0_i32_2 = arith.constant 0 : i32
    return %c0_i32, %c0_i32_0, %c0_i32_1 : i32, i32, i32
  }
  func.func @transform_2(%arg0: i32) -> (i32, i32) {
    %c0_i32 = arith.constant 0 : i32
    %c0_i32_0 = arith.constant 0 : i32
    %c0_i32_1 = arith.constant 0 : i32
    return %c0_i32, %c0_i32_0 : i32, i32
  }
  func.func @transform_3(%arg0: i32) -> (i32, i32, i32) {
    %c0_i32 = arith.constant 0 : i32
    %c0_i32_0 = arith.constant 0 : i32
    %c0_i32_1 = arith.constant 0 : i32
    %c0_i32_2 = arith.constant 0 : i32
    return %c0_i32, %c0_i32_0, %c0_i32_1 : i32, i32, i32
  }
  func.func @transform_4(%arg0: i32) -> (i32, i32) {
    %c0_i32 = arith.constant 0 : i32
    %c0_i32_0 = arith.constant 0 : i32
    %c0_i32_1 = arith.constant 0 : i32
    return %c0_i32, %c0_i32_0 : i32, i32
  }
  func.func @transform_5(%arg0: i32) -> (i32, i32, i32) {
    %c0_i32 = arith.constant 0 : i32
    %c0_i32_0 = arith.constant 0 : i32
    %c0_i32_1 = arith.constant 0 : i32
    %c0_i32_2 = arith.constant 0 : i32
    return %c0_i32, %c0_i32_0, %c0_i32_1 : i32, i32, i32
  }
  func.func @transform_6(%arg0: i32) -> (i32, i32) {
    %c0_i32 = arith.constant 0 : i32
    %c0_i32_0 = arith.constant 0 : i32
    %c0_i32_1 = arith.constant 0 : i32
    return %c0_i32, %c0_i32_0 : i32, i32
  }
  func.func @transform_7(%arg0: i32) -> (i32, i32) {
    %c0_i32 = arith.constant 0 : i32
    %c0_i32_0 = arith.constant 0 : i32
    %c0_i32_1 = arith.constant 0 : i32
    return %c0_i32, %c0_i32_0 : i32, i32
  }
  func.func @transform_8(%arg0: i32) -> (i32, i32, i32) {
    %c0_i32 = arith.constant 0 : i32
    %c0_i32_0 = arith.constant 0 : i32
    %c0_i32_1 = arith.constant 0 : i32
    return %arg0, %c0_i32, %c0_i32_0 : i32, i32, i32
  }
}

</mosaic_0001>

<bundles_post_ra>
// kernel: encoder_event_forward.5
= control target key start
LH: loop header
LB: loop body
LE: loop exit
PB: predicated region body
PF: predicated region fallthrough
CT: control target
= control target key end

     0   :  { %s3434_s27 = smov 0   ;;  %s3842_s0 = inlined_call_operand.vmem [shape: f32[2,32,64], index: 0, kind: input, shape index: {}]   ;;  %s3843_s1 = inlined_call_operand.vmem [shape: f32[9,16,8], index: 1, kind: input, shape index: {}]   ;;  %s3844_s2 = inlined_call_operand.vmem [shape: f32[16,1], index: 2, kind: input, shape index: {}]   ;;  %s3845_s3 = inlined_call_operand.vmem [shape: f32[9,16,16], index: 3, kind: input, shape index: {}]   ;;  %s3846_s4 = inlined_call_operand.vmem [shape: f32[16,1], index: 4, kind: input, shape index: {}]   ;;  %s3847_s5 = inlined_call_operand.vmem [shape: f32[9,16,16], index: 5, kind: input, shape index: {}]   ;;  %s3848_s6 = inlined_call_operand.vmem [shape: f32[16,1], index: 6, kind: input, shape index: {}]   ;;  %s3849_s7 = inlined_call_operand.vmem [shape: f32[2,64], index: 7, kind: input, shape index: {}]   ;;  %s3850_s8 = inlined_call_operand.vmem [shape: f32[2,16,64], index: 8, kind: output, shape index: {}]  }
   0x1 LB: > { %s2950_s28 = sadd.s32 4294967295, %s3371_s27   ;;  %p2954_p0 = scmp.ge.s32.totalorder %s3371_s27, 1  ;;  %s3371_s27 = sphi %s3434_s27, %s18_s27  }
   0x2   : > { %p262_p1 = scmp.lt.s32.totalorder %s3371_s27, 3 }
   0x4   : > { %p263_p2 = pnand %p2954_p0, %p262_p1 }
   0x5   : > { %p296_p3 = scmp.lt.s32.totalorder (!%p263_p2), %s2950_s28, 1  ;;  %s3373_s15 = smov (!%p263_p2), 9  }
   0x6   : > { %266 = sbr.rel (%p263_p2) target bundleno = 1288 (0x508), region = 52  ;;  %s3374_s16 = smov (!%p263_p2), 1  }
   0x7   : > { %s3375_s17 = smov (!%p263_p2), 8   ;;  %s3377_s20 = smov (!%p263_p2), 2  }
   0x8   : > { %s3378_s21 = smov (!%p263_p2), 10   ;;  %s3379_s22 = smov (!%p263_p2), 18  }
   0x9   : > { %s3380_s23 = smov (!%p263_p2), 16   ;;  %s3381_s26 = smov (!%p263_p2), 127  }
   0xa   : > { %s3382_s30 = smov (!%p263_p2), 119   ;;  %s3385_s18 = smov (!%p263_p2), 120  }
   0xb   : > { %vm328_vm0 = vcmask 64512   ;;  %v2959_v0 = vld [vmem:[%s3843_s1 + $0x10] sm:$0xff]  ;;  %v322_v1 = vld [vmem:[%s3843_s1] sm:$0xff]  ;;  %s3854_s28 = smov (!%p296_p3, %s2950_s28), 1  ;;  %v1114_v5 = vld [vmem:[%s3844_s2 + $0x8] sm:$0xff]  ;;  %v3376_v7 = vmov 0   ;;  %v317_v8 = vlaneseq }
   0xc   : > { %3170 = vmatprep.mubr.msk.f32.mxu0 %vm328_vm0, %v2959_v0  ;;  %3175 = vmatprep.mubr.msk.f32.mxu1 %vm328_vm0, %v322_v1  ;;  %s3067_s11 = sshll.u32 %s3854_s28, 5  ;;  %v1113_v6 = vld [vmem:[%s3844_s2] sm:$0xff]  ;;  %vm315_vm1 = vcmask 72704   ;;  %vm589_vm2 = vcmask 7168   ;;  %vm3497_vm3 = vmneg %vm328_vm0  ;;  %v2960_v21 = vld [vmem:[%s3843_s1 + $0x18] sm:$0xff]  ;;  %vm1139_vm4 = vcmask 596992  }
   0xd   : > { %s3456_s14 = scalar_lea.vmem %s3842_s0, %s3067_s11  ;;  %3363 = vset.pattern.permute.xlu1 %v3376_v7  ;;  %3364 = vset.pattern.permute.xlu0 %v3376_v7  ;;  %v3481_v9 = vshrl.u32 %v317_v8, 7  ;;  %v3487_v11 = vld [vmem:[%s3849_s7] sm:$0x3]  ;;  %v323_v22 = vld [vmem:[%s3843_s1 + $0x8] sm:$0xff]  ;;  %v2973_v25 = vld [vmem:[%s3843_s1 + $0x30] sm:$0xff]  ;;  %vm1157_vm5 = vcmask 130048  }
   0xe   : > { %v3459_v2 = vld [vmem:[%s3456_s14 + $0x18] sm:$0xff]  ;;  %v3462_v3 = vld [vmem:[%s3456_s14 + $0x8] sm:$0xff]  ;;  %v3468_v4 = vld [vmem:[%s3456_s14 + $0x10] sm:$0xff]  ;;  %s3383_s11 = smov 111   ;;  %s3387_s19 = smov 112   ;;  %vm2892_vm6 = vcmask 523264  }
   0xf   : > { %312 = vrot.lane.b32.xlu0 %v3459_v2, %s3373_s15  ;;  %586 = vrot.lane.b32.xlu1 %v3462_v3, %s3374_s16  ;;  %v319_v10 = vsub.s32 0, %v3481_v9  ;;  %v2967_v24 = vld [vmem:[%s3843_s1 + $0x20] sm:$0xff]  ;;  %v2968_v28 = vld [vmem:[%s3843_s1 + $0x28] sm:$0xff]  ;;  %v1322_v42 = vsub.s32 1, %v3481_v9  ;;  %s3068_s13 = sshll.u32 %s3854_s28, 4 }
  0x10   : > { %v307_v26 = vld [vmem:[%s3456_s14] sm:$0xff]  ;;  %v2974_v29 = vld [vmem:[%s3843_s1 + $0x38] sm:$0xff]  ;;  %v2981_v33 = vld [vmem:[%s3843_s1 + $0x50] sm:$0xff]  ;;  %s3386_s14 = smov 118  }
  0x11   : > { %v3490_v12 = vrot.slane %v3487_v11, %v319_v10  ;;  %v2977_v32 = vld [vmem:[%s3843_s1 + $0x40] sm:$0xff]  ;;  %v2978_v34 = vld [vmem:[%s3843_s1 + $0x48] sm:$0xff]  ;;  %v2982_v35 = vld [vmem:[%s3843_s1 + $0x58] sm:$0xff]  ;;  %v1323_v43 = vrot.slane %v3487_v11, %v1322_v42 }
  0x12   : > { %v2985_v36 = vld [vmem:[%s3843_s1 + $0x60] sm:$0xff]  ;;  %v2989_v37 = vld [vmem:[%s3843_s1 + $0x70] sm:$0xff]  ;;  %v2986_v38 = vld [vmem:[%s3843_s1 + $0x68] sm:$0xff] }
  0x13   : > { %325 = vrot.lane.b32.xlu0 %v3468_v4, %s3375_s17  ;;  %495 = vrot.lane.b32.xlu1 %v3459_v2, %s3375_s17  ;;  %v2990_v39 = vld [vmem:[%s3843_s1 + $0x78] sm:$0xff]  ;;  %v2993_v40 = vld [vmem:[%s3843_s1 + $0x80] sm:$0xff] }
  0x14   : > { %v2994_v41 = vld [vmem:[%s3843_s1 + $0x88] sm:$0xff] }
  0x17   : > { %850 = vrot.lane.b32.xlu0 %v3459_v2, %s3374_s16  ;;  %1122 = vperm.xlu1 %3363, %v1114_v5   ;;  %s3384_s16 = smov 126  }
  0x1b   : > { %1117 = vperm.xlu0 %3364, %v1113_v6  }
  0x1f   : > { %1325 = vrot.lane.b32.xlu0 %v1323_v43, %s3377_s20  ;;  %s3388_s20 = smov 110  }
  0x23   : > { %1616 = vrot.lane.b32.xlu0 %v1323_v43, %s3378_s21 }
  0x27   : > { %1906 = vrot.lane.b32.xlu0 %v1323_v43, %s3379_s22 }
  0x81   : > { %v313_v13 = vpop.permute.xlu0 %312  ;;  %v587_v14 = vpop.permute.xlu1 %586 }
  0x82   : > { %v316_v15 = vsel %vm315_vm1, 0.0, %v313_v13  ;;  %v590_v16 = vsel %vm589_vm2, 0.0, %v587_v14 }
  0x83   : > { %v591_v17 = vmul.f32 %v590_v16, %v3490_v12  ;;  %v321_v18 = vmul.f32 %v3490_v12, %v316_v15 }
  0x85   : > { %3173 = vmatprep.subr.mxu1 %v321_v18  ;;  %v326_v20 = vpop.permute.xlu0 %325  ;;  %v496_v23 = vpop.permute.xlu1 %495 }
  0x86   : > { %3168 = vmatprep.subr.msk.mxu0 %vm3497_vm3, %v326_v20  ;;  %3174 = vmatpush3.msra.mxu1 %v321_v18 }
  0x87   : > { %3169 = vmatpush3.msk.msra.mxu0 %vm3497_vm3, %v326_v20  ;;  %3183 = vmatprep.subr.mxu1 %v591_v17 }
  0x88   : > { %3171 = vmatmul.mubr.msk.f32.vlgmr.msra.gmra.mxu0 %vm328_vm0, %v2960_v21  ;;  %3176 = vmatmul.mubr.msk.f32.vlgmr.msra.gmra.mxu1 %vm328_vm0, %v323_v22 }
  0x89   : > { %3178 = vmatprep.subr.msk.mxu0 %vm3497_vm3, %v496_v23  ;;  %3184 = vmatpush3.msra.mxu1 %v591_v17  ;;  %v851_v27 = vpop.permute.xlu0 %850 }
  0x8a   : > { %3179 = vmatpush3.msk.msra.mxu0 %vm3497_vm3, %v496_v23  ;;  %3180 = vmatprep.mubr.msk.f32.mxu0 %vm328_vm0, %v2967_v24  ;;  %v853_v30 = vsel %vm589_vm2, 0.0, %v851_v27  ;;  %v2997_v23 = vld [vmem:[%s3845_s3 + $0x10] sm:$0xff] }
  0x8b   : > { %3185 = vmatprep.mubr.msk.f32.mxu1 %vm328_vm0, %v2973_v25  ;;  %v854_v31 = vmul.f32 %v853_v30, %v3490_v12  ;;  %3188 = vmatprep.subr.mxu0 %v307_v26 }
  0x8c   : > { %3181 = vmatmul.mubr.msk.f32.vlgmr.msra.gmra.mxu0 %vm328_vm0, %v2968_v28  ;;  %3186 = vmatmul.mubr.msk.f32.vlgmr.msra.gmra.mxu1 %vm328_vm0, %v2974_v29 }
  0x8d   : > { %3189 = vmatpush3.msra.mxu0 %v307_v26  ;;  %3193 = vmatprep.subr.mxu1 %v3462_v3  ;;  %v1144_v26 = vld [vmem:[%s3845_s3] sm:$0xff] }
  0x8e   : > { %3190 = vmatprep.mubr.msk.f32.mxu0 %vm328_vm0, %v2977_v32  ;;  %3194 = vmatpush3.msra.mxu1 %v3462_v3  ;;  %v3007_v32 = vld [vmem:[%s3845_s3 + $0x30] sm:$0xff] }
  0x8f   : > { %3195 = vmatprep.mubr.msk.f32.mxu1 %vm328_vm0, %v2981_v33  ;;  %3198 = vmatprep.subr.mxu0 %v854_v31 }
  0x90   : > { %3191 = vmatmul.mubr.msk.f32.vlgmr.msra.gmra.mxu0 %vm328_vm0, %v2978_v34  ;;  %3196 = vmatmul.mubr.msk.f32.vlgmr.msra.gmra.mxu1 %vm328_vm0, %v2982_v35 }
  0x91   : > { %3199 = vmatpush3.msra.mxu0 %v854_v31  ;;  %3203 = vmatprep.subr.mxu1 %v3468_v4  ;;  %v1145_v31 = vld [vmem:[%s3845_s3 + $0x8] sm:$0xff] }
  0x92   : > { %3200 = vmatprep.mubr.msk.f32.mxu0 %vm328_vm0, %v2985_v36  ;;  %3204 = vmatpush3.msra.mxu1 %v3468_v4  ;;  %v1123_v8 = vpop.permute.xlu1 %1122 }
  0x93   : > { %3205 = vmatprep.mubr.msk.f32.mxu1 %vm328_vm0, %v2989_v37  ;;  %3208 = vmatprep.subr.mxu0 %v3459_v2 }
  0x94   : > { %3201 = vmatmul.mubr.msk.f32.vlgmr.msra.gmra.mxu0 %vm328_vm0, %v2986_v38  ;;  %3206 = vmatmul.mubr.msk.f32.vlgmr.msra.gmra.mxu1 %vm328_vm0, %v2990_v39 }
  0x95   : > { %3209 = vmatpush3.msra.mxu0 %v3459_v2  ;;  %3210 = vmatprep.mubr.msk.f32.mxu0 %vm328_vm0, %v2993_v40 }
  0x96   : > { %v1118_v15 = vpop.permute.xlu0 %1117  ;;  %3217 = vmatprep.mubr.msk.f32.mxu1 %vm1157_vm5, %v2997_v23 }
  0x98   : > { %3211 = vmatmul.mubr.msk.f32.vlgmr.msra.gmra.mxu0 %vm328_vm0, %v2994_v41 }
  0x99   : > { %3224 = vmatprep.mubr.msk.f32.mxu0 %vm1157_vm5, %v1144_v26 }
  0x9a   : > { %v3624_v33 = vpop.permute.xlu0 %1325 }
  0x9e   : > { %v3637_v38 = vpop.permute.xlu0 %1616 }
 0x148   : > { %v3172_v44 = vpop.f32.mrf.mxu0  ;;  %v3177_v45 = vpop.f32.mrf.mxu1 }
 0x149   : > { %v492_v48 = vadd.f32 %v3177_v45, %v3172_v44  ;;  %v3647_v44 = vpop.permute.xlu0 %1906 }
 0x14a   : > { %v405_v46 = vpop.f32.mrf.mxu0  ;;  %v486_v47 = vpop.f32.mrf.mxu1 }
 0x14b   : > { %v487_v51 = vadd.f32 %v486_v47, %v405_v46  ;;  %v2006_v47 = vld [vmem:[%s3846_s4 + $0x8] sm:$0xff] }
 0x14c   : > { %v3182_v49 = vpop.f32.mrf.mxu0  ;;  %v3187_v50 = vpop.f32.mrf.mxu1 }
 0x14d   : > { %v584_v52 = vadd.f32 %v3182_v49, %v492_v48  ;;  %v2005_v49 = vld [vmem:[%s3846_s4] sm:$0xff] }
 0x14e   : > { %v574_v53 = vpop.f32.mrf.mxu0  ;;  %v667_v54 = vpop.f32.mrf.mxu1 }
 0x14f   : > { %v677_v55 = vadd.f32 %v3187_v50, %v584_v52  ;;  %v583_v56 = vadd.f32 %v574_v53, %v487_v51  ;;  %v2998_v53 = vld [vmem:[%s3845_s3 + $0x18] sm:$0xff] }
 0x150   : > { %v3192_v57 = vpop.f32.mrf.mxu0  ;;  %v3197_v58 = vpop.f32.mrf.mxu1 }
 0x151   : > { %v676_v59 = vadd.f32 %v667_v54, %v583_v56  ;;  %v763_v60 = vadd.f32 %v3192_v57, %v677_v55  ;;  %v3003_v54 = vld [vmem:[%s3845_s3 + $0x20] sm:$0xff] }
 0x152   : > { %v753_v61 = vpop.f32.mrf.mxu0  ;;  %v839_v62 = vpop.f32.mrf.mxu1 }
 0x153   : > { %v849_v63 = vadd.f32 %v3197_v58, %v763_v60  ;;  %v762_v0 = vadd.f32 %v753_v61, %v676_v59  ;;  %v3004_v61 = vld [vmem:[%s3845_s3 + $0x28] sm:$0xff] }
 0x154   : > { %v3202_v1 = vpop.f32.mrf.mxu0  ;;  %v3207_v2 = vpop.f32.mrf.mxu1 }
 0x155   : > { %v848_v3 = vadd.f32 %v839_v62, %v762_v0  ;;  %v940_v4 = vadd.f32 %v3202_v1, %v849_v63  ;;  %v3011_v62 = vld [vmem:[%s3845_s3 + $0x40] sm:$0xff]  ;;  %v3008_v1 = vld [vmem:[%s3845_s3 + $0x38] sm:$0xff] }
 0x156   : > { %v930_v5 = vpop.f32.mrf.mxu0  ;;  %v1016_v9 = vpop.f32.mrf.mxu1 }
 0x157   : > { %v1026_v6 = vadd.f32 %v3207_v2, %v940_v4  ;;  %v939_v7 = vadd.f32 %v930_v5, %v848_v3  ;;  %v3012_v2 = vld [vmem:[%s3845_s3 + $0x48] sm:$0xff]  ;;  %v3015_v3 = vld [vmem:[%s3845_s3 + $0x50] sm:$0xff] }
 0x158   : > { %v3212_v10 = vpop.f32.mrf.mxu0 }
 0x159   : > { %v1025_v11 = vadd.f32 %v1016_v9, %v939_v7  ;;  %v1112_v13 = vadd.f32 %v3212_v10, %v1026_v6  ;;  %v3016_v6 = vld [vmem:[%s3845_s3 + $0x58] sm:$0xff]  ;;  %v3019_v7 = vld [vmem:[%s3845_s3 + $0x60] sm:$0xff]  ;;  %v3023_v9 = vld [vmem:[%s3845_s3 + $0x70] sm:$0xff] }
 0x15a   : > { %v1102_v14 = vpop.f32.mrf.mxu0  ;;  %v3020_v10 = vld [vmem:[%s3845_s3 + $0x68] sm:$0xff] }
 0x15b   : > { %v3584_v16 = vadd.f32 %v1123_v8, %v1112_v13  ;;  %v1111_v17 = vadd.f32 %v1102_v14, %v1025_v11  ;;  %v3024_v11 = vld [vmem:[%s3845_s3 + $0x78] sm:$0xff]  ;;  %v3027_v13 = vld [vmem:[%s3845_s3 + $0x80] sm:$0xff] }
 0x15d   : > { %v1128_v18 = vmax.f32 %v3584_v16, 0.0  ;;  %v3587_v19 = vadd.f32 %v1118_v15, %v1111_v17  ;;  %v3028_v17 = vld [vmem:[%s3845_s3 + $0x88] sm:$0xff] }
 0x15f   : > { %1133 = vrot.lane.b32.xlu1 %v1128_v18, %s3373_s15  ;;  %v1127_v20 = vmax.f32 %v3587_v19, 0.0 }
 0x163   : > { %1131 = vrot.lane.b32.xlu1 %v1127_v20, %s3373_s15 }
 0x167   : > { %1425 = vrot.lane.b32.xlu1 %v3490_v12, %s3375_s17 }
 0x16b   : > { %1715 = vrot.lane.b32.xlu1 %v3490_v12, %s3380_s23 }
 0x1d1   : > { %v1134_v21 = vpop.permute.xlu1 %1133 }
 0x1d2   : > { %v1138_v22 = vsel %vm315_vm1, 0.0, %v1134_v21 }
 0x1d3   : > { %v1141_v24 = vsel %vm1139_vm4, %v1138_v22, 0.0 }
 0x1d4   : > { %1153 = vrot.lane.b32.xlu1 %v1141_v24, %s3381_s26  ;;  %v1143_v25 = vmul.f32 %v1141_v24, %v3490_v12  ;;  %v1329_v34 = vmul.f32 %v3624_v33, %v1141_v24  ;;  %v1620_v39 = vmul.f32 %v3637_v38, %v1141_v24  ;;  %v1910_v45 = vmul.f32 %v3647_v44, %v1141_v24 }
 0x1d5   : > { %v1132_v27 = vpop.permute.xlu1 %1131 }
 0x1d6   : > { %v1137_v28 = vsel %vm315_vm1, 0.0, %v1132_v27  ;;  %3220 = vmatprep.subr.mxu0 %v1143_v25 }
 0x1d7   : > { %v1140_v29 = vsel %vm1139_vm4, %v1137_v28, 0.0  ;;  %3221 = vmatpush3.msra.mxu0 %v1143_v25 }
 0x1d8   : > { %1529 = vrot.lane.b32.xlu1 %v1141_v24, %s3382_s30  ;;  %1151 = vrot.lane.b32.xlu0 %v1140_v29, %s3381_s26  ;;  %v1142_v30 = vmul.f32 %v1140_v29, %v3490_v12  ;;  %v1328_v36 = vmul.f32 %v3624_v33, %v1140_v29  ;;  %v1619_v42 = vmul.f32 %v3637_v38, %v1140_v29 }
 0x1d9   : > { %v3629_v35 = vpop.permute.xlu1 %1425  ;;  %v1909_v48 = vmul.f32 %v3647_v44, %v1140_v29 }
 0x1da   : > { %3222 = vmatprep.subr.mxu0 %v1142_v30  ;;  %v1429_v37 = vmul.f32 %v3629_v35, %v1141_v24  ;;  %v1428_v40 = vmul.f32 %v3629_v35, %v1140_v29 }
 0x1db   : > { %3223 = vmatpush3.msra.mxu0 %v1142_v30 }
 0x1dc   : > { %1819 = vrot.lane.b32.xlu1 %v1141_v24, %s3383_s11  ;;  %1527 = vrot.lane.b32.xlu0 %v1140_v29, %s3382_s30 }
 0x1dd   : > { %3225 = vmatmul.mubr.msk.f32.vlgmr.msra.gmra.mxu0 %vm1157_vm5, %v1145_v31  ;;  %v3641_v41 = vpop.permute.xlu1 %1715 }
 0x1de   : > { %3238 = vmatprep.mubr.msk.f32.mxu0 %vm1157_vm5, %v3007_v32  ;;  %v1719_v43 = vmul.f32 %v3641_v41, %v1141_v24  ;;  %v1718_v46 = vmul.f32 %v3641_v41, %v1140_v29 }
 0x1e0   : > { %1337 = vrot.lane.b32.xlu1 %v1329_v34, %s3384_s16  ;;  %1817 = vrot.lane.b32.xlu0 %v1140_v29, %s3383_s11 }
 0x1e4   : > { %1335 = vrot.lane.b32.xlu0 %v1328_v36, %s3384_s16  ;;  %1437 = vrot.lane.b32.xlu1 %v1429_v37, %s3385_s18 }
 0x1e8   : > { %1628 = vrot.lane.b32.xlu1 %v1620_v39, %s3386_s14  ;;  %1435 = vrot.lane.b32.xlu0 %v1428_v40, %s3385_s18 }
 0x1ec   : > { %1626 = vrot.lane.b32.xlu0 %v1619_v42, %s3386_s14  ;;  %1727 = vrot.lane.b32.xlu1 %v1719_v43, %s3387_s19 }
 0x1f0   : > { %1918 = vrot.lane.b32.xlu1 %v1910_v45, %s3388_s20  ;;  %1725 = vrot.lane.b32.xlu0 %v1718_v46, %s3387_s19 }
 0x1f4   : > { %2014 = vperm.xlu1 %3363, %v2006_v47   ;;  %1916 = vrot.lane.b32.xlu0 %v1909_v48, %s3388_s20 }
 0x1f8   : > { %2009 = vperm.xlu0 %3364, %v2005_v49  }
 0x246   : > { %v1154_v50 = vpop.permute.xlu1 %1153 }
 0x247   : > { %3213 = vmatprep.subr.mxu1 %v1154_v50 }
 0x248   : > { %3214 = vmatpush3.msra.mxu1 %v1154_v50 }
 0x24a   : > { %v1152_v51 = vpop.permute.xlu0 %1151  ;;  %v1530_v52 = vpop.permute.xlu1 %1529 }
 0x24b   : > { %3215 = vmatprep.subr.mxu1 %v1152_v51 }
 0x24c   : > { %3216 = vmatpush3.msra.mxu1 %v1152_v51 }
 0x24d   : > { %3218 = vmatmul.mubr.msk.f32.vlgmr.msra.gmra.mxu1 %vm1157_vm5, %v2998_v53 }
 0x24e   : > { %v1528_v55 = vpop.permute.xlu0 %1527  ;;  %v1820_v56 = vpop.permute.xlu1 %1819  ;;  %3231 = vmatprep.mubr.msk.f32.mxu1 %vm1157_vm5, %v3003_v54 }
 0x252   : > { %v1818_v57 = vpop.permute.xlu0 %1817  ;;  %v1338_v58 = vpop.permute.xlu1 %1337 }
 0x253   : > { %3227 = vmatprep.subr.mxu1 %v1338_v58 }
 0x254   : > { %3228 = vmatpush3.msra.mxu1 %v1338_v58 }
 0x256   : > { %v1336_v59 = vpop.permute.xlu0 %1335  ;;  %v1438_v60 = vpop.permute.xlu1 %1437 }
 0x257   : > { %3229 = vmatprep.subr.mxu1 %v1336_v59  ;;  %3234 = vmatprep.subr.mxu0 %v1438_v60 }
 0x258   : > { %3230 = vmatpush3.msra.mxu1 %v1336_v59  ;;  %3235 = vmatpush3.msra.mxu0 %v1438_v60 }
 0x259   : > { %3232 = vmatmul.mubr.msk.f32.vlgmr.msra.gmra.mxu1 %vm1157_vm5, %v3004_v61  ;;  %3241 = vmatprep.subr.mxu1 %v1530_v52 }
 0x25a   : > { %v1436_v63 = vpop.permute.xlu0 %1435  ;;  %3242 = vmatpush3.msra.mxu1 %v1530_v52  ;;  %v1629_v0 = vpop.permute.xlu1 %1628  ;;  %3245 = vmatprep.mubr.msk.f32.mxu1 %vm1157_vm5, %v3011_v62 }
 0x25b   : > { %3236 = vmatprep.subr.mxu0 %v1436_v63  ;;  %3243 = vmatprep.subr.mxu1 %v1528_v55 }
 0x25c   : > { %3237 = vmatpush3.msra.mxu0 %v1436_v63  ;;  %3244 = vmatpush3.msra.mxu1 %v1528_v55 }
 0x25d   : > { %3239 = vmatmul.mubr.msk.f32.vlgmr.msra.gmra.mxu0 %vm1157_vm5, %v3008_v1  ;;  %3248 = vmatprep.subr.mxu0 %v1629_v0 }
 0x25e   : > { %v1627_v4 = vpop.permute.xlu0 %1626  ;;  %3249 = vmatpush3.msra.mxu0 %v1629_v0  ;;  %v1728_v5 = vpop.permute.xlu1 %1727  ;;  %3246 = vmatmul.mubr.msk.f32.vlgmr.msra.gmra.mxu1 %vm1157_vm5, %v3012_v2 }
 0x25f   : > { %3250 = vmatprep.subr.mxu0 %v1627_v4  ;;  %3255 = vmatprep.subr.mxu1 %v1728_v5 }
 0x260   : > { %3251 = vmatpush3.msra.mxu0 %v1627_v4  ;;  %3252 = vmatprep.mubr.msk.f32.mxu0 %vm1157_vm5, %v3015_v3  ;;  %v3031_v4 = vld [vmem:[%s3847_s5 + $0x10] sm:$0xff] }
 0x261   : > { %3256 = vmatpush3.msra.mxu1 %v1728_v5  ;;  %3253 = vmatmul.mubr.msk.f32.vlgmr.msra.gmra.mxu0 %vm1157_vm5, %v3016_v6 }
 0x262   : > { %3262 = vmatprep.subr.mxu0 %v1820_v56  ;;  %v1726_v8 = vpop.permute.xlu0 %1725  ;;  %3259 = vmatprep.mubr.msk.f32.mxu1 %vm1157_vm5, %v3019_v7  ;;  %v1919_v14 = vpop.permute.xlu1 %1918 }
 0x263   : > { %3263 = vmatpush3.msra.mxu0 %v1820_v56  ;;  %3257 = vmatprep.subr.mxu1 %v1726_v8 }
 0x264   : > { %3264 = vmatprep.subr.mxu0 %v1818_v57  ;;  %3258 = vmatpush3.msra.mxu1 %v1726_v8 }
 0x265   : > { %3265 = vmatpush3.msra.mxu0 %v1818_v57  ;;  %3266 = vmatprep.mubr.msk.f32.mxu0 %vm1157_vm5, %v3023_v9  ;;  %v2035_v9 = vld [vmem:[%s3847_s5] sm:$0xff] }
 0x266   : > { %3260 = vmatmul.mubr.msk.f32.vlgmr.msra.gmra.mxu1 %vm1157_vm5, %v3020_v10  ;;  %3267 = vmatmul.mubr.msk.f32.vlgmr.msra.gmra.mxu0 %vm1157_vm5, %v3024_v11  ;;  %v1917_v15 = vpop.permute.xlu0 %1916 }
 0x267   : > { %3269 = vmatprep.subr.mxu1 %v1919_v14  ;;  %3273 = vmatprep.mubr.msk.f32.mxu1 %vm1157_vm5, %v3027_v13  ;;  %v2036_v13 = vld [vmem:[%s3847_s5 + $0x8] sm:$0xff] }
 0x268   : > { %3270 = vmatpush3.msra.mxu1 %v1919_v14  ;;  %3280 = vmatprep.mubr.msk.f32.mxu0 %vm1157_vm5, %v3031_v4  ;;  %v3041_v14 = vld [vmem:[%s3847_s5 + $0x30] sm:$0xff] }
 0x269   : > { %3271 = vmatprep.subr.mxu1 %v1917_v15 }
 0x26a   : > { %3272 = vmatpush3.msra.mxu1 %v1917_v15 }
 0x26b   : > { %3274 = vmatmul.mubr.msk.f32.vlgmr.msra.gmra.mxu1 %vm1157_vm5, %v3028_v17 }
 0x26c   : > { %3287 = vmatprep.mubr.msk.f32.mxu1 %vm1157_vm5, %v2035_v9 }
 0x26f   : > { %v2015_v58 = vpop.permute.xlu1 %2014 }
 0x273   : > { %v2010_v62 = vpop.permute.xlu0 %2009 }
 0x29d   : > { %v3226_v22 = vpop.f32.mrf.mxu0 }
 0x29f   : > { %v1311_v25 = vpop.f32.mrf.mxu0 }
 0x30d   : > { %v3219_v21 = vpop.f32.mrf.mxu1 }
 0x30e   : > { %v1317_v24 = vadd.f32 %v3226_v22, %v3219_v21 }
 0x30f   : > { %v1230_v23 = vpop.f32.mrf.mxu1 }
 0x310   : > { %v1312_v27 = vadd.f32 %v1311_v25, %v1230_v23 }
 0x319   : > { %v3233_v26 = vpop.f32.mrf.mxu1 }
 0x31a   : > { %v1423_v28 = vadd.f32 %v3233_v26, %v1317_v24  ;;  %v2875_v26 = vld [vmem:[%s3848_s6 + $0x8] sm:$0xff] }
 0x31b   : > { %v1413_v29 = vpop.f32.mrf.mxu1 }
 0x31c   : > { %v1422_v31 = vadd.f32 %v1413_v29, %v1312_v27 }
 0x31d   : > { %v3240_v30 = vpop.f32.mrf.mxu0 }
 0x31e   : > { %v1523_v32 = vadd.f32 %v3240_v30, %v1423_v28  ;;  %v3247_v34 = vpop.f32.mrf.mxu1  ;;  %v3037_v28 = vld [vmem:[%s3847_s5 + $0x20] sm:$0xff] }
 0x31f   : > { %v1513_v36 = vpop.f32.mrf.mxu0 }
 0x320   : > { %v1522_v37 = vadd.f32 %v1513_v36, %v1422_v31  ;;  %v1605_v39 = vpop.f32.mrf.mxu1  ;;  %v1615_v40 = vadd.f32 %v3247_v34, %v1523_v32 }
 0x321   : > { %v3254_v42 = vpop.f32.mrf.mxu0 }
 0x322   : > { %v1614_v43 = vadd.f32 %v1605_v39, %v1522_v37  ;;  %v1714_v46 = vadd.f32 %v3254_v42, %v1615_v40  ;;  %v3038_v37 = vld [vmem:[%s3847_s5 + $0x28] sm:$0xff]  ;;  %v3042_v42 = vld [vmem:[%s3847_s5 + $0x38] sm:$0xff] }
 0x323   : > { %v1704_v45 = vpop.f32.mrf.mxu0 }
 0x324   : > { %v1713_v49 = vadd.f32 %v1704_v45, %v1614_v43  ;;  %v3045_v43 = vld [vmem:[%s3847_s5 + $0x40] sm:$0xff] }
 0x326   : > { %v3261_v47 = vpop.f32.mrf.mxu1  ;;  %v3268_v48 = vpop.f32.mrf.mxu0 }
 0x327   : > { %v1813_v50 = vadd.f32 %v3261_v47, %v1714_v46  ;;  %v3046_v46 = vld [vmem:[%s3847_s5 + $0x48] sm:$0xff]  ;;  %v3049_v47 = vld [vmem:[%s3847_s5 + $0x50] sm:$0xff] }
 0x328   : > { %v1803_v51 = vpop.f32.mrf.mxu1  ;;  %v1895_v54 = vpop.f32.mrf.mxu0 }
 0x329   : > { %v1905_v52 = vadd.f32 %v3268_v48, %v1813_v50  ;;  %v1812_v53 = vadd.f32 %v1803_v51, %v1713_v49  ;;  %v3050_v49 = vld [vmem:[%s3847_s5 + $0x58] sm:$0xff] }
 0x32b   : > { %v1904_v55 = vadd.f32 %v1895_v54, %v1812_v53  ;;  %v3275_v56 = vpop.f32.mrf.mxu1  ;;  %v3054_v53 = vld [vmem:[%s3847_s5 + $0x68] sm:$0xff] }
 0x32c   : > { %v2004_v57 = vadd.f32 %v3275_v56, %v1905_v52  ;;  %v3053_v52 = vld [vmem:[%s3847_s5 + $0x60] sm:$0xff]  ;;  %v3058_v56 = vld [vmem:[%s3847_s5 + $0x78] sm:$0xff] }
 0x32d   : > { %v1994_v59 = vpop.f32.mrf.mxu1 }
 0x32e   : > { %v2018_v60 = vadd.f32 %v2015_v58, %v2004_v57  ;;  %v2003_v61 = vadd.f32 %v1994_v59, %v1904_v55  ;;  %v3057_v55 = vld [vmem:[%s3847_s5 + $0x70] sm:$0xff]  ;;  %v3061_v58 = vld [vmem:[%s3847_s5 + $0x80] sm:$0xff]  ;;  %v3062_v59 = vld [vmem:[%s3847_s5 + $0x88] sm:$0xff] }
 0x330   : > { %v2020_v63 = vmax.f32 %v2018_v60, 0.0  ;;  %v2017_v0 = vadd.f32 %v2010_v62, %v2003_v61 }
 0x332   : > { %v2019_v1 = vmax.f32 %v2017_v0, 0.0  ;;  %2025 = vrot.lane.b32.xlu1 %v2020_v63, %s3373_s15 }
 0x334   : > { %2023 = vrot.lane.b32.xlu0 %v2019_v1, %s3373_s15  ;;  %s305_s15 = scalar_lea.vmem %s3850_s8, %s3068_s13 }
 0x3a4   : > { %v2026_v2 = vpop.permute.xlu1 %2025 }
 0x3a5   : > { %v2030_v3 = vsel %vm315_vm1, 0.0, %v2026_v2 }
 0x3a6   : > { %v2032_v5 = vsel %vm1139_vm4, %v2030_v3, 0.0  ;;  %v2024_v6 = vpop.permute.xlu0 %2023 }
 0x3a7   : > { %v2029_v7 = vsel %vm315_vm1, 0.0, %v2024_v6  ;;  %2044 = vrot.lane.b32.xlu1 %v2032_v5, %s3381_s26  ;;  %v2034_v8 = vmul.f32 %v2032_v5, %v3490_v12  ;;  %v2307_v17 = vmul.f32 %v2032_v5, %v3629_v35  ;;  %v2495_v22 = vmul.f32 %v2032_v5, %v3637_v38 }
 0x3a8   : > { %v2031_v10 = vsel %vm1139_vm4, %v2029_v7, 0.0 }
 0x3a9   : > { %2042 = vrot.lane.b32.xlu0 %v2031_v10, %s3381_s26  ;;  %3283 = vmatprep.subr.mxu1 %v2034_v8  ;;  %v2033_v11 = vmul.f32 %v2031_v10, %v3490_v12  ;;  %v2211_v12 = vmul.f32 %v2032_v5, %v3624_v33  ;;  %v2210_v15 = vmul.f32 %v2031_v10, %v3624_v33 }
 0x3aa   : > { %3284 = vmatpush3.msra.mxu1 %v2034_v8  ;;  %v2306_v21 = vmul.f32 %v2031_v10, %v3629_v35  ;;  %v2494_v23 = vmul.f32 %v2031_v10, %v3637_v38  ;;  %v2591_v33 = vmul.f32 %v2032_v5, %v3641_v41  ;;  %v2590_v24 = vmul.f32 %v2031_v10, %v3641_v41  ;;  %v2874_v38 = vld [vmem:[%s3848_s6] sm:$0xff] }
 0x3ab   : > { %2407 = vrot.lane.b32.xlu1 %v2032_v5, %s3382_s30  ;;  %3285 = vmatprep.subr.mxu1 %v2033_v11  ;;  %v2779_v35 = vmul.f32 %v2032_v5, %v3647_v44  ;;  %v2778_v25 = vmul.f32 %v2031_v10, %v3647_v44  ;;  %v3032_v44 = vld [vmem:[%s3847_s5 + $0x18] sm:$0xff] }
 0x3ac   : > { %3286 = vmatpush3.msra.mxu1 %v2033_v11 }
 0x3ad   : > { %2405 = vrot.lane.b32.xlu0 %v2031_v10, %s3382_s30  ;;  %3288 = vmatmul.mubr.msk.f32.vlgmr.msra.gmra.mxu1 %vm1157_vm5, %v2036_v13 }
 0x3ae   : > { %3301 = vmatprep.mubr.msk.f32.mxu1 %vm1157_vm5, %v3041_v14 }
 0x3af   : > { %2691 = vrot.lane.b32.xlu1 %v2032_v5, %s3383_s11 }
 0x3b1   : > { %2689 = vrot.lane.b32.xlu0 %v2031_v10, %s3383_s11 }
 0x3b3   : > { %2219 = vrot.lane.b32.xlu1 %v2211_v12, %s3384_s16 }
 0x3b5   : > { %2217 = vrot.lane.b32.xlu0 %v2210_v15, %s3384_s16 }
 0x3b7   : > { %2315 = vrot.lane.b32.xlu1 %v2307_v17, %s3385_s18 }
 0x3b9   : > { %2313 = vrot.lane.b32.xlu0 %v2306_v21, %s3385_s18 }
 0x3bb   : > { %2503 = vrot.lane.b32.xlu1 %v2495_v22, %s3386_s14 }
 0x3bd   : > { %2501 = vrot.lane.b32.xlu0 %v2494_v23, %s3386_s14 }
 0x3bf   : > { %2599 = vrot.lane.b32.xlu1 %v2591_v33, %s3387_s19 }
 0x3c1   : > { %2597 = vrot.lane.b32.xlu0 %v2590_v24, %s3387_s19 }
 0x3c3   : > { %2787 = vrot.lane.b32.xlu1 %v2779_v35, %s3388_s20 }
 0x3c5   : > { %2785 = vrot.lane.b32.xlu0 %v2778_v25, %s3388_s20 }
 0x3c7   : > { %2878 = vperm.xlu1 %3363, %v2874_v38  }
 0x3c9   : > { %2883 = vperm.xlu0 %3364, %v2875_v26  }
 0x419   : > { %v2045_v41 = vpop.permute.xlu1 %2044 }
 0x41a   : > { %3276 = vmatprep.subr.mxu0 %v2045_v41 }
 0x41b   : > { %v2043_v27 = vpop.permute.xlu0 %2042  ;;  %3277 = vmatpush3.msra.mxu0 %v2045_v41 }
 0x41c   : > { %3278 = vmatprep.subr.mxu0 %v2043_v27 }
 0x41d   : > { %3279 = vmatpush3.msra.mxu0 %v2043_v27  ;;  %v2408_v29 = vpop.permute.xlu1 %2407 }
 0x41e   : > { %3281 = vmatmul.mubr.msk.f32.vlgmr.msra.gmra.mxu0 %vm1157_vm5, %v3032_v44 }
 0x41f   : > { %v2406_v30 = vpop.permute.xlu0 %2405  ;;  %3294 = vmatprep.mubr.msk.f32.mxu0 %vm1157_vm5, %v3037_v28 }
 0x421   : > { %v2692_v31 = vpop.permute.xlu1 %2691 }
 0x423   : > { %v2690_v32 = vpop.permute.xlu0 %2689 }
 0x425   : > { %v2220_v34 = vpop.permute.xlu1 %2219 }
 0x426   : > { %3290 = vmatprep.subr.mxu0 %v2220_v34 }
 0x427   : > { %v2218_v36 = vpop.permute.xlu0 %2217  ;;  %3291 = vmatpush3.msra.mxu0 %v2220_v34 }
 0x428   : > { %3292 = vmatprep.subr.mxu0 %v2218_v36 }
 0x429   : > { %3293 = vmatpush3.msra.mxu0 %v2218_v36  ;;  %v2316_v39 = vpop.permute.xlu1 %2315 }
 0x42a   : > { %3297 = vmatprep.subr.mxu1 %v2316_v39  ;;  %3304 = vmatprep.subr.mxu0 %v2408_v29 }
 0x42b   : > { %v2314_v40 = vpop.permute.xlu0 %2313  ;;  %3295 = vmatmul.mubr.msk.f32.vlgmr.msra.gmra.mxu0 %vm1157_vm5, %v3038_v37  ;;  %3298 = vmatpush3.msra.mxu1 %v2316_v39 }
 0x42c   : > { %3305 = vmatpush3.msra.mxu0 %v2408_v29  ;;  %3299 = vmatprep.subr.mxu1 %v2314_v40 }
 0x42d   : > { %3306 = vmatprep.subr.mxu0 %v2406_v30  ;;  %v2504_v45 = vpop.permute.xlu1 %2503  ;;  %3300 = vmatpush3.msra.mxu1 %v2314_v40 }
 0x42e   : > { %3307 = vmatpush3.msra.mxu0 %v2406_v30  ;;  %3302 = vmatmul.mubr.msk.f32.vlgmr.msra.gmra.mxu1 %vm1157_vm5, %v3042_v42 }
 0x42f   : > { %3311 = vmatprep.subr.mxu1 %v2504_v45  ;;  %v2502_v48 = vpop.permute.xlu0 %2501  ;;  %3308 = vmatprep.mubr.msk.f32.mxu0 %vm1157_vm5, %v3045_v43 }
 0x430   : > { %3312 = vmatpush3.msra.mxu1 %v2504_v45  ;;  %3309 = vmatmul.mubr.msk.f32.vlgmr.msra.gmra.mxu0 %vm1157_vm5, %v3046_v46 }
 0x431   : > { %3313 = vmatprep.subr.mxu1 %v2502_v48  ;;  %v2600_v50 = vpop.permute.xlu1 %2599  ;;  %3315 = vmatprep.mubr.msk.f32.mxu1 %vm1157_vm5, %v3049_v47 }
 0x432   : > { %3314 = vmatpush3.msra.mxu1 %v2502_v48  ;;  %3318 = vmatprep.subr.mxu0 %v2600_v50 }
 0x433   : > { %3316 = vmatmul.mubr.msk.f32.vlgmr.msra.gmra.mxu1 %vm1157_vm5, %v3050_v49  ;;  %3325 = vmatprep.subr.mxu1 %v2692_v31  ;;  %v2598_v51 = vpop.permute.xlu0 %2597 }
 0x434   : > { %3319 = vmatpush3.msra.mxu0 %v2600_v50  ;;  %3326 = vmatpush3.msra.mxu1 %v2692_v31 }
 0x435   : > { %3320 = vmatprep.subr.mxu0 %v2598_v51  ;;  %3327 = vmatprep.subr.mxu1 %v2690_v32  ;;  %v2788_v54 = vpop.permute.xlu1 %2787 }
 0x436   : > { %3321 = vmatpush3.msra.mxu0 %v2598_v51  ;;  %3322 = vmatprep.mubr.msk.f32.mxu0 %vm1157_vm5, %v3053_v52 }
 0x437   : > { %3328 = vmatpush3.msra.mxu1 %v2690_v32  ;;  %3323 = vmatmul.mubr.msk.f32.vlgmr.msra.gmra.mxu0 %vm1157_vm5, %v3054_v53  ;;  %v2786_v57 = vpop.permute.xlu0 %2785 }
 0x438   : > { %3329 = vmatprep.mubr.msk.f32.mxu1 %vm1157_vm5, %v3057_v55  ;;  %3332 = vmatprep.subr.mxu0 %v2788_v54 }
 0x439   : > { %3330 = vmatmul.mubr.msk.f32.vlgmr.msra.gmra.mxu1 %vm1157_vm5, %v3058_v56  ;;  %3333 = vmatpush3.msra.mxu0 %v2788_v54 }
 0x43a   : > { %3334 = vmatprep.subr.mxu0 %v2786_v57  ;;  %3336 = vmatprep.mubr.msk.f32.mxu0 %vm1157_vm5, %v3061_v58 }
 0x43b   : > { %3335 = vmatpush3.msra.mxu0 %v2786_v57 }
 0x43c   : > { %3337 = vmatmul.mubr.msk.f32.vlgmr.msra.gmra.mxu0 %vm1157_vm5, %v3062_v59 }
 0x442   : > { %v2879_v31 = vpop.permute.xlu1 %2878 }
 0x444   : > { %v2884_v44 = vpop.permute.xlu0 %2883 }
 0x46d   : > { %v3289_v61 = vpop.f32.mrf.mxu1 }
 0x46f   : > { %v2201_v0 = vpop.f32.mrf.mxu1 }
 0x4de   : > { %v3282_v60 = vpop.f32.mrf.mxu0 }
 0x4df   : > { %v2207_v63 = vadd.f32 %v3289_v61, %v3282_v60 }
 0x4e0   : > { %v2120_v62 = vpop.f32.mrf.mxu0 }
 0x4e1   : > { %v2202_v1 = vadd.f32 %v2201_v0, %v2120_v62 }
 0x4eb   : > { %v3296_v2 = vpop.f32.mrf.mxu0 }
 0x4ec   : > { %v2305_v3 = vadd.f32 %v3296_v2, %v2207_v63 }
 0x4ed   : > { %v2295_v4 = vpop.f32.mrf.mxu0 }
 0x4ee   : > { %v3303_v5 = vpop.f32.mrf.mxu1  ;;  %v2304_v6 = vadd.f32 %v2295_v4, %v2202_v1 }
 0x4ef   : > { %v2401_v7 = vadd.f32 %v3303_v5, %v2305_v3 }
 0x4f0   : > { %v2391_v8 = vpop.f32.mrf.mxu1  ;;  %v3310_v9 = vpop.f32.mrf.mxu0 }
 0x4f1   : > { %v2400_v10 = vadd.f32 %v2391_v8, %v2304_v6  ;;  %v2493_v11 = vadd.f32 %v3310_v9, %v2401_v7 }
 0x4f2   : > { %v2483_v13 = vpop.f32.mrf.mxu0 }
 0x4f3   : > { %v3317_v14 = vpop.f32.mrf.mxu1  ;;  %v2492_v12 = vadd.f32 %v2483_v13, %v2400_v10 }
 0x4f4   : > { %v2589_v17 = vadd.f32 %v3317_v14, %v2493_v11 }
 0x4f5   : > { %v2579_v15 = vpop.f32.mrf.mxu1 }
 0x4f6   : > { %v2588_v22 = vadd.f32 %v2579_v15, %v2492_v12 }
 0x4f7   : > { %v3324_v21 = vpop.f32.mrf.mxu0 }
 0x4f8   : > { %v2685_v23 = vadd.f32 %v3324_v21, %v2589_v17 }
 0x4f9   : > { %v3331_v33 = vpop.f32.mrf.mxu1  ;;  %v2675_v24 = vpop.f32.mrf.mxu0 }
 0x4fa   : > { %v2777_v35 = vadd.f32 %v3331_v33, %v2685_v23  ;;  %v2684_v25 = vadd.f32 %v2675_v24, %v2588_v22 }
 0x4fb   : > { %v2767_v38 = vpop.f32.mrf.mxu1 }
 0x4fc   : > { %v2776_v26 = vadd.f32 %v2767_v38, %v2684_v25  ;;  %v3338_v41 = vpop.f32.mrf.mxu0 }
 0x4fd   : > { %v2873_v27 = vadd.f32 %v3338_v41, %v2777_v35 }
 0x4fe   : > { %v2863_v28 = vpop.f32.mrf.mxu0 }
 0x4ff   : > { %v2887_v29 = vadd.f32 %v2884_v44, %v2873_v27  ;;  %v2872_v30 = vadd.f32 %v2863_v28, %v2776_v26 }
 0x501   : > { %v2889_v32 = vadd.f32 %v2887_v29, %v1128_v18  ;;  %v2886_v34 = vadd.f32 %v2879_v31, %v2872_v30 }
 0x503   : > { %v2891_v36 = vmax.f32 %v2889_v32, 0.0  ;;  %v2888_v37 = vadd.f32 %v2886_v34, %v1127_v20 }
 0x505   : > { %2894 = vst.msk [vmem:[%s305_s15 + $0x8] sm:$0xff] %vm2892_vm6, %v2891_v36  ;;  %v2890_v39 = vmax.f32 %v2888_v37, 0.0 }
 0x507   : > { %2893 = vst.msk [vmem:[%s305_s15] sm:$0xff] %vm2892_vm6, %v2890_v39 }
 0x508 PF: > { %s18_s27 = sadd.s32 1, %s3371_s27  }
 0x509   : > { %p15_p4 = scmp.ge.s32.totalorder %s18_s27, 4  }
 0x50b   :  { %17 = sbr.rel (!%p15_p4) target bundleno = 1 (0x1), region = 106 }

// kernel: encoder_event_forward.4
= control target key start
LH: loop header
LB: loop body
LE: loop exit
PB: predicated region body
PF: predicated region fallthrough
CT: control target
= control target key end

     0   :  { %s3164_s27 = smov 0   ;;  %s3630_s0 = inlined_call_operand.vmem [shape: f32[2,4,256], index: 0, kind: input, shape index: {}]   ;;  %s3631_s1 = inlined_call_operand.vmem [shape: f32[9,8,4], index: 1, kind: input, shape index: {}]   ;;  %s3632_s2 = inlined_call_operand.vmem [shape: f32[8,1], index: 2, kind: input, shape index: {}]   ;;  %s3633_s3 = inlined_call_operand.vmem [shape: f32[9,8,8], index: 3, kind: input, shape index: {}]   ;;  %s3634_s4 = inlined_call_operand.vmem [shape: f32[8,1], index: 4, kind: input, shape index: {}]   ;;  %s3635_s5 = inlined_call_operand.vmem [shape: f32[9,8,8], index: 5, kind: input, shape index: {}]   ;;  %s3636_s6 = inlined_call_operand.vmem [shape: f32[8,1], index: 6, kind: input, shape index: {}]   ;;  %s3637_s7 = inlined_call_operand.vmem [shape: f32[2,256], index: 7, kind: input, shape index: {}]   ;;  %s3638_s8 = inlined_call_operand.vmem [shape: f32[2,8,256], index: 8, kind: output, shape index: {}]  }
   0x1 LB: > { %s2986_s28 = sadd.s32 4294967295, %s3101_s27   ;;  %p2990_p0 = scmp.ge.s32.totalorder %s3101_s27, 1  ;;  %s3101_s27 = sphi %s3164_s27, %s18_s27  }
   0x2   : > { %p262_p1 = scmp.lt.s32.totalorder %s3101_s27, 3 }
   0x4   : > { %p263_p2 = pnand %p2990_p0, %p262_p1 }
   0x5   : > { %p296_p3 = scmp.lt.s32.totalorder (!%p263_p2), %s2986_s28, 1  ;;  %s3103_s13 = smov (!%p263_p2), 17  }
   0x6   : > { %266 = sbr.rel (%p263_p2) target bundleno = 1451 (0x5ab), region = 52  ;;  %s3104_s14 = smov (!%p263_p2), 2  }
   0x7   : > { %s3105_s15 = smov (!%p263_p2), 16   ;;  %s3106_s16 = smov (!%p263_p2), 18  }
   0x8   : > { %s3107_s17 = smov (!%p263_p2), 32   ;;  %s3108_s18 = smov (!%p263_p2), 34  }
   0x9   : > { %s3109_s19 = smov (!%p263_p2), 111   ;;  %s3110_s20 = smov (!%p263_p2), 127  }
   0xa   : > { %s3112_s21 = smov (!%p263_p2), 126   ;;  %s3113_s22 = smov (!%p263_p2), 95  }
   0xb   : > { %v322_v0 = vlaneseq  ;;  %s3640_s28 = smov (!%p296_p3, %s2986_s28), 1  ;;  %v306_v2 = vld [vmem:[%s3637_s7] sm:$0xf]  ;;  %vm314_vm0 = vcmask 138240   ;;  %vm360_vm1 = vcmask 1043456   ;;  %v3111_v29 = vmov 0.0  }
   0xc   : > { %s3066_s9 = sshll.u32 %s3640_s28, 3  ;;  %429 = vmatprep.mubr.f32.mxu0 %v3111_v29  ;;  %509 = vmatprep.mubr.f32.mxu1 %v3111_v29  ;;  %v342_v34 = vld [vmem:[%s3631_s1] sm:$0xff]  ;;  %s3114_s25 = smov 112   ;;  %vm356_vm2 = vcmask 31744   ;;  %vm540_vm3 = vcmask 15360   ;;  %vm648_vm4 = vcmask 130048  }
   0xd   : > { %v323_v1 = vshrl.u32 %v322_v0, 7  ;;  %s300_s12 = scalar_lea.vmem %s3630_s0, %s3066_s9  ;;  %s3115_s26 = smov 110   ;;  %vm845_vm5 = vcmask 146432   ;;  %vm951_vm6 = vcmask 261120   ;;  %vm1148_vm7 = vcmask 277504   ;;  %v1250_v57 = vld [vmem:[%s3632_s2] sm:$0xff] }
   0xe   : > { %v307_v6 = vld [vmem:[%s300_s12] sm:$0xff]  ;;  %s3116_s29 = smov 96   ;;  %v3117_v53 = vmov 0   ;;  %s3118_s30 = smov 94   ;;  %vm353_vm8 = vcmask 1039360   ;;  %v2995_v0 = vld [vmem:[%s3631_s1 + $0x8] sm:$0xff] }
   0xf   : > { %v518_v3 = vsub.s32 1, %v323_v1  ;;  %v522_v4 = vsub.s32 3, %v323_v1  ;;  %v324_v5 = vsub.s32 0, %v323_v1  ;;  %v328_v9 = vsub.s32 2, %v323_v1  ;;  %310 = vrot.lane.b32.xlu0 %v307_v6, %s3103_s13  ;;  %3093 = vset.pattern.permute.xlu1 %v3117_v53 }
  0x10   : > { %v309_v10 = vcombine.high %v307_v6, %v307_v6  ;;  %3092 = vset.pattern.permute.xlu0 %v3117_v53  ;;  %vm559_vm9 = vcmask 1031168   ;;  %vm758_vm10 = vcmask 908288   ;;  %vm667_vm11 = vcmask 916480  }
  0x11   : > { %v519_v7 = vrot.slane %v306_v2, %v518_v3  ;;  %v523_v8 = vrot.slane %v306_v2, %v522_v4  ;;  %v325_v11 = vrot.slane %v306_v2, %v324_v5  ;;  %v329_v14 = vrot.slane %v306_v2, %v328_v9 }
  0x12   : > { %vm970_vm12 = vcmask 785408   ;;  %vm864_vm13 = vcmask 900096   ;;  %vm1061_vm14 = vcmask 777216   ;;  %vm1167_vm15 = vcmask 769024  }
  0x13   : > { %v529_v12 = vrot.slane %v519_v7, %v518_v3  ;;  %v533_v13 = vrot.slane %v523_v8, %v518_v3  ;;  %312 = vrot.lane.b32.xlu0 %v309_v10, %s3103_s13  ;;  %v3183_v15 = vrot.slane %v325_v11, %v324_v5  ;;  %v3185_v16 = vrot.slane %v329_v14, %v324_v5 }
  0x15   : > { %536 = vrot.lane.b32.xlu1 %v529_v12, %s3104_s14 }
  0x17   : > { %644 = vrot.lane.b32.xlu0 %v3183_v15, %s3105_s15 }
  0x19   : > { %538 = vrot.lane.b32.xlu1 %v533_v13, %s3104_s14 }
  0x1b   : > { %841 = vrot.lane.b32.xlu0 %v529_v12, %s3106_s16 }
  0x1d   : > { %646 = vrot.lane.b32.xlu1 %v3185_v16, %s3105_s15 }
  0x1f   : > { %947 = vrot.lane.b32.xlu0 %v3183_v15, %s3107_s17 }
  0x21   : > { %843 = vrot.lane.b32.xlu1 %v533_v13, %s3106_s16 }
  0x23   : > { %1144 = vrot.lane.b32.xlu0 %v529_v12, %s3108_s18 }
  0x25   : > { %949 = vrot.lane.b32.xlu1 %v3185_v16, %s3107_s17 }
  0x29   : > { %1146 = vrot.lane.b32.xlu1 %v533_v13, %s3108_s18 }
  0x81   : > { %v311_v17 = vpop.permute.xlu0 %310 }
  0x82   : > { %v3192_v18 = vsel %vm314_vm0, 0.0, %v311_v17 }
  0x83   : > { %752 = vrot.lane.b32.xlu1 %v3192_v18, %s3109_s19  ;;  %347 = vrot.lane.b32.xlu0 %v3192_v18, %s3110_s20  ;;  %v340_v25 = vmul.f32 %v3183_v15, %v3192_v18 }
  0x85   : > { %v313_v20 = vpop.permute.xlu0 %312 }
  0x86   : > { %v3201_v21 = vsel %vm314_vm0, %v311_v17, %v313_v20  ;;  %v3204_v22 = vsel %vm314_vm0, %v313_v20, 0.0  ;;  %v3002_v17 = vld [vmem:[%s3631_s1 + $0x10] sm:$0xff] }
  0x87   : > { %v3198_v19 = vpop.permute.xlu1 %536  ;;  %351 = vrot.lane.b32.xlu1 %v3204_v22, %s3110_s20  ;;  %349 = vrot.lane.b32.xlu0 %v3201_v21, %s3110_s20  ;;  %v341_v23 = vmul.f32 %v3185_v16, %v3201_v21 }
  0x88   : > { %v545_v28 = vmul.f32 %v3198_v19, %v3192_v18 }
  0x89   : > { %2999 = vmatprep.subr.msk.mxu1 %vm360_vm1, %v341_v23  ;;  %v3217_v26 = vpop.permute.xlu0 %644 }
  0x8a   : > { %3000 = vmatpush1.msk.msra.mxu1 %vm360_vm1, %v340_v25  ;;  %v653_v36 = vmul.f32 %v3217_v26, %v3192_v18 }
  0x8b   : > { %v3212_v24 = vpop.permute.xlu1 %538  ;;  %754 = vrot.lane.b32.xlu1 %v3201_v21, %s3109_s19  ;;  %756 = vrot.lane.b32.xlu0 %v3204_v22, %s3109_s19 }
  0x8c   : > { %v547_v32 = vmul.f32 %v3212_v24, %v3204_v22  ;;  %3001 = vmatmul.mubr.msk.f32.vlgmr.msra.gmra.mxu1 %vm356_vm2, %v342_v34  ;;  %v3262_v40 = vsel %vm540_vm3, %v3198_v19, %v3212_v24 }
  0x8d   : > { %v3233_v30 = vpop.permute.xlu0 %841  ;;  %741 = vmatprep.mubr.f32.mxu1 %v3111_v29  ;;  %v546_v43 = vmul.f32 %v3262_v40, %v3201_v21 }
  0x8e   : > { %v850_v38 = vmul.f32 %v3233_v30, %v3192_v18 }
  0x8f   : > { %v3224_v27 = vpop.permute.xlu1 %646  ;;  %553 = vrot.lane.b32.xlu1 %v545_v28, %s3112_s21  ;;  %1057 = vrot.lane.b32.xlu0 %v3201_v21, %s3113_s22  ;;  %v3006_v28 = vld [vmem:[%s3631_s1 + $0x18] sm:$0xff] }
  0x90   : > { %v655_v31 = vmul.f32 %v3224_v27, %v3204_v22  ;;  %v3274_v44 = vsel %vm648_vm4, %v3217_v26, %v3224_v27 }
  0x91   : > { %v3252_v37 = vpop.permute.xlu0 %947  ;;  %v654_v45 = vmul.f32 %v3274_v44, %v3201_v21 }
  0x92   : > { %v956_v39 = vmul.f32 %v3252_v37, %v3192_v18 }
  0x93   : > { %v3239_v33 = vpop.permute.xlu1 %843  ;;  %665 = vrot.lane.b32.xlu1 %v655_v31, %s3114_s25  ;;  %557 = vrot.lane.b32.xlu0 %v547_v32, %s3112_s21  ;;  %v3010_v31 = vld [vmem:[%s3631_s1 + $0x20] sm:$0xff] }
  0x94   : > { %v852_v35 = vmul.f32 %v3239_v33, %v3204_v22  ;;  %v3282_v46 = vsel %vm845_vm5, %v3233_v30, %v3239_v33 }
  0x95   : > { %v3293_v49 = vpop.permute.xlu0 %1144  ;;  %v851_v50 = vmul.f32 %v3282_v46, %v3201_v21 }
  0x96   : > { %v1153_v56 = vmul.f32 %v3293_v49, %v3192_v18 }
  0x97   : > { %862 = vrot.lane.b32.xlu1 %v852_v35, %s3115_s26  ;;  %661 = vrot.lane.b32.xlu0 %v653_v36, %s3114_s25  ;;  %v3264_v41 = vpop.permute.xlu1 %949 }
  0x98   : > { %v958_v42 = vmul.f32 %v3264_v41, %v3204_v22  ;;  %v3286_v47 = vsel %vm951_vm6, %v3252_v37, %v3264_v41 }
  0x99   : > { %v957_v51 = vmul.f32 %v3286_v47, %v3201_v21 }
  0x9b   : > { %858 = vrot.lane.b32.xlu0 %v850_v38, %s3115_s26  ;;  %964 = vrot.lane.b32.xlu1 %v956_v39, %s3116_s29  ;;  %v3288_v48 = vpop.permute.xlu1 %1146 }
  0x9c   : > { %v3301_v52 = vsel %vm1148_vm7, %v3293_v49, %v3288_v48  ;;  %v1155_v55 = vmul.f32 %v3288_v48, %v3204_v22 }
  0x9d   : > { %v1154_v54 = vmul.f32 %v3301_v52, %v3201_v21 }
  0x9f   : > { %968 = vrot.lane.b32.xlu0 %v958_v42, %s3116_s29  ;;  %555 = vrot.lane.b32.xlu1 %v546_v43, %s3112_s21  ;;  %v3014_v42 = vld [vmem:[%s3631_s1 + $0x28] sm:$0xff] }
  0xa3   : > { %663 = vrot.lane.b32.xlu0 %v654_v45, %s3114_s25  ;;  %1059 = vrot.lane.b32.xlu1 %v3204_v22, %s3113_s22  ;;  %v3018_v45 = vld [vmem:[%s3631_s1 + $0x30] sm:$0xff] }
  0xa7   : > { %860 = vrot.lane.b32.xlu0 %v851_v50, %s3115_s26  ;;  %966 = vrot.lane.b32.xlu1 %v957_v51, %s3116_s29 }
  0xab   : > { %1055 = vrot.lane.b32.xlu0 %v3192_v18, %s3113_s22  ;;  %1163 = vrot.lane.b32.xlu1 %v1154_v54, %s3118_s30  ;;  %v3022_v54 = vld [vmem:[%s3631_s1 + $0x38] sm:$0xff] }
  0xaf   : > { %1165 = vrot.lane.b32.xlu0 %v1155_v55, %s3118_s30  ;;  %1161 = vrot.lane.b32.xlu1 %v1153_v56, %s3118_s30 }
  0xb3   : > { %1253 = vperm.xlu0 %3092, %v1250_v57  }
  0xf5   : > { %v753_v58 = vpop.permute.xlu1 %752  ;;  %v348_v59 = vpop.permute.xlu0 %347 }
  0xf9   : > { %v352_v60 = vpop.permute.xlu1 %351  ;;  %v350_v61 = vpop.permute.xlu0 %349 }
  0xfa   : > { %v355_v62 = vsel %vm353_vm8, %v350_v61, %v352_v60  ;;  %v354_v63 = vsel %vm353_vm8, %v348_v59, %v350_v61  ;;  %v3026_v59 = vld [vmem:[%s3631_s1 + $0x40] sm:$0xff] }
  0xfb   : > { %2996 = vmatprep.subr.msk.mxu0 %vm360_vm1, %v355_v62 }
  0xfc   : > { %2997 = vmatpush1.msk.msra.mxu0 %vm360_vm1, %v354_v63 }
  0xfd   : > { %v755_v1 = vpop.permute.xlu1 %754  ;;  %v757_v2 = vpop.permute.xlu0 %756  ;;  %2998 = vmatmul.mubr.msk.f32.vlgmr.msra.gmra.mxu0 %vm356_vm2, %v2995_v0 }
  0xfe   : > { %633 = vmatprep.mubr.f32.mxu0 %v3111_v29  ;;  %v760_v18 = vsel %vm758_vm10, %v755_v1, %v757_v2  ;;  %v759_v20 = vsel %vm758_vm10, %v753_v58, %v755_v1 }
 0x101   : > { %v554_v3 = vpop.permute.xlu1 %553  ;;  %v1058_v4 = vpop.permute.xlu0 %1057 }
 0x105   : > { %v666_v5 = vpop.permute.xlu1 %665  ;;  %v558_v6 = vpop.permute.xlu0 %557 }
 0x109   : > { %v863_v7 = vpop.permute.xlu1 %862  ;;  %v662_v8 = vpop.permute.xlu0 %661 }
 0x10d   : > { %v965_v9 = vpop.permute.xlu1 %964  ;;  %v859_v10 = vpop.permute.xlu0 %858 }
 0x111   : > { %v556_v11 = vpop.permute.xlu1 %555  ;;  %v969_v12 = vpop.permute.xlu0 %968 }
 0x112   : > { %v560_v13 = vsel %vm559_vm9, %v554_v3, %v556_v11  ;;  %v561_v14 = vsel %vm559_vm9, %v556_v11, %v558_v6 }
 0x113   : > { %3003 = vmatprep.subr.msk.mxu0 %vm360_vm1, %v561_v14 }
 0x114   : > { %3004 = vmatpush1.msk.msra.mxu0 %vm360_vm1, %v560_v13 }
 0x115   : > { %v1060_v21 = vpop.permute.xlu1 %1059  ;;  %3005 = vmatmul.mubr.msk.f32.vlgmr.msra.gmra.mxu0 %vm356_vm2, %v3002_v17  ;;  %3011 = vmatprep.subr.msk.mxu0 %vm360_vm1, %v760_v18  ;;  %v664_v22 = vpop.permute.xlu0 %663 }
 0x116   : > { %v668_v23 = vsel %vm667_vm11, %v662_v8, %v664_v22  ;;  %v669_v25 = vsel %vm667_vm11, %v664_v22, %v666_v5  ;;  %3012 = vmatpush1.msk.msra.mxu0 %vm360_vm1, %v759_v20  ;;  %832 = vmatprep.mubr.f32.mxu0 %v3111_v29  ;;  %v1063_v43 = vsel %vm1061_vm14, %v1058_v4, %v1060_v21 }
 0x117   : > { %3007 = vmatprep.subr.msk.mxu1 %vm360_vm1, %v669_v25 }
 0x118   : > { %3008 = vmatpush1.msk.msra.mxu1 %vm360_vm1, %v668_v23 }
 0x119   : > { %v967_v32 = vpop.permute.xlu1 %966  ;;  %3009 = vmatmul.mubr.msk.f32.vlgmr.msra.gmra.mxu1 %vm356_vm2, %v3006_v28  ;;  %v861_v34 = vpop.permute.xlu0 %860  ;;  %3013 = vmatmul.mubr.msk.f32.vlgmr.msra.gmra.mxu0 %vm356_vm2, %v3010_v31 }
 0x11a   : > { %v971_v35 = vsel %vm970_vm12, %v965_v9, %v967_v32  ;;  %v972_v36 = vsel %vm970_vm12, %v967_v32, %v969_v12  ;;  %v865_v38 = vsel %vm864_vm13, %v859_v10, %v861_v34  ;;  %v866_v39 = vsel %vm864_vm13, %v861_v34, %v863_v7  ;;  %938 = vmatprep.mubr.f32.mxu1 %v3111_v29 }
 0x11b   : > { %3015 = vmatprep.subr.msk.mxu1 %vm360_vm1, %v866_v39  ;;  %3019 = vmatprep.subr.msk.mxu0 %vm360_vm1, %v972_v36 }
 0x11c   : > { %3016 = vmatpush1.msk.msra.mxu1 %vm360_vm1, %v865_v38  ;;  %3020 = vmatpush1.msk.msra.mxu0 %vm360_vm1, %v971_v35 }
 0x11d   : > { %v1164_v50 = vpop.permute.xlu1 %1163  ;;  %3017 = vmatmul.mubr.msk.f32.vlgmr.msra.gmra.mxu1 %vm356_vm2, %v3014_v42  ;;  %3023 = vmatprep.subr.msk.mxu1 %vm360_vm1, %v1063_v43  ;;  %v1056_v51 = vpop.permute.xlu0 %1055 }
 0x11e   : > { %v1062_v53 = vsel %vm1061_vm14, %v1056_v51, %v1058_v4  ;;  %1044 = vmatprep.mubr.f32.mxu0 %v3111_v29  ;;  %1135 = vmatprep.mubr.f32.mxu1 %v3111_v29 }
 0x11f   : > { %3021 = vmatmul.mubr.msk.f32.vlgmr.msra.gmra.mxu0 %vm356_vm2, %v3018_v45  ;;  %3024 = vmatpush1.msk.msra.mxu1 %vm360_vm1, %v1062_v53 }
 0x120   : > { %1241 = vmatprep.mubr.f32.mxu0 %v3111_v29 }
 0x121   : > { %v1162_v55 = vpop.permute.xlu1 %1161  ;;  %3025 = vmatmul.mubr.msk.f32.vlgmr.msra.gmra.mxu1 %vm356_vm2, %v3022_v54  ;;  %v1166_v56 = vpop.permute.xlu0 %1165 }
 0x122   : > { %v1168_v57 = vsel %vm1167_vm15, %v1162_v55, %v1164_v50  ;;  %v1169_v58 = vsel %vm1167_vm15, %v1164_v50, %v1166_v56  ;;  %1357 = vmatprep.mubr.f32.mxu1 %v3111_v29 }
 0x123   : > { %3027 = vmatprep.subr.msk.mxu0 %vm360_vm1, %v1169_v58 }
 0x124   : > { %3028 = vmatpush1.msk.msra.mxu0 %vm360_vm1, %v1168_v57  ;;  %vm1289_vm1 = vcmask 64512  }
 0x125   : > { %3029 = vmatmul.mubr.msk.f32.vlgmr.msra.gmra.mxu0 %vm356_vm2, %v3026_v59 }
 0x126   : > { %1431 = vmatprep.mubr.f32.mxu0 %v3111_v29 }
 0x12e   : > { %v1254_v35 = vpop.permute.xlu0 %1253 }
 0x14c   : > { %v511_v61 = vpop.f32.mrf.mxu1 }
 0x14e   : > { %v513_v0 = vpop.f32.mrf.mxu1 }
 0x1bd   : > { %v431_v60 = vpop.f32.mrf.mxu0 }
 0x1be   : > { %v512_v63 = vadd.f32 %v511_v61, %v431_v60 }
 0x1bf   : > { %v433_v62 = vpop.f32.mrf.mxu0 }
 0x1c0   : > { %v514_v2 = vadd.f32 %v513_v0, %v433_v62 }
 0x1d5   : > { %v635_v1 = vpop.f32.mrf.mxu0 }
 0x1d6   : > { %v640_v3 = vadd.f32 %v635_v1, %v512_v63  ;;  %v1274_v63 = vld [vmem:[%s3633_s3] sm:$0xff] }
 0x1d7   : > { %v637_v4 = vpop.f32.mrf.mxu0 }
 0x1d8   : > { %v641_v7 = vadd.f32 %v637_v4, %v514_v2 }
 0x1d9   : > { %v743_v5 = vpop.f32.mrf.mxu1  ;;  %v834_v6 = vpop.f32.mrf.mxu0 }
 0x1da   : > { %v748_v8 = vadd.f32 %v743_v5, %v640_v3 }
 0x1db   : > { %v745_v9 = vpop.f32.mrf.mxu1  ;;  %v836_v10 = vpop.f32.mrf.mxu0 }
 0x1dc   : > { %v749_v11 = vadd.f32 %v745_v9, %v641_v7  ;;  %v839_v12 = vadd.f32 %v834_v6, %v748_v8 }
 0x1dd   : > { %v940_v13 = vpop.f32.mrf.mxu1 }
 0x1de   : > { %v840_v14 = vadd.f32 %v836_v10, %v749_v11  ;;  %v945_v17 = vadd.f32 %v940_v13, %v839_v12  ;;  %v2084_v12 = vld [vmem:[%s3634_s4] sm:$0xff] }
 0x1df   : > { %v942_v18 = vpop.f32.mrf.mxu1  ;;  %v1046_v20 = vpop.f32.mrf.mxu0 }
 0x1e0   : > { %v946_v21 = vadd.f32 %v942_v18, %v840_v14  ;;  %v1051_v22 = vadd.f32 %v1046_v20, %v945_v17 }
 0x1e1   : > { %v1048_v23 = vpop.f32.mrf.mxu0  ;;  %v1137_v25 = vpop.f32.mrf.mxu1 }
 0x1e2   : > { %v1052_v28 = vadd.f32 %v1048_v23, %v946_v21  ;;  %v1142_v32 = vadd.f32 %v1137_v25, %v1051_v22  ;;  %v3030_v25 = vld [vmem:[%s3633_s3 + $0x8] sm:$0xff] }
 0x1e3   : > { %v1139_v31 = vpop.f32.mrf.mxu1 }
 0x1e4   : > { %v1143_v36 = vadd.f32 %v1139_v31, %v1052_v28 }
 0x1e5   : > { %v1243_v34 = vpop.f32.mrf.mxu0 }
 0x1e6   : > { %v1248_v38 = vadd.f32 %v1243_v34, %v1142_v32 }
 0x1e7   : > { %v1245_v39 = vpop.f32.mrf.mxu0 }
 0x1e8   : > { %v1249_v42 = vadd.f32 %v1245_v39, %v1143_v36  ;;  %v3391_v43 = vadd.f32 %v1254_v35, %v1248_v38 }
 0x1ea   : > { %v3393_v45 = vadd.f32 %v1254_v35, %v1249_v42  ;;  %v1258_v50 = vmax.f32 %v3391_v43, 0.0 }
 0x1ec   : > { %1262 = vrot.lane.b32.xlu1 %v1258_v50, %s3103_s13  ;;  %v1259_v51 = vmax.f32 %v3393_v45, 0.0 }
 0x1f0   : > { %1264 = vrot.lane.b32.xlu1 %v1259_v51, %s3103_s13 }
 0x25e   : > { %v1263_v53 = vpop.permute.xlu1 %1262 }
 0x25f   : > { %v1270_v54 = vsel %vm314_vm0, 0.0, %v1263_v53 }
 0x260   : > { %1628 = vrot.lane.b32.xlu1 %v1270_v54, %s3109_s19  ;;  %1279 = vrot.lane.b32.xlu0 %v1270_v54, %s3110_s20  ;;  %v1272_v59 = vmul.f32 %v1270_v54, %v3183_v15  ;;  %v1438_v60 = vmul.f32 %v1270_v54, %v3198_v19  ;;  %v1532_v61 = vmul.f32 %v1270_v54, %v3217_v26 }
 0x261   : > { %v1808_v62 = vmul.f32 %v1270_v54, %v3252_v37  ;;  %v1714_v0 = vmul.f32 %v1270_v54, %v3233_v30  ;;  %v1990_v11 = vmul.f32 %v1270_v54, %v3293_v49 }
 0x262   : > { %v1265_v55 = vpop.permute.xlu1 %1264 }
 0x263   : > { %v1266_v56 = vsel %vm314_vm0, %v1263_v53, %v1265_v55  ;;  %v1271_v57 = vsel %vm314_vm0, %v1265_v55, 0.0  ;;  %v3033_v55 = vld [vmem:[%s3633_s3 + $0x10] sm:$0xff] }
 0x264   : > { %1904 = vrot.lane.b32.xlu0 %v1270_v54, %s3113_s22  ;;  %1283 = vrot.lane.b32.xlu1 %v1271_v57, %s3110_s20  ;;  %v1273_v58 = vmul.f32 %v1266_v56, %v3185_v16  ;;  %v1439_v1 = vmul.f32 %v1266_v56, %v3262_v40  ;;  %v1440_v2 = vmul.f32 %v1271_v57, %v3212_v24 }
 0x265   : > { %v1534_v3 = vmul.f32 %v1271_v57, %v3224_v27  ;;  %v1533_v4 = vmul.f32 %v1266_v56, %v3274_v44  ;;  %v1716_v5 = vmul.f32 %v1271_v57, %v3239_v33  ;;  %v1715_v6 = vmul.f32 %v1266_v56, %v3282_v46 }
 0x266   : > { %1397 = vmatprep.subr.mxu0 %v1273_v58  ;;  %v1809_v7 = vmul.f32 %v1266_v56, %v3286_v47  ;;  %v1810_v8 = vmul.f32 %v1271_v57, %v3264_v41  ;;  %v1991_v9 = vmul.f32 %v1266_v56, %v3301_v52  ;;  %v1992_v10 = vmul.f32 %v1271_v57, %v3288_v48 }
 0x267   : > { %1398 = vmatpush1.msra.mxu0 %v1272_v59 }
 0x268   : > { %1446 = vrot.lane.b32.xlu1 %v1438_v60, %s3112_s21  ;;  %1281 = vrot.lane.b32.xlu0 %v1266_v56, %s3110_s20 }
 0x269   : > { %3032 = vmatmul.mubr.msk.f32.vlgmr.msra.gmra.mxu0 %vm1289_vm1, %v1274_v63  ;;  %v3035_v63 = vld [vmem:[%s3633_s3 + $0x18] sm:$0xff] }
 0x26a   : > { %1617 = vmatprep.mubr.f32.mxu0 %v3111_v29 }
 0x26c   : > { %1630 = vrot.lane.b32.xlu1 %v1266_v56, %s3109_s19  ;;  %1540 = vrot.lane.b32.xlu0 %v1532_v61, %s3114_s25 }
 0x270   : > { %1816 = vrot.lane.b32.xlu1 %v1808_v62, %s3116_s29  ;;  %1632 = vrot.lane.b32.xlu0 %v1271_v57, %s3109_s19 }
 0x274   : > { %1908 = vrot.lane.b32.xlu1 %v1271_v57, %s3113_s22  ;;  %1722 = vrot.lane.b32.xlu0 %v1714_v0, %s3115_s26  ;;  %v3037_v0 = vld [vmem:[%s3633_s3 + $0x20] sm:$0xff] }
 0x278   : > { %1906 = vrot.lane.b32.xlu0 %v1266_v56, %s3113_s22  ;;  %1448 = vrot.lane.b32.xlu1 %v1439_v1, %s3112_s21 }
 0x27c   : > { %1450 = vrot.lane.b32.xlu0 %v1440_v2, %s3112_s21  ;;  %1544 = vrot.lane.b32.xlu1 %v1534_v3, %s3114_s25 }
 0x280   : > { %1542 = vrot.lane.b32.xlu0 %v1533_v4, %s3114_s25  ;;  %1726 = vrot.lane.b32.xlu1 %v1716_v5, %s3115_s26  ;;  %v3039_v5 = vld [vmem:[%s3633_s3 + $0x28] sm:$0xff] }
 0x284   : > { %1724 = vrot.lane.b32.xlu0 %v1715_v6, %s3115_s26  ;;  %1818 = vrot.lane.b32.xlu1 %v1809_v7, %s3116_s29 }
 0x288   : > { %1820 = vrot.lane.b32.xlu0 %v1810_v8, %s3116_s29  ;;  %2000 = vrot.lane.b32.xlu1 %v1991_v9, %s3118_s30 }
 0x28c   : > { %2002 = vrot.lane.b32.xlu0 %v1992_v10, %s3118_s30  ;;  %1998 = vrot.lane.b32.xlu1 %v1990_v11, %s3118_s30  ;;  %v3041_v11 = vld [vmem:[%s3633_s3 + $0x30] sm:$0xff] }
 0x290   : > { %2087 = vperm.xlu0 %3092, %v2084_v12   ;;  %v3043_v12 = vld [vmem:[%s3633_s3 + $0x38] sm:$0xff] }
 0x2d2   : > { %v1280_v13 = vpop.permute.xlu0 %1279  ;;  %v1629_v14 = vpop.permute.xlu1 %1628 }
 0x2d6   : > { %v1905_v17 = vpop.permute.xlu0 %1904  ;;  %v1284_v18 = vpop.permute.xlu1 %1283 }
 0x2da   : > { %v1282_v20 = vpop.permute.xlu0 %1281  ;;  %v1447_v21 = vpop.permute.xlu1 %1446 }
 0x2db   : > { %v1285_v22 = vsel %vm353_vm8, %v1280_v13, %v1282_v20  ;;  %v1286_v23 = vsel %vm353_vm8, %v1282_v20, %v1284_v18 }
 0x2dc   : > { %1323 = vmatprep.subr.mxu1 %v1286_v23 }
 0x2dd   : > { %1324 = vmatpush1.msra.mxu1 %v1285_v22 }
 0x2de   : > { %v1541_v28 = vpop.permute.xlu0 %1540  ;;  %v1631_v31 = vpop.permute.xlu1 %1630  ;;  %3031 = vmatmul.mubr.msk.f32.vlgmr.msra.gmra.mxu1 %vm1289_vm1, %v3030_v25 }
 0x2df   : > { %1523 = vmatprep.mubr.f32.mxu1 %v3111_v29  ;;  %v1634_v58 = vsel %vm758_vm10, %v1629_v14, %v1631_v31 }
 0x2e2   : > { %v1633_v32 = vpop.permute.xlu0 %1632  ;;  %v1817_v34 = vpop.permute.xlu1 %1816 }
 0x2e3   : > { %v1635_v57 = vsel %vm758_vm10, %v1631_v31, %v1633_v32 }
 0x2e6   : > { %v1723_v35 = vpop.permute.xlu0 %1722  ;;  %v1909_v36 = vpop.permute.xlu1 %1908 }
 0x2ea   : > { %v1907_v38 = vpop.permute.xlu0 %1906  ;;  %v1449_v39 = vpop.permute.xlu1 %1448 }
 0x2eb   : > { %v1452_v56 = vsel %vm559_vm9, %v1447_v21, %v1449_v39  ;;  %v1911_v6 = vsel %vm1061_vm14, %v1907_v38, %v1909_v36  ;;  %v1910_v7 = vsel %vm1061_vm14, %v1905_v17, %v1907_v38  ;;  %v3045_v21 = vld [vmem:[%s3633_s3 + $0x40] sm:$0xff] }
 0x2ee   : > { %v1451_v42 = vpop.permute.xlu0 %1450  ;;  %v1545_v53 = vpop.permute.xlu1 %1544 }
 0x2ef   : > { %v1453_v54 = vsel %vm559_vm9, %v1449_v39, %v1451_v42 }
 0x2f0   : > { %1489 = vmatprep.subr.mxu1 %v1453_v54 }
 0x2f1   : > { %1490 = vmatpush1.msra.mxu1 %v1452_v56 }
 0x2f2   : > { %v1543_v59 = vpop.permute.xlu0 %1542  ;;  %3034 = vmatmul.mubr.msk.f32.vlgmr.msra.gmra.mxu1 %vm1289_vm1, %v3033_v55  ;;  %1671 = vmatprep.subr.mxu1 %v1635_v57  ;;  %v1727_v60 = vpop.permute.xlu1 %1726 }
 0x2f3   : > { %v1546_v61 = vsel %vm667_vm11, %v1541_v28, %v1543_v59  ;;  %1672 = vmatpush1.msra.mxu1 %v1634_v58  ;;  %v1547_v62 = vsel %vm667_vm11, %v1543_v59, %v1545_v53  ;;  %1705 = vmatprep.mubr.f32.mxu1 %v3111_v29 }
 0x2f4   : > { %1583 = vmatprep.subr.mxu0 %v1547_v62 }
 0x2f5   : > { %1584 = vmatpush1.msra.mxu0 %v1546_v61 }
 0x2f6   : > { %v1725_v1 = vpop.permute.xlu0 %1724  ;;  %3036 = vmatmul.mubr.msk.f32.vlgmr.msra.gmra.mxu0 %vm1289_vm1, %v3035_v63  ;;  %v1819_v2 = vpop.permute.xlu1 %1818  ;;  %3038 = vmatmul.mubr.msk.f32.vlgmr.msra.gmra.mxu1 %vm1289_vm1, %v3037_v0 }
 0x2f7   : > { %v1728_v3 = vsel %vm864_vm13, %v1723_v35, %v1725_v1  ;;  %v1729_v4 = vsel %vm864_vm13, %v1725_v1, %v1727_v60  ;;  %1799 = vmatprep.mubr.f32.mxu0 %v3111_v29  ;;  %1893 = vmatprep.mubr.f32.mxu1 %v3111_v29  ;;  %v1822_v13 = vsel %vm970_vm12, %v1817_v34, %v1819_v2 }
 0x2f8   : > { %1765 = vmatprep.subr.mxu0 %v1729_v4 }
 0x2f9   : > { %1766 = vmatpush1.msra.mxu0 %v1728_v3 }
 0x2fa   : > { %v1821_v8 = vpop.permute.xlu0 %1820  ;;  %3040 = vmatmul.mubr.msk.f32.vlgmr.msra.gmra.mxu0 %vm1289_vm1, %v3039_v5  ;;  %1947 = vmatprep.subr.mxu0 %v1911_v6  ;;  %v2001_v9 = vpop.permute.xlu1 %2000 }
 0x2fb   : > { %1948 = vmatpush1.msra.mxu0 %v1910_v7  ;;  %v1823_v10 = vsel %vm970_vm12, %v1819_v2, %v1821_v8  ;;  %1981 = vmatprep.mubr.f32.mxu0 %v3111_v29 }
 0x2fc   : > { %1859 = vmatprep.subr.mxu1 %v1823_v10 }
 0x2fd   : > { %1860 = vmatpush1.msra.mxu1 %v1822_v13 }
 0x2fe   : > { %v2003_v14 = vpop.permute.xlu0 %2002  ;;  %3042 = vmatmul.mubr.msk.f32.vlgmr.msra.gmra.mxu1 %vm1289_vm1, %v3041_v11  ;;  %3044 = vmatmul.mubr.msk.f32.vlgmr.msra.gmra.mxu0 %vm1289_vm1, %v3043_v12  ;;  %v1999_v17 = vpop.permute.xlu1 %1998 }
 0x2ff   : > { %v2004_v18 = vsel %vm1167_vm15, %v1999_v17, %v2001_v9  ;;  %v2005_v20 = vsel %vm1167_vm15, %v2001_v9, %v2003_v14  ;;  %2075 = vmatprep.mubr.f32.mxu1 %v3111_v29  ;;  %2190 = vmatprep.mubr.f32.mxu0 %v3111_v29 }
 0x300   : > { %2041 = vmatprep.subr.mxu1 %v2005_v20 }
 0x301   : > { %2042 = vmatpush1.msra.mxu1 %v2004_v18 }
 0x302   : > { %3046 = vmatmul.mubr.msk.f32.vlgmr.msra.gmra.mxu1 %vm1289_vm1, %v3045_v21 }
 0x303   : > { %2264 = vmatprep.mubr.f32.mxu1 %v3111_v29 }
 0x30b   : > { %v2088_v9 = vpop.permute.xlu0 %2087 }
 0x329   : > { %v1433_v23 = vpop.f32.mrf.mxu0 }
 0x32b   : > { %v1435_v31 = vpop.f32.mrf.mxu0 }
 0x39e   : > { %v1359_v22 = vpop.f32.mrf.mxu1 }
 0x39f   : > { %v1434_v28 = vadd.f32 %v1433_v23, %v1359_v22 }
 0x3a0   : > { %v1361_v25 = vpop.f32.mrf.mxu1 }
 0x3a1   : > { %v1436_v34 = vadd.f32 %v1435_v31, %v1361_v25 }
 0x3b2   : > { %v1525_v32 = vpop.f32.mrf.mxu1 }
 0x3b3   : > { %v1530_v35 = vadd.f32 %v1525_v32, %v1434_v28 }
 0x3b4   : > { %v1527_v36 = vpop.f32.mrf.mxu1 }
 0x3b5   : > { %v1531_v42 = vadd.f32 %v1527_v36, %v1436_v34 }
 0x3b6   : > { %v1619_v38 = vpop.f32.mrf.mxu0  ;;  %v1707_v39 = vpop.f32.mrf.mxu1 }
 0x3b7   : > { %v1624_v53 = vadd.f32 %v1619_v38, %v1530_v35 }
 0x3b8   : > { %v1621_v54 = vpop.f32.mrf.mxu0  ;;  %v1709_v55 = vpop.f32.mrf.mxu1 }
 0x3b9   : > { %v1625_v56 = vadd.f32 %v1621_v54, %v1531_v42  ;;  %v1712_v57 = vadd.f32 %v1707_v39, %v1624_v53 }
 0x3ba   : > { %v1801_v58 = vpop.f32.mrf.mxu0 }
 0x3bb   : > { %v1713_v59 = vadd.f32 %v1709_v55, %v1625_v56  ;;  %v1806_v61 = vadd.f32 %v1801_v58, %v1712_v57 }
 0x3bc   : > { %v1803_v60 = vpop.f32.mrf.mxu0 }
 0x3bd   : > { %v1807_v0 = vadd.f32 %v1803_v60, %v1713_v59 }
 0x3be   : > { %v1895_v62 = vpop.f32.mrf.mxu1  ;;  %v1983_v63 = vpop.f32.mrf.mxu0 }
 0x3bf   : > { %v1900_v1 = vadd.f32 %v1895_v62, %v1806_v61 }
 0x3c0   : > { %v1897_v2 = vpop.f32.mrf.mxu1  ;;  %v1985_v5 = vpop.f32.mrf.mxu0 }
 0x3c1   : > { %v1988_v3 = vadd.f32 %v1983_v63, %v1900_v1  ;;  %v1901_v4 = vadd.f32 %v1897_v2, %v1807_v0  ;;  %v3050_v1 = vld [vmem:[%s3635_s5 + $0x10] sm:$0xff] }
 0x3c2   : > { %v2077_v6 = vpop.f32.mrf.mxu1 }
 0x3c3   : > { %v1989_v7 = vadd.f32 %v1985_v5, %v1901_v4  ;;  %v2082_v8 = vadd.f32 %v2077_v6, %v1988_v3 }
 0x3c4   : > { %v2079_v10 = vpop.f32.mrf.mxu1 }
 0x3c5   : > { %v2090_v11 = vadd.f32 %v2088_v9, %v2082_v8  ;;  %v2083_v12 = vadd.f32 %v2079_v10, %v1989_v7  ;;  %v3054_v10 = vld [vmem:[%s3635_s5 + $0x20] sm:$0xff] }
 0x3c7   : > { %v2092_v13 = vmax.f32 %v2090_v11, 0.0  ;;  %v2091_v14 = vadd.f32 %v2088_v9, %v2083_v12  ;;  %v3052_v9 = vld [vmem:[%s3635_s5 + $0x18] sm:$0xff] }
 0x3c9   : > { %v2093_v17 = vmax.f32 %v2091_v14, 0.0  ;;  %2096 = vrot.lane.b32.xlu1 %v2092_v13, %s3103_s13 }
 0x3cb   : > { %2098 = vrot.lane.b32.xlu0 %v2093_v17, %s3103_s13  ;;  %v3056_v17 = vld [vmem:[%s3635_s5 + $0x28] sm:$0xff]  ;;  %s3067_s13 = sshll.u32 %s3640_s28, 4 }
 0x43b   : > { %v2097_v18 = vpop.permute.xlu1 %2096 }
 0x43c   : > { %v2104_v20 = vsel %vm314_vm0, 0.0, %v2097_v18 }
 0x43d   : > { %2113 = vrot.lane.b32.xlu1 %v2104_v20, %s3110_s20  ;;  %2461 = vrot.lane.b32.xlu0 %v2104_v20, %s3109_s19  ;;  %v2099_v21 = vpop.permute.xlu0 %2098  ;;  %v2106_v28 = vmul.f32 %v2104_v20, %v3183_v15  ;;  %v2271_v31 = vmul.f32 %v2104_v20, %v3198_v19  ;;  %v2365_v32 = vmul.f32 %v2104_v20, %v3217_v26  ;;  %v2108_v19 = vld [vmem:[%s3635_s5] sm:$0xff] }
 0x43e   : > { %v2100_v22 = vsel %vm314_vm0, %v2097_v18, %v2099_v21  ;;  %v2105_v25 = vsel %vm314_vm0, %v2099_v21, 0.0  ;;  %v2547_v15 = vmul.f32 %v2104_v20, %v3233_v30 }
 0x43f   : > { %v2107_v23 = vmul.f32 %v2100_v22, %v3185_v16  ;;  %v2641_v16 = vmul.f32 %v2104_v20, %v3252_v37  ;;  %v2272_v26 = vmul.f32 %v2100_v22, %v3262_v40  ;;  %v2273_v30 = vmul.f32 %v2105_v25, %v3212_v24 }
 0x440   : > { %v2367_v37 = vmul.f32 %v2105_v25, %v3224_v27  ;;  %v2366_v34 = vmul.f32 %v2100_v22, %v3274_v44  ;;  %v2549_v35 = vmul.f32 %v2105_v25, %v3239_v33  ;;  %v2548_v40 = vmul.f32 %v2100_v22, %v3282_v46  ;;  %v2917_v46 = vld [vmem:[%s3636_s6] sm:$0xff] }
 0x441   : > { %2737 = vrot.lane.b32.xlu1 %v2104_v20, %s3113_s22  ;;  %2117 = vrot.lane.b32.xlu0 %v2105_v25, %s3110_s20  ;;  %v2642_v36 = vmul.f32 %v2100_v22, %v3286_v47  ;;  %v2643_v24 = vmul.f32 %v2105_v25, %v3264_v41  ;;  %v2824_v27 = vmul.f32 %v2100_v22, %v3301_v52 }
 0x442   : > { %2230 = vmatprep.subr.mxu1 %v2107_v23  ;;  %v2825_v33 = vmul.f32 %v2105_v25, %v3288_v48  ;;  %v2823_v44 = vmul.f32 %v2104_v20, %v3293_v49  ;;  %v3047_v49 = vld [vmem:[%s3635_s5 + $0x8] sm:$0xff] }
 0x443   : > { %2231 = vmatpush1.msra.mxu1 %v2106_v28  ;;  %v3060_v28 = vld [vmem:[%s3635_s5 + $0x38] sm:$0xff] }
 0x444   : > { %3049 = vmatmul.mubr.msk.f32.vlgmr.msra.gmra.mxu1 %vm1289_vm1, %v2108_v19 }
 0x445   : > { %2279 = vrot.lane.b32.xlu0 %v2271_v31, %s3112_s21  ;;  %2115 = vrot.lane.b32.xlu1 %v2100_v22, %s3110_s20  ;;  %s305_s20 = scalar_lea.vmem %s3638_s8, %s3067_s13 }
 0x446   : > { %2450 = vmatprep.mubr.f32.mxu1 %v3111_v29 }
 0x449   : > { %2463 = vrot.lane.b32.xlu0 %v2100_v22, %s3109_s19  ;;  %2373 = vrot.lane.b32.xlu1 %v2365_v32, %s3114_s25 }
 0x44d   : > { %2649 = vrot.lane.b32.xlu0 %v2641_v16, %s3116_s29  ;;  %2465 = vrot.lane.b32.xlu1 %v2105_v25, %s3109_s19 }
 0x451   : > { %2741 = vrot.lane.b32.xlu0 %v2105_v25, %s3113_s22  ;;  %2555 = vrot.lane.b32.xlu1 %v2547_v15, %s3115_s26  ;;  %v3058_v25 = vld [vmem:[%s3635_s5 + $0x30] sm:$0xff] }
 0x455   : > { %2739 = vrot.lane.b32.xlu1 %v2100_v22, %s3113_s22  ;;  %2281 = vrot.lane.b32.xlu0 %v2272_v26, %s3112_s21  ;;  %v3062_v26 = vld [vmem:[%s3635_s5 + $0x40] sm:$0xff] }
 0x459   : > { %2283 = vrot.lane.b32.xlu1 %v2273_v30, %s3112_s21  ;;  %2377 = vrot.lane.b32.xlu0 %v2367_v37, %s3114_s25 }
 0x45d   : > { %2375 = vrot.lane.b32.xlu1 %v2366_v34, %s3114_s25  ;;  %2559 = vrot.lane.b32.xlu0 %v2549_v35, %s3115_s26 }
 0x461   : > { %2557 = vrot.lane.b32.xlu1 %v2548_v40, %s3115_s26  ;;  %2651 = vrot.lane.b32.xlu0 %v2642_v36, %s3116_s29 }
 0x465   : > { %2653 = vrot.lane.b32.xlu1 %v2643_v24, %s3116_s29  ;;  %2833 = vrot.lane.b32.xlu0 %v2824_v27, %s3118_s30 }
 0x469   : > { %2835 = vrot.lane.b32.xlu1 %v2825_v33, %s3118_s30  ;;  %2831 = vrot.lane.b32.xlu0 %v2823_v44, %s3118_s30 }
 0x46d   : > { %2920 = vperm.xlu1 %3093, %v2917_v46  }
 0x4af   : > { %v2114_v41 = vpop.permute.xlu1 %2113  ;;  %v2462_v47 = vpop.permute.xlu0 %2461 }
 0x4b3   : > { %v2738_v52 = vpop.permute.xlu1 %2737  ;;  %v2118_v38 = vpop.permute.xlu0 %2117 }
 0x4b7   : > { %v2116_v39 = vpop.permute.xlu1 %2115  ;;  %v2280_v42 = vpop.permute.xlu0 %2279 }
 0x4b8   : > { %v2119_v53 = vsel %vm353_vm8, %v2114_v41, %v2116_v39  ;;  %v2120_v48 = vsel %vm353_vm8, %v2116_v39, %v2118_v38 }
 0x4b9   : > { %2156 = vmatprep.subr.mxu0 %v2120_v48 }
 0x4ba   : > { %2157 = vmatpush1.msra.mxu0 %v2119_v53 }
 0x4bb   : > { %v2374_v54 = vpop.permute.xlu1 %2373  ;;  %v2464_v55 = vpop.permute.xlu0 %2463  ;;  %3048 = vmatmul.mubr.msk.f32.vlgmr.msra.gmra.mxu0 %vm1289_vm1, %v3047_v49 }
 0x4bc   : > { %2356 = vmatprep.mubr.f32.mxu0 %v3111_v29  ;;  %v2467_v4 = vsel %vm758_vm10, %v2462_v47, %v2464_v55 }
 0x4bf   : > { %v2466_v56 = vpop.permute.xlu1 %2465  ;;  %v2650_v57 = vpop.permute.xlu0 %2649 }
 0x4c0   : > { %v2468_v3 = vsel %vm758_vm10, %v2464_v55, %v2466_v56 }
 0x4c3   : > { %v2556_v58 = vpop.permute.xlu1 %2555  ;;  %v2742_v59 = vpop.permute.xlu0 %2741 }
 0x4c7   : > { %v2740_v60 = vpop.permute.xlu1 %2739  ;;  %v2282_v61 = vpop.permute.xlu0 %2281 }
 0x4c8   : > { %v2285_v2 = vsel %vm559_vm9, %v2280_v42, %v2282_v61  ;;  %v2744_v18 = vsel %vm1061_vm14, %v2740_v60, %v2742_v59  ;;  %v2743_v20 = vsel %vm1061_vm14, %v2738_v52, %v2740_v60 }
 0x4cb   : > { %v2284_v62 = vpop.permute.xlu1 %2283  ;;  %v2378_v63 = vpop.permute.xlu0 %2377 }
 0x4cc   : > { %v2286_v0 = vsel %vm559_vm9, %v2282_v61, %v2284_v62 }
 0x4cd   : > { %2322 = vmatprep.subr.mxu0 %v2286_v0 }
 0x4ce   : > { %2323 = vmatpush1.msra.mxu0 %v2285_v2 }
 0x4cf   : > { %v2376_v5 = vpop.permute.xlu1 %2375  ;;  %2504 = vmatprep.subr.mxu0 %v2468_v3  ;;  %v2560_v6 = vpop.permute.xlu0 %2559  ;;  %3051 = vmatmul.mubr.msk.f32.vlgmr.msra.gmra.mxu0 %vm1289_vm1, %v3050_v1 }
 0x4d0   : > { %v2379_v7 = vsel %vm667_vm11, %v2374_v54, %v2376_v5  ;;  %2505 = vmatpush1.msra.mxu0 %v2467_v4  ;;  %v2380_v8 = vsel %vm667_vm11, %v2376_v5, %v2378_v63  ;;  %2538 = vmatprep.mubr.f32.mxu0 %v3111_v29 }
 0x4d1   : > { %2416 = vmatprep.subr.mxu1 %v2380_v8 }
 0x4d2   : > { %2417 = vmatpush1.msra.mxu1 %v2379_v7 }
 0x4d3   : > { %v2558_v11 = vpop.permute.xlu1 %2557  ;;  %v2652_v12 = vpop.permute.xlu0 %2651  ;;  %3053 = vmatmul.mubr.msk.f32.vlgmr.msra.gmra.mxu1 %vm1289_vm1, %v3052_v9  ;;  %3055 = vmatmul.mubr.msk.f32.vlgmr.msra.gmra.mxu0 %vm1289_vm1, %v3054_v10 }
 0x4d4   : > { %v2561_v13 = vsel %vm864_vm13, %v2556_v58, %v2558_v11  ;;  %v2562_v14 = vsel %vm864_vm13, %v2558_v11, %v2560_v6  ;;  %2632 = vmatprep.mubr.f32.mxu1 %v3111_v29  ;;  %2726 = vmatprep.mubr.f32.mxu0 %v3111_v29  ;;  %v2655_v31 = vsel %vm970_vm12, %v2650_v57, %v2652_v12 }
 0x4d5   : > { %2598 = vmatprep.subr.mxu1 %v2562_v14 }
 0x4d6   : > { %2599 = vmatpush1.msra.mxu1 %v2561_v13 }
 0x4d7   : > { %v2654_v21 = vpop.permute.xlu1 %2653  ;;  %2780 = vmatprep.subr.mxu1 %v2744_v18  ;;  %v2834_v22 = vpop.permute.xlu0 %2833  ;;  %3057 = vmatmul.mubr.msk.f32.vlgmr.msra.gmra.mxu1 %vm1289_vm1, %v3056_v17 }
 0x4d8   : > { %2781 = vmatpush1.msra.mxu1 %v2743_v20  ;;  %v2656_v23 = vsel %vm970_vm12, %v2652_v12, %v2654_v21  ;;  %2814 = vmatprep.mubr.f32.mxu1 %v3111_v29 }
 0x4d9   : > { %2692 = vmatprep.subr.mxu0 %v2656_v23 }
 0x4da   : > { %2693 = vmatpush1.msra.mxu0 %v2655_v31 }
 0x4db   : > { %v2836_v32 = vpop.permute.xlu1 %2835  ;;  %3059 = vmatmul.mubr.msk.f32.vlgmr.msra.gmra.mxu0 %vm1289_vm1, %v3058_v25  ;;  %v2832_v16 = vpop.permute.xlu0 %2831  ;;  %3061 = vmatmul.mubr.msk.f32.vlgmr.msra.gmra.mxu1 %vm1289_vm1, %v3060_v28 }
 0x4dc   : > { %v2837_v15 = vsel %vm1167_vm15, %v2832_v16, %v2834_v22  ;;  %v2838_v19 = vsel %vm1167_vm15, %v2834_v22, %v2836_v32  ;;  %2908 = vmatprep.mubr.f32.mxu0 %v3111_v29 }
 0x4dd   : > { %2874 = vmatprep.subr.mxu0 %v2838_v19 }
 0x4de   : > { %2875 = vmatpush1.msra.mxu0 %v2837_v15 }
 0x4df   : > { %3063 = vmatmul.mubr.msk.f32.vlgmr.msra.gmra.mxu0 %vm1289_vm1, %v3062_v26 }
 0x4e8   : > { %v2921_v61 = vpop.permute.xlu1 %2920 }
 0x504   : > { %v2266_v37 = vpop.f32.mrf.mxu1 }
 0x506   : > { %v2268_v40 = vpop.f32.mrf.mxu1 }
 0x57b   : > { %v2192_v30 = vpop.f32.mrf.mxu0 }
 0x57c   : > { %v2267_v35 = vadd.f32 %v2266_v37, %v2192_v30 }
 0x57d   : > { %v2194_v34 = vpop.f32.mrf.mxu0 }
 0x57e   : > { %v2269_v24 = vadd.f32 %v2268_v40, %v2194_v34 }
 0x58f   : > { %v2358_v36 = vpop.f32.mrf.mxu0 }
 0x590   : > { %v2363_v27 = vadd.f32 %v2358_v36, %v2267_v35 }
 0x591   : > { %v2360_v33 = vpop.f32.mrf.mxu0 }
 0x592   : > { %v2364_v29 = vadd.f32 %v2360_v33, %v2269_v24 }
 0x593   : > { %v2452_v44 = vpop.f32.mrf.mxu1  ;;  %v2540_v46 = vpop.f32.mrf.mxu0 }
 0x594   : > { %v2457_v41 = vadd.f32 %v2452_v44, %v2363_v27 }
 0x595   : > { %v2454_v47 = vpop.f32.mrf.mxu1  ;;  %v2542_v52 = vpop.f32.mrf.mxu0 }
 0x596   : > { %v2458_v38 = vadd.f32 %v2454_v47, %v2364_v29  ;;  %v2545_v39 = vadd.f32 %v2540_v46, %v2457_v41 }
 0x597   : > { %v2634_v42 = vpop.f32.mrf.mxu1 }
 0x598   : > { %v2546_v53 = vadd.f32 %v2542_v52, %v2458_v38  ;;  %v2639_v49 = vadd.f32 %v2634_v42, %v2545_v39 }
 0x599   : > { %v2636_v48 = vpop.f32.mrf.mxu1 }
 0x59a   : > { %v2640_v56 = vadd.f32 %v2636_v48, %v2546_v53 }
 0x59b   : > { %v2728_v54 = vpop.f32.mrf.mxu0  ;;  %v2816_v55 = vpop.f32.mrf.mxu1 }
 0x59c   : > { %v2733_v57 = vadd.f32 %v2728_v54, %v2639_v49 }
 0x59d   : > { %v2730_v58 = vpop.f32.mrf.mxu0  ;;  %v2818_v62 = vpop.f32.mrf.mxu1 }
 0x59e   : > { %v2734_v59 = vadd.f32 %v2730_v58, %v2640_v56  ;;  %v2821_v60 = vadd.f32 %v2816_v55, %v2733_v57 }
 0x59f   : > { %v2910_v63 = vpop.f32.mrf.mxu0 }
 0x5a0   : > { %v2822_v0 = vadd.f32 %v2818_v62, %v2734_v59  ;;  %v2915_v1 = vadd.f32 %v2910_v63, %v2821_v60 }
 0x5a1   : > { %v2912_v2 = vpop.f32.mrf.mxu0 }
 0x5a2   : > { %v2923_v3 = vadd.f32 %v2921_v61, %v2915_v1  ;;  %v2916_v4 = vadd.f32 %v2912_v2, %v2822_v0 }
 0x5a4   : > { %v2925_v5 = vadd.f32 %v2923_v3, %v1258_v50  ;;  %v2924_v6 = vadd.f32 %v2921_v61, %v2916_v4 }
 0x5a6   : > { %v2927_v7 = vmax.f32 %v2925_v5, 0.0  ;;  %v2926_v8 = vadd.f32 %v2924_v6, %v1259_v51 }
 0x5a8   : > { %2929 = vst [vmem:[%s305_s20] sm:$0xff] %v2927_v7  ;;  %v2928_v9 = vmax.f32 %v2926_v8, 0.0 }
 0x5aa   : > { %2930 = vst [vmem:[%s305_s20 + $0x8] sm:$0xff] %v2928_v9 }
 0x5ab PF: > { %s18_s27 = sadd.s32 1, %s3101_s27  }
 0x5ac   : > { %p15_p4 = scmp.ge.s32.totalorder %s18_s27, 4  }
 0x5ae   :  { %17 = sbr.rel (!%p15_p4) target bundleno = 1 (0x1), region = 106 }

// kernel: encoder_event_forward.6
= control target key start
LH: loop header
LB: loop body
LE: loop exit
PB: predicated region body
PF: predicated region fallthrough
CT: control target
= control target key end

     0   :  { %s4592_s27 = smov 0   ;;  %s5493_s0 = inlined_call_operand.vmem [shape: f32[2,64,16], index: 0, kind: input, shape index: {}]   ;;  %s5494_s1 = inlined_call_operand.vmem [shape: f32[9,32,16], index: 1, kind: input, shape index: {}]   ;;  %s5495_s2 = inlined_call_operand.vmem [shape: f32[32,1], index: 2, kind: input, shape index: {}]   ;;  %s5496_s3 = inlined_call_operand.vmem [shape: f32[9,32,32], index: 3, kind: input, shape index: {}]   ;;  %s5497_s4 = inlined_call_operand.vmem [shape: f32[32,1], index: 4, kind: input, shape index: {}]   ;;  %s5498_s5 = inlined_call_operand.vmem [shape: f32[9,32,32], index: 5, kind: input, shape index: {}]   ;;  %s5499_s6 = inlined_call_operand.vmem [shape: f32[32,1], index: 6, kind: input, shape index: {}]   ;;  %s5500_s7 = inlined_call_operand.vmem [shape: f32[2,16], index: 7, kind: input, shape index: {}]   ;;  %s5501_s8 = inlined_call_operand.vmem [shape: f32[2,32,16], index: 8, kind: output, shape index: {}]  }
   0x1 LB: > { %s3728_s28 = sadd.s32 4294967295, %s4529_s27   ;;  %p3732_p0 = scmp.ge.s32.totalorder %s4529_s27, 1  ;;  %s4529_s27 = sphi %s4592_s27, %s18_s27  }
   0x2   : > { %p262_p1 = scmp.lt.s32.totalorder %s4529_s27, 3 }
   0x4   : > { %p263_p2 = pnand %p3732_p0, %p262_p1 }
   0x5   : > { %p296_p3 = scmp.lt.s32.totalorder (!%p263_p2), %s3728_s28, 1  ;;  %s4531_s15 = smov (!%p263_p2), 4  }
   0x6   : > { %266 = sbr.rel (%p263_p2) target bundleno = 1401 (0x579), region = 52  ;;  %s4532_s16 = smov (!%p263_p2), 5  }
   0x7   : > { %s4533_s17 = smov (!%p263_p2), 1   ;;  %s4535_s25 = smov (!%p263_p2), 2  }
   0x8   : > { %s4536_s26 = smov (!%p263_p2), 6   ;;  %s4537_s29 = smov (!%p263_p2), 8  }
   0x9   : > { %s4538_s30 = smov (!%p263_p2), 10   ;;  %s4540_s9 = smov (!%p263_p2), 123  }
   0xa   : > { %s4541_s10 = smov (!%p263_p2), 124   ;;  %s4543_s12 = smov (!%p263_p2), 122  }
   0xb   : > { %v3739_v0 = vld [vmem:[%s5494_s1 + $0x30] sm:$0xff]  ;;  %vm352_vm0 = vcmask 130048   ;;  %s5505_s28 = smov (!%p296_p3, %s3728_s28), 1  ;;  %v3737_v1 = vld [vmem:[%s5494_s1 + $0x20] sm:$0xff]  ;;  %v1323_v9 = vld [vmem:[%s5495_s2 + $0x18] sm:$0xff]  ;;  %v4534_v10 = vmov 0   ;;  %v326_v13 = vlaneseq }
   0xc   : > { %4158 = vmatprep.mubr.msk.f32.mxu1 %vm352_vm0, %v3739_v0  ;;  %4155 = vmatprep.mubr.msk.f32.mxu0 %vm352_vm0, %v3737_v1  ;;  %s3951_s11 = sshll.u32 %s5505_s28, 6  ;;  %v1322_v8 = vld [vmem:[%s5495_s2 + $0x10] sm:$0xff]  ;;  %v1321_v11 = vld [vmem:[%s5495_s2 + $0x8] sm:$0xff]  ;;  %v1320_v12 = vld [vmem:[%s5495_s2] sm:$0xff]  ;;  %vm344_vm1 = vcmask 31744   ;;  %vm323_vm3 = vcmask 39936  }
   0xd   : > { %s4614_s14 = scalar_lea.vmem %s5493_s0, %s3951_s11  ;;  %4522 = vset.pattern.permute.xlu1 %v4534_v10  ;;  %4521 = vset.pattern.permute.xlu0 %v4534_v10  ;;  %v4662_v14 = vshrl.u32 %v326_v13, 7  ;;  %vm4664_vm2 = vmneg %vm344_vm1  ;;  %v4672_v17 = vld [vmem:[%s5500_s7] sm:$0x3]  ;;  %v3740_v21 = vld [vmem:[%s5494_s1 + $0x38] sm:$0xff]  ;;  %vm669_vm4 = vcmask 7168   ;;  %vm1372_vm5 = vcmask 171008  }
   0xe   : > { %v4617_v2 = vld [vmem:[%s4614_s14 + $0x28] sm:$0xff]  ;;  %v4620_v3 = vld [vmem:[%s4614_s14 + $0x20] sm:$0xff]  ;;  %v4627_v4 = vld [vmem:[%s4614_s14 + $0x38] sm:$0xff]  ;;  %s4542_s11 = smov 126   ;;  %vm1406_vm6 = vcmask 261120   ;;  %s4544_s21 = smov 120  }
   0xf   : > { %340 = vrot.lane.b32.xlu0 %v4617_v2, %s4531_s15  ;;  %338 = vrot.lane.b32.xlu1 %v4620_v3, %s4531_s15  ;;  %v4630_v5 = vld [vmem:[%s4614_s14 + $0x30] sm:$0xff]  ;;  %v4641_v6 = vld [vmem:[%s4614_s14 + $0x18] sm:$0xff]  ;;  %v328_v16 = vsub.s32 0, %v4662_v14  ;;  %s4546_s13 = smov 118  }
  0x10   : > { %v4644_v7 = vld [vmem:[%s4614_s14 + $0x10] sm:$0xff]  ;;  %v3738_v22 = vld [vmem:[%s5494_s1 + $0x28] sm:$0xff]  ;;  %v332_v23 = vld [vmem:[%s5494_s1] sm:$0xff] }
  0x11   : > { %v4683_v20 = vrot.slane %v4672_v17, %v328_v16  ;;  %v3753_v24 = vld [vmem:[%s5494_s1 + $0x40] sm:$0xff]  ;;  %v333_v33 = vld [vmem:[%s5494_s1 + $0x8] sm:$0xff]  ;;  %v334_v35 = vld [vmem:[%s5494_s1 + $0x10] sm:$0xff] }
  0x12   : > { %v3754_v34 = vld [vmem:[%s5494_s1 + $0x48] sm:$0xff]  ;;  %v3755_v36 = vld [vmem:[%s5494_s1 + $0x50] sm:$0xff]  ;;  %v335_v42 = vld [vmem:[%s5494_s1 + $0x18] sm:$0xff] }
  0x13   : > { %319 = vrot.lane.b32.xlu0 %v4627_v4, %s4532_s16  ;;  %317 = vrot.lane.b32.xlu1 %v4630_v5, %s4532_s16  ;;  %v308_v37 = vld [vmem:[%s4614_s14 + $0x8] sm:$0xff]  ;;  %v3756_v45 = vld [vmem:[%s5494_s1 + $0x58] sm:$0xff] }
  0x14   : > { %v3765_v46 = vld [vmem:[%s5494_s1 + $0x60] sm:$0xff]  ;;  %v3766_v49 = vld [vmem:[%s5494_s1 + $0x68] sm:$0xff]  ;;  %v3767_v53 = vld [vmem:[%s5494_s1 + $0x70] sm:$0xff] }
  0x15   : > { %v307_v47 = vld [vmem:[%s4614_s14] sm:$0xff]  ;;  %v3774_v54 = vld [vmem:[%s5494_s1 + $0x88] sm:$0xff]  ;;  %v3775_v57 = vld [vmem:[%s5494_s1 + $0x90] sm:$0xff] }
  0x16   : > { %v3773_v50 = vld [vmem:[%s5494_s1 + $0x80] sm:$0xff]  ;;  %v3768_v58 = vld [vmem:[%s5494_s1 + $0x78] sm:$0xff]  ;;  %v3782_v62 = vld [vmem:[%s5494_s1 + $0xa8] sm:$0xff] }
  0x17   : > { %549 = vrot.lane.b32.xlu0 %v4627_v4, %s4531_s15  ;;  %547 = vrot.lane.b32.xlu1 %v4630_v5, %s4531_s15  ;;  %v3776_v60 = vld [vmem:[%s5494_s1 + $0x98] sm:$0xff]  ;;  %v3781_v61 = vld [vmem:[%s5494_s1 + $0xa0] sm:$0xff] }
  0x18   : > { %v3789_v63 = vld [vmem:[%s5494_s1 + $0xc0] sm:$0xff]  ;;  %v3783_v0 = vld [vmem:[%s5494_s1 + $0xb0] sm:$0xff]  ;;  %v3790_v1 = vld [vmem:[%s5494_s1 + $0xc8] sm:$0xff] }
  0x19   : > { %v3805_v10 = vld [vmem:[%s5494_s1 + $0x100] sm:$0xff]  ;;  %v3808_v13 = vld [vmem:[%s5494_s1 + $0x118] sm:$0xff] }
  0x1b   : > { %665 = vrot.lane.b32.xlu0 %v4641_v6, %s4533_s17  ;;  %663 = vrot.lane.b32.xlu1 %v4644_v7, %s4533_s17 }
  0x1f   : > { %994 = vrot.lane.b32.xlu0 %v4627_v4, %s4533_s17  ;;  %992 = vrot.lane.b32.xlu1 %v4630_v5, %s4533_s17 }
  0x23   : > { %1336 = vperm.xlu1 %4522, %v1322_v8   ;;  %1341 = vperm.xlu0 %4521, %v1323_v9   ;;  %v3792_v8 = vld [vmem:[%s5494_s1 + $0xd8] sm:$0xff]  ;;  %v3797_v9 = vld [vmem:[%s5494_s1 + $0xe0] sm:$0xff] }
  0x27   : > { %1331 = vperm.xlu1 %4522, %v1321_v11   ;;  %1326 = vperm.xlu0 %4521, %v1320_v12   ;;  %v3799_v11 = vld [vmem:[%s5494_s1 + $0xf0] sm:$0xff] }
  0x28   : > { %v3807_v12 = vld [vmem:[%s5494_s1 + $0x110] sm:$0xff] }
  0x81   : > { %v341_v18 = vpop.permute.xlu0 %340  ;;  %v339_v19 = vpop.permute.xlu1 %338 }
  0x82   : > { %4151 = vmatprep.subr.msk.mxu0 %vm4664_vm2, %v341_v18  ;;  %4493 = vmatprep.subr.msk.mxu1 %vm4664_vm2, %v341_v18 }
  0x83   : > { %4152 = vmatpush3.msk.msra.mxu0 %vm4664_vm2, %v341_v18  ;;  %4495 = vmatpush3.msk.msra.mxu1 %vm4664_vm2, %v341_v18 }
  0x84   : > { %4153 = vmatprep.subr.msk.mxu0 %vm4664_vm2, %v339_v19  ;;  %4494 = vmatprep.subr.msk.mxu1 %vm4664_vm2, %v339_v19 }
  0x85   : > { %v320_v25 = vpop.permute.xlu0 %319  ;;  %4154 = vmatpush3.msk.msra.mxu0 %vm4664_vm2, %v339_v19  ;;  %4496 = vmatpush3.msk.msra.mxu1 %vm4664_vm2, %v339_v19  ;;  %v318_v26 = vpop.permute.xlu1 %317 }
  0x86   : > { %v325_v27 = vsel %vm323_vm3, 0.0, %v320_v25  ;;  %v324_v28 = vsel %vm323_vm3, 0.0, %v318_v26  ;;  %4159 = vmatmul.mubr.msk.f32.vlgmr.msra.gmra.mxu1 %vm352_vm0, %v3740_v21  ;;  %4156 = vmatmul.mubr.msk.f32.vlgmr.msra.gmra.mxu0 %vm352_vm0, %v3738_v22 }
  0x87   : > { %v331_v29 = vmul.f32 %v4683_v20, %v325_v27  ;;  %v330_v30 = vmul.f32 %v4683_v20, %v324_v28  ;;  %4165 = vmatprep.mubr.msk.f32.mxu1 %vm352_vm0, %v332_v23  ;;  %4175 = vmatprep.mubr.msk.f32.mxu0 %vm352_vm0, %v3753_v24 }
  0x89   : > { %v550_v31 = vpop.permute.xlu0 %549  ;;  %4161 = vmatprep.subr.mxu1 %v331_v29  ;;  %v548_v32 = vpop.permute.xlu1 %547 }
  0x8a   : > { %4162 = vmatpush3.msra.mxu1 %v331_v29  ;;  %4171 = vmatprep.subr.msk.mxu0 %vm4664_vm2, %v550_v31 }
  0x8b   : > { %4163 = vmatprep.subr.mxu1 %v330_v30  ;;  %4172 = vmatpush3.msk.msra.mxu0 %vm4664_vm2, %v550_v31 }
  0x8c   : > { %4164 = vmatpush3.msra.mxu1 %v330_v30  ;;  %4173 = vmatprep.subr.msk.mxu0 %vm4664_vm2, %v548_v32 }
  0x8d   : > { %4166 = vmatmul.mubr.msk.f32.vlgmr.msra.gmra.mxu1 %vm352_vm0, %v333_v33  ;;  %v666_v38 = vpop.permute.xlu0 %665  ;;  %4174 = vmatpush3.msk.msra.mxu0 %vm4664_vm2, %v548_v32  ;;  %v664_v39 = vpop.permute.xlu1 %663 }
  0x8e   : > { %v671_v40 = vsel %vm669_vm4, 0.0, %v666_v38  ;;  %4176 = vmatmul.mubr.msk.f32.vlgmr.msra.gmra.mxu0 %vm352_vm0, %v3754_v34  ;;  %v670_v41 = vsel %vm669_vm4, 0.0, %v664_v39  ;;  %4168 = vmatprep.mubr.msk.f32.mxu1 %vm352_vm0, %v334_v35 }
  0x8f   : > { %v673_v43 = vmul.f32 %v671_v40, %v4683_v20  ;;  %v672_v44 = vmul.f32 %v670_v41, %v4683_v20  ;;  %4178 = vmatprep.mubr.msk.f32.mxu0 %vm352_vm0, %v3755_v36  ;;  %4191 = vmatprep.subr.mxu0 %v308_v37 }
  0x90   : > { %4192 = vmatpush3.msra.mxu0 %v308_v37 }
  0x91   : > { %4169 = vmatmul.mubr.msk.f32.gmra.mxu1 %vm352_vm0, %v335_v42  ;;  %4181 = vmatprep.subr.mxu1 %v673_v43  ;;  %v995_v48 = vpop.permute.xlu0 %994  ;;  %v993_v52 = vpop.permute.xlu1 %992 }
  0x92   : > { %4182 = vmatpush3.msra.mxu1 %v673_v43  ;;  %4179 = vmatmul.mubr.msk.f32.gmra.mxu0 %vm352_vm0, %v3756_v45  ;;  %v999_v51 = vsel %vm669_vm4, 0.0, %v995_v48  ;;  %v998_v56 = vsel %vm669_vm4, 0.0, %v993_v52 }
  0x93   : > { %4183 = vmatprep.subr.mxu1 %v672_v44  ;;  %4185 = vmatprep.mubr.msk.f32.mxu1 %vm352_vm0, %v3765_v46  ;;  %v1001_v55 = vmul.f32 %v999_v51, %v4683_v20  ;;  %v1000_v59 = vmul.f32 %v998_v56, %v4683_v20 }
  0x94   : > { %4184 = vmatpush3.msra.mxu1 %v672_v44  ;;  %4193 = vmatprep.subr.mxu0 %v307_v47 }
  0x95   : > { %4186 = vmatmul.mubr.msk.f32.vlgmr.msra.gmra.mxu1 %vm352_vm0, %v3766_v49  ;;  %4195 = vmatprep.mubr.msk.f32.mxu0 %vm352_vm0, %v3773_v50 }
  0x96   : > { %4194 = vmatpush3.msra.mxu0 %v307_v47  ;;  %4188 = vmatprep.mubr.msk.f32.mxu1 %vm352_vm0, %v3767_v53 }
  0x97   : > { %4196 = vmatmul.mubr.msk.f32.vlgmr.msra.gmra.mxu0 %vm352_vm0, %v3774_v54  ;;  %4201 = vmatprep.subr.mxu1 %v4641_v6 }
  0x98   : > { %4198 = vmatprep.mubr.msk.f32.mxu0 %vm352_vm0, %v3775_v57  ;;  %4202 = vmatpush3.msra.mxu1 %v4641_v6  ;;  %v3791_v6 = vld [vmem:[%s5494_s1 + $0xd0] sm:$0xff] }
  0x99   : > { %4189 = vmatmul.mubr.msk.f32.gmra.mxu1 %vm352_vm0, %v3768_v58  ;;  %4211 = vmatprep.subr.mxu0 %v1001_v55 }
  0x9a   : > { %4203 = vmatprep.subr.mxu1 %v4644_v7  ;;  %4212 = vmatpush3.msra.mxu0 %v1001_v55 }
  0x9b   : > { %4199 = vmatmul.mubr.msk.f32.gmra.mxu0 %vm352_vm0, %v3776_v60  ;;  %4204 = vmatpush3.msra.mxu1 %v4644_v7  ;;  %v3784_v7 = vld [vmem:[%s5494_s1 + $0xb8] sm:$0xff] }
  0x9c   : > { %4205 = vmatprep.mubr.msk.f32.mxu1 %vm352_vm0, %v3781_v61  ;;  %4213 = vmatprep.subr.mxu0 %v1000_v59 }
  0x9d   : > { %4206 = vmatmul.mubr.msk.f32.vlgmr.msra.gmra.mxu1 %vm352_vm0, %v3782_v62  ;;  %4214 = vmatpush3.msra.mxu0 %v1000_v59 }
  0x9e   : > { %4215 = vmatprep.mubr.msk.f32.mxu0 %vm352_vm0, %v3789_v63  ;;  %4208 = vmatprep.mubr.msk.f32.mxu1 %vm352_vm0, %v3783_v0 }
  0x9f   : > { %4216 = vmatmul.mubr.msk.f32.vlgmr.msra.gmra.mxu0 %vm352_vm0, %v3790_v1  ;;  %4221 = vmatprep.subr.mxu1 %v4617_v2 }
  0xa0   : > { %4218 = vmatprep.mubr.msk.f32.mxu0 %vm352_vm0, %v3791_v6  ;;  %4222 = vmatpush3.msra.mxu1 %v4617_v2  ;;  %v3798_v2 = vld [vmem:[%s5494_s1 + $0xe8] sm:$0xff]  ;;  %v1337_v6 = vpop.permute.xlu1 %1336 }
  0xa1   : > { %4209 = vmatmul.mubr.msk.f32.gmra.mxu1 %vm352_vm0, %v3784_v7  ;;  %4223 = vmatprep.subr.mxu1 %v4620_v3 }
  0xa2   : > { %4231 = vmatprep.subr.mxu0 %v4627_v4  ;;  %4224 = vmatpush3.msra.mxu1 %v4620_v3  ;;  %v3806_v3 = vld [vmem:[%s5494_s1 + $0x108] sm:$0xff] }
  0xa3   : > { %4219 = vmatmul.mubr.msk.f32.gmra.mxu0 %vm352_vm0, %v3792_v8  ;;  %4225 = vmatprep.mubr.msk.f32.mxu1 %vm352_vm0, %v3797_v9 }
  0xa4   : > { %4232 = vmatpush3.msra.mxu0 %v4627_v4  ;;  %4235 = vmatprep.mubr.msk.f32.mxu0 %vm352_vm0, %v3805_v10  ;;  %v3800_v4 = vld [vmem:[%s5494_s1 + $0xf8] sm:$0xff] }
  0xa5   : > { %4226 = vmatmul.mubr.msk.f32.vlgmr.msra.gmra.mxu1 %vm352_vm0, %v3798_v2  ;;  %4233 = vmatprep.subr.mxu0 %v4630_v5 }
  0xa6   : > { %4234 = vmatpush3.msra.mxu0 %v4630_v5  ;;  %4228 = vmatprep.mubr.msk.f32.mxu1 %vm352_vm0, %v3799_v11  ;;  %v1342_v11 = vpop.permute.xlu0 %1341 }
  0xa7   : > { %4236 = vmatmul.mubr.msk.f32.vlgmr.msra.gmra.mxu0 %vm352_vm0, %v3806_v3 }
  0xa8   : > { %4238 = vmatprep.mubr.msk.f32.mxu0 %vm352_vm0, %v3807_v12 }
  0xa9   : > { %4229 = vmatmul.mubr.msk.f32.gmra.mxu1 %vm352_vm0, %v3800_v4 }
  0xab   : > { %4239 = vmatmul.mubr.msk.f32.gmra.mxu0 %vm352_vm0, %v3808_v13 }
 0x146   : > { %v4157_v15 = vpop.f32.mrf.mxu0  ;;  %v4160_v5 = vpop.f32.mrf.mxu1 }
 0x148   : > { %v431_v16 = vpop.f32.mrf.mxu0  ;;  %v441_v18 = vpop.f32.mrf.mxu1 }
 0x14d   : > { %v4167_v19 = vpop.f32.mrf.mxu1 }
 0x14e   : > { %v4177_v21 = vpop.f32.mrf.mxu0  ;;  %v534_v29 = vadd.f32 %v4167_v19, %v4157_v15 }
 0x14f   : > { %v528_v22 = vpop.f32.mrf.mxu1 }
 0x150   : > { %v638_v23 = vpop.f32.mrf.mxu0  ;;  %v529_v32 = vadd.f32 %v528_v22, %v431_v16  ;;  %v658_v36 = vadd.f32 %v4177_v21, %v534_v29  ;;  %v1332_v22 = vpop.permute.xlu1 %1331 }
 0x151   : > { %v4170_v24 = vpop.f32.mrf.mxu1 }
 0x152   : > { %v4180_v25 = vpop.f32.mrf.mxu0  ;;  %v544_v33 = vadd.f32 %v4170_v24, %v4160_v5  ;;  %v657_v40 = vadd.f32 %v638_v23, %v529_v32 }
 0x153   : > { %v538_v26 = vpop.f32.mrf.mxu1 }
 0x154   : > { %v648_v27 = vpop.f32.mrf.mxu0  ;;  %v539_v37 = vadd.f32 %v538_v26, %v441_v18  ;;  %v660_v41 = vadd.f32 %v4180_v25, %v544_v33  ;;  %v1603_v33 = vsub.s32 1, %v4662_v14 }
 0x155   : > { %v4187_v28 = vpop.f32.mrf.mxu1 }
 0x156   : > { %v777_v42 = vadd.f32 %v4187_v28, %v658_v36  ;;  %v659_v45 = vadd.f32 %v648_v27, %v539_v37  ;;  %v1327_v27 = vpop.permute.xlu0 %1326  ;;  %v1604_v36 = vrot.slane %v4672_v17, %v1603_v33 }
 0x157   : > { %v757_v30 = vpop.f32.mrf.mxu1  ;;  %v4197_v31 = vpop.f32.mrf.mxu0 }
 0x158   : > { %v776_v46 = vadd.f32 %v757_v30, %v657_v40  ;;  %v883_v50 = vadd.f32 %v4197_v31, %v777_v42 }
 0x159   : > { %v4190_v34 = vpop.f32.mrf.mxu1  ;;  %v863_v35 = vpop.f32.mrf.mxu0 }
 0x15a   : > { %v779_v47 = vadd.f32 %v4190_v34, %v660_v41  ;;  %v882_v54 = vadd.f32 %v863_v35, %v776_v46 }
 0x15b   : > { %v767_v38 = vpop.f32.mrf.mxu1  ;;  %v4200_v39 = vpop.f32.mrf.mxu0 }
 0x15c   : > { %v778_v51 = vadd.f32 %v767_v38, %v659_v45  ;;  %v885_v55 = vadd.f32 %v4200_v39, %v779_v47 }
 0x15d   : > { %v873_v43 = vpop.f32.mrf.mxu0  ;;  %v4207_v44 = vpop.f32.mrf.mxu1 }
 0x15e   : > { %v989_v56 = vadd.f32 %v4207_v44, %v883_v50  ;;  %v884_v59 = vadd.f32 %v873_v43, %v778_v51 }
 0x15f   : > { %v969_v48 = vpop.f32.mrf.mxu1  ;;  %v4217_v49 = vpop.f32.mrf.mxu0 }
 0x160   : > { %v988_v60 = vadd.f32 %v969_v48, %v882_v54  ;;  %v1105_v0 = vadd.f32 %v4217_v49, %v989_v56 }
 0x161   : > { %v4210_v52 = vpop.f32.mrf.mxu1  ;;  %v1085_v53 = vpop.f32.mrf.mxu0 }
 0x162   : > { %v991_v61 = vadd.f32 %v4210_v52, %v885_v55  ;;  %v1104_v9 = vadd.f32 %v1085_v53, %v988_v60 }
 0x163   : > { %v979_v57 = vpop.f32.mrf.mxu1  ;;  %v4220_v58 = vpop.f32.mrf.mxu0 }
 0x164   : > { %v990_v1 = vadd.f32 %v979_v57, %v884_v59  ;;  %v1107_v10 = vadd.f32 %v4220_v58, %v991_v61  ;;  %v1381_v58 = vld [vmem:[%s5496_s3] sm:$0xff]  ;;  %v1382_v59 = vld [vmem:[%s5496_s3 + $0x8] sm:$0xff] }
 0x165   : > { %v4227_v62 = vpop.f32.mrf.mxu1  ;;  %v1095_v63 = vpop.f32.mrf.mxu0  ;;  %4263 = vmatprep.mubr.msk.f32.mxu0 %vm1406_vm6, %v1381_v58 }
 0x166   : > { %v1211_v2 = vadd.f32 %v4227_v62, %v1105_v0  ;;  %v1106_v4 = vadd.f32 %v1095_v63, %v990_v1  ;;  %v3813_v62 = vld [vmem:[%s5496_s3 + $0x20] sm:$0xff]  ;;  %v1383_v1 = vld [vmem:[%s5496_s3 + $0x10] sm:$0xff] }
 0x167   : > { %v1191_v7 = vpop.f32.mrf.mxu1  ;;  %v4237_v8 = vpop.f32.mrf.mxu0  ;;  %4249 = vmatprep.mubr.msk.f32.mxu1 %vm1406_vm6, %v3813_v62 }
 0x168   : > { %v1210_v13 = vadd.f32 %v1191_v7, %v1104_v9  ;;  %v1317_v18 = vadd.f32 %v4237_v8, %v1211_v2  ;;  %v3833_v9 = vld [vmem:[%s5496_s3 + $0x60] sm:$0xff] }
 0x169   : > { %v4230_v3 = vpop.f32.mrf.mxu1  ;;  %v1297_v12 = vpop.f32.mrf.mxu0 }
 0x16a   : > { %v1213_v15 = vadd.f32 %v4230_v3, %v1107_v10  ;;  %v1316_v24 = vadd.f32 %v1297_v12, %v1210_v13  ;;  %v4865_v28 = vadd.f32 %v1332_v22, %v1317_v18  ;;  %v2490_v22 = vld [vmem:[%s5497_s4 + $0x10] sm:$0xff] }
 0x16b   : > { %v1201_v5 = vpop.f32.mrf.mxu1  ;;  %v4240_v16 = vpop.f32.mrf.mxu0 }
 0x16c   : > { %v1212_v19 = vadd.f32 %v1201_v5, %v1106_v4  ;;  %v1319_v21 = vadd.f32 %v4240_v16, %v1213_v15  ;;  %v4870_v31 = vadd.f32 %v1327_v27, %v1316_v24  ;;  %v1349_v34 = vmax.f32 %v4865_v28, 0.0  ;;  %v2488_v24 = vld [vmem:[%s5497_s4] sm:$0xff] }
 0x16d   : > { %v1307_v23 = vpop.f32.mrf.mxu0 }
 0x16e   : > { %v4863_v25 = vadd.f32 %v1342_v11, %v1319_v21  ;;  %v1318_v26 = vadd.f32 %v1307_v23, %v1212_v19  ;;  %v1348_v35 = vmax.f32 %v4870_v31, 0.0  ;;  %v2491_v21 = vld [vmem:[%s5497_s4 + $0x18] sm:$0xff]  ;;  %v2489_v23 = vld [vmem:[%s5497_s4 + $0x8] sm:$0xff] }
 0x170   : > { %v1351_v29 = vmax.f32 %v4863_v25, 0.0  ;;  %v4868_v30 = vadd.f32 %v1337_v6, %v1318_v26  ;;  %v1384_v6 = vld [vmem:[%s5496_s3 + $0x18] sm:$0xff] }
 0x172   : > { %v1350_v32 = vmax.f32 %v4868_v30, 0.0  ;;  %1362 = vrot.lane.b32.xlu1 %v1351_v29, %s4532_s16 }
 0x174   : > { %1360 = vrot.lane.b32.xlu0 %v1350_v32, %s4532_s16 }
 0x176   : > { %1358 = vrot.lane.b32.xlu1 %v1349_v34, %s4532_s16 }
 0x178   : > { %1356 = vrot.lane.b32.xlu0 %v1348_v35, %s4532_s16 }
 0x17a   : > { %1606 = vrot.lane.b32.xlu1 %v1604_v36, %s4535_s25 }
 0x17c   : > { %1736 = vrot.lane.b32.xlu0 %v4683_v20, %s4531_s15  ;;  %s4539_s15 = smov 127  }
 0x17e   : > { %1983 = vrot.lane.b32.xlu1 %v1604_v36, %s4536_s26 }
 0x180   : > { %2112 = vrot.lane.b32.xlu0 %v4683_v20, %s4537_s29 }
 0x182   : > { %2359 = vrot.lane.b32.xlu1 %v1604_v36, %s4538_s30  ;;  %s4545_s30 = smov 119  }
 0x1e4   : > { %v1363_v14 = vpop.permute.xlu1 %1362 }
 0x1e5   : > { %v1371_v17 = vsel %vm323_vm3, 0.0, %v1363_v14 }
 0x1e6   : > { %v4894_v37 = vsel %vm1372_vm5, %v1371_v17, 0.0  ;;  %v1361_v38 = vpop.permute.xlu0 %1360 }
 0x1e7   : > { %v1370_v39 = vsel %vm323_vm3, 0.0, %v1361_v38  ;;  %v1380_v40 = vmul.f32 %v4894_v37, %v4683_v20 }
 0x1e8   : > { %v4900_v41 = vsel %vm1372_vm5, %v1370_v39, 0.0  ;;  %v1359_v42 = vpop.permute.xlu1 %1358 }
 0x1e9   : > { %v1369_v43 = vsel %vm323_vm3, 0.0, %v1359_v42  ;;  %4255 = vmatprep.subr.mxu0 %v1380_v40  ;;  %v1379_v44 = vmul.f32 %v4900_v41, %v4683_v20 }
 0x1ea   : > { %v4906_v45 = vsel %vm1372_vm5, %v1369_v43, 0.0  ;;  %4256 = vmatpush3.msra.mxu0 %v1380_v40  ;;  %v1357_v46 = vpop.permute.xlu0 %1356 }
 0x1eb   : > { %v1368_v47 = vsel %vm323_vm3, 0.0, %v1357_v46  ;;  %1396 = vrot.lane.b32.xlu0 %v4906_v45, %s4539_s15  ;;  %4257 = vmatprep.subr.mxu0 %v1379_v44  ;;  %v1378_v48 = vmul.f32 %v4906_v45, %v4683_v20 }
 0x1ec   : > { %v4914_v49 = vsel %vm1372_vm5, %v1368_v47, 0.0  ;;  %4258 = vmatpush3.msra.mxu0 %v1379_v44  ;;  %v4920_v51 = vpop.permute.xlu1 %1606  ;;  %v3814_v47 = vld [vmem:[%s5496_s3 + $0x28] sm:$0xff] }
 0x1ed   : > { %4259 = vmatprep.subr.mxu0 %v1378_v48  ;;  %1394 = vrot.lane.b32.xlu1 %v4914_v49, %s4539_s15  ;;  %v1377_v50 = vmul.f32 %v4914_v49, %v4683_v20  ;;  %v1610_v54 = vmul.f32 %v4920_v51, %v4906_v45  ;;  %v1609_v60 = vmul.f32 %v4920_v51, %v4914_v49 }
 0x1ee   : > { %4260 = vmatpush3.msra.mxu0 %v1378_v48  ;;  %v4922_v52 = vpop.permute.xlu0 %1736  ;;  %v1612_v0 = vmul.f32 %v4920_v51, %v4894_v37  ;;  %v1611_v10 = vmul.f32 %v4920_v51, %v4900_v41  ;;  %v3815_v48 = vld [vmem:[%s5496_s3 + $0x30] sm:$0xff] }
 0x1ef   : > { %1872 = vrot.lane.b32.xlu0 %v4906_v45, %s4540_s9  ;;  %4261 = vmatprep.subr.mxu0 %v1377_v50  ;;  %v1740_v53 = vmul.f32 %v4922_v52, %v4906_v45  ;;  %v1739_v63 = vmul.f32 %v4922_v52, %v4914_v49  ;;  %v1742_v7 = vmul.f32 %v4922_v52, %v4894_v37 }
 0x1f0   : > { %4262 = vmatpush3.msra.mxu0 %v1377_v50  ;;  %v4932_v55 = vpop.permute.xlu1 %1983  ;;  %v1741_v11 = vmul.f32 %v4922_v52, %v4900_v41 }
 0x1f1   : > { %1754 = vrot.lane.b32.xlu1 %v1740_v53, %s4541_s10  ;;  %v1987_v56 = vmul.f32 %v4932_v55, %v4906_v45  ;;  %4264 = vmatmul.mubr.msk.f32.vlgmr.msra.gmra.mxu0 %vm1406_vm6, %v1382_v59  ;;  %v1986_v8 = vmul.f32 %v4932_v55, %v4914_v49  ;;  %v1989_v2 = vmul.f32 %v4932_v55, %v4894_v37  ;;  %v3816_v53 = vld [vmem:[%s5496_s3 + $0x38] sm:$0xff]  ;;  %v3826_v59 = vld [vmem:[%s5496_s3 + $0x48] sm:$0xff] }
 0x1f2   : > { %v4941_v57 = vpop.permute.xlu0 %2112  ;;  %4266 = vmatprep.mubr.msk.f32.mxu0 %vm1406_vm6, %v1383_v1  ;;  %v1988_v4 = vmul.f32 %v4932_v55, %v4900_v41 }
 0x1f3   : > { %1624 = vrot.lane.b32.xlu0 %v1610_v54, %s4542_s11  ;;  %v2116_v61 = vmul.f32 %v4941_v57, %v4906_v45  ;;  %v2118_v3 = vmul.f32 %v4941_v57, %v4894_v37  ;;  %v2115_v12 = vmul.f32 %v4941_v57, %v4914_v49  ;;  %v2117_v13 = vmul.f32 %v4941_v57, %v4900_v41  ;;  %v3825_v54 = vld [vmem:[%s5496_s3 + $0x40] sm:$0xff] }
 0x1f4   : > { %v5013_v15 = vpop.permute.xlu1 %2359 }
 0x1f5   : > { %1870 = vrot.lane.b32.xlu1 %v4914_v49, %s4540_s9  ;;  %4267 = vmatmul.mubr.msk.f32.gmra.mxu0 %vm1406_vm6, %v1384_v6  ;;  %v2365_v5 = vmul.f32 %v5013_v15, %v4894_v37  ;;  %v2364_v16 = vmul.f32 %v5013_v15, %v4900_v41  ;;  %v2363_v18 = vmul.f32 %v5013_v15, %v4906_v45 }
 0x1f6   : > { %4291 = vmatprep.mubr.msk.f32.mxu0 %vm1406_vm6, %v3833_v9  ;;  %v2362_v19 = vmul.f32 %v5013_v15, %v4914_v49  ;;  %v3836_v9 = vld [vmem:[%s5496_s3 + $0x78] sm:$0xff] }
 0x1f7   : > { %1400 = vrot.lane.b32.xlu0 %v4894_v37, %s4539_s15 }
 0x1f9   : > { %2001 = vrot.lane.b32.xlu1 %v1987_v56, %s4543_s12 }
 0x1fb   : > { %1876 = vrot.lane.b32.xlu0 %v4894_v37, %s4540_s9 }
 0x1fd   : > { %1622 = vrot.lane.b32.xlu1 %v1609_v60, %s4542_s11 }
 0x1ff   : > { %2130 = vrot.lane.b32.xlu0 %v2116_v61, %s4544_s21  ;;  %v3827_v61 = vld [vmem:[%s5496_s3 + $0x50] sm:$0xff] }
 0x201   : > { %1752 = vrot.lane.b32.xlu1 %v1739_v63, %s4541_s10  ;;  %v3828_v63 = vld [vmem:[%s5496_s3 + $0x58] sm:$0xff] }
 0x203   : > { %1628 = vrot.lane.b32.xlu0 %v1612_v0, %s4542_s11  ;;  %v3834_v0 = vld [vmem:[%s5496_s3 + $0x68] sm:$0xff] }
 0x205   : > { %1398 = vrot.lane.b32.xlu1 %v4900_v41, %s4539_s15 }
 0x207   : > { %1758 = vrot.lane.b32.xlu0 %v1742_v7, %s4541_s10  ;;  %v3835_v7 = vld [vmem:[%s5496_s3 + $0x70] sm:$0xff] }
 0x209   : > { %1999 = vrot.lane.b32.xlu1 %v1986_v8, %s4543_s12  ;;  %v3841_v8 = vld [vmem:[%s5496_s3 + $0x80] sm:$0xff] }
 0x20b   : > { %1874 = vrot.lane.b32.xlu0 %v4900_v41, %s4540_s9 }
 0x20d   : > { %1626 = vrot.lane.b32.xlu1 %v1611_v10, %s4542_s11  ;;  %v3842_v10 = vld [vmem:[%s5496_s3 + $0x88] sm:$0xff] }
 0x20f   : > { %2005 = vrot.lane.b32.xlu0 %v1989_v2, %s4543_s12 }
 0x211   : > { %1756 = vrot.lane.b32.xlu1 %v1741_v11, %s4541_s10 }
 0x213   : > { %2134 = vrot.lane.b32.xlu0 %v2118_v3, %s4544_s21  ;;  %v3843_v3 = vld [vmem:[%s5496_s3 + $0x90] sm:$0xff] }
 0x215   : > { %2128 = vrot.lane.b32.xlu1 %v2115_v12, %s4544_s21  ;;  %v3849_v12 = vld [vmem:[%s5496_s3 + $0xa0] sm:$0xff] }
 0x217   : > { %2252 = vrot.lane.b32.xlu0 %v4894_v37, %s4545_s30 }
 0x219   : > { %2003 = vrot.lane.b32.xlu1 %v1988_v4, %s4543_s12  ;;  %v3844_v4 = vld [vmem:[%s5496_s3 + $0x98] sm:$0xff] }
 0x21b   : > { %2132 = vrot.lane.b32.xlu0 %v2117_v13, %s4544_s21  ;;  %v3850_v13 = vld [vmem:[%s5496_s3 + $0xa8] sm:$0xff] }
 0x21d   : > { %2250 = vrot.lane.b32.xlu1 %v4900_v41, %s4545_s30 }
 0x21f   : > { %2381 = vrot.lane.b32.xlu0 %v2365_v5, %s4546_s13 }
 0x221   : > { %2248 = vrot.lane.b32.xlu1 %v4906_v45, %s4545_s30 }
 0x223   : > { %2379 = vrot.lane.b32.xlu0 %v2364_v16, %s4546_s13 }
 0x225   : > { %2246 = vrot.lane.b32.xlu1 %v4914_v49, %s4545_s30 }
 0x227   : > { %2377 = vrot.lane.b32.xlu0 %v2363_v18, %s4546_s13  ;;  %v3851_v18 = vld [vmem:[%s5496_s3 + $0xb0] sm:$0xff] }
 0x229   : > { %2375 = vrot.lane.b32.xlu1 %v2362_v19, %s4546_s13  ;;  %v3857_v19 = vld [vmem:[%s5496_s3 + $0xc0] sm:$0xff] }
 0x22b   : > { %2509 = vperm.xlu0 %4521, %v2491_v21   ;;  %v3852_v21 = vld [vmem:[%s5496_s3 + $0xb8] sm:$0xff] }
 0x22d   : > { %2504 = vperm.xlu1 %4522, %v2490_v22   ;;  %v3858_v22 = vld [vmem:[%s5496_s3 + $0xc8] sm:$0xff] }
 0x22f   : > { %2499 = vperm.xlu0 %4521, %v2489_v23  }
 0x231   : > { %2494 = vperm.xlu1 %4522, %v2488_v24  }
 0x25d   : > { %v1397_v26 = vpop.permute.xlu0 %1396 }
 0x25f   : > { %v1395_v27 = vpop.permute.xlu1 %1394 }
 0x261   : > { %v5046_v33 = vpop.permute.xlu0 %1872 }
 0x263   : > { %v1755_v36 = vpop.permute.xlu1 %1754 }
 0x265   : > { %v1625_v14 = vpop.permute.xlu0 %1624 }
 0x267   : > { %v5048_v17 = vpop.permute.xlu1 %1870 }
 0x269   : > { %v1401_v37 = vpop.permute.xlu0 %1400 }
 0x26a   : > { %4241 = vmatprep.subr.mxu1 %v1401_v37 }
 0x26b   : > { %v5050_v38 = vpop.permute.xlu1 %2001  ;;  %4242 = vmatpush3.msra.mxu1 %v1401_v37  ;;  %v3873_v37 = vld [vmem:[%s5496_s3 + $0x100] sm:$0xff] }
 0x26d   : > { %v1877_v39 = vpop.permute.xlu0 %1876 }
 0x26f   : > { %v1623_v40 = vpop.permute.xlu1 %1622 }
 0x271   : > { %v5052_v41 = vpop.permute.xlu0 %2130 }
 0x273   : > { %v1753_v42 = vpop.permute.xlu1 %1752 }
 0x275   : > { %v1629_v43 = vpop.permute.xlu0 %1628 }
 0x277   : > { %v1399_v44 = vpop.permute.xlu1 %1398 }
 0x278   : > { %4243 = vmatprep.subr.mxu1 %v1399_v44 }
 0x279   : > { %4244 = vmatpush3.msra.mxu1 %v1399_v44  ;;  %v1759_v45 = vpop.permute.xlu0 %1758 }
 0x27a   : > { %4245 = vmatprep.subr.mxu1 %v1397_v26  ;;  %4283 = vmatprep.subr.mxu0 %v1759_v45 }
 0x27b   : > { %v5054_v46 = vpop.permute.xlu1 %1999  ;;  %4246 = vmatpush3.msra.mxu1 %v1397_v26  ;;  %4284 = vmatpush3.msra.mxu0 %v1759_v45  ;;  %v3859_v26 = vld [vmem:[%s5496_s3 + $0xd0] sm:$0xff] }
 0x27c   : > { %4247 = vmatprep.subr.mxu1 %v1395_v27 }
 0x27d   : > { %4248 = vmatpush3.msra.mxu1 %v1395_v27  ;;  %v1875_v49 = vpop.permute.xlu0 %1874  ;;  %v3865_v27 = vld [vmem:[%s5496_s3 + $0xe0] sm:$0xff] }
 0x27e   : > { %4250 = vmatmul.mubr.msk.f32.vlgmr.msra.gmra.mxu1 %vm1406_vm6, %v3814_v47  ;;  %4269 = vmatprep.subr.mxu1 %v1629_v43 }
 0x27f   : > { %v1627_v50 = vpop.permute.xlu1 %1626  ;;  %4270 = vmatpush3.msra.mxu1 %v1629_v43  ;;  %4252 = vmatprep.mubr.msk.f32.mxu1 %vm1406_vm6, %v3815_v48 }
 0x280   : > { %4271 = vmatprep.subr.mxu1 %v1627_v50 }
 0x281   : > { %4272 = vmatpush3.msra.mxu1 %v1627_v50  ;;  %v2006_v56 = vpop.permute.xlu0 %2005 }
 0x282   : > { %4253 = vmatmul.mubr.msk.f32.gmra.mxu1 %vm1406_vm6, %v3816_v53  ;;  %4273 = vmatprep.subr.mxu1 %v1625_v14 }
 0x283   : > { %v1757_v58 = vpop.permute.xlu1 %1756  ;;  %4274 = vmatpush3.msra.mxu1 %v1625_v14  ;;  %4277 = vmatprep.mubr.msk.f32.mxu1 %vm1406_vm6, %v3825_v54 }
 0x284   : > { %4275 = vmatprep.subr.mxu1 %v1623_v40  ;;  %4285 = vmatprep.subr.mxu0 %v1757_v58 }
 0x285   : > { %4276 = vmatpush3.msra.mxu1 %v1623_v40  ;;  %4286 = vmatpush3.msra.mxu0 %v1757_v58  ;;  %v2135_v60 = vpop.permute.xlu0 %2134  ;;  %v3874_v40 = vld [vmem:[%s5496_s3 + $0x108] sm:$0xff] }
 0x286   : > { %4278 = vmatmul.mubr.msk.f32.vlgmr.msra.gmra.mxu1 %vm1406_vm6, %v3826_v59  ;;  %4287 = vmatprep.subr.mxu0 %v1755_v36 }
 0x287   : > { %4297 = vmatprep.subr.mxu1 %v1877_v39  ;;  %v2129_v62 = vpop.permute.xlu1 %2128  ;;  %4288 = vmatpush3.msra.mxu0 %v1755_v36  ;;  %v3866_v36 = vld [vmem:[%s5496_s3 + $0xe8] sm:$0xff] }
 0x288   : > { %4298 = vmatpush3.msra.mxu1 %v1877_v39  ;;  %4289 = vmatprep.subr.mxu0 %v1753_v42  ;;  %v3868_v39 = vld [vmem:[%s5496_s3 + $0xf8] sm:$0xff] }
 0x289   : > { %4299 = vmatprep.subr.mxu1 %v1875_v49  ;;  %4280 = vmatprep.mubr.msk.f32.mxu1 %vm1406_vm6, %v3827_v61  ;;  %v2253_v1 = vpop.permute.xlu0 %2252 }
 0x28a   : > { %4290 = vmatpush3.msra.mxu0 %v1753_v42  ;;  %4300 = vmatpush3.msra.mxu1 %v1875_v49  ;;  %v3876_v42 = vld [vmem:[%s5496_s3 + $0x118] sm:$0xff] }
 0x28b   : > { %4281 = vmatmul.mubr.msk.f32.gmra.mxu1 %vm1406_vm6, %v3828_v63  ;;  %4292 = vmatmul.mubr.msk.f32.vlgmr.msra.gmra.mxu0 %vm1406_vm6, %v3834_v0  ;;  %v2004_v6 = vpop.permute.xlu1 %2003 }
 0x28c   : > { %4301 = vmatprep.subr.mxu1 %v5046_v33  ;;  %4311 = vmatprep.subr.mxu0 %v2006_v56 }
 0x28d   : > { %4302 = vmatpush3.msra.mxu1 %v5046_v33  ;;  %4312 = vmatpush3.msra.mxu0 %v2006_v56  ;;  %v2133_v2 = vpop.permute.xlu0 %2132  ;;  %v3860_v33 = vld [vmem:[%s5496_s3 + $0xd8] sm:$0xff] }
 0x28e   : > { %4303 = vmatprep.subr.mxu1 %v5048_v17  ;;  %4313 = vmatprep.subr.mxu0 %v2004_v6 }
 0x28f   : > { %4294 = vmatprep.mubr.msk.f32.mxu0 %vm1406_vm6, %v3835_v7  ;;  %4304 = vmatpush3.msra.mxu1 %v5048_v17  ;;  %v2251_v11 = vpop.permute.xlu1 %2250  ;;  %v3867_v17 = vld [vmem:[%s5496_s3 + $0xf0] sm:$0xff] }
 0x290   : > { %4305 = vmatprep.mubr.msk.f32.mxu1 %vm1406_vm6, %v3841_v8  ;;  %4314 = vmatpush3.msra.mxu0 %v2004_v6 }
 0x291   : > { %4295 = vmatmul.mubr.msk.f32.gmra.mxu0 %vm1406_vm6, %v3836_v9  ;;  %4306 = vmatmul.mubr.msk.f32.vlgmr.msra.gmra.mxu1 %vm1406_vm6, %v3842_v10  ;;  %v2382_v5 = vpop.permute.xlu0 %2381 }
 0x292   : > { %4315 = vmatprep.subr.mxu0 %v5050_v38  ;;  %4325 = vmatprep.subr.mxu1 %v2135_v60 }
 0x293   : > { %4316 = vmatpush3.msra.mxu0 %v5050_v38  ;;  %4326 = vmatpush3.msra.mxu1 %v2135_v60  ;;  %v2249_v16 = vpop.permute.xlu1 %2248 }
 0x294   : > { %4317 = vmatprep.subr.mxu0 %v5054_v46  ;;  %4327 = vmatprep.subr.mxu1 %v2133_v2 }
 0x295   : > { %4308 = vmatprep.mubr.msk.f32.mxu1 %vm1406_vm6, %v3843_v3  ;;  %4318 = vmatpush3.msra.mxu0 %v5054_v46  ;;  %v2380_v23 = vpop.permute.xlu0 %2379 }
 0x296   : > { %4319 = vmatprep.mubr.msk.f32.mxu0 %vm1406_vm6, %v3849_v12  ;;  %4328 = vmatpush3.msra.mxu1 %v2133_v2 }
 0x297   : > { %4309 = vmatmul.mubr.msk.f32.gmra.mxu1 %vm1406_vm6, %v3844_v4  ;;  %4320 = vmatmul.mubr.msk.f32.vlgmr.msra.gmra.mxu0 %vm1406_vm6, %v3850_v13  ;;  %v2247_v24 = vpop.permute.xlu1 %2246 }
 0x298   : > { %4329 = vmatprep.subr.mxu1 %v5052_v41  ;;  %4339 = vmatprep.subr.mxu0 %v2253_v1 }
 0x299   : > { %4330 = vmatpush3.msra.mxu1 %v5052_v41  ;;  %4340 = vmatpush3.msra.mxu0 %v2253_v1  ;;  %v2378_v14 = vpop.permute.xlu0 %2377  ;;  %v3875_v41 = vld [vmem:[%s5496_s3 + $0x110] sm:$0xff] }
 0x29a   : > { %4331 = vmatprep.subr.mxu1 %v2129_v62  ;;  %4341 = vmatprep.subr.mxu0 %v2251_v11 }
 0x29b   : > { %4322 = vmatprep.mubr.msk.f32.mxu0 %vm1406_vm6, %v3851_v18  ;;  %4332 = vmatpush3.msra.mxu1 %v2129_v62  ;;  %v2376_v38 = vpop.permute.xlu1 %2375 }
 0x29c   : > { %4333 = vmatprep.mubr.msk.f32.mxu1 %vm1406_vm6, %v3857_v19  ;;  %4342 = vmatpush3.msra.mxu0 %v2251_v11 }
 0x29d   : > { %4323 = vmatmul.mubr.msk.f32.gmra.mxu0 %vm1406_vm6, %v3852_v21  ;;  %4334 = vmatmul.mubr.msk.f32.vlgmr.msra.gmra.mxu1 %vm1406_vm6, %v3858_v22 }
 0x29e   : > { %4343 = vmatprep.subr.mxu0 %v2249_v16  ;;  %4353 = vmatprep.subr.mxu1 %v2382_v5 }
 0x29f   : > { %4344 = vmatpush3.msra.mxu0 %v2249_v16  ;;  %4354 = vmatpush3.msra.mxu1 %v2382_v5 }
 0x2a0   : > { %4345 = vmatprep.subr.mxu0 %v2247_v24  ;;  %4355 = vmatprep.subr.mxu1 %v2380_v23 }
 0x2a1   : > { %4336 = vmatprep.mubr.msk.f32.mxu1 %vm1406_vm6, %v3859_v26  ;;  %4346 = vmatpush3.msra.mxu0 %v2247_v24 }
 0x2a2   : > { %4347 = vmatprep.mubr.msk.f32.mxu0 %vm1406_vm6, %v3865_v27  ;;  %4356 = vmatpush3.msra.mxu1 %v2380_v23 }
 0x2a3   : > { %4337 = vmatmul.mubr.msk.f32.gmra.mxu1 %vm1406_vm6, %v3860_v33  ;;  %4348 = vmatmul.mubr.msk.f32.vlgmr.msra.gmra.mxu0 %vm1406_vm6, %v3866_v36 }
 0x2a4   : > { %4357 = vmatprep.subr.mxu1 %v2378_v14  ;;  %4350 = vmatprep.mubr.msk.f32.mxu0 %vm1406_vm6, %v3867_v17 }
 0x2a5   : > { %4358 = vmatpush3.msra.mxu1 %v2378_v14  ;;  %4361 = vmatprep.mubr.msk.f32.mxu1 %vm1406_vm6, %v3873_v37 }
 0x2a6   : > { %4359 = vmatprep.subr.mxu1 %v2376_v38 }
 0x2a7   : > { %4360 = vmatpush3.msra.mxu1 %v2376_v38  ;;  %4351 = vmatmul.mubr.msk.f32.gmra.mxu0 %vm1406_vm6, %v3868_v39 }
 0x2a8   : > { %4362 = vmatmul.mubr.msk.f32.vlgmr.msra.gmra.mxu1 %vm1406_vm6, %v3874_v40 }
 0x2a9   : > { %4364 = vmatprep.mubr.msk.f32.mxu1 %vm1406_vm6, %v3875_v41 }
 0x2ac   : > { %4365 = vmatmul.mubr.msk.f32.gmra.mxu1 %vm1406_vm6, %v3876_v42 }
 0x2b1   : > { %v4265_v43 = vpop.f32.mrf.mxu0 }
 0x2b3   : > { %v1582_v46 = vpop.f32.mrf.mxu0 }
 0x2b5   : > { %v4268_v49 = vpop.f32.mrf.mxu0 }
 0x2b7   : > { %v1592_v54 = vpop.f32.mrf.mxu0 }
 0x33e   : > { %v4251_v44 = vpop.f32.mrf.mxu1 }
 0x33f   : > { %v1588_v2 = vadd.f32 %v4265_v43, %v4251_v44  ;;  %v2510_v43 = vpop.permute.xlu0 %2509 }
 0x340   : > { %v1485_v45 = vpop.f32.mrf.mxu1 }
 0x341   : > { %v1583_v4 = vadd.f32 %v1582_v46, %v1485_v45 }
 0x342   : > { %v4254_v47 = vpop.f32.mrf.mxu1 }
 0x343   : > { %v1598_v11 = vadd.f32 %v4268_v49, %v4254_v47 }
 0x344   : > { %v1495_v48 = vpop.f32.mrf.mxu1 }
 0x345   : > { %v1593_v13 = vadd.f32 %v1592_v54, %v1495_v48 }
 0x346   : > { %v4279_v50 = vpop.f32.mrf.mxu1 }
 0x347   : > { %v1732_v5 = vadd.f32 %v4279_v50, %v1588_v2 }
 0x348   : > { %v1712_v53 = vpop.f32.mrf.mxu1 }
 0x349   : > { %v1731_v18 = vadd.f32 %v1712_v53, %v1583_v4 }
 0x34b   : > { %v4282_v56 = vpop.f32.mrf.mxu1  ;;  %v4293_v58 = vpop.f32.mrf.mxu0 }
 0x34c   : > { %v1734_v16 = vadd.f32 %v4282_v56, %v1598_v11  ;;  %v1862_v19 = vadd.f32 %v4293_v58, %v1732_v5  ;;  %v2505_v58 = vpop.permute.xlu1 %2504 }
 0x34d   : > { %v1722_v59 = vpop.f32.mrf.mxu1  ;;  %v1842_v60 = vpop.f32.mrf.mxu0 }
 0x34e   : > { %v1733_v21 = vadd.f32 %v1722_v59, %v1593_v13  ;;  %v1861_v26 = vadd.f32 %v1842_v60, %v1731_v18 }
 0x350   : > { %v2495_v11 = vpop.permute.xlu1 %2494 }
 0x351   : > { %v4296_v61 = vpop.f32.mrf.mxu0  ;;  %v4307_v62 = vpop.f32.mrf.mxu1 }
 0x352   : > { %v1864_v22 = vadd.f32 %v4296_v61, %v1734_v16  ;;  %v1980_v27 = vadd.f32 %v4307_v62, %v1862_v19 }
 0x353   : > { %v1852_v63 = vpop.f32.mrf.mxu0  ;;  %v1960_v0 = vpop.f32.mrf.mxu1 }
 0x354   : > { %v1863_v33 = vadd.f32 %v1852_v63, %v1733_v21  ;;  %v1979_v37 = vadd.f32 %v1960_v0, %v1861_v26 }
 0x357   : > { %v4310_v1 = vpop.f32.mrf.mxu1  ;;  %v4321_v6 = vpop.f32.mrf.mxu0 }
 0x358   : > { %v1982_v36 = vadd.f32 %v4310_v1, %v1864_v22  ;;  %v2109_v38 = vadd.f32 %v4321_v6, %v1980_v27 }
 0x359   : > { %v1970_v7 = vpop.f32.mrf.mxu1  ;;  %v2089_v8 = vpop.f32.mrf.mxu0 }
 0x35a   : > { %v1981_v39 = vadd.f32 %v1970_v7, %v1863_v33  ;;  %v2108_v44 = vadd.f32 %v2089_v8, %v1979_v37  ;;  %v2500_v8 = vpop.permute.xlu0 %2499 }
 0x35d   : > { %v4324_v9 = vpop.f32.mrf.mxu0  ;;  %v4335_v10 = vpop.f32.mrf.mxu1 }
 0x35e   : > { %v2111_v40 = vadd.f32 %v4324_v9, %v1982_v36  ;;  %v2238_v45 = vadd.f32 %v4335_v10, %v2109_v38 }
 0x35f   : > { %v2099_v3 = vpop.f32.mrf.mxu0  ;;  %v2218_v12 = vpop.f32.mrf.mxu1 }
 0x360   : > { %v2110_v46 = vadd.f32 %v2099_v3, %v1981_v39  ;;  %v2237_v50 = vadd.f32 %v2218_v12, %v2108_v44 }
 0x363   : > { %v4338_v23 = vpop.f32.mrf.mxu1  ;;  %v4349_v24 = vpop.f32.mrf.mxu0 }
 0x364   : > { %v2240_v47 = vadd.f32 %v4338_v23, %v2111_v40  ;;  %v2356_v53 = vadd.f32 %v4349_v24, %v2238_v45  ;;  %v3881_v45 = vld [vmem:[%s5498_s5 + $0x20] sm:$0xff] }
 0x365   : > { %v2228_v14 = vpop.f32.mrf.mxu1  ;;  %v2336_v17 = vpop.f32.mrf.mxu0  ;;  %4375 = vmatprep.mubr.msk.f32.mxu0 %vm1406_vm6, %v3881_v45  ;;  %v3903_v45 = vld [vmem:[%s5498_s5 + $0x70] sm:$0xff] }
 0x366   : > { %v2239_v54 = vadd.f32 %v2228_v14, %v2110_v46  ;;  %v2355_v60 = vadd.f32 %v2336_v17, %v2237_v50 }
 0x367   : > { %v4352_v41 = vpop.f32.mrf.mxu0 }
 0x368   : > { %v4363_v42 = vpop.f32.mrf.mxu1  ;;  %v2358_v56 = vadd.f32 %v4352_v41, %v2240_v47  ;;  %v2548_v41 = vld [vmem:[%s5498_s5] sm:$0xff] }
 0x369   : > { %v2346_v48 = vpop.f32.mrf.mxu0  ;;  %v2485_v61 = vadd.f32 %v4363_v42, %v2356_v53  ;;  %4389 = vmatprep.mubr.msk.f32.mxu1 %vm1406_vm6, %v2548_v41  ;;  %v3902_v41 = vld [vmem:[%s5498_s5 + $0x68] sm:$0xff] }
 0x36a   : > { %v2465_v49 = vpop.f32.mrf.mxu1  ;;  %v2357_v62 = vadd.f32 %v2346_v48, %v2239_v54  ;;  %v2550_v48 = vld [vmem:[%s5498_s5 + $0x10] sm:$0xff]  ;;  %v3901_v54 = vld [vmem:[%s5498_s5 + $0x60] sm:$0xff] }
 0x36b   : > { %v2484_v1 = vadd.f32 %v2465_v49, %v2355_v60  ;;  %v2513_v9 = vadd.f32 %v2500_v8, %v2485_v61  ;;  %v2551_v49 = vld [vmem:[%s5498_s5 + $0x18] sm:$0xff] }
 0x36c   : > { %v4366_v59 = vpop.f32.mrf.mxu1 }
 0x36d   : > { %v2487_v63 = vadd.f32 %v4366_v59, %v2358_v56  ;;  %v2512_v3 = vadd.f32 %v2495_v11, %v2484_v1  ;;  %v2517_v4 = vmax.f32 %v2513_v9, 0.0  ;;  %v3634_v1 = vld [vmem:[%s5499_s6 + $0x8] sm:$0xff] }
 0x36e   : > { %v2475_v0 = vpop.f32.mrf.mxu1 }
 0x36f   : > { %v2515_v6 = vadd.f32 %v2510_v43, %v2487_v63  ;;  %v2486_v7 = vadd.f32 %v2475_v0, %v2357_v62  ;;  %v2516_v13 = vmax.f32 %v2512_v3, 0.0  ;;  %v2549_v43 = vld [vmem:[%s5498_s5 + $0x8] sm:$0xff]  ;;  %v3633_v0 = vld [vmem:[%s5499_s6] sm:$0xff] }
 0x371   : > { %v2519_v10 = vmax.f32 %v2515_v6, 0.0  ;;  %v2514_v2 = vadd.f32 %v2505_v58, %v2486_v7  ;;  %v3635_v6 = vld [vmem:[%s5499_s6 + $0x10] sm:$0xff] }
 0x373   : > { %v2518_v12 = vmax.f32 %v2514_v2, 0.0  ;;  %2530 = vrot.lane.b32.xlu0 %v2519_v10, %s4532_s16 }
 0x375   : > { %2528 = vrot.lane.b32.xlu1 %v2518_v12, %s4532_s16 }
 0x377   : > { %2526 = vrot.lane.b32.xlu0 %v2517_v4, %s4532_s16 }
 0x379   : > { %2524 = vrot.lane.b32.xlu1 %v2516_v13, %s4532_s16 }
 0x3e5   : > { %v2531_v5 = vpop.permute.xlu0 %2530 }
 0x3e6   : > { %v2539_v16 = vsel %vm323_vm3, 0.0, %v2531_v5 }
 0x3e7   : > { %v5192_v18 = vsel %vm1372_vm5, %v2539_v16, 0.0  ;;  %v2529_v19 = vpop.permute.xlu1 %2528 }
 0x3e8   : > { %v2538_v21 = vsel %vm323_vm3, 0.0, %v2529_v19  ;;  %v2547_v22 = vmul.f32 %v5192_v18, %v4683_v20  ;;  %v2770_v47 = vmul.f32 %v5192_v18, %v4920_v51  ;;  %v2896_v50 = vmul.f32 %v5192_v18, %v4922_v52 }
 0x3e9   : > { %v5198_v23 = vsel %vm1372_vm5, %v2538_v21, 0.0  ;;  %v2527_v24 = vpop.permute.xlu0 %2526  ;;  %v3140_v58 = vmul.f32 %v5192_v18, %v4932_v55  ;;  %v3266_v60 = vmul.f32 %v5192_v18, %v4941_v57  ;;  %v3510_v62 = vmul.f32 %v5192_v18, %v5013_v15 }
 0x3ea   : > { %v2537_v26 = vsel %vm323_vm3, 0.0, %v2527_v24  ;;  %4381 = vmatprep.subr.mxu1 %v2547_v22  ;;  %v2546_v27 = vmul.f32 %v5198_v23, %v4683_v20  ;;  %v2769_v56 = vmul.f32 %v5198_v23, %v4920_v51  ;;  %v2895_v59 = vmul.f32 %v5198_v23, %v4922_v52  ;;  %v3883_v24 = vld [vmem:[%s5498_s5 + $0x30] sm:$0xff] }
 0x3eb   : > { %v5204_v33 = vsel %vm1372_vm5, %v2537_v26, 0.0  ;;  %v2525_v36 = vpop.permute.xlu1 %2524  ;;  %4382 = vmatpush3.msra.mxu1 %v2547_v22  ;;  %v3139_v61 = vmul.f32 %v5198_v23, %v4932_v55 }
 0x3ec   : > { %v2536_v14 = vsel %vm323_vm3, 0.0, %v2525_v36  ;;  %4383 = vmatprep.subr.mxu1 %v2546_v27  ;;  %2563 = vrot.lane.b32.xlu0 %v5204_v33, %s4539_s15  ;;  %v2545_v17 = vmul.f32 %v5204_v33, %v4683_v20  ;;  %v2894_v39 = vmul.f32 %v5204_v33, %v4922_v52  ;;  %v2768_v40 = vmul.f32 %v5204_v33, %v4920_v51  ;;  %v3893_v36 = vld [vmem:[%s5498_s5 + $0x40] sm:$0xff] }
 0x3ed   : > { %v5212_v37 = vsel %vm1372_vm5, %v2536_v14, 0.0  ;;  %4384 = vmatpush3.msra.mxu1 %v2546_v27  ;;  %v3264_v44 = vmul.f32 %v5204_v33, %v4941_v57 }
 0x3ee   : > { %2561 = vrot.lane.b32.xlu1 %v5212_v37, %s4539_s15  ;;  %4385 = vmatprep.subr.mxu1 %v2545_v17  ;;  %v2544_v38 = vmul.f32 %v5212_v37, %v4683_v20  ;;  %v3138_v20 = vmul.f32 %v5204_v33, %v4932_v55  ;;  %v2767_v42 = vmul.f32 %v5212_v37, %v4920_v51 }
 0x3ef   : > { %4386 = vmatpush3.msra.mxu1 %v2545_v17  ;;  %v2893_v46 = vmul.f32 %v5212_v37, %v4922_v52  ;;  %v3137_v53 = vmul.f32 %v5212_v37, %v4932_v55  ;;  %v3263_v51 = vmul.f32 %v5212_v37, %v4941_v57  ;;  %v3265_v52 = vmul.f32 %v5198_v23, %v4941_v57 }
 0x3f0   : > { %3026 = vrot.lane.b32.xlu0 %v5204_v33, %s4540_s9  ;;  %4387 = vmatprep.subr.mxu1 %v2544_v38  ;;  %v3509_v55 = vmul.f32 %v5198_v23, %v5013_v15  ;;  %v3508_v57 = vmul.f32 %v5204_v33, %v5013_v15  ;;  %v3507_v63 = vmul.f32 %v5212_v37, %v5013_v15  ;;  %v3636_v15 = vld [vmem:[%s5499_s6 + $0x18] sm:$0xff] }
 0x3f1   : > { %4388 = vmatpush3.msra.mxu1 %v2544_v38 }
 0x3f2   : > { %2908 = vrot.lane.b32.xlu1 %v2894_v39, %s4541_s10  ;;  %4390 = vmatmul.mubr.msk.f32.vlgmr.msra.gmra.mxu1 %vm1406_vm6, %v2549_v43  ;;  %v3895_v39 = vld [vmem:[%s5498_s5 + $0x50] sm:$0xff] }
 0x3f3   : > { %4392 = vmatprep.mubr.msk.f32.mxu1 %vm1406_vm6, %v2550_v48 }
 0x3f4   : > { %2782 = vrot.lane.b32.xlu0 %v2768_v40, %s4542_s11 }
 0x3f6   : > { %3024 = vrot.lane.b32.xlu1 %v5212_v37, %s4540_s9  ;;  %4393 = vmatmul.mubr.msk.f32.gmra.mxu1 %vm1406_vm6, %v2551_v49 }
 0x3f7   : > { %4417 = vmatprep.mubr.msk.f32.mxu1 %vm1406_vm6, %v3901_v54  ;;  %v3912_v54 = vld [vmem:[%s5498_s5 + $0x98] sm:$0xff] }
 0x3f8   : > { %2567 = vrot.lane.b32.xlu0 %v5192_v18, %s4539_s15 }
 0x3fa   : > { %3152 = vrot.lane.b32.xlu1 %v3138_v20, %s4543_s12  ;;  %v3896_v20 = vld [vmem:[%s5498_s5 + $0x58] sm:$0xff] }
 0x3fc   : > { %3030 = vrot.lane.b32.xlu0 %v5192_v18, %s4540_s9 }
 0x3fe   : > { %2780 = vrot.lane.b32.xlu1 %v2767_v42, %s4542_s11 }
 0x400   : > { %3278 = vrot.lane.b32.xlu0 %v3264_v44, %s4544_s21  ;;  %v3909_v44 = vld [vmem:[%s5498_s5 + $0x80] sm:$0xff] }
 0x402   : > { %2906 = vrot.lane.b32.xlu1 %v2893_v46, %s4541_s10  ;;  %v3904_v46 = vld [vmem:[%s5498_s5 + $0x78] sm:$0xff] }
 0x404   : > { %2786 = vrot.lane.b32.xlu0 %v2770_v47, %s4542_s11  ;;  %v3910_v47 = vld [vmem:[%s5498_s5 + $0x88] sm:$0xff] }
 0x406   : > { %2565 = vrot.lane.b32.xlu1 %v5198_v23, %s4539_s15 }
 0x408   : > { %2912 = vrot.lane.b32.xlu0 %v2896_v50, %s4541_s10  ;;  %v3911_v50 = vld [vmem:[%s5498_s5 + $0x90] sm:$0xff] }
 0x40a   : > { %3150 = vrot.lane.b32.xlu1 %v3137_v53, %s4543_s12  ;;  %v3917_v53 = vld [vmem:[%s5498_s5 + $0xa0] sm:$0xff] }
 0x40c   : > { %3028 = vrot.lane.b32.xlu0 %v5198_v23, %s4540_s9 }
 0x40e   : > { %2784 = vrot.lane.b32.xlu1 %v2769_v56, %s4542_s11  ;;  %v3918_v56 = vld [vmem:[%s5498_s5 + $0xa8] sm:$0xff] }
 0x410   : > { %3156 = vrot.lane.b32.xlu0 %v3140_v58, %s4543_s12 }
 0x412   : > { %2910 = vrot.lane.b32.xlu1 %v2895_v59, %s4541_s10 }
 0x414   : > { %3282 = vrot.lane.b32.xlu0 %v3266_v60, %s4544_s21  ;;  %v3925_v60 = vld [vmem:[%s5498_s5 + $0xc0] sm:$0xff] }
 0x416   : > { %3276 = vrot.lane.b32.xlu1 %v3263_v51, %s4544_s21  ;;  %v3919_v51 = vld [vmem:[%s5498_s5 + $0xb0] sm:$0xff] }
 0x418   : > { %3400 = vrot.lane.b32.xlu0 %v5192_v18, %s4545_s30 }
 0x41a   : > { %3154 = vrot.lane.b32.xlu1 %v3139_v61, %s4543_s12  ;;  %v3920_v61 = vld [vmem:[%s5498_s5 + $0xb8] sm:$0xff] }
 0x41c   : > { %3280 = vrot.lane.b32.xlu0 %v3265_v52, %s4544_s21  ;;  %v3926_v52 = vld [vmem:[%s5498_s5 + $0xc8] sm:$0xff] }
 0x41e   : > { %3398 = vrot.lane.b32.xlu1 %v5198_v23, %s4545_s30  ;;  %v3882_v23 = vld [vmem:[%s5498_s5 + $0x28] sm:$0xff] }
 0x420   : > { %3526 = vrot.lane.b32.xlu0 %v3510_v62, %s4546_s13 }
 0x422   : > { %3396 = vrot.lane.b32.xlu1 %v5204_v33, %s4545_s30  ;;  %v3884_v33 = vld [vmem:[%s5498_s5 + $0x38] sm:$0xff] }
 0x424   : > { %3524 = vrot.lane.b32.xlu0 %v3509_v55, %s4546_s13 }
 0x426   : > { %3394 = vrot.lane.b32.xlu1 %v5212_v37, %s4545_s30  ;;  %v3894_v37 = vld [vmem:[%s5498_s5 + $0x48] sm:$0xff] }
 0x428   : > { %3522 = vrot.lane.b32.xlu0 %v3508_v57, %s4546_s13  ;;  %v3927_v57 = vld [vmem:[%s5498_s5 + $0xd0] sm:$0xff] }
 0x42a   : > { %3520 = vrot.lane.b32.xlu1 %v3507_v63, %s4546_s13  ;;  %v3933_v63 = vld [vmem:[%s5498_s5 + $0xe0] sm:$0xff]  ;;  %s3952_s13 = sshll.u32 %s5505_s28, 5 }
 0x42b   : > { %s305_s14 = scalar_lea.vmem %s5501_s8, %s3952_s13 }
 0x42c   : > { %3639 = vperm.xlu0 %4521, %v3633_v0   ;;  %v3928_v0 = vld [vmem:[%s5498_s5 + $0xd8] sm:$0xff] }
 0x42e   : > { %3644 = vperm.xlu1 %4522, %v3634_v1   ;;  %v3934_v1 = vld [vmem:[%s5498_s5 + $0xe8] sm:$0xff] }
 0x430   : > { %3649 = vperm.xlu0 %4521, %v3635_v6  }
 0x432   : > { %3654 = vperm.xlu1 %4522, %v3636_v15   ;;  %v3935_v15 = vld [vmem:[%s5498_s5 + $0xf0] sm:$0xff] }
 0x45e   : > { %v2564_v7 = vpop.permute.xlu0 %2563 }
 0x460   : > { %v2562_v8 = vpop.permute.xlu1 %2561 }
 0x462   : > { %v5334_v9 = vpop.permute.xlu0 %3026 }
 0x464   : > { %v2909_v10 = vpop.permute.xlu1 %2908 }
 0x466   : > { %v2783_v2 = vpop.permute.xlu0 %2782 }
 0x468   : > { %v5336_v11 = vpop.permute.xlu1 %3024 }
 0x46a   : > { %v2568_v3 = vpop.permute.xlu0 %2567 }
 0x46b   : > { %4367 = vmatprep.subr.mxu0 %v2568_v3 }
 0x46c   : > { %v5338_v12 = vpop.permute.xlu1 %3152  ;;  %4368 = vmatpush3.msra.mxu0 %v2568_v3 }
 0x46e   : > { %v3031_v4 = vpop.permute.xlu0 %3030 }
 0x470   : > { %v2781_v13 = vpop.permute.xlu1 %2780 }
 0x472   : > { %v5340_v5 = vpop.permute.xlu0 %3278 }
 0x474   : > { %v2907_v16 = vpop.permute.xlu1 %2906 }
 0x476   : > { %v2787_v18 = vpop.permute.xlu0 %2786 }
 0x478   : > { %v2566_v19 = vpop.permute.xlu1 %2565 }
 0x479   : > { %4369 = vmatprep.subr.mxu0 %v2566_v19 }
 0x47a   : > { %4370 = vmatpush3.msra.mxu0 %v2566_v19  ;;  %v2913_v21 = vpop.permute.xlu0 %2912 }
 0x47b   : > { %4371 = vmatprep.subr.mxu0 %v2564_v7  ;;  %4409 = vmatprep.subr.mxu1 %v2913_v21 }
 0x47c   : > { %v5342_v22 = vpop.permute.xlu1 %3150  ;;  %4372 = vmatpush3.msra.mxu0 %v2564_v7  ;;  %4410 = vmatpush3.msra.mxu1 %v2913_v21  ;;  %v3941_v7 = vld [vmem:[%s5498_s5 + $0x100] sm:$0xff] }
 0x47d   : > { %4373 = vmatprep.subr.mxu0 %v2562_v8 }
 0x47e   : > { %4374 = vmatpush3.msra.mxu0 %v2562_v8  ;;  %v3029_v26 = vpop.permute.xlu0 %3028 }
 0x47f   : > { %4376 = vmatmul.mubr.msk.f32.vlgmr.msra.gmra.mxu0 %vm1406_vm6, %v3882_v23  ;;  %4395 = vmatprep.subr.mxu0 %v2787_v18 }
 0x480   : > { %v2785_v27 = vpop.permute.xlu1 %2784  ;;  %4396 = vmatpush3.msra.mxu0 %v2787_v18  ;;  %4378 = vmatprep.mubr.msk.f32.mxu0 %vm1406_vm6, %v3883_v24 }
 0x481   : > { %4397 = vmatprep.subr.mxu0 %v2785_v27 }
 0x482   : > { %4398 = vmatpush3.msra.mxu0 %v2785_v27  ;;  %v3157_v14 = vpop.permute.xlu0 %3156 }
 0x483   : > { %4379 = vmatmul.mubr.msk.f32.gmra.mxu0 %vm1406_vm6, %v3884_v33  ;;  %4399 = vmatprep.subr.mxu0 %v2783_v2 }
 0x484   : > { %v2911_v17 = vpop.permute.xlu1 %2910  ;;  %4400 = vmatpush3.msra.mxu0 %v2783_v2  ;;  %4403 = vmatprep.mubr.msk.f32.mxu0 %vm1406_vm6, %v3893_v36  ;;  %v3943_v2 = vld [vmem:[%s5498_s5 + $0x110] sm:$0xff] }
 0x485   : > { %4401 = vmatprep.subr.mxu0 %v2781_v13  ;;  %4411 = vmatprep.subr.mxu1 %v2911_v17 }
 0x486   : > { %4402 = vmatpush3.msra.mxu0 %v2781_v13  ;;  %v3283_v38 = vpop.permute.xlu0 %3282  ;;  %4412 = vmatpush3.msra.mxu1 %v2911_v17 }
 0x487   : > { %4404 = vmatmul.mubr.msk.f32.vlgmr.msra.gmra.mxu0 %vm1406_vm6, %v3894_v37  ;;  %4413 = vmatprep.subr.mxu1 %v2909_v10 }
 0x488   : > { %4423 = vmatprep.subr.mxu0 %v3031_v4  ;;  %v3277_v40 = vpop.permute.xlu1 %3276  ;;  %4414 = vmatpush3.msra.mxu1 %v2909_v10  ;;  %v3942_v10 = vld [vmem:[%s5498_s5 + $0x108] sm:$0xff] }
 0x489   : > { %4424 = vmatpush3.msra.mxu0 %v3031_v4  ;;  %4415 = vmatprep.subr.mxu1 %v2907_v16 }
 0x48a   : > { %4425 = vmatprep.subr.mxu0 %v3029_v26  ;;  %4406 = vmatprep.mubr.msk.f32.mxu0 %vm1406_vm6, %v3895_v39  ;;  %v3401_v42 = vpop.permute.xlu0 %3400 }
 0x48b   : > { %4426 = vmatpush3.msra.mxu0 %v3029_v26  ;;  %4416 = vmatpush3.msra.mxu1 %v2907_v16 }
 0x48c   : > { %4407 = vmatmul.mubr.msk.f32.gmra.mxu0 %vm1406_vm6, %v3896_v20  ;;  %4418 = vmatmul.mubr.msk.f32.vlgmr.msra.gmra.mxu1 %vm1406_vm6, %v3902_v41  ;;  %v3155_v43 = vpop.permute.xlu1 %3154 }
 0x48d   : > { %4427 = vmatprep.subr.mxu0 %v5334_v9  ;;  %4437 = vmatprep.subr.mxu1 %v3157_v14 }
 0x48e   : > { %4428 = vmatpush3.msra.mxu0 %v5334_v9  ;;  %4438 = vmatpush3.msra.mxu1 %v3157_v14  ;;  %v3281_v48 = vpop.permute.xlu0 %3280  ;;  %v3936_v9 = vld [vmem:[%s5498_s5 + $0xf8] sm:$0xff] }
 0x48f   : > { %4429 = vmatprep.subr.mxu0 %v5336_v11  ;;  %4439 = vmatprep.subr.mxu1 %v3155_v43 }
 0x490   : > { %4430 = vmatpush3.msra.mxu0 %v5336_v11  ;;  %4431 = vmatprep.mubr.msk.f32.mxu0 %vm1406_vm6, %v3909_v44  ;;  %v3399_v49 = vpop.permute.xlu1 %3398  ;;  %v3944_v11 = vld [vmem:[%s5498_s5 + $0x118] sm:$0xff] }
 0x491   : > { %4420 = vmatprep.mubr.msk.f32.mxu1 %vm1406_vm6, %v3903_v45  ;;  %4440 = vmatpush3.msra.mxu1 %v3155_v43 }
 0x492   : > { %4421 = vmatmul.mubr.msk.f32.gmra.mxu1 %vm1406_vm6, %v3904_v46  ;;  %4432 = vmatmul.mubr.msk.f32.vlgmr.msra.gmra.mxu0 %vm1406_vm6, %v3910_v47  ;;  %v3527_v58 = vpop.permute.xlu0 %3526 }
 0x493   : > { %4441 = vmatprep.subr.mxu1 %v5338_v12  ;;  %4451 = vmatprep.subr.mxu0 %v3283_v38 }
 0x494   : > { %4442 = vmatpush3.msra.mxu1 %v5338_v12  ;;  %4452 = vmatpush3.msra.mxu0 %v3283_v38  ;;  %v3397_v59 = vpop.permute.xlu1 %3396 }
 0x495   : > { %4443 = vmatprep.subr.mxu1 %v5342_v22  ;;  %4453 = vmatprep.subr.mxu0 %v3281_v48 }
 0x496   : > { %4434 = vmatprep.mubr.msk.f32.mxu0 %vm1406_vm6, %v3911_v50  ;;  %4454 = vmatpush3.msra.mxu0 %v3281_v48  ;;  %v3525_v62 = vpop.permute.xlu0 %3524 }
 0x497   : > { %4444 = vmatpush3.msra.mxu1 %v5342_v22  ;;  %4445 = vmatprep.mubr.msk.f32.mxu1 %vm1406_vm6, %v3917_v53 }
 0x498   : > { %4435 = vmatmul.mubr.msk.f32.gmra.mxu0 %vm1406_vm6, %v3912_v54  ;;  %4446 = vmatmul.mubr.msk.f32.vlgmr.msra.gmra.mxu1 %vm1406_vm6, %v3918_v56  ;;  %v3395_v55 = vpop.permute.xlu1 %3394 }
 0x499   : > { %4455 = vmatprep.subr.mxu0 %v5340_v5  ;;  %4465 = vmatprep.subr.mxu1 %v3401_v42 }
 0x49a   : > { %4456 = vmatpush3.msra.mxu0 %v5340_v5  ;;  %4466 = vmatpush3.msra.mxu1 %v3401_v42  ;;  %v3523_v6 = vpop.permute.xlu0 %3522 }
 0x49b   : > { %4457 = vmatprep.subr.mxu0 %v3277_v40  ;;  %4467 = vmatprep.subr.mxu1 %v3399_v49 }
 0x49c   : > { %4458 = vmatpush3.msra.mxu0 %v3277_v40  ;;  %4459 = vmatprep.mubr.msk.f32.mxu0 %vm1406_vm6, %v3925_v60  ;;  %v3521_v8 = vpop.permute.xlu1 %3520 }
 0x49d   : > { %4448 = vmatprep.mubr.msk.f32.mxu1 %vm1406_vm6, %v3919_v51  ;;  %4468 = vmatpush3.msra.mxu1 %v3399_v49 }
 0x49e   : > { %4449 = vmatmul.mubr.msk.f32.gmra.mxu1 %vm1406_vm6, %v3920_v61  ;;  %4460 = vmatmul.mubr.msk.f32.vlgmr.msra.gmra.mxu0 %vm1406_vm6, %v3926_v52 }
 0x49f   : > { %4469 = vmatprep.subr.mxu1 %v3397_v59  ;;  %4479 = vmatprep.subr.mxu0 %v3527_v58 }
 0x4a0   : > { %4470 = vmatpush3.msra.mxu1 %v3397_v59  ;;  %4480 = vmatpush3.msra.mxu0 %v3527_v58 }
 0x4a1   : > { %4471 = vmatprep.subr.mxu1 %v3395_v55  ;;  %4481 = vmatprep.subr.mxu0 %v3525_v62 }
 0x4a2   : > { %4462 = vmatprep.mubr.msk.f32.mxu0 %vm1406_vm6, %v3927_v57  ;;  %4482 = vmatpush3.msra.mxu0 %v3525_v62 }
 0x4a3   : > { %4472 = vmatpush3.msra.mxu1 %v3395_v55  ;;  %4473 = vmatprep.mubr.msk.f32.mxu1 %vm1406_vm6, %v3933_v63 }
 0x4a4   : > { %4463 = vmatmul.mubr.msk.f32.gmra.mxu0 %vm1406_vm6, %v3928_v0  ;;  %4474 = vmatmul.mubr.msk.f32.vlgmr.msra.gmra.mxu1 %vm1406_vm6, %v3934_v1 }
 0x4a5   : > { %4483 = vmatprep.subr.mxu0 %v3523_v6  ;;  %4476 = vmatprep.mubr.msk.f32.mxu1 %vm1406_vm6, %v3935_v15 }
 0x4a6   : > { %4484 = vmatpush3.msra.mxu0 %v3523_v6  ;;  %4487 = vmatprep.mubr.msk.f32.mxu0 %vm1406_vm6, %v3941_v7 }
 0x4a7   : > { %4485 = vmatprep.subr.mxu0 %v3521_v8 }
 0x4a8   : > { %4486 = vmatpush3.msra.mxu0 %v3521_v8  ;;  %4477 = vmatmul.mubr.msk.f32.gmra.mxu1 %vm1406_vm6, %v3936_v9 }
 0x4a9   : > { %4488 = vmatmul.mubr.msk.f32.vlgmr.msra.gmra.mxu0 %vm1406_vm6, %v3942_v10  ;;  %v3645_v10 = vpop.permute.xlu1 %3644 }
 0x4aa   : > { %4490 = vmatprep.mubr.msk.f32.mxu0 %vm1406_vm6, %v3943_v2 }
 0x4ad   : > { %4491 = vmatmul.mubr.msk.f32.gmra.mxu0 %vm1406_vm6, %v3944_v11  ;;  %v3640_v11 = vpop.permute.xlu0 %3639 }
 0x4b2   : > { %v4391_v3 = vpop.f32.mrf.mxu1 }
 0x4b4   : > { %v2748_v13 = vpop.f32.mrf.mxu1 }
 0x4b6   : > { %v4394_v18 = vpop.f32.mrf.mxu1 }
 0x4b8   : > { %v2758_v22 = vpop.f32.mrf.mxu1 }
 0x53f   : > { %v4377_v12 = vpop.f32.mrf.mxu0 }
 0x540   : > { %v2754_v20 = vadd.f32 %v4391_v3, %v4377_v12 }
 0x541   : > { %v2651_v4 = vpop.f32.mrf.mxu0 }
 0x542   : > { %v2749_v41 = vadd.f32 %v2748_v13, %v2651_v4 }
 0x543   : > { %v4380_v5 = vpop.f32.mrf.mxu0 }
 0x544   : > { %v2764_v45 = vadd.f32 %v4394_v18, %v4380_v5 }
 0x545   : > { %v2661_v16 = vpop.f32.mrf.mxu0 }
 0x546   : > { %v2759_v50 = vadd.f32 %v2758_v22, %v2661_v16 }
 0x547   : > { %v4405_v19 = vpop.f32.mrf.mxu0 }
 0x548   : > { %v2890_v42 = vadd.f32 %v4405_v19, %v2754_v20 }
 0x549   : > { %v2870_v21 = vpop.f32.mrf.mxu0 }
 0x54a   : > { %v2889_v46 = vadd.f32 %v2870_v21, %v2749_v41 }
 0x54c   : > { %v4408_v23 = vpop.f32.mrf.mxu0  ;;  %v4419_v24 = vpop.f32.mrf.mxu1 }
 0x54d   : > { %v3016_v47 = vadd.f32 %v4419_v24, %v2890_v42  ;;  %v2892_v53 = vadd.f32 %v4408_v23, %v2764_v45 }
 0x54e   : > { %v2880_v26 = vpop.f32.mrf.mxu0  ;;  %v2996_v27 = vpop.f32.mrf.mxu1 }
 0x54f   : > { %v3015_v54 = vadd.f32 %v2996_v27, %v2889_v46  ;;  %v2891_v58 = vadd.f32 %v2880_v26, %v2759_v50 }
 0x552   : > { %v4422_v33 = vpop.f32.mrf.mxu1  ;;  %v4433_v36 = vpop.f32.mrf.mxu0 }
 0x553   : > { %v3134_v56 = vadd.f32 %v4433_v36, %v3016_v47  ;;  %v3018_v59 = vadd.f32 %v4422_v33, %v2892_v53  ;;  %v3655_v36 = vpop.permute.xlu1 %3654 }
 0x554   : > { %v3006_v14 = vpop.f32.mrf.mxu1  ;;  %v3114_v17 = vpop.f32.mrf.mxu0 }
 0x555   : > { %v3133_v60 = vadd.f32 %v3114_v17, %v3015_v54  ;;  %v3017_v62 = vadd.f32 %v3006_v14, %v2891_v58 }
 0x558   : > { %v4436_v37 = vpop.f32.mrf.mxu0  ;;  %v4447_v38 = vpop.f32.mrf.mxu1 }
 0x559   : > { %v3260_v51 = vadd.f32 %v4447_v38, %v3134_v56  ;;  %v3136_v55 = vadd.f32 %v4436_v37, %v3018_v59 }
 0x55a   : > { %v3124_v39 = vpop.f32.mrf.mxu0  ;;  %v3240_v40 = vpop.f32.mrf.mxu1 }
 0x55b   : > { %v3259_v57 = vadd.f32 %v3240_v40, %v3133_v60  ;;  %v3135_v6 = vadd.f32 %v3124_v39, %v3017_v62  ;;  %v3650_v40 = vpop.permute.xlu0 %3649 }
 0x55e   : > { %v4450_v43 = vpop.f32.mrf.mxu1  ;;  %v4461_v44 = vpop.f32.mrf.mxu0 }
 0x55f   : > { %v3386_v63 = vadd.f32 %v4461_v44, %v3260_v51  ;;  %v3262_v15 = vadd.f32 %v4450_v43, %v3136_v55 }
 0x560   : > { %v3250_v48 = vpop.f32.mrf.mxu1  ;;  %v3366_v49 = vpop.f32.mrf.mxu0 }
 0x561   : > { %v3385_v7 = vadd.f32 %v3366_v49, %v3259_v57  ;;  %v3261_v3 = vadd.f32 %v3250_v48, %v3135_v6 }
 0x564   : > { %v4464_v61 = vpop.f32.mrf.mxu0  ;;  %v4475_v52 = vpop.f32.mrf.mxu1 }
 0x565   : > { %v3504_v8 = vadd.f32 %v4475_v52, %v3386_v63  ;;  %v3388_v12 = vadd.f32 %v4464_v61, %v3262_v15 }
 0x566   : > { %v3376_v0 = vpop.f32.mrf.mxu0  ;;  %v3484_v1 = vpop.f32.mrf.mxu1 }
 0x567   : > { %v3503_v4 = vadd.f32 %v3484_v1, %v3385_v7  ;;  %v3387_v18 = vadd.f32 %v3376_v0, %v3261_v3 }
 0x568   : > { %v4478_v9 = vpop.f32.mrf.mxu1 }
 0x569   : > { %v4489_v2 = vpop.f32.mrf.mxu0  ;;  %v3506_v19 = vadd.f32 %v4478_v9, %v3388_v12 }
 0x56a   : > { %v3630_v13 = vadd.f32 %v4489_v2, %v3504_v8  ;;  %v3494_v5 = vpop.f32.mrf.mxu1 }
 0x56b   : > { %v3610_v16 = vpop.f32.mrf.mxu0  ;;  %v3505_v26 = vadd.f32 %v3494_v5, %v3387_v18 }
 0x56c   : > { %v3658_v21 = vadd.f32 %v3645_v10, %v3630_v13  ;;  %v3629_v22 = vadd.f32 %v3610_v16, %v3503_v4 }
 0x56d   : > { %v4492_v23 = vpop.f32.mrf.mxu0 }
 0x56e   : > { %v3662_v24 = vadd.f32 %v3658_v21, %v1349_v34  ;;  %v3657_v27 = vadd.f32 %v3640_v11, %v3629_v22  ;;  %v3632_v33 = vadd.f32 %v4492_v23, %v3506_v19 }
 0x56f   : > { %v3620_v14 = vpop.f32.mrf.mxu0 }
 0x570   : > { %v3666_v17 = vmax.f32 %v3662_v24, 0.0  ;;  %v3661_v37 = vadd.f32 %v3657_v27, %v1348_v35  ;;  %v3660_v38 = vadd.f32 %v3655_v36, %v3632_v33  ;;  %v3631_v39 = vadd.f32 %v3620_v14, %v3505_v26 }
 0x572   : > { %3670 = vst.msk [vmem:[%s305_s14 + $0x8] sm:$0xff] %vm352_vm0, %v3666_v17  ;;  %v3665_v28 = vmax.f32 %v3661_v37, 0.0  ;;  %v3664_v34 = vadd.f32 %v3660_v38, %v1351_v29  ;;  %v3659_v20 = vadd.f32 %v3650_v40, %v3631_v39 }
 0x574   : > { %3669 = vst.msk [vmem:[%s305_s14] sm:$0xff] %vm352_vm0, %v3665_v28  ;;  %v3668_v41 = vmax.f32 %v3664_v34, 0.0  ;;  %v3663_v42 = vadd.f32 %v3659_v20, %v1350_v32 }
 0x576   : > { %3672 = vst.msk [vmem:[%s305_s14 + $0x18] sm:$0xff] %vm352_vm0, %v3668_v41  ;;  %v3667_v31 = vmax.f32 %v3663_v42, 0.0 }
 0x578   : > { %3671 = vst.msk [vmem:[%s305_s14 + $0x10] sm:$0xff] %vm352_vm0, %v3667_v31 }
 0x579 PF: > { %s18_s27 = sadd.s32 1, %s4529_s27  }
 0x57a   : > { %p15_p4 = scmp.ge.s32.totalorder %s18_s27, 4  }
 0x57c   :  { %17 = sbr.rel (!%p15_p4) target bundleno = 1 (0x1), region = 106 }

// kernel: encoder_event_forward.7
= control target key start
LH: loop header
LB: loop body
LE: loop exit
PB: predicated region body
PF: predicated region fallthrough
CT: control target
= control target key end

     0   :  { %s4710_s27 = smov 0   ;;  %s5664_s0 = inlined_call_operand.vmem [shape: f32[2,128,4], index: 0, kind: input, shape index: {}]   ;;  %s5665_s1 = inlined_call_operand.vmem [shape: f32[9,32,32], index: 1, kind: input, shape index: {}]   ;;  %s5666_s2 = inlined_call_operand.vmem [shape: f32[32,1], index: 2, kind: input, shape index: {}]   ;;  %s5667_s3 = inlined_call_operand.vmem [shape: f32[9,32,32], index: 3, kind: input, shape index: {}]   ;;  %s5668_s4 = inlined_call_operand.vmem [shape: f32[32,1], index: 4, kind: input, shape index: {}]   ;;  %s5669_s5 = inlined_call_operand.vmem [shape: f32[9,32,32], index: 5, kind: input, shape index: {}]   ;;  %s5670_s6 = inlined_call_operand.vmem [shape: f32[32,1], index: 6, kind: input, shape index: {}]   ;;  %s5671_s7 = inlined_call_operand.vmem [shape: f32[2,4], index: 7, kind: input, shape index: {}]   ;;  %s5672_s8 = inlined_call_operand.vmem [shape: f32[2,32,4], index: 8, kind: output, shape index: {}]  }
   0x1 LB: > { %s3788_s28 = sadd.s32 4294967295, %s4651_s27   ;;  %p3792_p0 = scmp.ge.s32.totalorder %s4651_s27, 1  ;;  %s4651_s27 = sphi %s4710_s27, %s18_s27  }
   0x2   : > { %p262_p1 = scmp.lt.s32.totalorder %s4651_s27, 3 }
   0x4   : > { %p263_p2 = pnand %p3792_p0, %p262_p1 }
   0x5   : > { %p296_p3 = scmp.lt.s32.totalorder (!%p263_p2), %s3788_s28, 1  ;;  %s4653_s11 = smov (!%p263_p2), 3  }
   0x6   : > { %266 = sbr.rel (%p263_p2) target bundleno = 1423 (0x58f), region = 52  ;;  %s4654_s12 = smov (!%p263_p2), 2  }
   0x7   : > { %s4655_s17 = smov (!%p263_p2), 1   ;;  %s4657_s25 = smov (!%p263_p2), 4  }
   0x8   : > { %s4658_s26 = smov (!%p263_p2), 6   ;;  %s4661_s30 = smov (!%p263_p2), 126  }
   0x9   : > { %s4662_s9 = smov (!%p263_p2), 124   ;;  %s4663_s24 = smov (!%p263_p2), 123  }
   0xb   : > { %s5676_s28 = smov (!%p296_p3, %s3788_s28), 1  ;;  %vm382_vm0 = vcmask 261120   ;;  %v3797_v4 = vld [vmem:[%s5665_s1 + $0x20] sm:$0xff]  ;;  %v1382_v14 = vld [vmem:[%s5666_s2 + $0x10] sm:$0xff]  ;;  %v1383_v15 = vld [vmem:[%s5666_s2 + $0x18] sm:$0xff]  ;;  %v4656_v16 = vmov 0   ;;  %v344_v19 = vlaneseq }
   0xc   : > { %s4019_s29 = sshll.u32 %s5676_s28, 7  ;;  %4245 = vmatprep.mubr.msk.f32.mxu0 %vm382_vm0, %v3797_v4  ;;  %v352_v7 = vld [vmem:[%s5665_s1] sm:$0xff]  ;;  %4644 = vset.pattern.permute.xlu1 %v4656_v16  ;;  %v1381_v17 = vld [vmem:[%s5666_s2 + $0x8] sm:$0xff]  ;;  %vm372_vm1 = vcmask 15360   ;;  %vm339_vm2 = vcmask 23552   ;;  %v3799_v35 = vld [vmem:[%s5665_s1 + $0x30] sm:$0xff] }
   0xd   : > { %s4724_s10 = scalar_lea.vmem %s5664_s0, %s4019_s29  ;;  %4259 = vmatprep.mubr.msk.f32.mxu1 %vm382_vm0, %v352_v7  ;;  %4643 = vset.pattern.permute.xlu0 %v4656_v16  ;;  %v1380_v18 = vld [vmem:[%s5666_s2] sm:$0xff]  ;;  %v4814_v20 = vshrl.u32 %v344_v19, 7  ;;  %vm4822_vm3 = vmneg %vm372_vm1  ;;  %v3798_v33 = vld [vmem:[%s5665_s1 + $0x28] sm:$0xff]  ;;  %vm715_vm4 = vcmask 7168   ;;  %vm1432_vm5 = vcmask 56320   ;;  %s4660_s29 = smov 125  }
   0xe   : > { %v4727_v0 = vld [vmem:[%s4724_s10 + $0x78] sm:$0xff]  ;;  %v4737_v2 = vld [vmem:[%s4724_s10 + $0x50] sm:$0xff]  ;;  %v4740_v3 = vld [vmem:[%s4724_s10 + $0x48] sm:$0xff]  ;;  %vm3728_vm6 = vcmask 31744  }
   0xf   : > { %v4730_v1 = vld [vmem:[%s4724_s10 + $0x58] sm:$0xff]  ;;  %333 = vrot.lane.b32.xlu1 %v4727_v0, %s4653_s11  ;;  %v4750_v5 = vld [vmem:[%s4724_s10 + $0x70] sm:$0xff]  ;;  %v4753_v6 = vld [vmem:[%s4724_s10 + $0x40] sm:$0xff]  ;;  %v346_v21 = vsub.s32 0, %v4814_v20 }
  0x10   : > { %366 = vrot.lane.b32.xlu0 %v4730_v1, %s4654_s12  ;;  %v4765_v8 = vld [vmem:[%s4724_s10 + $0x68] sm:$0xff]  ;;  %v4772_v9 = vld [vmem:[%s4724_s10 + $0x60] sm:$0xff]  ;;  %v4779_v10 = vld [vmem:[%s4724_s10 + $0x38] sm:$0xff] }
  0x11   : > { %v4785_v11 = vld [vmem:[%s4724_s10 + $0x30] sm:$0xff]  ;;  %v4791_v12 = vld [vmem:[%s4724_s10 + $0x28] sm:$0xff]  ;;  %v4794_v13 = vld [vmem:[%s4724_s10 + $0x20] sm:$0xff] }
  0x12   : > { %v4820_v22 = vld [vmem:[%s5671_s7] sm:$0x3]  ;;  %v3800_v39 = vld [vmem:[%s5665_s1 + $0x38] sm:$0xff]  ;;  %v353_v47 = vld [vmem:[%s5665_s1 + $0x8] sm:$0xff] }
  0x13   : > { %362 = vrot.lane.b32.xlu1 %v4740_v3, %s4654_s12  ;;  %v4827_v24 = vrot.slane %v4820_v22, %v346_v21  ;;  %v3817_v41 = vld [vmem:[%s5665_s1 + $0x40] sm:$0xff]  ;;  %v354_v50 = vld [vmem:[%s5665_s1 + $0x10] sm:$0xff]  ;;  %v355_v53 = vld [vmem:[%s5665_s1 + $0x18] sm:$0xff] }
  0x14   : > { %364 = vrot.lane.b32.xlu0 %v4737_v2, %s4654_s12  ;;  %v3818_v56 = vld [vmem:[%s5665_s1 + $0x48] sm:$0xff]  ;;  %v310_v57 = vld [vmem:[%s4724_s10 + $0x18] sm:$0xff]  ;;  %v3819_v60 = vld [vmem:[%s5665_s1 + $0x50] sm:$0xff] }
  0x15   : > { %v309_v61 = vld [vmem:[%s4724_s10 + $0x10] sm:$0xff]  ;;  %v3833_v62 = vld [vmem:[%s5665_s1 + $0x60] sm:$0xff]  ;;  %v3820_v7 = vld [vmem:[%s5665_s1 + $0x58] sm:$0xff] }
  0x16   : > { %v307_v23 = vld [vmem:[%s4724_s10] sm:$0xff] }
  0x17   : > { %360 = vrot.lane.b32.xlu1 %v4753_v6, %s4654_s12 }
  0x18   : > { %331 = vrot.lane.b32.xlu0 %v4750_v5, %s4653_s11 }
  0x1b   : > { %583 = vrot.lane.b32.xlu1 %v4727_v0, %s4654_s12 }
  0x1c   : > { %329 = vrot.lane.b32.xlu0 %v4765_v8, %s4653_s11 }
  0x1f   : > { %581 = vrot.lane.b32.xlu1 %v4750_v5, %s4654_s12 }
  0x20   : > { %327 = vrot.lane.b32.xlu0 %v4772_v9, %s4653_s11 }
  0x23   : > { %579 = vrot.lane.b32.xlu1 %v4765_v8, %s4654_s12 }
  0x24   : > { %709 = vrot.lane.b32.xlu0 %v4779_v10, %s4655_s17 }
  0x27   : > { %577 = vrot.lane.b32.xlu1 %v4772_v9, %s4654_s12 }
  0x28   : > { %707 = vrot.lane.b32.xlu0 %v4785_v11, %s4655_s17 }
  0x2b   : > { %703 = vrot.lane.b32.xlu1 %v4794_v13, %s4655_s17 }
  0x2c   : > { %705 = vrot.lane.b32.xlu0 %v4791_v12, %s4655_s17 }
  0x2f   : > { %1046 = vrot.lane.b32.xlu1 %v4750_v5, %s4655_s17 }
  0x30   : > { %1048 = vrot.lane.b32.xlu0 %v4727_v0, %s4655_s17 }
  0x33   : > { %1042 = vrot.lane.b32.xlu1 %v4772_v9, %s4655_s17 }
  0x34   : > { %1044 = vrot.lane.b32.xlu0 %v4765_v8, %s4655_s17 }
  0x37   : > { %1396 = vperm.xlu1 %4644, %v1382_v14  }
  0x38   : > { %1401 = vperm.xlu0 %4643, %v1383_v15  }
  0x3b   : > { %1391 = vperm.xlu1 %4644, %v1381_v17  }
  0x3c   : > { %1386 = vperm.xlu0 %4643, %v1380_v18   ;;  %v308_v18 = vld [vmem:[%s4724_s10 + $0x8] sm:$0xff] }
  0x81   : > { %v334_v25 = vpop.permute.xlu1 %333 }
  0x82   : > { %v367_v26 = vpop.permute.xlu0 %366  ;;  %v343_v27 = vsel %vm339_vm2, 0.0, %v334_v25 }
  0x83   : > { %4237 = vmatprep.subr.msk.mxu0 %vm4822_vm3, %v367_v26  ;;  %v351_v28 = vmul.f32 %v4827_v24, %v343_v27  ;;  %v3841_v27 = vld [vmem:[%s5665_s1 + $0x80] sm:$0xff] }
  0x84   : > { %4238 = vmatpush3.msk.msra.mxu0 %vm4822_vm3, %v367_v26 }
  0x85   : > { %v363_v30 = vpop.permute.xlu1 %362  ;;  %4251 = vmatprep.subr.mxu1 %v351_v28 }
  0x86   : > { %v365_v29 = vpop.permute.xlu0 %364  ;;  %4252 = vmatpush3.msra.mxu1 %v351_v28 }
  0x87   : > { %4239 = vmatprep.subr.msk.mxu0 %vm4822_vm3, %v365_v29 }
  0x88   : > { %4240 = vmatpush3.msk.msra.mxu0 %vm4822_vm3, %v365_v29  ;;  %v3834_v29 = vld [vmem:[%s5665_s1 + $0x68] sm:$0xff] }
  0x89   : > { %4241 = vmatprep.subr.msk.mxu0 %vm4822_vm3, %v363_v30  ;;  %v361_v32 = vpop.permute.xlu1 %360 }
  0x8a   : > { %v332_v31 = vpop.permute.xlu0 %331  ;;  %4242 = vmatpush3.msk.msra.mxu0 %vm4822_vm3, %v363_v30  ;;  %v3842_v30 = vld [vmem:[%s5665_s1 + $0x88] sm:$0xff] }
  0x8b   : > { %v342_v34 = vsel %vm339_vm2, 0.0, %v332_v31  ;;  %4243 = vmatprep.subr.msk.mxu0 %vm4822_vm3, %v361_v32 }
  0x8c   : > { %v350_v36 = vmul.f32 %v4827_v24, %v342_v34  ;;  %4244 = vmatpush3.msk.msra.mxu0 %vm4822_vm3, %v361_v32 }
  0x8d   : > { %4246 = vmatmul.mubr.msk.f32.vlgmr.msra.gmra.mxu0 %vm382_vm0, %v3798_v33  ;;  %v584_v38 = vpop.permute.xlu1 %583 }
  0x8e   : > { %4253 = vmatprep.subr.mxu1 %v350_v36  ;;  %v330_v37 = vpop.permute.xlu0 %329  ;;  %4248 = vmatprep.mubr.msk.f32.mxu0 %vm382_vm0, %v3799_v35  ;;  %v3835_v35 = vld [vmem:[%s5665_s1 + $0x70] sm:$0xff] }
  0x8f   : > { %v341_v40 = vsel %vm339_vm2, 0.0, %v330_v37  ;;  %4254 = vmatpush3.msra.mxu1 %v350_v36  ;;  %4265 = vmatprep.subr.msk.mxu0 %vm4822_vm3, %v584_v38  ;;  %v3843_v36 = vld [vmem:[%s5665_s1 + $0x90] sm:$0xff] }
  0x90   : > { %v349_v42 = vmul.f32 %v4827_v24, %v341_v40  ;;  %4266 = vmatpush3.msk.msra.mxu0 %vm4822_vm3, %v584_v38  ;;  %v3844_v40 = vld [vmem:[%s5665_s1 + $0x98] sm:$0xff] }
  0x91   : > { %4249 = vmatmul.mubr.msk.f32.gmra.mxu0 %vm382_vm0, %v3800_v39  ;;  %v582_v44 = vpop.permute.xlu1 %581  ;;  %v3836_v39 = vld [vmem:[%s5665_s1 + $0x78] sm:$0xff] }
  0x92   : > { %4255 = vmatprep.subr.mxu1 %v349_v42  ;;  %v328_v43 = vpop.permute.xlu0 %327  ;;  %4273 = vmatprep.mubr.msk.f32.mxu0 %vm382_vm0, %v3817_v41  ;;  %v3849_v41 = vld [vmem:[%s5665_s1 + $0xa0] sm:$0xff] }
  0x93   : > { %v340_v45 = vsel %vm339_vm2, 0.0, %v328_v43  ;;  %4256 = vmatpush3.msra.mxu1 %v349_v42  ;;  %4267 = vmatprep.subr.msk.mxu0 %vm4822_vm3, %v582_v44  ;;  %v3857_v42 = vld [vmem:[%s5665_s1 + $0xc0] sm:$0xff]  ;;  %v3858_v43 = vld [vmem:[%s5665_s1 + $0xc8] sm:$0xff] }
  0x94   : > { %v348_v46 = vmul.f32 %v4827_v24, %v340_v45  ;;  %4268 = vmatpush3.msk.msra.mxu0 %vm4822_vm3, %v582_v44  ;;  %v3852_v44 = vld [vmem:[%s5665_s1 + $0xb8] sm:$0xff] }
  0x95   : > { %v580_v48 = vpop.permute.xlu1 %579  ;;  %v3860_v45 = vld [vmem:[%s5665_s1 + $0xd8] sm:$0xff] }
  0x96   : > { %4257 = vmatprep.subr.mxu1 %v348_v46  ;;  %v710_v49 = vpop.permute.xlu0 %709  ;;  %4269 = vmatprep.subr.msk.mxu0 %vm4822_vm3, %v580_v48 }
  0x97   : > { %v719_v51 = vsel %vm715_vm4, 0.0, %v710_v49  ;;  %4258 = vmatpush3.msra.mxu1 %v348_v46  ;;  %4270 = vmatpush3.msk.msra.mxu0 %vm4822_vm3, %v580_v48  ;;  %v3876_v46 = vld [vmem:[%s5665_s1 + $0x118] sm:$0xff] }
  0x98   : > { %v723_v52 = vmul.f32 %v719_v51, %v4827_v24  ;;  %4260 = vmatmul.mubr.msk.f32.vlgmr.msra.gmra.mxu1 %vm382_vm0, %v353_v47 }
  0x99   : > { %4262 = vmatprep.mubr.msk.f32.mxu1 %vm382_vm0, %v354_v50  ;;  %v578_v54 = vpop.permute.xlu1 %577 }
  0x9a   : > { %4279 = vmatprep.subr.mxu1 %v723_v52  ;;  %v708_v55 = vpop.permute.xlu0 %707  ;;  %4271 = vmatprep.subr.msk.mxu0 %vm4822_vm3, %v578_v54 }
  0x9b   : > { %v718_v58 = vsel %vm715_vm4, 0.0, %v708_v55  ;;  %4280 = vmatpush3.msra.mxu1 %v723_v52  ;;  %4272 = vmatpush3.msk.msra.mxu0 %vm4822_vm3, %v578_v54 }
  0x9c   : > { %v722_v59 = vmul.f32 %v718_v58, %v4827_v24  ;;  %4263 = vmatmul.mubr.msk.f32.gmra.mxu1 %vm382_vm0, %v355_v53  ;;  %4274 = vmatmul.mubr.msk.f32.vlgmr.msra.gmra.mxu0 %vm382_vm0, %v3818_v56 }
  0x9d   : > { %4293 = vmatprep.subr.mxu0 %v310_v57  ;;  %v704_v4 = vpop.permute.xlu1 %703  ;;  %4276 = vmatprep.mubr.msk.f32.mxu0 %vm382_vm0, %v3819_v60 }
  0x9e   : > { %4281 = vmatprep.subr.mxu1 %v722_v59  ;;  %v706_v63 = vpop.permute.xlu0 %705  ;;  %4294 = vmatpush3.msra.mxu0 %v310_v57  ;;  %v716_v15 = vsel %vm715_vm4, 0.0, %v704_v4 }
  0x9f   : > { %v717_v14 = vsel %vm715_vm4, 0.0, %v706_v63  ;;  %4282 = vmatpush3.msra.mxu1 %v722_v59  ;;  %v720_v17 = vmul.f32 %v716_v15, %v4827_v24  ;;  %4295 = vmatprep.subr.mxu0 %v309_v61 }
  0xa0   : > { %v721_v16 = vmul.f32 %v717_v14, %v4827_v24  ;;  %4287 = vmatprep.mubr.msk.f32.mxu1 %vm382_vm0, %v3833_v62  ;;  %4277 = vmatmul.mubr.msk.f32.gmra.mxu0 %vm382_vm0, %v3820_v7 }
  0xa1   : > { %4296 = vmatpush3.msra.mxu0 %v309_v61  ;;  %v1047_v21 = vpop.permute.xlu1 %1046  ;;  %4301 = vmatprep.mubr.msk.f32.mxu0 %vm382_vm0, %v3841_v27 }
  0xa2   : > { %4283 = vmatprep.subr.mxu1 %v721_v16  ;;  %v1049_v19 = vpop.permute.xlu0 %1048  ;;  %4297 = vmatprep.subr.mxu0 %v308_v18  ;;  %v1056_v26 = vsel %vm715_vm4, 0.0, %v1047_v21 }
  0xa3   : > { %v1057_v25 = vsel %vm715_vm4, 0.0, %v1049_v19  ;;  %4284 = vmatpush3.msra.mxu1 %v721_v16  ;;  %4298 = vmatpush3.msra.mxu0 %v308_v18  ;;  %v1060_v31 = vmul.f32 %v1056_v26, %v4827_v24 }
  0xa4   : > { %v1061_v28 = vmul.f32 %v1057_v25, %v4827_v24  ;;  %4285 = vmatprep.subr.mxu1 %v720_v17  ;;  %4299 = vmatprep.subr.mxu0 %v307_v23 }
  0xa5   : > { %4286 = vmatpush3.msra.mxu1 %v720_v17  ;;  %4300 = vmatpush3.msra.mxu0 %v307_v23  ;;  %v1043_v33 = vpop.permute.xlu1 %1042 }
  0xa6   : > { %v1045_v32 = vpop.permute.xlu0 %1044  ;;  %4288 = vmatmul.mubr.msk.f32.vlgmr.msra.gmra.mxu1 %vm382_vm0, %v3834_v29  ;;  %4302 = vmatmul.mubr.msk.f32.vlgmr.msra.gmra.mxu0 %vm382_vm0, %v3842_v30  ;;  %v1054_v37 = vsel %vm715_vm4, 0.0, %v1043_v33 }
  0xa7   : > { %v1055_v34 = vsel %vm715_vm4, 0.0, %v1045_v32  ;;  %4307 = vmatprep.subr.mxu1 %v4779_v10  ;;  %4321 = vmatprep.subr.mxu0 %v1061_v28 }
  0xa8   : > { %4308 = vmatpush3.msra.mxu1 %v4779_v10  ;;  %4322 = vmatpush3.msra.mxu0 %v1061_v28  ;;  %v1059_v38 = vmul.f32 %v1055_v34, %v4827_v24  ;;  %v1058_v10 = vmul.f32 %v1054_v37, %v4827_v24 }
  0xa9   : > { %4309 = vmatprep.subr.mxu1 %v4785_v11  ;;  %4323 = vmatprep.subr.mxu0 %v1060_v31 }
  0xaa   : > { %4290 = vmatprep.mubr.msk.f32.mxu1 %vm382_vm0, %v3835_v35  ;;  %4304 = vmatprep.mubr.msk.f32.mxu0 %vm382_vm0, %v3843_v36 }
  0xab   : > { %4310 = vmatpush3.msra.mxu1 %v4785_v11  ;;  %4324 = vmatpush3.msra.mxu0 %v1060_v31  ;;  %v3850_v11 = vld [vmem:[%s5665_s1 + $0xa8] sm:$0xff] }
  0xac   : > { %4291 = vmatmul.mubr.msk.f32.gmra.mxu1 %vm382_vm0, %v3836_v39  ;;  %4305 = vmatmul.mubr.msk.f32.gmra.mxu0 %vm382_vm0, %v3844_v40 }
  0xad   : > { %4311 = vmatprep.subr.mxu1 %v4791_v12  ;;  %4325 = vmatprep.subr.mxu0 %v1059_v38 }
  0xae   : > { %4312 = vmatpush3.msra.mxu1 %v4791_v12  ;;  %4326 = vmatpush3.msra.mxu0 %v1059_v38  ;;  %v3851_v12 = vld [vmem:[%s5665_s1 + $0xb0] sm:$0xff] }
  0xaf   : > { %4313 = vmatprep.subr.mxu1 %v4794_v13  ;;  %4327 = vmatprep.subr.mxu0 %v1058_v10 }
  0xb0   : > { %4314 = vmatpush3.msra.mxu1 %v4794_v13  ;;  %4315 = vmatprep.mubr.msk.f32.mxu1 %vm382_vm0, %v3849_v41  ;;  %v3859_v13 = vld [vmem:[%s5665_s1 + $0xd0] sm:$0xff] }
  0xb1   : > { %4328 = vmatpush3.msra.mxu0 %v1058_v10  ;;  %4329 = vmatprep.mubr.msk.f32.mxu0 %vm382_vm0, %v3857_v42 }
  0xb2   : > { %4316 = vmatmul.mubr.msk.f32.vlgmr.msra.gmra.mxu1 %vm382_vm0, %v3850_v11  ;;  %4330 = vmatmul.mubr.msk.f32.vlgmr.msra.gmra.mxu0 %vm382_vm0, %v3858_v43 }
  0xb3   : > { %4335 = vmatprep.subr.mxu1 %v4730_v1  ;;  %4349 = vmatprep.subr.mxu0 %v4727_v0 }
  0xb4   : > { %4336 = vmatpush3.msra.mxu1 %v4730_v1  ;;  %4350 = vmatpush3.msra.mxu0 %v4727_v0  ;;  %v3865_v0 = vld [vmem:[%s5665_s1 + $0xe0] sm:$0xff] }
  0xb5   : > { %4337 = vmatprep.subr.mxu1 %v4737_v2  ;;  %4351 = vmatprep.subr.mxu0 %v4750_v5  ;;  %v3873_v1 = vld [vmem:[%s5665_s1 + $0x100] sm:$0xff] }
  0xb6   : > { %4318 = vmatprep.mubr.msk.f32.mxu1 %vm382_vm0, %v3851_v12  ;;  %4332 = vmatprep.mubr.msk.f32.mxu0 %vm382_vm0, %v3859_v13 }
  0xb7   : > { %4338 = vmatpush3.msra.mxu1 %v4737_v2  ;;  %4352 = vmatpush3.msra.mxu0 %v4750_v5  ;;  %v3866_v2 = vld [vmem:[%s5665_s1 + $0xe8] sm:$0xff] }
  0xb8   : > { %4319 = vmatmul.mubr.msk.f32.gmra.mxu1 %vm382_vm0, %v3852_v44  ;;  %4333 = vmatmul.mubr.msk.f32.gmra.mxu0 %vm382_vm0, %v3860_v45  ;;  %v3874_v5 = vld [vmem:[%s5665_s1 + $0x108] sm:$0xff]  ;;  %v1397_v44 = vpop.permute.xlu1 %1396 }
  0xb9   : > { %4339 = vmatprep.subr.mxu1 %v4740_v3  ;;  %4353 = vmatprep.subr.mxu0 %v4765_v8 }
  0xba   : > { %4340 = vmatpush3.msra.mxu1 %v4740_v3  ;;  %4354 = vmatpush3.msra.mxu0 %v4765_v8  ;;  %v3867_v3 = vld [vmem:[%s5665_s1 + $0xf0] sm:$0xff] }
  0xbb   : > { %4341 = vmatprep.subr.mxu1 %v4753_v6  ;;  %4355 = vmatprep.subr.mxu0 %v4772_v9  ;;  %v3875_v8 = vld [vmem:[%s5665_s1 + $0x110] sm:$0xff] }
  0xbc   : > { %4342 = vmatpush3.msra.mxu1 %v4753_v6  ;;  %4343 = vmatprep.mubr.msk.f32.mxu1 %vm382_vm0, %v3865_v0  ;;  %v3868_v6 = vld [vmem:[%s5665_s1 + $0xf8] sm:$0xff] }
  0xbd   : > { %4356 = vmatpush3.msra.mxu0 %v4772_v9  ;;  %4357 = vmatprep.mubr.msk.f32.mxu0 %vm382_vm0, %v3873_v1 }
  0xbe   : > { %4344 = vmatmul.mubr.msk.f32.vlgmr.msra.gmra.mxu1 %vm382_vm0, %v3866_v2  ;;  %4358 = vmatmul.mubr.msk.f32.vlgmr.msra.gmra.mxu0 %vm382_vm0, %v3874_v5 }
  0xbf   : > { %4346 = vmatprep.mubr.msk.f32.mxu1 %vm382_vm0, %v3867_v3  ;;  %4360 = vmatprep.mubr.msk.f32.mxu0 %vm382_vm0, %v3875_v8  ;;  %v1402_v3 = vpop.permute.xlu0 %1401 }
  0xc2   : > { %4347 = vmatmul.mubr.msk.f32.gmra.mxu1 %vm382_vm0, %v3868_v6  ;;  %4361 = vmatmul.mubr.msk.f32.gmra.mxu0 %vm382_vm0, %v3876_v46 }
 0x14d   : > { %v4247_v9 = vpop.f32.mrf.mxu0 }
 0x14f   : > { %v461_v47 = vpop.f32.mrf.mxu0 }
 0x151   : > { %v4250_v48 = vpop.f32.mrf.mxu0 }
 0x153   : > { %v471_v50 = vpop.f32.mrf.mxu0 }
 0x158   : > { %v4261_v49 = vpop.f32.mrf.mxu1 }
 0x159   : > { %v564_v14 = vadd.f32 %v4261_v49, %v4247_v9 }
 0x15a   : > { %v558_v51 = vpop.f32.mrf.mxu1 }
 0x15b   : > { %v559_v17 = vadd.f32 %v558_v51, %v461_v47 }
 0x15c   : > { %v4275_v52 = vpop.f32.mrf.mxu0  ;;  %v4264_v54 = vpop.f32.mrf.mxu1 }
 0x15d   : > { %v574_v18 = vadd.f32 %v4264_v54, %v4250_v48  ;;  %v696_v19 = vadd.f32 %v4275_v52, %v564_v14  ;;  %v1392_v52 = vpop.permute.xlu1 %1391 }
 0x15e   : > { %v676_v53 = vpop.f32.mrf.mxu0  ;;  %v568_v57 = vpop.f32.mrf.mxu1 }
 0x15f   : > { %v569_v25 = vadd.f32 %v568_v57, %v471_v50  ;;  %v695_v26 = vadd.f32 %v676_v53, %v559_v17  ;;  %v1387_v57 = vpop.permute.xlu0 %1386 }
 0x160   : > { %v4278_v55 = vpop.f32.mrf.mxu0 }
 0x161   : > { %v698_v27 = vadd.f32 %v4278_v55, %v574_v18 }
 0x162   : > { %v686_v56 = vpop.f32.mrf.mxu0 }
 0x163   : > { %v697_v29 = vadd.f32 %v686_v56, %v569_v25 }
 0x166   : > { %v4289_v58 = vpop.f32.mrf.mxu1  ;;  %v4303_v59 = vpop.f32.mrf.mxu0 }
 0x167   : > { %v827_v28 = vadd.f32 %v4289_v58, %v696_v19 }
 0x168   : > { %v807_v60 = vpop.f32.mrf.mxu1  ;;  %v913_v61 = vpop.f32.mrf.mxu0 }
 0x169   : > { %v826_v30 = vadd.f32 %v807_v60, %v695_v26  ;;  %v933_v34 = vadd.f32 %v4303_v59, %v827_v28 }
 0x16b   : > { %v932_v38 = vadd.f32 %v913_v61, %v826_v30 }
 0x16c   : > { %v4292_v62 = vpop.f32.mrf.mxu1  ;;  %v4306_v63 = vpop.f32.mrf.mxu0 }
 0x16d   : > { %v829_v31 = vadd.f32 %v4292_v62, %v698_v27 }
 0x16e   : > { %v817_v4 = vpop.f32.mrf.mxu1  ;;  %v923_v7 = vpop.f32.mrf.mxu0 }
 0x16f   : > { %v828_v35 = vadd.f32 %v817_v4, %v697_v29  ;;  %v935_v39 = vadd.f32 %v4306_v63, %v829_v31  ;;  %v1662_v63 = vsub.s32 1, %v4814_v20 }
 0x171   : > { %v934_v10 = vadd.f32 %v923_v7, %v828_v35  ;;  %v1663_v14 = vrot.slane %v4820_v22, %v1662_v63 }
 0x172   : > { %v4317_v15 = vpop.f32.mrf.mxu1  ;;  %v4331_v16 = vpop.f32.mrf.mxu0 }
 0x173   : > { %v1039_v40 = vadd.f32 %v4317_v15, %v933_v34 }
 0x174   : > { %v1019_v21 = vpop.f32.mrf.mxu1  ;;  %v1145_v23 = vpop.f32.mrf.mxu0 }
 0x175   : > { %v1038_v41 = vadd.f32 %v1019_v21, %v932_v38  ;;  %v1165_v12 = vadd.f32 %v4331_v16, %v1039_v40  ;;  %v1442_v40 = vld [vmem:[%s5667_s3 + $0x8] sm:$0xff] }
 0x177   : > { %v1164_v1 = vadd.f32 %v1145_v23, %v1038_v41 }
 0x178   : > { %v4320_v32 = vpop.f32.mrf.mxu1  ;;  %v4334_v33 = vpop.f32.mrf.mxu0 }
 0x179   : > { %v1041_v42 = vadd.f32 %v4320_v32, %v935_v39  ;;  %v1441_v39 = vld [vmem:[%s5667_s3] sm:$0xff] }
 0x17a   : > { %v1029_v36 = vpop.f32.mrf.mxu1  ;;  %v1155_v37 = vpop.f32.mrf.mxu0  ;;  %4385 = vmatprep.mubr.msk.f32.mxu0 %vm382_vm0, %v1441_v39 }
 0x17b   : > { %v1040_v13 = vadd.f32 %v1029_v36, %v934_v10  ;;  %v1167_v2 = vadd.f32 %v4334_v33, %v1041_v42  ;;  %v3881_v42 = vld [vmem:[%s5667_s3 + $0x20] sm:$0xff] }
 0x17c   : > { %4371 = vmatprep.mubr.msk.f32.mxu1 %vm382_vm0, %v3881_v42 }
 0x17d   : > { %v1166_v46 = vadd.f32 %v1155_v37, %v1040_v13  ;;  %v1444_v13 = vld [vmem:[%s5667_s3 + $0x18] sm:$0xff] }
 0x17e   : > { %v4345_v11 = vpop.f32.mrf.mxu1  ;;  %v4359_v43 = vpop.f32.mrf.mxu0 }
 0x17f   : > { %v1271_v5 = vadd.f32 %v4345_v11, %v1165_v12 }
 0x180   : > { %v1251_v45 = vpop.f32.mrf.mxu1  ;;  %v1357_v0 = vpop.f32.mrf.mxu0 }
 0x181   : > { %v1270_v9 = vadd.f32 %v1251_v45, %v1164_v1  ;;  %v1377_v49 = vadd.f32 %v4359_v43, %v1271_v5  ;;  %v1443_v43 = vld [vmem:[%s5667_s3 + $0x10] sm:$0xff] }
 0x182   : > { %v4348_v8 = vpop.f32.mrf.mxu1  ;;  %v4362_v6 = vpop.f32.mrf.mxu0 }
 0x183   : > { %v1273_v47 = vadd.f32 %v4348_v8, %v1167_v2  ;;  %v1376_v54 = vadd.f32 %v1357_v0, %v1270_v9  ;;  %v5051_v58 = vadd.f32 %v1392_v52, %v1377_v49  ;;  %v3901_v0 = vld [vmem:[%s5667_s3 + $0x60] sm:$0xff]  ;;  %v2549_v52 = vld [vmem:[%s5668_s4 + $0x10] sm:$0xff] }
 0x184   : > { %v1261_v48 = vpop.f32.mrf.mxu1  ;;  %v1367_v53 = vpop.f32.mrf.mxu0 }
 0x185   : > { %v1379_v50 = vadd.f32 %v4362_v6, %v1273_v47  ;;  %v1272_v51 = vadd.f32 %v1261_v48, %v1166_v46  ;;  %v5056_v61 = vadd.f32 %v1387_v57, %v1376_v54  ;;  %v1409_v4 = vmax.f32 %v5051_v58, 0.0  ;;  %v2547_v54 = vld [vmem:[%s5668_s4] sm:$0xff] }
 0x187   : > { %v5049_v55 = vadd.f32 %v1402_v3, %v1379_v50  ;;  %v1378_v56 = vadd.f32 %v1367_v53, %v1272_v51  ;;  %v1408_v7 = vmax.f32 %v5056_v61, 0.0  ;;  %v2550_v51 = vld [vmem:[%s5668_s4 + $0x18] sm:$0xff]  ;;  %v2548_v53 = vld [vmem:[%s5668_s4 + $0x8] sm:$0xff] }
 0x189   : > { %v1411_v59 = vmax.f32 %v5049_v55, 0.0  ;;  %v5054_v60 = vadd.f32 %v1397_v44, %v1378_v56 }
 0x18b   : > { %v1410_v62 = vmax.f32 %v5054_v60, 0.0  ;;  %1422 = vrot.lane.b32.xlu1 %v1411_v59, %s4653_s11 }
 0x18d   : > { %1420 = vrot.lane.b32.xlu0 %v1410_v62, %s4653_s11 }
 0x18f   : > { %1418 = vrot.lane.b32.xlu1 %v1409_v4, %s4653_s11 }
 0x191   : > { %1416 = vrot.lane.b32.xlu0 %v1408_v7, %s4653_s11 }
 0x193   : > { %1665 = vrot.lane.b32.xlu1 %v1663_v14, %s4654_s12 }
 0x195   : > { %1795 = vrot.lane.b32.xlu0 %v4827_v24, %s4654_s12  ;;  %s4659_s12 = smov 127  }
 0x197   : > { %2042 = vrot.lane.b32.xlu1 %v1663_v14, %s4657_s25 }
 0x199   : > { %2171 = vrot.lane.b32.xlu0 %v4827_v24, %s4657_s25  ;;  %s4664_s25 = smov 122  }
 0x19b   : > { %2418 = vrot.lane.b32.xlu1 %v1663_v14, %s4658_s26 }
 0x1fd   : > { %v1423_v20 = vpop.permute.xlu1 %1422 }
 0x1fe   : > { %v1431_v15 = vsel %vm339_vm2, 0.0, %v1423_v20 }
 0x1ff   : > { %v5081_v22 = vsel %vm1432_vm5, %v1431_v15, 0.0  ;;  %v1421_v16 = vpop.permute.xlu0 %1420 }
 0x200   : > { %v1430_v17 = vsel %vm339_vm2, 0.0, %v1421_v16  ;;  %v1440_v18 = vmul.f32 %v5081_v22, %v4827_v24 }
 0x201   : > { %v5087_v19 = vsel %vm1432_vm5, %v1430_v17, 0.0  ;;  %v1419_v21 = vpop.permute.xlu1 %1418 }
 0x202   : > { %v1429_v23 = vsel %vm339_vm2, 0.0, %v1419_v21  ;;  %4377 = vmatprep.subr.mxu0 %v1440_v18  ;;  %v1439_v25 = vmul.f32 %v5087_v19, %v4827_v24 }
 0x203   : > { %v5093_v26 = vsel %vm1432_vm5, %v1429_v23, 0.0  ;;  %4378 = vmatpush3.msra.mxu0 %v1440_v18  ;;  %v1417_v27 = vpop.permute.xlu0 %1416 }
 0x204   : > { %v1428_v28 = vsel %vm339_vm2, 0.0, %v1417_v27  ;;  %1456 = vrot.lane.b32.xlu0 %v5093_v26, %s4659_s12  ;;  %4379 = vmatprep.subr.mxu0 %v1439_v25  ;;  %v1438_v29 = vmul.f32 %v5093_v26, %v4827_v24 }
 0x205   : > { %v5101_v30 = vsel %vm1432_vm5, %v1428_v28, 0.0  ;;  %4380 = vmatpush3.msra.mxu0 %v1439_v25  ;;  %v5107_v32 = vpop.permute.xlu1 %1665  ;;  %v3882_v28 = vld [vmem:[%s5667_s3 + $0x28] sm:$0xff] }
 0x206   : > { %4381 = vmatprep.subr.mxu0 %v1438_v29  ;;  %1454 = vrot.lane.b32.xlu1 %v5101_v30, %s4659_s12  ;;  %v1437_v31 = vmul.f32 %v5101_v30, %v4827_v24  ;;  %v1669_v35 = vmul.f32 %v5107_v32, %v5093_v26  ;;  %v1668_v10 = vmul.f32 %v5107_v32, %v5101_v30 }
 0x207   : > { %4382 = vmatpush3.msra.mxu0 %v1438_v29  ;;  %v5109_v33 = vpop.permute.xlu0 %1795  ;;  %v1671_v12 = vmul.f32 %v5107_v32, %v5081_v22  ;;  %v1670_v1 = vmul.f32 %v5107_v32, %v5087_v19  ;;  %v3883_v29 = vld [vmem:[%s5667_s3 + $0x30] sm:$0xff] }
 0x208   : > { %1931 = vrot.lane.b32.xlu0 %v5093_v26, %s4660_s29  ;;  %4383 = vmatprep.subr.mxu0 %v1437_v31  ;;  %v1799_v34 = vmul.f32 %v5109_v33, %v5093_v26  ;;  %v1798_v11 = vmul.f32 %v5109_v33, %v5101_v30  ;;  %v1801_v44 = vmul.f32 %v5109_v33, %v5081_v22 }
 0x209   : > { %4384 = vmatpush3.msra.mxu0 %v1437_v31  ;;  %v5119_v36 = vpop.permute.xlu1 %2042  ;;  %v1800_v5 = vmul.f32 %v5109_v33, %v5087_v19 }
 0x20a   : > { %1813 = vrot.lane.b32.xlu1 %v1799_v34, %s4661_s30  ;;  %v2046_v37 = vmul.f32 %v5119_v36, %v5093_v26  ;;  %4386 = vmatmul.mubr.msk.f32.vlgmr.msra.gmra.mxu0 %vm382_vm0, %v1442_v40  ;;  %v2045_v45 = vmul.f32 %v5119_v36, %v5101_v30  ;;  %v2048_v2 = vmul.f32 %v5119_v36, %v5081_v22  ;;  %v3884_v34 = vld [vmem:[%s5667_s3 + $0x38] sm:$0xff]  ;;  %v3894_v40 = vld [vmem:[%s5667_s3 + $0x48] sm:$0xff] }
 0x20b   : > { %v5128_v38 = vpop.permute.xlu0 %2171  ;;  %4388 = vmatprep.mubr.msk.f32.mxu0 %vm382_vm0, %v1443_v43  ;;  %v2047_v6 = vmul.f32 %v5119_v36, %v5087_v19  ;;  %v3902_v43 = vld [vmem:[%s5667_s3 + $0x68] sm:$0xff] }
 0x20c   : > { %1683 = vrot.lane.b32.xlu0 %v1669_v35, %s4661_s30  ;;  %v2175_v41 = vmul.f32 %v5128_v38, %v5093_v26  ;;  %v2177_v3 = vmul.f32 %v5128_v38, %v5081_v22  ;;  %v2174_v8 = vmul.f32 %v5128_v38, %v5101_v30  ;;  %v2176_v46 = vmul.f32 %v5128_v38, %v5087_v19  ;;  %v3893_v35 = vld [vmem:[%s5667_s3 + $0x40] sm:$0xff] }
 0x20d   : > { %v5200_v9 = vpop.permute.xlu1 %2418 }
 0x20e   : > { %1929 = vrot.lane.b32.xlu1 %v5101_v30, %s4660_s29  ;;  %4389 = vmatmul.mubr.msk.f32.gmra.mxu0 %vm382_vm0, %v1444_v13  ;;  %v2424_v47 = vmul.f32 %v5200_v9, %v5081_v22  ;;  %v2423_v48 = vmul.f32 %v5200_v9, %v5087_v19  ;;  %v2422_v49 = vmul.f32 %v5200_v9, %v5093_v26 }
 0x20f   : > { %4413 = vmatprep.mubr.msk.f32.mxu0 %vm382_vm0, %v3901_v0  ;;  %v2421_v50 = vmul.f32 %v5200_v9, %v5101_v30  ;;  %v3904_v0 = vld [vmem:[%s5667_s3 + $0x78] sm:$0xff] }
 0x210   : > { %1460 = vrot.lane.b32.xlu0 %v5081_v22, %s4659_s12 }
 0x212   : > { %2060 = vrot.lane.b32.xlu1 %v2046_v37, %s4662_s9 }
 0x214   : > { %1935 = vrot.lane.b32.xlu0 %v5081_v22, %s4660_s29 }
 0x216   : > { %1681 = vrot.lane.b32.xlu1 %v1668_v10, %s4661_s30 }
 0x218   : > { %2189 = vrot.lane.b32.xlu0 %v2175_v41, %s4662_s9  ;;  %v3895_v41 = vld [vmem:[%s5667_s3 + $0x50] sm:$0xff] }
 0x21a   : > { %1811 = vrot.lane.b32.xlu1 %v1798_v11, %s4661_s30  ;;  %v3896_v11 = vld [vmem:[%s5667_s3 + $0x58] sm:$0xff] }
 0x21c   : > { %1687 = vrot.lane.b32.xlu0 %v1671_v12, %s4661_s30 }
 0x21e   : > { %1458 = vrot.lane.b32.xlu1 %v5087_v19, %s4659_s12 }
 0x220   : > { %1817 = vrot.lane.b32.xlu0 %v1801_v44, %s4661_s30  ;;  %v3903_v44 = vld [vmem:[%s5667_s3 + $0x70] sm:$0xff] }
 0x222   : > { %2058 = vrot.lane.b32.xlu1 %v2045_v45, %s4662_s9  ;;  %v3909_v45 = vld [vmem:[%s5667_s3 + $0x80] sm:$0xff] }
 0x224   : > { %1933 = vrot.lane.b32.xlu0 %v5087_v19, %s4660_s29 }
 0x226   : > { %1685 = vrot.lane.b32.xlu1 %v1670_v1, %s4661_s30  ;;  %v3910_v1 = vld [vmem:[%s5667_s3 + $0x88] sm:$0xff] }
 0x228   : > { %2064 = vrot.lane.b32.xlu0 %v2048_v2, %s4662_s9 }
 0x22a   : > { %1815 = vrot.lane.b32.xlu1 %v1800_v5, %s4661_s30 }
 0x22c   : > { %2193 = vrot.lane.b32.xlu0 %v2177_v3, %s4662_s9  ;;  %v3911_v3 = vld [vmem:[%s5667_s3 + $0x90] sm:$0xff] }
 0x22e   : > { %2187 = vrot.lane.b32.xlu1 %v2174_v8, %s4662_s9  ;;  %v3917_v8 = vld [vmem:[%s5667_s3 + $0xa0] sm:$0xff] }
 0x230   : > { %2311 = vrot.lane.b32.xlu0 %v5081_v22, %s4663_s24 }
 0x232   : > { %2062 = vrot.lane.b32.xlu1 %v2047_v6, %s4662_s9  ;;  %v3912_v6 = vld [vmem:[%s5667_s3 + $0x98] sm:$0xff] }
 0x234   : > { %2191 = vrot.lane.b32.xlu0 %v2176_v46, %s4662_s9  ;;  %v3918_v46 = vld [vmem:[%s5667_s3 + $0xa8] sm:$0xff] }
 0x236   : > { %2309 = vrot.lane.b32.xlu1 %v5087_v19, %s4663_s24 }
 0x238   : > { %2440 = vrot.lane.b32.xlu0 %v2424_v47, %s4664_s25 }
 0x23a   : > { %2307 = vrot.lane.b32.xlu1 %v5093_v26, %s4663_s24 }
 0x23c   : > { %2438 = vrot.lane.b32.xlu0 %v2423_v48, %s4664_s25 }
 0x23e   : > { %2305 = vrot.lane.b32.xlu1 %v5101_v30, %s4663_s24 }
 0x240   : > { %2436 = vrot.lane.b32.xlu0 %v2422_v49, %s4664_s25  ;;  %v3919_v49 = vld [vmem:[%s5667_s3 + $0xb0] sm:$0xff] }
 0x242   : > { %2434 = vrot.lane.b32.xlu1 %v2421_v50, %s4664_s25  ;;  %v3925_v50 = vld [vmem:[%s5667_s3 + $0xc0] sm:$0xff] }
 0x244   : > { %2568 = vperm.xlu0 %4643, %v2550_v51   ;;  %v3920_v51 = vld [vmem:[%s5667_s3 + $0xb8] sm:$0xff] }
 0x246   : > { %2563 = vperm.xlu1 %4644, %v2549_v52   ;;  %v3926_v52 = vld [vmem:[%s5667_s3 + $0xc8] sm:$0xff] }
 0x248   : > { %2558 = vperm.xlu0 %4643, %v2548_v53  }
 0x24a   : > { %2553 = vperm.xlu1 %4644, %v2547_v54  }
 0x276   : > { %v1457_v56 = vpop.permute.xlu0 %1456 }
 0x278   : > { %v1455_v57 = vpop.permute.xlu1 %1454 }
 0x27a   : > { %v5233_v63 = vpop.permute.xlu0 %1931 }
 0x27c   : > { %v1814_v14 = vpop.permute.xlu1 %1813 }
 0x27e   : > { %v1684_v20 = vpop.permute.xlu0 %1683 }
 0x280   : > { %v5235_v15 = vpop.permute.xlu1 %1929 }
 0x282   : > { %v1461_v22 = vpop.permute.xlu0 %1460 }
 0x283   : > { %4363 = vmatprep.subr.mxu1 %v1461_v22 }
 0x284   : > { %v5237_v16 = vpop.permute.xlu1 %2060  ;;  %4364 = vmatpush3.msra.mxu1 %v1461_v22  ;;  %v3941_v22 = vld [vmem:[%s5667_s3 + $0x100] sm:$0xff] }
 0x286   : > { %v1936_v17 = vpop.permute.xlu0 %1935 }
 0x288   : > { %v1682_v18 = vpop.permute.xlu1 %1681 }
 0x28a   : > { %v5239_v19 = vpop.permute.xlu0 %2189 }
 0x28c   : > { %v1812_v21 = vpop.permute.xlu1 %1811 }
 0x28e   : > { %v1688_v23 = vpop.permute.xlu0 %1687 }
 0x290   : > { %v1459_v25 = vpop.permute.xlu1 %1458 }
 0x291   : > { %4365 = vmatprep.subr.mxu1 %v1459_v25 }
 0x292   : > { %4366 = vmatpush3.msra.mxu1 %v1459_v25  ;;  %v1818_v26 = vpop.permute.xlu0 %1817 }
 0x293   : > { %4367 = vmatprep.subr.mxu1 %v1457_v56  ;;  %4405 = vmatprep.subr.mxu0 %v1818_v26 }
 0x294   : > { %v5241_v27 = vpop.permute.xlu1 %2058  ;;  %4368 = vmatpush3.msra.mxu1 %v1457_v56  ;;  %4406 = vmatpush3.msra.mxu0 %v1818_v26  ;;  %v3927_v56 = vld [vmem:[%s5667_s3 + $0xd0] sm:$0xff] }
 0x295   : > { %4369 = vmatprep.subr.mxu1 %v1455_v57 }
 0x296   : > { %4370 = vmatpush3.msra.mxu1 %v1455_v57  ;;  %v1934_v30 = vpop.permute.xlu0 %1933  ;;  %v3933_v57 = vld [vmem:[%s5667_s3 + $0xe0] sm:$0xff] }
 0x297   : > { %4372 = vmatmul.mubr.msk.f32.vlgmr.msra.gmra.mxu1 %vm382_vm0, %v3882_v28  ;;  %4391 = vmatprep.subr.mxu1 %v1688_v23 }
 0x298   : > { %v1686_v31 = vpop.permute.xlu1 %1685  ;;  %4392 = vmatpush3.msra.mxu1 %v1688_v23  ;;  %4374 = vmatprep.mubr.msk.f32.mxu1 %vm382_vm0, %v3883_v29 }
 0x299   : > { %4393 = vmatprep.subr.mxu1 %v1686_v31 }
 0x29a   : > { %4394 = vmatpush3.msra.mxu1 %v1686_v31  ;;  %v2065_v37 = vpop.permute.xlu0 %2064 }
 0x29b   : > { %4375 = vmatmul.mubr.msk.f32.gmra.mxu1 %vm382_vm0, %v3884_v34  ;;  %4395 = vmatprep.subr.mxu1 %v1684_v20 }
 0x29c   : > { %v1816_v39 = vpop.permute.xlu1 %1815  ;;  %4396 = vmatpush3.msra.mxu1 %v1684_v20  ;;  %4399 = vmatprep.mubr.msk.f32.mxu1 %vm382_vm0, %v3893_v35 }
 0x29d   : > { %4397 = vmatprep.subr.mxu1 %v1682_v18  ;;  %4407 = vmatprep.subr.mxu0 %v1816_v39 }
 0x29e   : > { %4398 = vmatpush3.msra.mxu1 %v1682_v18  ;;  %4408 = vmatpush3.msra.mxu0 %v1816_v39  ;;  %v2194_v10 = vpop.permute.xlu0 %2193  ;;  %v3942_v18 = vld [vmem:[%s5667_s3 + $0x108] sm:$0xff] }
 0x29f   : > { %4400 = vmatmul.mubr.msk.f32.vlgmr.msra.gmra.mxu1 %vm382_vm0, %v3894_v40  ;;  %4409 = vmatprep.subr.mxu0 %v1814_v14 }
 0x2a0   : > { %4419 = vmatprep.subr.mxu1 %v1936_v17  ;;  %v2188_v42 = vpop.permute.xlu1 %2187  ;;  %4410 = vmatpush3.msra.mxu0 %v1814_v14  ;;  %v3934_v14 = vld [vmem:[%s5667_s3 + $0xe8] sm:$0xff] }
 0x2a1   : > { %4420 = vmatpush3.msra.mxu1 %v1936_v17  ;;  %4411 = vmatprep.subr.mxu0 %v1812_v21  ;;  %v3936_v17 = vld [vmem:[%s5667_s3 + $0xf8] sm:$0xff] }
 0x2a2   : > { %4421 = vmatprep.subr.mxu1 %v1934_v30  ;;  %4402 = vmatprep.mubr.msk.f32.mxu1 %vm382_vm0, %v3895_v41  ;;  %v2312_v12 = vpop.permute.xlu0 %2311 }
 0x2a3   : > { %4412 = vmatpush3.msra.mxu0 %v1812_v21  ;;  %4422 = vmatpush3.msra.mxu1 %v1934_v30  ;;  %v3944_v21 = vld [vmem:[%s5667_s3 + $0x118] sm:$0xff] }
 0x2a4   : > { %4403 = vmatmul.mubr.msk.f32.gmra.mxu1 %vm382_vm0, %v3896_v11  ;;  %4414 = vmatmul.mubr.msk.f32.vlgmr.msra.gmra.mxu0 %vm382_vm0, %v3902_v43  ;;  %v2063_v13 = vpop.permute.xlu1 %2062 }
 0x2a5   : > { %4423 = vmatprep.subr.mxu1 %v5233_v63  ;;  %4433 = vmatprep.subr.mxu0 %v2065_v37 }
 0x2a6   : > { %4424 = vmatpush3.msra.mxu1 %v5233_v63  ;;  %4434 = vmatpush3.msra.mxu0 %v2065_v37  ;;  %v2192_v2 = vpop.permute.xlu0 %2191  ;;  %v3928_v63 = vld [vmem:[%s5667_s3 + $0xd8] sm:$0xff] }
 0x2a7   : > { %4425 = vmatprep.subr.mxu1 %v5235_v15  ;;  %4435 = vmatprep.subr.mxu0 %v2063_v13 }
 0x2a8   : > { %4416 = vmatprep.mubr.msk.f32.mxu0 %vm382_vm0, %v3903_v44  ;;  %4426 = vmatpush3.msra.mxu1 %v5235_v15  ;;  %v2310_v5 = vpop.permute.xlu1 %2309  ;;  %v3935_v15 = vld [vmem:[%s5667_s3 + $0xf0] sm:$0xff] }
 0x2a9   : > { %4427 = vmatprep.mubr.msk.f32.mxu1 %vm382_vm0, %v3909_v45  ;;  %4436 = vmatpush3.msra.mxu0 %v2063_v13 }
 0x2aa   : > { %4417 = vmatmul.mubr.msk.f32.gmra.mxu0 %vm382_vm0, %v3904_v0  ;;  %4428 = vmatmul.mubr.msk.f32.vlgmr.msra.gmra.mxu1 %vm382_vm0, %v3910_v1  ;;  %v2441_v47 = vpop.permute.xlu0 %2440 }
 0x2ab   : > { %4437 = vmatprep.subr.mxu0 %v5237_v16  ;;  %4447 = vmatprep.subr.mxu1 %v2194_v10 }
 0x2ac   : > { %4438 = vmatpush3.msra.mxu0 %v5237_v16  ;;  %4448 = vmatpush3.msra.mxu1 %v2194_v10  ;;  %v2308_v48 = vpop.permute.xlu1 %2307 }
 0x2ad   : > { %4439 = vmatprep.subr.mxu0 %v5241_v27  ;;  %4449 = vmatprep.subr.mxu1 %v2192_v2 }
 0x2ae   : > { %4430 = vmatprep.mubr.msk.f32.mxu1 %vm382_vm0, %v3911_v3  ;;  %4440 = vmatpush3.msra.mxu0 %v5241_v27  ;;  %v2439_v53 = vpop.permute.xlu0 %2438 }
 0x2af   : > { %4441 = vmatprep.mubr.msk.f32.mxu0 %vm382_vm0, %v3917_v8  ;;  %4450 = vmatpush3.msra.mxu1 %v2192_v2 }
 0x2b0   : > { %4431 = vmatmul.mubr.msk.f32.gmra.mxu1 %vm382_vm0, %v3912_v6  ;;  %4442 = vmatmul.mubr.msk.f32.vlgmr.msra.gmra.mxu0 %vm382_vm0, %v3918_v46  ;;  %v2306_v54 = vpop.permute.xlu1 %2305 }
 0x2b1   : > { %4451 = vmatprep.subr.mxu1 %v5239_v19  ;;  %4461 = vmatprep.subr.mxu0 %v2312_v12 }
 0x2b2   : > { %4452 = vmatpush3.msra.mxu1 %v5239_v19  ;;  %4462 = vmatpush3.msra.mxu0 %v2312_v12  ;;  %v2437_v20 = vpop.permute.xlu0 %2436  ;;  %v3943_v19 = vld [vmem:[%s5667_s3 + $0x110] sm:$0xff] }
 0x2b3   : > { %4453 = vmatprep.subr.mxu1 %v2188_v42  ;;  %4463 = vmatprep.subr.mxu0 %v2310_v5 }
 0x2b4   : > { %4444 = vmatprep.mubr.msk.f32.mxu0 %vm382_vm0, %v3919_v49  ;;  %4454 = vmatpush3.msra.mxu1 %v2188_v42  ;;  %v2435_v16 = vpop.permute.xlu1 %2434 }
 0x2b5   : > { %4455 = vmatprep.mubr.msk.f32.mxu1 %vm382_vm0, %v3925_v50  ;;  %4464 = vmatpush3.msra.mxu0 %v2310_v5 }
 0x2b6   : > { %4445 = vmatmul.mubr.msk.f32.gmra.mxu0 %vm382_vm0, %v3920_v51  ;;  %4456 = vmatmul.mubr.msk.f32.vlgmr.msra.gmra.mxu1 %vm382_vm0, %v3926_v52 }
 0x2b7   : > { %4465 = vmatprep.subr.mxu0 %v2308_v48  ;;  %4475 = vmatprep.subr.mxu1 %v2441_v47 }
 0x2b8   : > { %4466 = vmatpush3.msra.mxu0 %v2308_v48  ;;  %4476 = vmatpush3.msra.mxu1 %v2441_v47 }
 0x2b9   : > { %4467 = vmatprep.subr.mxu0 %v2306_v54  ;;  %4477 = vmatprep.subr.mxu1 %v2439_v53 }
 0x2ba   : > { %4458 = vmatprep.mubr.msk.f32.mxu1 %vm382_vm0, %v3927_v56  ;;  %4468 = vmatpush3.msra.mxu0 %v2306_v54 }
 0x2bb   : > { %4469 = vmatprep.mubr.msk.f32.mxu0 %vm382_vm0, %v3933_v57  ;;  %4478 = vmatpush3.msra.mxu1 %v2439_v53 }
 0x2bc   : > { %4459 = vmatmul.mubr.msk.f32.gmra.mxu1 %vm382_vm0, %v3928_v63  ;;  %4470 = vmatmul.mubr.msk.f32.vlgmr.msra.gmra.mxu0 %vm382_vm0, %v3934_v14 }
 0x2bd   : > { %4479 = vmatprep.subr.mxu1 %v2437_v20  ;;  %4472 = vmatprep.mubr.msk.f32.mxu0 %vm382_vm0, %v3935_v15 }
 0x2be   : > { %4480 = vmatpush3.msra.mxu1 %v2437_v20  ;;  %4483 = vmatprep.mubr.msk.f32.mxu1 %vm382_vm0, %v3941_v22 }
 0x2bf   : > { %4481 = vmatprep.subr.mxu1 %v2435_v16 }
 0x2c0   : > { %4482 = vmatpush3.msra.mxu1 %v2435_v16  ;;  %4473 = vmatmul.mubr.msk.f32.gmra.mxu0 %vm382_vm0, %v3936_v17 }
 0x2c1   : > { %4484 = vmatmul.mubr.msk.f32.vlgmr.msra.gmra.mxu1 %vm382_vm0, %v3942_v18 }
 0x2c2   : > { %4486 = vmatprep.mubr.msk.f32.mxu1 %vm382_vm0, %v3943_v19 }
 0x2c5   : > { %4487 = vmatmul.mubr.msk.f32.gmra.mxu1 %vm382_vm0, %v3944_v21 }
 0x2ca   : > { %v4387_v23 = vpop.f32.mrf.mxu0 }
 0x2cc   : > { %v1641_v27 = vpop.f32.mrf.mxu0 }
 0x2ce   : > { %v4390_v30 = vpop.f32.mrf.mxu0 }
 0x2d0   : > { %v1651_v35 = vpop.f32.mrf.mxu0 }
 0x357   : > { %v4373_v25 = vpop.f32.mrf.mxu1 }
 0x358   : > { %v1647_v2 = vadd.f32 %v4387_v23, %v4373_v25  ;;  %v2569_v23 = vpop.permute.xlu0 %2568 }
 0x359   : > { %v1544_v26 = vpop.f32.mrf.mxu1 }
 0x35a   : > { %v1642_v6 = vadd.f32 %v1641_v27, %v1544_v26 }
 0x35b   : > { %v4376_v28 = vpop.f32.mrf.mxu1 }
 0x35c   : > { %v1657_v5 = vadd.f32 %v4390_v30, %v4376_v28 }
 0x35d   : > { %v1554_v29 = vpop.f32.mrf.mxu1 }
 0x35e   : > { %v1652_v46 = vadd.f32 %v1651_v35, %v1554_v29 }
 0x35f   : > { %v4401_v31 = vpop.f32.mrf.mxu1 }
 0x360   : > { %v1791_v47 = vadd.f32 %v4401_v31, %v1647_v2 }
 0x361   : > { %v1771_v34 = vpop.f32.mrf.mxu1 }
 0x362   : > { %v1790_v49 = vadd.f32 %v1771_v34, %v1642_v6 }
 0x364   : > { %v4404_v37 = vpop.f32.mrf.mxu1  ;;  %v4415_v39 = vpop.f32.mrf.mxu0 }
 0x365   : > { %v1793_v48 = vadd.f32 %v4404_v37, %v1657_v5  ;;  %v1921_v50 = vadd.f32 %v4415_v39, %v1791_v47  ;;  %v2564_v39 = vpop.permute.xlu1 %2563 }
 0x366   : > { %v1781_v40 = vpop.f32.mrf.mxu1  ;;  %v1901_v10 = vpop.f32.mrf.mxu0 }
 0x367   : > { %v1792_v51 = vadd.f32 %v1781_v40, %v1652_v46  ;;  %v1920_v56 = vadd.f32 %v1901_v10, %v1790_v49 }
 0x369   : > { %v2554_v5 = vpop.permute.xlu1 %2553 }
 0x36a   : > { %v4418_v41 = vpop.f32.mrf.mxu0  ;;  %v4429_v42 = vpop.f32.mrf.mxu1 }
 0x36b   : > { %v1923_v52 = vadd.f32 %v4418_v41, %v1793_v48  ;;  %v2039_v57 = vadd.f32 %v4429_v42, %v1921_v50 }
 0x36c   : > { %v1911_v11 = vpop.f32.mrf.mxu0  ;;  %v2019_v43 = vpop.f32.mrf.mxu1 }
 0x36d   : > { %v1922_v63 = vadd.f32 %v1911_v11, %v1792_v51  ;;  %v2038_v22 = vadd.f32 %v2019_v43, %v1920_v56 }
 0x370   : > { %v4432_v12 = vpop.f32.mrf.mxu1  ;;  %v4443_v13 = vpop.f32.mrf.mxu0 }
 0x371   : > { %v2041_v14 = vadd.f32 %v4432_v12, %v1923_v52  ;;  %v2168_v16 = vadd.f32 %v4443_v13, %v2039_v57 }
 0x372   : > { %v2029_v44 = vpop.f32.mrf.mxu1  ;;  %v2148_v45 = vpop.f32.mrf.mxu0 }
 0x373   : > { %v2040_v17 = vadd.f32 %v2029_v44, %v1922_v63  ;;  %v2167_v25 = vadd.f32 %v2148_v45, %v2038_v22  ;;  %v2559_v45 = vpop.permute.xlu0 %2558 }
 0x376   : > { %v4446_v0 = vpop.f32.mrf.mxu0  ;;  %v4457_v1 = vpop.f32.mrf.mxu1 }
 0x377   : > { %v2170_v18 = vadd.f32 %v4446_v0, %v2041_v14  ;;  %v2297_v26 = vadd.f32 %v4457_v1, %v2168_v16 }
 0x378   : > { %v2158_v3 = vpop.f32.mrf.mxu0  ;;  %v2277_v8 = vpop.f32.mrf.mxu1 }
 0x379   : > { %v2169_v27 = vadd.f32 %v2158_v3, %v2040_v17  ;;  %v2296_v31 = vadd.f32 %v2277_v8, %v2167_v25 }
 0x37c   : > { %v4460_v53 = vpop.f32.mrf.mxu1  ;;  %v4471_v54 = vpop.f32.mrf.mxu0 }
 0x37d   : > { %v2299_v28 = vadd.f32 %v4460_v53, %v2170_v18  ;;  %v2415_v34 = vadd.f32 %v4471_v54, %v2297_v26 }
 0x37e   : > { %v2287_v20 = vpop.f32.mrf.mxu1  ;;  %v2395_v15 = vpop.f32.mrf.mxu0 }
 0x37f   : > { %v2298_v35 = vadd.f32 %v2287_v20, %v2169_v27  ;;  %v2414_v10 = vadd.f32 %v2395_v15, %v2296_v31 }
 0x380   : > { %v4474_v19 = vpop.f32.mrf.mxu0 }
 0x381   : > { %v4485_v21 = vpop.f32.mrf.mxu1  ;;  %v2417_v37 = vadd.f32 %v4474_v19, %v2299_v28  ;;  %v2609_v28 = vld [vmem:[%s5669_s5 + $0x10] sm:$0xff] }
 0x382   : > { %v2405_v29 = vpop.f32.mrf.mxu0  ;;  %v2544_v41 = vadd.f32 %v4485_v21, %v2415_v34  ;;  %v2608_v21 = vld [vmem:[%s5669_s5 + $0x8] sm:$0xff]  ;;  %v3969_v34 = vld [vmem:[%s5669_s5 + $0x60] sm:$0xff] }
 0x383   : > { %v2524_v30 = vpop.f32.mrf.mxu1  ;;  %v2416_v42 = vadd.f32 %v2405_v29, %v2298_v35  ;;  %v2610_v29 = vld [vmem:[%s5669_s5 + $0x18] sm:$0xff] }
 0x384   : > { %v2543_v12 = vadd.f32 %v2524_v30, %v2414_v10  ;;  %v2572_v0 = vadd.f32 %v2559_v45, %v2544_v41 }
 0x385   : > { %v4488_v40 = vpop.f32.mrf.mxu1 }
 0x386   : > { %v2546_v11 = vadd.f32 %v4488_v40, %v2417_v37  ;;  %v2571_v3 = vadd.f32 %v2554_v5, %v2543_v12  ;;  %v2576_v6 = vmax.f32 %v2572_v0, 0.0  ;;  %v3693_v12 = vld [vmem:[%s5670_s6 + $0x8] sm:$0xff] }
 0x387   : > { %v2534_v43 = vpop.f32.mrf.mxu1 }
 0x388   : > { %v2574_v13 = vadd.f32 %v2569_v23, %v2546_v11  ;;  %v2545_v44 = vadd.f32 %v2534_v43, %v2416_v42  ;;  %v2575_v46 = vmax.f32 %v2571_v3, 0.0  ;;  %v3949_v23 = vld [vmem:[%s5669_s5 + $0x20] sm:$0xff] }
 0x389   : > { %4497 = vmatprep.mubr.msk.f32.mxu0 %vm382_vm0, %v3949_v23  ;;  %v3692_v43 = vld [vmem:[%s5670_s6] sm:$0xff] }
 0x38a   : > { %v2578_v1 = vmax.f32 %v2574_v13, 0.0  ;;  %v2573_v2 = vadd.f32 %v2564_v39, %v2545_v44  ;;  %v3694_v13 = vld [vmem:[%s5670_s6 + $0x10] sm:$0xff] }
 0x38c   : > { %v2577_v8 = vmax.f32 %v2573_v2, 0.0  ;;  %2589 = vrot.lane.b32.xlu0 %v2578_v1, %s4653_s11 }
 0x38e   : > { %2587 = vrot.lane.b32.xlu1 %v2577_v8, %s4653_s11 }
 0x390   : > { %2585 = vrot.lane.b32.xlu0 %v2576_v6, %s4653_s11 }
 0x392   : > { %2583 = vrot.lane.b32.xlu1 %v2575_v46, %s4653_s11 }
 0x3fe   : > { %v2590_v47 = vpop.permute.xlu0 %2589 }
 0x3ff   : > { %v2598_v48 = vsel %vm339_vm2, 0.0, %v2590_v47 }
 0x400   : > { %v5379_v49 = vsel %vm1432_vm5, %v2598_v48, 0.0  ;;  %v2588_v50 = vpop.permute.xlu1 %2587 }
 0x401   : > { %v2597_v51 = vsel %vm339_vm2, 0.0, %v2588_v50  ;;  %v2606_v52 = vmul.f32 %v5379_v49, %v4827_v24  ;;  %v2955_v27 = vmul.f32 %v5379_v49, %v5109_v33  ;;  %v2829_v30 = vmul.f32 %v5379_v49, %v5107_v32  ;;  %v3951_v50 = vld [vmem:[%s5669_s5 + $0x30] sm:$0xff] }
 0x402   : > { %v5385_v53 = vsel %vm1432_vm5, %v2597_v51, 0.0  ;;  %v2586_v54 = vpop.permute.xlu0 %2585  ;;  %v3199_v31 = vmul.f32 %v5379_v49, %v5119_v36  ;;  %v3325_v40 = vmul.f32 %v5379_v49, %v5128_v38  ;;  %v3569_v41 = vmul.f32 %v5379_v49, %v5200_v9 }
 0x403   : > { %v2596_v56 = vsel %vm339_vm2, 0.0, %v2586_v54  ;;  %4503 = vmatprep.subr.mxu1 %v2606_v52  ;;  %v2605_v57 = vmul.f32 %v5385_v53, %v4827_v24  ;;  %v2828_v37 = vmul.f32 %v5385_v53, %v5107_v32  ;;  %v2954_v39 = vmul.f32 %v5385_v53, %v5109_v33  ;;  %v3961_v54 = vld [vmem:[%s5669_s5 + $0x40] sm:$0xff] }
 0x404   : > { %v5391_v63 = vsel %vm1432_vm5, %v2596_v56, 0.0  ;;  %v2584_v14 = vpop.permute.xlu1 %2583  ;;  %4504 = vmatpush3.msra.mxu1 %v2606_v52  ;;  %v3324_v10 = vmul.f32 %v5385_v53, %v5128_v38  ;;  %v3568_v42 = vmul.f32 %v5385_v53, %v5200_v9 }
 0x405   : > { %v2595_v20 = vsel %vm339_vm2, 0.0, %v2584_v14  ;;  %4505 = vmatprep.subr.mxu1 %v2605_v57  ;;  %2622 = vrot.lane.b32.xlu0 %v5391_v63, %s4659_s12  ;;  %v2604_v15 = vmul.f32 %v5391_v63, %v4827_v24  ;;  %v2953_v17 = vmul.f32 %v5391_v63, %v5109_v33  ;;  %v2827_v18 = vmul.f32 %v5391_v63, %v5107_v32 }
 0x406   : > { %v5399_v22 = vsel %vm1432_vm5, %v2595_v20, 0.0  ;;  %4506 = vmatpush3.msra.mxu1 %v2605_v57  ;;  %v3197_v19 = vmul.f32 %v5391_v63, %v5119_v36  ;;  %v3567_v11 = vmul.f32 %v5391_v63, %v5200_v9 }
 0x407   : > { %2620 = vrot.lane.b32.xlu1 %v5399_v22, %s4659_s12  ;;  %4507 = vmatprep.subr.mxu1 %v2604_v15  ;;  %v2603_v16 = vmul.f32 %v5399_v22, %v4827_v24  ;;  %v2607_v24 = vld [vmem:[%s5669_s5] sm:$0xff]  ;;  %v2952_v25 = vmul.f32 %v5399_v22, %v5109_v33  ;;  %v2826_v26 = vmul.f32 %v5399_v22, %v5107_v32 }
 0x408   : > { %4508 = vmatpush3.msra.mxu1 %v2604_v15  ;;  %4511 = vmatprep.mubr.msk.f32.mxu1 %vm382_vm0, %v2607_v24  ;;  %v3196_v35 = vmul.f32 %v5399_v22, %v5119_v36  ;;  %v3198_v32 = vmul.f32 %v5385_v53, %v5119_v36  ;;  %v3323_v33 = vmul.f32 %v5391_v63, %v5128_v38  ;;  %v3962_v15 = vld [vmem:[%s5669_s5 + $0x48] sm:$0xff] }
 0x409   : > { %3085 = vrot.lane.b32.xlu0 %v5391_v63, %s4660_s29  ;;  %4509 = vmatprep.subr.mxu1 %v2603_v16  ;;  %v3322_v36 = vmul.f32 %v5399_v22, %v5128_v38  ;;  %v3566_v38 = vmul.f32 %v5399_v22, %v5200_v9  ;;  %v3695_v9 = vld [vmem:[%s5670_s6 + $0x18] sm:$0xff] }
 0x40a   : > { %4510 = vmatpush3.msra.mxu1 %v2603_v16  ;;  %v3970_v16 = vld [vmem:[%s5669_s5 + $0x68] sm:$0xff] }
 0x40b   : > { %2967 = vrot.lane.b32.xlu1 %v2953_v17, %s4661_s30  ;;  %4512 = vmatmul.mubr.msk.f32.vlgmr.msra.gmra.mxu1 %vm382_vm0, %v2608_v21  ;;  %v3971_v21 = vld [vmem:[%s5669_s5 + $0x70] sm:$0xff] }
 0x40c   : > { %4514 = vmatprep.mubr.msk.f32.mxu1 %vm382_vm0, %v2609_v28  ;;  %v3978_v28 = vld [vmem:[%s5669_s5 + $0x88] sm:$0xff] }
 0x40d   : > { %2841 = vrot.lane.b32.xlu0 %v2827_v18, %s4661_s30  ;;  %v3963_v18 = vld [vmem:[%s5669_s5 + $0x50] sm:$0xff] }
 0x40f   : > { %3211 = vrot.lane.b32.xlu1 %v3197_v19, %s4662_s9  ;;  %4515 = vmatmul.mubr.msk.f32.gmra.mxu1 %vm382_vm0, %v2610_v29  ;;  %v3964_v19 = vld [vmem:[%s5669_s5 + $0x58] sm:$0xff] }
 0x410   : > { %4539 = vmatprep.mubr.msk.f32.mxu1 %vm382_vm0, %v3969_v34 }
 0x411   : > { %2626 = vrot.lane.b32.xlu0 %v5379_v49, %s4659_s12 }
 0x413   : > { %2965 = vrot.lane.b32.xlu1 %v2952_v25, %s4661_s30  ;;  %v3972_v25 = vld [vmem:[%s5669_s5 + $0x78] sm:$0xff] }
 0x415   : > { %2839 = vrot.lane.b32.xlu0 %v2826_v26, %s4661_s30 }
 0x417   : > { %2624 = vrot.lane.b32.xlu1 %v5385_v53, %s4659_s12 }
 0x419   : > { %3089 = vrot.lane.b32.xlu0 %v5379_v49, %s4660_s29 }
 0x41b   : > { %2971 = vrot.lane.b32.xlu1 %v2955_v27, %s4661_s30  ;;  %v3977_v27 = vld [vmem:[%s5669_s5 + $0x80] sm:$0xff] }
 0x41d   : > { %2845 = vrot.lane.b32.xlu0 %v2829_v30, %s4661_s30  ;;  %v3985_v30 = vld [vmem:[%s5669_s5 + $0xa0] sm:$0xff] }
 0x41f   : > { %3215 = vrot.lane.b32.xlu1 %v3199_v31, %s4662_s9  ;;  %v3986_v31 = vld [vmem:[%s5669_s5 + $0xa8] sm:$0xff] }
 0x421   : > { %3087 = vrot.lane.b32.xlu0 %v5385_v53, %s4660_s29 }
 0x423   : > { %3209 = vrot.lane.b32.xlu1 %v3196_v35, %s4662_s9  ;;  %v3979_v35 = vld [vmem:[%s5669_s5 + $0x90] sm:$0xff] }
 0x425   : > { %2843 = vrot.lane.b32.xlu0 %v2828_v37, %s4661_s30  ;;  %v3980_v37 = vld [vmem:[%s5669_s5 + $0x98] sm:$0xff] }
 0x427   : > { %2969 = vrot.lane.b32.xlu1 %v2954_v39, %s4661_s30 }
 0x429   : > { %3083 = vrot.lane.b32.xlu0 %v5399_v22, %s4660_s29 }
 0x42b   : > { %3459 = vrot.lane.b32.xlu1 %v5379_v49, %s4663_s24  ;;  %v3950_v49 = vld [vmem:[%s5669_s5 + $0x28] sm:$0xff] }
 0x42d   : > { %3341 = vrot.lane.b32.xlu0 %v3325_v40, %s4662_s9  ;;  %v3987_v40 = vld [vmem:[%s5669_s5 + $0xb0] sm:$0xff] }
 0x42f   : > { %3213 = vrot.lane.b32.xlu1 %v3198_v32, %s4662_s9  ;;  %v3988_v32 = vld [vmem:[%s5669_s5 + $0xb8] sm:$0xff] }
 0x431   : > { %3337 = vrot.lane.b32.xlu0 %v3323_v33, %s4662_s9 }
 0x433   : > { %3457 = vrot.lane.b32.xlu1 %v5385_v53, %s4663_s24  ;;  %v3952_v53 = vld [vmem:[%s5669_s5 + $0x38] sm:$0xff] }
 0x435   : > { %3339 = vrot.lane.b32.xlu0 %v3324_v10, %s4662_s9  ;;  %v3993_v10 = vld [vmem:[%s5669_s5 + $0xc0] sm:$0xff] }
 0x437   : > { %3455 = vrot.lane.b32.xlu1 %v5391_v63, %s4663_s24 }
 0x439   : > { %3335 = vrot.lane.b32.xlu0 %v3322_v36, %s4662_s9  ;;  %v3994_v36 = vld [vmem:[%s5669_s5 + $0xc8] sm:$0xff] }
 0x43b   : > { %3453 = vrot.lane.b32.xlu1 %v5399_v22, %s4663_s24 }
 0x43d   : > { %3585 = vrot.lane.b32.xlu0 %v3569_v41, %s4664_s25  ;;  %v4001_v41 = vld [vmem:[%s5669_s5 + $0xe0] sm:$0xff] }
 0x43f   : > { %3583 = vrot.lane.b32.xlu1 %v3568_v42, %s4664_s25 }
 0x441   : > { %3581 = vrot.lane.b32.xlu0 %v3567_v11, %s4664_s25  ;;  %v4002_v11 = vld [vmem:[%s5669_s5 + $0xe8] sm:$0xff] }
 0x443   : > { %3579 = vrot.lane.b32.xlu1 %v3566_v38, %s4664_s25  ;;  %v3995_v38 = vld [vmem:[%s5669_s5 + $0xd0] sm:$0xff]  ;;  %s4020_s25 = sshll.u32 %s5676_s28, 5 }
 0x444   : > { %s305_s17 = scalar_lea.vmem %s5672_s8, %s4020_s25 }
 0x445   : > { %3698 = vperm.xlu0 %4643, %v3692_v43  }
 0x447   : > { %3703 = vperm.xlu1 %4644, %v3693_v12   ;;  %v3996_v12 = vld [vmem:[%s5669_s5 + $0xd8] sm:$0xff] }
 0x449   : > { %3708 = vperm.xlu0 %4643, %v3694_v13   ;;  %v4003_v13 = vld [vmem:[%s5669_s5 + $0xf0] sm:$0xff] }
 0x44b   : > { %3713 = vperm.xlu1 %4644, %v3695_v9  }
 0x477   : > { %v2623_v44 = vpop.permute.xlu0 %2622 }
 0x479   : > { %v2621_v45 = vpop.permute.xlu1 %2620 }
 0x47b   : > { %v5521_v0 = vpop.permute.xlu0 %3085 }
 0x47d   : > { %v2968_v1 = vpop.permute.xlu1 %2967 }
 0x47f   : > { %v2842_v2 = vpop.permute.xlu0 %2841 }
 0x481   : > { %v5523_v5 = vpop.permute.xlu1 %3211 }
 0x483   : > { %v2627_v3 = vpop.permute.xlu0 %2626 }
 0x484   : > { %4489 = vmatprep.subr.mxu0 %v2627_v3 }
 0x485   : > { %v2966_v8 = vpop.permute.xlu1 %2965  ;;  %4490 = vmatpush3.msra.mxu0 %v2627_v3 }
 0x487   : > { %v2840_v6 = vpop.permute.xlu0 %2839 }
 0x489   : > { %v2625_v46 = vpop.permute.xlu1 %2624 }
 0x48a   : > { %4491 = vmatprep.subr.mxu0 %v2625_v46 }
 0x48b   : > { %4492 = vmatpush3.msra.mxu0 %v2625_v46  ;;  %v3090_v47 = vpop.permute.xlu0 %3089 }
 0x48c   : > { %4493 = vmatprep.subr.mxu0 %v2623_v44 }
 0x48d   : > { %v2972_v48 = vpop.permute.xlu1 %2971  ;;  %4494 = vmatpush3.msra.mxu0 %v2623_v44  ;;  %v4004_v44 = vld [vmem:[%s5669_s5 + $0xf8] sm:$0xff] }
 0x48e   : > { %4495 = vmatprep.subr.mxu0 %v2621_v45  ;;  %4531 = vmatprep.subr.mxu1 %v2972_v48 }
 0x48f   : > { %4496 = vmatpush3.msra.mxu0 %v2621_v45  ;;  %v2846_v51 = vpop.permute.xlu0 %2845  ;;  %4532 = vmatpush3.msra.mxu1 %v2972_v48 }
 0x490   : > { %4517 = vmatprep.subr.mxu0 %v2846_v51  ;;  %4498 = vmatmul.mubr.msk.f32.vlgmr.msra.gmra.mxu0 %vm382_vm0, %v3950_v49 }
 0x491   : > { %v3216_v52 = vpop.permute.xlu1 %3215  ;;  %4518 = vmatpush3.msra.mxu0 %v2846_v51  ;;  %4500 = vmatprep.mubr.msk.f32.mxu0 %vm382_vm0, %v3951_v50 }
 0x493   : > { %v3088_v56 = vpop.permute.xlu0 %3087 }
 0x494   : > { %4501 = vmatmul.mubr.msk.f32.gmra.mxu0 %vm382_vm0, %v3952_v53 }
 0x495   : > { %v3210_v57 = vpop.permute.xlu1 %3209  ;;  %4525 = vmatprep.mubr.msk.f32.mxu0 %vm382_vm0, %v3961_v54 }
 0x497   : > { %v2844_v63 = vpop.permute.xlu0 %2843 }
 0x498   : > { %4519 = vmatprep.subr.mxu0 %v2844_v63 }
 0x499   : > { %v2970_v14 = vpop.permute.xlu1 %2969  ;;  %4520 = vmatpush3.msra.mxu0 %v2844_v63 }
 0x49a   : > { %4521 = vmatprep.subr.mxu0 %v2842_v2  ;;  %4533 = vmatprep.subr.mxu1 %v2970_v14 }
 0x49b   : > { %4522 = vmatpush3.msra.mxu0 %v2842_v2  ;;  %v3084_v20 = vpop.permute.xlu0 %3083  ;;  %4534 = vmatpush3.msra.mxu1 %v2970_v14  ;;  %v4010_v2 = vld [vmem:[%s5669_s5 + $0x108] sm:$0xff] }
 0x49c   : > { %4523 = vmatprep.subr.mxu0 %v2840_v6  ;;  %4535 = vmatprep.subr.mxu1 %v2968_v1 }
 0x49d   : > { %v3460_v22 = vpop.permute.xlu1 %3459  ;;  %4524 = vmatpush3.msra.mxu0 %v2840_v6  ;;  %4536 = vmatpush3.msra.mxu1 %v2968_v1  ;;  %v4011_v1 = vld [vmem:[%s5669_s5 + $0x110] sm:$0xff] }
 0x49e   : > { %4526 = vmatmul.mubr.msk.f32.vlgmr.msra.gmra.mxu0 %vm382_vm0, %v3962_v15  ;;  %4537 = vmatprep.subr.mxu1 %v2966_v8 }
 0x49f   : > { %4545 = vmatprep.subr.mxu0 %v3090_v47  ;;  %v3342_v17 = vpop.permute.xlu0 %3341  ;;  %4538 = vmatpush3.msra.mxu1 %v2966_v8 }
 0x4a0   : > { %4546 = vmatpush3.msra.mxu0 %v3090_v47  ;;  %4540 = vmatmul.mubr.msk.f32.vlgmr.msra.gmra.mxu1 %vm382_vm0, %v3970_v16 }
 0x4a1   : > { %4547 = vmatprep.subr.mxu0 %v3088_v56  ;;  %4559 = vmatprep.subr.mxu1 %v3216_v52  ;;  %v3214_v24 = vpop.permute.xlu1 %3213 }
 0x4a2   : > { %4528 = vmatprep.mubr.msk.f32.mxu0 %vm382_vm0, %v3963_v18  ;;  %4548 = vmatpush3.msra.mxu0 %v3088_v56 }
 0x4a3   : > { %4560 = vmatpush3.msra.mxu1 %v3216_v52  ;;  %4529 = vmatmul.mubr.msk.f32.gmra.mxu0 %vm382_vm0, %v3964_v19  ;;  %v3338_v23 = vpop.permute.xlu0 %3337 }
 0x4a4   : > { %4549 = vmatprep.subr.mxu0 %v5521_v0  ;;  %4561 = vmatprep.subr.mxu1 %v3214_v24 }
 0x4a5   : > { %4550 = vmatpush3.msra.mxu0 %v5521_v0  ;;  %4542 = vmatprep.mubr.msk.f32.mxu1 %vm382_vm0, %v3971_v21  ;;  %v3458_v26 = vpop.permute.xlu1 %3457  ;;  %v4009_v0 = vld [vmem:[%s5669_s5 + $0x100] sm:$0xff] }
 0x4a6   : > { %4562 = vmatpush3.msra.mxu1 %v3214_v24  ;;  %4551 = vmatprep.subr.mxu0 %v3084_v20 }
 0x4a7   : > { %4543 = vmatmul.mubr.msk.f32.gmra.mxu1 %vm382_vm0, %v3972_v25  ;;  %4563 = vmatprep.subr.mxu1 %v5523_v5  ;;  %v3340_v29 = vpop.permute.xlu0 %3339 }
 0x4a8   : > { %4552 = vmatpush3.msra.mxu0 %v3084_v20  ;;  %4553 = vmatprep.mubr.msk.f32.mxu0 %vm382_vm0, %v3977_v27 }
 0x4a9   : > { %4564 = vmatpush3.msra.mxu1 %v5523_v5  ;;  %4554 = vmatmul.mubr.msk.f32.vlgmr.msra.gmra.mxu0 %vm382_vm0, %v3978_v28  ;;  %v3456_v34 = vpop.permute.xlu1 %3455  ;;  %v4012_v5 = vld [vmem:[%s5669_s5 + $0x118] sm:$0xff] }
 0x4aa   : > { %4565 = vmatprep.subr.mxu1 %v3210_v57  ;;  %4573 = vmatprep.subr.mxu0 %v3342_v17 }
 0x4ab   : > { %4574 = vmatpush3.msra.mxu0 %v3342_v17  ;;  %4566 = vmatpush3.msra.mxu1 %v3210_v57  ;;  %v3336_v39 = vpop.permute.xlu0 %3335 }
 0x4ac   : > { %4567 = vmatprep.mubr.msk.f32.mxu1 %vm382_vm0, %v3985_v30  ;;  %4575 = vmatprep.subr.mxu0 %v3340_v29 }
 0x4ad   : > { %4568 = vmatmul.mubr.msk.f32.vlgmr.msra.gmra.mxu1 %vm382_vm0, %v3986_v31  ;;  %4587 = vmatprep.subr.mxu1 %v3460_v22  ;;  %v3454_v33 = vpop.permute.xlu1 %3453 }
 0x4ae   : > { %4556 = vmatprep.mubr.msk.f32.mxu0 %vm382_vm0, %v3979_v35  ;;  %4576 = vmatpush3.msra.mxu0 %v3340_v29 }
 0x4af   : > { %4588 = vmatpush3.msra.mxu1 %v3460_v22  ;;  %4557 = vmatmul.mubr.msk.f32.gmra.mxu0 %vm382_vm0, %v3980_v37  ;;  %v3586_v42 = vpop.permute.xlu0 %3585 }
 0x4b0   : > { %4577 = vmatprep.subr.mxu0 %v3338_v23  ;;  %4589 = vmatprep.subr.mxu1 %v3458_v26 }
 0x4b1   : > { %4578 = vmatpush3.msra.mxu0 %v3338_v23  ;;  %4570 = vmatprep.mubr.msk.f32.mxu1 %vm382_vm0, %v3987_v40  ;;  %v3584_v43 = vpop.permute.xlu1 %3583 }
 0x4b2   : > { %4590 = vmatpush3.msra.mxu1 %v3458_v26  ;;  %4579 = vmatprep.subr.mxu0 %v3336_v39 }
 0x4b3   : > { %4571 = vmatmul.mubr.msk.f32.gmra.mxu1 %vm382_vm0, %v3988_v32  ;;  %4591 = vmatprep.subr.mxu1 %v3456_v34  ;;  %v3582_v9 = vpop.permute.xlu0 %3581 }
 0x4b4   : > { %4580 = vmatpush3.msra.mxu0 %v3336_v39  ;;  %4581 = vmatprep.mubr.msk.f32.mxu0 %vm382_vm0, %v3993_v10 }
 0x4b5   : > { %4592 = vmatpush3.msra.mxu1 %v3456_v34  ;;  %4582 = vmatmul.mubr.msk.f32.vlgmr.msra.gmra.mxu0 %vm382_vm0, %v3994_v36  ;;  %v3580_v45 = vpop.permute.xlu1 %3579 }
 0x4b6   : > { %4593 = vmatprep.subr.mxu1 %v3454_v33  ;;  %4595 = vmatprep.mubr.msk.f32.mxu1 %vm382_vm0, %v4001_v41 }
 0x4b7   : > { %4594 = vmatpush3.msra.mxu1 %v3454_v33  ;;  %4601 = vmatprep.subr.mxu0 %v3586_v42 }
 0x4b8   : > { %4596 = vmatmul.mubr.msk.f32.vlgmr.msra.gmra.mxu1 %vm382_vm0, %v4002_v11  ;;  %4615 = vmatprep.subr.mxu1 %v3586_v42 }
 0x4b9   : > { %4584 = vmatprep.mubr.msk.f32.mxu0 %vm382_vm0, %v3995_v38  ;;  %4602 = vmatpush3.msra.mxu0 %v3586_v42 }
 0x4ba   : > { %4619 = vmatpush3.msra.mxu1 %v3586_v42  ;;  %4585 = vmatmul.mubr.msk.f32.gmra.mxu0 %vm382_vm0, %v3996_v12 }
 0x4bb   : > { %4603 = vmatprep.subr.mxu0 %v3584_v43  ;;  %4616 = vmatprep.subr.mxu1 %v3584_v43 }
 0x4bc   : > { %4604 = vmatpush3.msra.mxu0 %v3584_v43  ;;  %4598 = vmatprep.mubr.msk.f32.mxu1 %vm382_vm0, %v4003_v13 }
 0x4bd   : > { %4620 = vmatpush3.msra.mxu1 %v3584_v43  ;;  %4605 = vmatprep.subr.mxu0 %v3582_v9 }
 0x4be   : > { %4599 = vmatmul.mubr.msk.f32.gmra.mxu1 %vm382_vm0, %v4004_v44  ;;  %4617 = vmatprep.subr.mxu1 %v3582_v9 }
 0x4bf   : > { %4606 = vmatpush3.msra.mxu0 %v3582_v9  ;;  %4621 = vmatpush3.msra.mxu1 %v3582_v9 }
 0x4c0   : > { %4607 = vmatprep.subr.mxu0 %v3580_v45  ;;  %4618 = vmatprep.subr.mxu1 %v3580_v45 }
 0x4c1   : > { %4608 = vmatpush3.msra.mxu0 %v3580_v45  ;;  %4622 = vmatpush3.msra.mxu1 %v3580_v45 }
 0x4c2   : > { %4609 = vmatprep.mubr.msk.f32.mxu0 %vm382_vm0, %v4009_v0  ;;  %4612 = vmatprep.mubr.msk.f32.mxu1 %vm382_vm0, %v4011_v1  ;;  %v3704_v13 = vpop.permute.xlu1 %3703 }
 0x4c3   : > { %4610 = vmatmul.mubr.msk.f32.vlgmr.msra.gmra.mxu0 %vm382_vm0, %v4010_v2  ;;  %4613 = vmatmul.mubr.msk.f32.vlgmr.msra.gmra.mxu1 %vm382_vm0, %v4012_v5 }
 0x4cb   : > { %v4513_v8 = vpop.f32.mrf.mxu1 }
 0x4cd   : > { %v2807_v46 = vpop.f32.mrf.mxu1 }
 0x4cf   : > { %v4516_v48 = vpop.f32.mrf.mxu1 }
 0x4d1   : > { %v2817_v50 = vpop.f32.mrf.mxu1 }
 0x550   : > { %v4499_v3 = vpop.f32.mrf.mxu0 }
 0x551   : > { %v2813_v18 = vadd.f32 %v4513_v8, %v4499_v3  ;;  %v3699_v8 = vpop.permute.xlu0 %3698 }
 0x552   : > { %v2710_v6 = vpop.f32.mrf.mxu0 }
 0x553   : > { %v2808_v21 = vadd.f32 %v2807_v46, %v2710_v6 }
 0x554   : > { %v4502_v47 = vpop.f32.mrf.mxu0 }
 0x555   : > { %v2823_v19 = vadd.f32 %v4516_v48, %v4502_v47 }
 0x556   : > { %v2720_v49 = vpop.f32.mrf.mxu0 }
 0x557   : > { %v2818_v23 = vadd.f32 %v2817_v50, %v2720_v49  ;;  %v3714_v49 = vpop.permute.xlu1 %3713 }
 0x55e   : > { %v4527_v51 = vpop.f32.mrf.mxu0 }
 0x55f   : > { %v2949_v25 = vadd.f32 %v4527_v51, %v2813_v18 }
 0x560   : > { %v2929_v52 = vpop.f32.mrf.mxu0  ;;  %v4541_v53 = vpop.f32.mrf.mxu1 }
 0x561   : > { %v2948_v28 = vadd.f32 %v2929_v52, %v2808_v21  ;;  %v3075_v34 = vadd.f32 %v4541_v53, %v2949_v25 }
 0x562   : > { %v3055_v56 = vpop.f32.mrf.mxu1 }
 0x563   : > { %v4530_v54 = vpop.f32.mrf.mxu0  ;;  %v3074_v39 = vadd.f32 %v3055_v56, %v2948_v28 }
 0x564   : > { %v2951_v26 = vadd.f32 %v4530_v54, %v2823_v19 }
 0x565   : > { %v2939_v57 = vpop.f32.mrf.mxu0 }
 0x566   : > { %v2950_v29 = vadd.f32 %v2939_v57, %v2818_v23 }
 0x567   : > { %v4544_v63 = vpop.f32.mrf.mxu1 }
 0x568   : > { %v3077_v35 = vadd.f32 %v4544_v63, %v2951_v26 }
 0x569   : > { %v3065_v14 = vpop.f32.mrf.mxu1  ;;  %v4555_v20 = vpop.f32.mrf.mxu0 }
 0x56a   : > { %v3076_v40 = vadd.f32 %v3065_v14, %v2950_v29  ;;  %v3193_v32 = vadd.f32 %v4555_v20, %v3075_v34 }
 0x56b   : > { %v3173_v15 = vpop.f32.mrf.mxu0 }
 0x56c   : > { %v3192_v36 = vadd.f32 %v3173_v15, %v3074_v39  ;;  %v3709_v15 = vpop.permute.xlu0 %3708 }
 0x56d   : > { %v4569_v22 = vpop.f32.mrf.mxu1 }
 0x56e   : > { %v3319_v38 = vadd.f32 %v4569_v22, %v3193_v32 }
 0x56f   : > { %v4558_v16 = vpop.f32.mrf.mxu0  ;;  %v3299_v17 = vpop.f32.mrf.mxu1 }
 0x570   : > { %v3195_v33 = vadd.f32 %v4558_v16, %v3077_v35  ;;  %v3318_v9 = vadd.f32 %v3299_v17, %v3192_v36 }
 0x571   : > { %v3183_v24 = vpop.f32.mrf.mxu0 }
 0x572   : > { %v3194_v41 = vadd.f32 %v3183_v24, %v3076_v40 }
 0x573   : > { %v4572_v27 = vpop.f32.mrf.mxu1 }
 0x574   : > { %v3321_v43 = vadd.f32 %v4572_v27, %v3195_v33 }
 0x575   : > { %v3309_v30 = vpop.f32.mrf.mxu1  ;;  %v4583_v31 = vpop.f32.mrf.mxu0 }
 0x576   : > { %v3320_v44 = vadd.f32 %v3309_v30, %v3194_v41  ;;  %v3445_v45 = vadd.f32 %v4583_v31, %v3319_v38 }
 0x577   : > { %v3425_v37 = vpop.f32.mrf.mxu0 }
 0x578   : > { %v4597_v10 = vpop.f32.mrf.mxu1  ;;  %v3444_v2 = vadd.f32 %v3425_v37, %v3318_v9 }
 0x579   : > { %v3563_v6 = vadd.f32 %v4597_v10, %v3445_v45 }
 0x57a   : > { %v4586_v42 = vpop.f32.mrf.mxu0  ;;  %v3543_v11 = vpop.f32.mrf.mxu1 }
 0x57b   : > { %v3447_v0 = vadd.f32 %v4586_v42, %v3321_v43  ;;  %v3562_v50 = vadd.f32 %v3543_v11, %v3444_v2 }
 0x57c   : > { %v3435_v12 = vpop.f32.mrf.mxu0 }
 0x57d   : > { %v3446_v5 = vadd.f32 %v3435_v12, %v3320_v44 }
 0x57e   : > { %v4600_v1 = vpop.f32.mrf.mxu1 }
 0x57f   : > { %v3565_v46 = vadd.f32 %v4600_v1, %v3447_v0 }
 0x580   : > { %v3553_v3 = vpop.f32.mrf.mxu1 }
 0x581   : > { %v3564_v51 = vadd.f32 %v3553_v3, %v3446_v5 }
 0x583   : > { %v4611_v47 = vpop.f32.mrf.mxu0  ;;  %v4614_v48 = vpop.f32.mrf.mxu1 }
 0x584   : > { %v3689_v52 = vadd.f32 %v4611_v47, %v3563_v6  ;;  %v3691_v53 = vadd.f32 %v4614_v48, %v3565_v46 }
 0x585   : > { %v3669_v54 = vpop.f32.mrf.mxu0  ;;  %v3679_v56 = vpop.f32.mrf.mxu1 }
 0x586   : > { %v3717_v57 = vadd.f32 %v3704_v13, %v3689_v52  ;;  %v3719_v63 = vadd.f32 %v3714_v49, %v3691_v53  ;;  %v3688_v14 = vadd.f32 %v3669_v54, %v3562_v50  ;;  %v3690_v20 = vadd.f32 %v3679_v56, %v3564_v51 }
 0x588   : > { %v3721_v22 = vadd.f32 %v3717_v57, %v1409_v4  ;;  %v3723_v16 = vadd.f32 %v3719_v63, %v1411_v59  ;;  %v3716_v17 = vadd.f32 %v3699_v8, %v3688_v14  ;;  %v3718_v18 = vadd.f32 %v3709_v15, %v3690_v20 }
 0x58a   : > { %v3725_v19 = vmax.f32 %v3721_v22, 0.0  ;;  %v3727_v24 = vmax.f32 %v3723_v16, 0.0  ;;  %v3720_v21 = vadd.f32 %v3716_v17, %v1408_v7  ;;  %v3722_v23 = vadd.f32 %v3718_v18, %v1410_v62 }
 0x58c   : > { %3730 = vst.msk [vmem:[%s305_s17 + $0x8] sm:$0xff] %vm3728_vm6, %v3725_v19  ;;  %3732 = vst.msk [vmem:[%s305_s17 + $0x18] sm:$0xff] %vm3728_vm6, %v3727_v24  ;;  %v3724_v58 = vmax.f32 %v3720_v21, 0.0  ;;  %v3726_v55 = vmax.f32 %v3722_v23, 0.0 }
 0x58e   : > { %3729 = vst.msk [vmem:[%s305_s17] sm:$0xff] %vm3728_vm6, %v3724_v58  ;;  %3731 = vst.msk [vmem:[%s305_s17 + $0x10] sm:$0xff] %vm3728_vm6, %v3726_v55 }
 0x58f PF: > { %s18_s27 = sadd.s32 1, %s4651_s27  }
 0x590   : > { %p15_p4 = scmp.ge.s32.totalorder %s18_s27, 4  }
 0x592   :  { %17 = sbr.rel (!%p15_p4) target bundleno = 1 (0x1), region = 106 }

</bundles_post_ra>
